<compile_context>
chip_gen: v6e
topology: v6e:2x2x1
jax: 0.10.0
libtpu: 0.0.40
codegen_flags: <defaults>
</compile_context>

<pallas_src>
import math
from functools import partial

import jax
import jax.numpy as jnp
from jax.experimental import pallas as pl
from jax.experimental.pallas import tpu as pltpu

# ----------------------------- configuration --------------------------------
EMBED_DIM = 32

# vision cfg (small CLIPVisionCfg): eva_model_name=None -> VisionTransformer
V_IMAGE_SIZE = 16
V_PATCH_SIZE = 8
V_WIDTH = 32
V_HEAD_WIDTH = 16
V_HEADS = V_WIDTH // V_HEAD_WIDTH
V_LAYERS = 2
V_MLP_RATIO = 4
V_GRID = V_IMAGE_SIZE // V_PATCH_SIZE
V_NUM_PATCHES = V_GRID * V_GRID
V_SEQ = V_NUM_PATCHES + 1            # 5 = class token + patches
V_SEQ_PAD = 8                        # padded to the 8-sublane tile (keys masked)

# text cfg (small CLIPTextCfg): hf_model_name=None -> TextTransformer
T_CONTEXT = 8
T_VOCAB = 64
T_WIDTH = 32
T_HEADS = 2
T_HEAD_WIDTH = T_WIDTH // T_HEADS
T_LAYERS = 2
T_MLP_RATIO = 4

DH = V_HEAD_WIDTH                    # 16  (shared head dim -> shared 16-col blob)
HIDDEN = V_WIDTH * V_MLP_RATIO       # 128 (shared MLP hidden -> shared 128-col blob)
assert T_HEAD_WIDTH == DH and T_WIDTH * T_MLP_RATIO == HIDDEN and T_WIDTH == V_WIDTH

LN_EPS = 1e-5                        # nn.LayerNorm default; quick_gelu=False -> erf GELU
OUT_ROWS = 8                         # per-tower output block rows (sublane tile)
OUT_COLS = 128                       # lane-dense output columns


# ---------------- in-kernel math helpers (traced inside the kernel) ----------
def _mm(a, b):
    return jnp.dot(a, b, preferred_element_type=jnp.float32)


def _mm_nt(a, b):  # a @ b.T via dot_general (no explicit transpose op)
    return jax.lax.dot_general(a, b, (((1,), (1,)), ((), ())),
                               preferred_element_type=jnp.float32)


def _layer_norm(x, g, b):
    mean = jnp.mean(x, axis=-1, keepdims=True)
    xc = x - mean
    var = jnp.mean(xc * xc, axis=-1, keepdims=True)
    return xc * jax.lax.rsqrt(var + LN_EPS) * g + b


def _erf(x):
    # Abramowitz & Stegun 7.1.26 (|err| <= 1.5e-7): only exp/mul/select, which
    # lower cleanly in Mosaic (avoids depending on a lax.erf lowering rule).
    a1, a2, a3, a4, a5 = 0.254829592, -0.284496736, 1.421413741, -1.453152027, 1.061405429
    p = 0.3275911
    z = jnp.abs(x)
    t = 1.0 / (1.0 + p * z)
    poly = ((((a5 * t + a4) * t + a3) * t + a2) * t + a1) * t
    y = 1.0 - poly * jnp.exp(-z * z)
    return jnp.where(x >= 0, y, -y)


def _gelu(x):  # exact (erf) GELU, matching torch.nn.GELU(approximate='none')
    return 0.5 * x * (1.0 + _erf(x * (1.0 / math.sqrt(2.0))))


def _l2_normalize(x):  # F.normalize(dim=-1), eps=1e-12
    n = jnp.sqrt(jnp.sum(x * x, axis=-1, keepdims=True))
    return x / jnp.maximum(n, 1e-12)


# ------------------------------ fused CLIP kernel -----------------------------
def _clip_kernel(patches_ref, xtext_ref, tpool_ref, b16_ref, b32_ref, b128_ref,
                 out_ref, *, idx16, idx32, idx128, v_batch, t_batch):
    f32 = jnp.float32

    def g16(name):
        r0, r = idx16[name]
        return b16_ref[r0:r0 + r, :]

    def g32(name):
        r0, r = idx32[name]
        return b32_ref[r0:r0 + r, :]

    def g128(name):
        r0, r = idx128[name]
        return b128_ref[r0:r0 + r, :]

    def attention(x, prefix, l, *, batch, seq, heads, mask):
        # Head-major per-head weights; head outputs accumulated as VALUES into
        # the out-projection (no scratch stores, no lane slicing of activations).
        scale = 1.0 / math.sqrt(DH)
        rows = []
        for b in range(batch):                       # statically unrolled (B=2)
            hb = x[b * seq:(b + 1) * seq, :]
            acc = None
            for h in range(heads):                   # statically unrolled (H=2)
                q = _mm(hb, g16(f"{prefix}wq{l}_{h}")) + g16(f"{prefix}bq{l}_{h}")
                k = _mm(hb, g16(f"{prefix}wk{l}_{h}")) + g16(f"{prefix}bk{l}_{h}")
                v = _mm(hb, g16(f"{prefix}wv{l}_{h}")) + g16(f"{prefix}bv{l}_{h}")
                s = _mm_nt(q, k) * scale + mask
                s = s - jnp.max(s, axis=-1, keepdims=True)
                p = jnp.exp(s)
                p = p / jnp.sum(p, axis=-1, keepdims=True)
                o = _mm(_mm(p, v), g32(f"{prefix}wo{l}_{h}"))     # [seq, W]
                acc = o if acc is None else acc + o
            rows.append(acc)
        return jnp.concatenate(rows, axis=0)                      # [batch*seq, W]

    def encoder(x, prefix, layers, *, batch, seq, heads, mask):
        # TODO(synk): at real CLIP depths replace the static Python loops with
        # lax.fori_loop / a layer grid axis with pipelined weight DMAs.
        for l in range(layers):
            h1 = _layer_norm(x, g32(f"{prefix}ln1g{l}"), g32(f"{prefix}ln1b{l}"))
            x = x + attention(h1, prefix, l, batch=batch, seq=seq, heads=heads,
                              mask=mask) + g32(f"{prefix}ob{l}")
            h2 = _layer_norm(x, g32(f"{prefix}ln2g{l}"), g32(f"{prefix}ln2b{l}"))
            m = _gelu(_mm(h2, g128(f"{prefix}f1w{l}")) + g128(f"{prefix}f1b{l}"))
            x = x + _mm(m, g32(f"{prefix}f2w{l}")) + g32(f"{prefix}f2b{l}")
        return x

    def write_out(feat):
        # One dense zero-fill of the (8,128) block, then a single small store
        # for the real features; glue un-pads.
        out_ref[...] = jnp.zeros((OUT_ROWS, OUT_COLS), f32)
        out_ref[0:feat.shape[0], 0:feat.shape[1]] = feat

    # ----------------------------- vision tower ------------------------------
    @pl.when(pl.program_id(0) == 0)
    def _vision_tower():
        B, S = v_batch, V_SEQ_PAD
        pos = g32("v_pos")                                        # [S, W], pad rows 0
        x = _mm(patches_ref[...], g32("v_pw")) + jnp.concatenate([pos] * B, axis=0)
        x = _layer_norm(x, g32("v_preg"), g32("v_preb"))
        # mask padded key rows (>= V_SEQ) so padding never changes real tokens
        col = jax.lax.broadcasted_iota(jnp.int32, (S, S), 1)
        kmask = jnp.where(col >= V_SEQ, f32(-1e9), f32(0.0))
        x = encoder(x, "v", V_LAYERS, batch=B, seq=S, heads=V_HEADS, mask=kmask)
        # class-token pooling via an in-kernel one-hot (rows b*S), then LN+proj
        r = jax.lax.broadcasted_iota(jnp.int32, (B, B * S), 0)
        c = jax.lax.broadcasted_iota(jnp.int32, (B, B * S), 1)
        sel = jnp.where(c == r * S, f32(1.0), f32(0.0))
        pooled = _layer_norm(_mm(sel, x), g32("v_postg"), g32("v_postb"))
        write_out(_l2_normalize(_mm(pooled, g32("v_proj"))))

    # ------------------------------ text tower -------------------------------
    @pl.when(pl.program_id(0) == 1)
    def _text_tower():
        B, S = t_batch, T_CONTEXT
        row = jax.lax.broadcasted_iota(jnp.int32, (S, S), 0)
        col = jax.lax.broadcasted_iota(jnp.int32, (S, S), 1)
        cmask = jnp.where(col > row, f32(-1e9), f32(0.0))         # causal mask
        x = encoder(xtext_ref[...], "t", T_LAYERS, batch=B, seq=S,
                    heads=T_HEADS, mask=cmask)
        x = _layer_norm(x, g32("t_lnfg"), g32("t_lnfb"))
        pooled = _mm(tpool_ref[...], x)                           # EOT rows [B, W]
        write_out(_l2_normalize(_mm(pooled, g32("t_proj"))))


# ------------------------------ weight packing --------------------------------
class _Packer:
    """Packs many small f32 params into one [rows, cols] blob (8-row aligned
    entries) so the kernel needs ONE DMA per column width instead of per param."""

    def __init__(self, cols):
        self.cols = cols
        self.parts = []
        self.index = {}
        self.rows = 0

    def add(self, name, arr):
        arr = jnp.asarray(arr, jnp.float32)
        if arr.ndim == 1:
            arr = arr.reshape(1, -1)
        assert arr.ndim == 2 and arr.shape[1] == self.cols, (name, arr.shape, self.cols)
        r = arr.shape[0]
        rp = -(-r // 8) * 8
        if rp != r:
            arr = jnp.concatenate(
                [arr, jnp.zeros((rp - r, self.cols), jnp.float32)], axis=0)
        self.index[name] = (self.rows, r)
        self.parts.append(arr)
        self.rows += rp

    def finalize(self):
        return jnp.concatenate(self.parts, axis=0), dict(self.index)


def pack_params(params):
    p16, p32, p128 = _Packer(DH), _Packer(V_WIDTH), _Packer(HIDDEN)

    def pack_blocks(prefix, blk, width, heads, layers):
        dh = width // heads
        for l in range(layers):
            in_w, in_b, out_w = blk["in_w"][l], blk["in_b"][l], blk["out_w"][l]
            for h in range(heads):
                c = h * dh
                p16.add(f"{prefix}wq{l}_{h}", in_w[:, c:c + dh])
                p16.add(f"{prefix}wk{l}_{h}", in_w[:, width + c:width + c + dh])
                p16.add(f"{prefix}wv{l}_{h}", in_w[:, 2 * width + c:2 * width + c + dh])
                p16.add(f"{prefix}bq{l}_{h}", in_b[c:c + dh])
                p16.add(f"{prefix}bk{l}_{h}", in_b[width + c:width + c + dh])
                p16.add(f"{prefix}bv{l}_{h}", in_b[2 * width + c:2 * width + c + dh])
                p32.add(f"{prefix}wo{l}_{h}", out_w[c:c + dh, :])
            p32.add(f"{prefix}ob{l}", blk["out_b"][l])
            p32.add(f"{prefix}ln1g{l}", blk["ln1_g"][l])
            p32.add(f"{prefix}ln1b{l}", blk["ln1_b"][l])
            p32.add(f"{prefix}ln2g{l}", blk["ln2_g"][l])
            p32.add(f"{prefix}ln2b{l}", blk["ln2_b"][l])
            p128.add(f"{prefix}f1w{l}", blk["fc1_w"][l])
            p128.add(f"{prefix}f1b{l}", blk["fc1_b"][l])
            p32.add(f"{prefix}f2w{l}", blk["fc2_w"][l])
            p32.add(f"{prefix}f2b{l}", blk["fc2_b"][l])

    v, t = params["visual"], params["text"]
    pack_blocks("v", v["blocks"], V_WIDTH, V_HEADS, V_LAYERS)
    pack_blocks("t", t["blocks"], T_WIDTH, T_HEADS, T_LAYERS)

    p32.add("v_pw", v["patch_w"])
    pos = v["pos_emb"].at[0].add(v["class_emb"])      # fold class emb into row 0
    pos = jnp.concatenate(
        [pos, jnp.zeros((V_SEQ_PAD - V_SEQ, V_WIDTH), jnp.float32)], axis=0)
    p32.add("v_pos", pos)
    p32.add("v_preg", v["ln_pre_g"]); p32.add("v_preb", v["ln_pre_b"])
    p32.add("v_postg", v["ln_post_g"]); p32.add("v_postb", v["ln_post_b"])
    p32.add("v_proj", v["proj"])
    p32.add("t_lnfg", t["ln_final_g"]); p32.add("t_lnfb", t["ln_final_b"])
    p32.add("t_proj", t["text_proj"])

    b16, idx16 = p16.finalize()
    b32, idx32 = p32.finalize()
    b128, idx128 = p128.finalize()
    packed = {"b16": b16, "b32": b32, "b128": b128,
              "tok_emb": t["tok_emb"], "t_pos": t["pos_emb"],
              "logit_scale": params["logit_scale"]}
    return packed, (idx16, idx32, idx128)


# ------------------------------ pallas_call wrapper ----------------------------
def _cost_estimate(args, batch):
    def tower(seq, width, heads, layers, hidden):
        bs = batch * seq
        dh = width // heads
        per = (2 * bs * width * 3 * width
               + 2 * batch * heads * 2 * seq * seq * dh
               + 2 * bs * width * width
               + 4 * bs * width * hidden)
        return layers * per + 6 * bs * width * width
    flops = (tower(V_SEQ_PAD, V_WIDTH, V_HEADS, V_LAYERS, HIDDEN)
             + tower(T_CONTEXT, T_WIDTH, T_HEADS, T_LAYERS, HIDDEN))
    trans = (V_LAYERS + T_LAYERS) * batch * (2 * 8 * 8 + 8 * HIDDEN)
    bytes_acc = (sum(int(a.size) * a.dtype.itemsize for a in args)
                 + 2 * OUT_ROWS * OUT_COLS * 4)
    return pl.CostEstimate(flops=int(flops), transcendentals=int(trans),
                           bytes_accessed=int(bytes_acc))


def build_forward(index):
    idx16, idx32, idx128 = index

    @jax.jit
    def forward(image, text, packed):
        f32 = jnp.float32
        B, C, Himg, Wimg = image.shape
        ps = V_PATCH_SIZE
        gh, gw = Himg // ps, Wimg // ps
        P, K = gh * gw, C * ps * ps

        # ---- vision glue: patchify (Conv2d stride=patch as one matmul input) ----
        patches = (image.astype(f32)
                   .reshape(B, C, gh, ps, gw, ps)
                   .transpose(0, 2, 4, 1, 3, 5)
                   .reshape(B, P, K))
        # row 0 per batch = class token (zeros; class emb folded into v_pos row 0),
        # trailing rows = sublane padding (masked as keys in-kernel).
        patches_aug = jnp.concatenate(
            [jnp.zeros((B, 1, K), f32), patches,
             jnp.zeros((B, V_SEQ_PAD - 1 - P, K), f32)],
            axis=1).reshape(B * V_SEQ_PAD, K)

        # ---- text glue ----
        # TODO(synk): token-embedding gather + EOT argmax stay in JAX glue (data-
        # dependent gather); pooling assumes EOT token has the max id per row
        # (CLIP tokenizer convention, enforced in the test harness).
        S = text.shape[1]
        x_text = (jnp.take(packed["tok_emb"], text, axis=0)
                  + packed["t_pos"][None]).reshape(B * S, T_WIDTH).astype(f32)
        eot = jnp.argmax(text, axis=-1)
        t_pool = jax.nn.one_hot(jnp.arange(B) * S + eot, B * S, dtype=f32)

        args = (patches_aug, x_text, t_pool,
                packed["b16"], packed["b32"], packed["b128"])
        kernel = partial(_clip_kernel, idx16=idx16, idx32=idx32, idx128=idx128,
                         v_batch=B, t_batch=B)
        out = pl.pallas_call(
            kernel,
            out_shape=jax.ShapeDtypeStruct((2 * OUT_ROWS, OUT_COLS), f32),
            grid=(2,),  # grid point 0 = vision tower, 1 = text tower
            in_specs=[pl.BlockSpec(a.shape, lambda i: (0, 0)) for a in args],
            out_specs=pl.BlockSpec((OUT_ROWS, OUT_COLS), lambda i: (i, 0)),
            compiler_params=pltpu.CompilerParams(
                dimension_semantics=("parallel",)),   # 2 TCs on v7x; no-op on 1-TC
            cost_estimate=_cost_estimate(args, B),
        )(*args)

        img_f = out[0:B, :EMBED_DIM]                   # already L2-normalized
        txt_f = out[OUT_ROWS:OUT_ROWS + B, :EMBED_DIM]
        return img_f, txt_f, jnp.exp(packed["logit_scale"])

    return forward


# ------------------------------- parameter init --------------------------------
def _block_params(key, width, layers, mlp_ratio):
    f32 = jnp.float32
    hidden = int(width * mlp_ratio)
    k0, k1, k2, k3 = jax.random.split(key, 4)
    return {
        "ln1_g": jnp.ones((layers, width), f32),
        "ln1_b": jnp.zeros((layers, width), f32),
        "ln2_g": jnp.ones((layers, width), f32),
        "ln2_b": jnp.zeros((layers, width), f32),
        "in_w": 0.02 * jax.random.normal(k0, (layers, width, 3 * width), f32),
        "in_b": jnp.zeros((layers, 3 * width), f32),
        "out_w": 0.02 * jax.random.normal(k1, (layers, width, width), f32),
        "out_b": jnp.zeros((layers, width), f32),
        "fc1_w": 0.02 * jax.random.normal(k2, (layers, width, hidden), f32),
        "fc1_b": jnp.zeros((layers, hidden), f32),
        "fc2_w": 0.02 * jax.random.normal(k3, (layers, hidden, width), f32),
        "fc2_b": jnp.zeros((layers, width), f32),
    }


def init_params(key):
    f32 = jnp.float32
    kv, kt, k1, k2, k3, k4, k5, k6 = jax.random.split(key, 8)
    vis = {
        "patch_w": 0.02 * jax.random.normal(k1, (3 * V_PATCH_SIZE * V_PATCH_SIZE, V_WIDTH), f32),
        "class_emb": 0.02 * jax.random.normal(k2, (V_WIDTH,), f32),
        "pos_emb": 0.02 * jax.random.normal(k3, (V_SEQ, V_WIDTH), f32),
        "ln_pre_g": jnp.ones((V_WIDTH,), f32),
        "ln_pre_b": jnp.zeros((V_WIDTH,), f32),
        "ln_post_g": jnp.ones((V_WIDTH,), f32),
        "ln_post_b": jnp.zeros((V_WIDTH,), f32),
        "proj": 0.02 * jax.random.normal(k4, (V_WIDTH, EMBED_DIM), f32),
        "blocks": _block_params(kv, V_WIDTH, V_LAYERS, V_MLP_RATIO),
    }
    txt = {
        "tok_emb": 0.02 * jax.random.normal(k5, (T_VOCAB, T_WIDTH), f32),
        "pos_emb": 0.02 * jax.random.normal(k6, (T_CONTEXT, T_WIDTH), f32),
        "ln_final_g": jnp.ones((T_WIDTH,), f32),
        "ln_final_b": jnp.zeros((T_WIDTH,), f32),
        "text_proj": 0.02 * jax.random.normal(jax.random.fold_in(kt, 1), (T_WIDTH, EMBED_DIM), f32),
        "blocks": _block_params(kt, T_WIDTH, T_LAYERS, T_MLP_RATIO),
    }
    return {"visual": vis, "text": txt,
            "logit_scale": jnp.array(math.log(1.0 / 0.07), f32)}


# ------------------------------------ main --------------------------------------
if __name__ == "__main__":
    key = jax.random.PRNGKey(0)
    kp, ki, kt = jax.random.split(key, 3)
    params = init_params(kp)
    packed, index = pack_params(params)           # one-time packing (outside jit)
    forward = build_forward(index)

    image = jax.random.normal(ki, (2, 3, V_IMAGE_SIZE, V_IMAGE_SIZE), jnp.float32)  # NCHW
    text = jax.random.randint(kt, (2, T_CONTEXT), 1, T_VOCAB - 1, dtype=jnp.int32)
    text = text.at[:, -1].set(T_VOCAB - 1)        # eot token = max id -> argmax picks it

    img_f, txt_f, logit_scale = forward(image, text, packed)
    jax.block_until_ready((img_f, txt_f, logit_scale))

    assert img_f.shape == (2, EMBED_DIM) and txt_f.shape == (2, EMBED_DIM)
    assert bool(jnp.all(jnp.isfinite(img_f))) and bool(jnp.all(jnp.isfinite(txt_f)))
    assert bool(jnp.isfinite(logit_scale))
    # features are L2-normalized -> unit norm
    assert bool(jnp.all(jnp.abs(jnp.linalg.norm(img_f, axis=-1) - 1.0) < 1e-3))
    assert bool(jnp.all(jnp.abs(jnp.linalg.norm(txt_f, axis=-1) - 1.0) < 1e-3))
    print("KERNEL_OK")
</pallas_src>

<mosaic_0001>
module attributes {stable_mosaic.version = 11 : i64} {
  func.func @_clip_kernel(%arg0: i32, %arg1: memref<16x192xf32, #tpu.memory_space<vmem>>, %arg2: memref<16x32xf32, #tpu.memory_space<vmem>>, %arg3: memref<2x16xf32, #tpu.memory_space<vmem>>, %arg4: memref<960x16xf32, #tpu.memory_space<vmem>>, %arg5: memref<1144x32xf32, #tpu.memory_space<vmem>>, %arg6: memref<160x128xf32, #tpu.memory_space<vmem>>, %arg7: memref<8x128xf32, #tpu.memory_space<vmem>>) attributes {dimension_semantics = [#tpu.dimension_semantics<parallel>], iteration_bounds = array<i64: 2>, scalar_prefetch = 0 : i64, scratch_operands = 0 : i64, tpu.core_type = #tpu.core_type<tc>, window_params = [{pipeline_mode = #tpu.pipeline_mode<synchronous>, transform_indices = @transform_0, window_bounds = array<i64: 16, 192>}, {pipeline_mode = #tpu.pipeline_mode<synchronous>, transform_indices = @transform_1, window_bounds = array<i64: 16, 32>}, {pipeline_mode = #tpu.pipeline_mode<synchronous>, transform_indices = @transform_2, window_bounds = array<i64: 2, 16>}, {pipeline_mode = #tpu.pipeline_mode<synchronous>, transform_indices = @transform_3, window_bounds = array<i64: 960, 16>}, {pipeline_mode = #tpu.pipeline_mode<synchronous>, transform_indices = @transform_4, window_bounds = array<i64: 1144, 32>}, {pipeline_mode = #tpu.pipeline_mode<synchronous>, transform_indices = @transform_5, window_bounds = array<i64: 160, 128>}, {transform_indices = @transform_6, window_bounds = array<i64: 8, 128>}]} {
    %c0_i32 = arith.constant 0 : i32
    %0 = arith.cmpi eq, %arg0, %c0_i32 : i32
    %1 = arith.extui %0 : i1 to i32
    %c0_i32_0 = arith.constant 0 : i32
    %2 = arith.cmpi ne, %1, %c0_i32_0 : i32
    scf.if %2 {
      %c1024 = arith.constant 1024 : index
      %c0 = arith.constant 0 : index
      %6 = vector.load %arg5[%c1024, %c0] : memref<1144x32xf32, #tpu.memory_space<vmem>>, vector<8x32xf32>
      %c0_2 = arith.constant 0 : index
      %c0_3 = arith.constant 0 : index
      %7 = vector.load %arg1[%c0_2, %c0_3] : memref<16x192xf32, #tpu.memory_space<vmem>>, vector<16x192xf32>
      %c832 = arith.constant 832 : index
      %c0_4 = arith.constant 0 : index
      %8 = vector.load %arg5[%c832, %c0_4] : memref<1144x32xf32, #tpu.memory_space<vmem>>, vector<192x32xf32>
      %cst = arith.constant dense<0.000000e+00> : vector<16x32xf32>
      %9 = tpu.matmul %7, %8, %cst {dimension_numbers = #tpu.dot_dimension_numbers<[1], [0], [0], [1], [0, 0, 1, 1], [], []>} : vector<16x192xf32>, vector<192x32xf32>, vector<16x32xf32> -> vector<16x32xf32>
      %10 = tpu.concatenate %6, %6 in 0 : vector<8x32xf32>, vector<8x32xf32> -> vector<16x32xf32>
      %11 = arith.addf %9, %10 : vector<16x32xf32>
      %c1032 = arith.constant 1032 : index
      %c0_5 = arith.constant 0 : index
      %12 = vector.load %arg5[%c1032, %c0_5] : memref<1144x32xf32, #tpu.memory_space<vmem>>, vector<1x32xf32>
      %c1040 = arith.constant 1040 : index
      %c0_6 = arith.constant 0 : index
      %13 = vector.load %arg5[%c1040, %c0_6] : memref<1144x32xf32, #tpu.memory_space<vmem>>, vector<1x32xf32>
      %cst_7 = arith.constant dense<0.000000e+00> : vector<16xf32>
      %14 = vector.multi_reduction <add>, %11, %cst_7 [1] : vector<16x32xf32> to vector<16xf32>
      %15 = vector.shape_cast %14 : vector<16xf32> to vector<16x1xf32>
      %cst_8 = arith.constant 3.200000e+01 : f32
      %16 = vector.broadcast %cst_8 : f32 to vector<16x1xf32>
      %17 = arith.divf %15, %16 : vector<16x1xf32>
      %18 = vector.broadcast %17 : vector<16x1xf32> to vector<16x32xf32>
      %19 = arith.subf %11, %18 : vector<16x32xf32>
      %20 = arith.mulf %19, %19 : vector<16x32xf32>
      %cst_9 = arith.constant dense<0.000000e+00> : vector<16xf32>
      %21 = vector.multi_reduction <add>, %20, %cst_9 [1] : vector<16x32xf32> to vector<16xf32>
      %22 = vector.shape_cast %21 : vector<16xf32> to vector<16x1xf32>
      %cst_10 = arith.constant 3.200000e+01 : f32
      %23 = vector.broadcast %cst_10 : f32 to vector<16x1xf32>
      %24 = arith.divf %22, %23 : vector<16x1xf32>
      %cst_11 = arith.constant 9.99999974E-6 : f32
      %25 = vector.broadcast %cst_11 : f32 to vector<16x1xf32>
      %26 = arith.addf %24, %25 : vector<16x1xf32>
      %27 = math.rsqrt %26 : vector<16x1xf32>
      %28 = vector.broadcast %27 : vector<16x1xf32> to vector<16x32xf32>
      %29 = arith.mulf %19, %28 : vector<16x32xf32>
      %30 = vector.broadcast %12 : vector<1x32xf32> to vector<16x32xf32>
      %31 = arith.mulf %29, %30 : vector<16x32xf32>
      %32 = vector.broadcast %13 : vector<1x32xf32> to vector<16x32xf32>
      %33 = arith.addf %31, %32 : vector<16x32xf32>
      %34 = tpu.iota {dimensions = array<i32: 1>} : vector<8x8xi32>
      %c5_i32 = arith.constant 5 : i32
      %35 = vector.broadcast %c5_i32 : i32 to vector<8x8xi32>
      %36 = arith.cmpi sge, %34, %35 : vector<8x8xi32>
      %cst_12 = arith.constant -1.000000e+09 : f32
      %cst_13 = arith.constant 0.000000e+00 : f32
      %37 = vector.broadcast %cst_12 : f32 to vector<8x8xf32>
      %38 = vector.broadcast %cst_13 : f32 to vector<8x8xf32>
      %39 = arith.select %36, %37, %38 : vector<8x8xi1>, vector<8x8xf32>
      %c40 = arith.constant 40 : index
      %c0_14 = arith.constant 0 : index
      %40 = vector.load %arg5[%c40, %c0_14] : memref<1144x32xf32, #tpu.memory_space<vmem>>, vector<1x32xf32>
      %c48 = arith.constant 48 : index
      %c0_15 = arith.constant 0 : index
      %41 = vector.load %arg5[%c48, %c0_15] : memref<1144x32xf32, #tpu.memory_space<vmem>>, vector<1x32xf32>
      %cst_16 = arith.constant dense<0.000000e+00> : vector<16xf32>
      %42 = vector.multi_reduction <add>, %33, %cst_16 [1] : vector<16x32xf32> to vector<16xf32>
      %43 = vector.shape_cast %42 : vector<16xf32> to vector<16x1xf32>
      %cst_17 = arith.constant 3.200000e+01 : f32
      %44 = vector.broadcast %cst_17 : f32 to vector<16x1xf32>
      %45 = arith.divf %43, %44 : vector<16x1xf32>
      %46 = vector.broadcast %45 : vector<16x1xf32> to vector<16x32xf32>
      %47 = arith.subf %33, %46 : vector<16x32xf32>
      %48 = arith.mulf %47, %47 : vector<16x32xf32>
      %cst_18 = arith.constant dense<0.000000e+00> : vector<16xf32>
      %49 = vector.multi_reduction <add>, %48, %cst_18 [1] : vector<16x32xf32> to vector<16xf32>
      %50 = vector.shape_cast %49 : vector<16xf32> to vector<16x1xf32>
      %cst_19 = arith.constant 3.200000e+01 : f32
      %51 = vector.broadcast %cst_19 : f32 to vector<16x1xf32>
      %52 = arith.divf %50, %51 : vector<16x1xf32>
      %cst_20 = arith.constant 9.99999974E-6 : f32
      %53 = vector.broadcast %cst_20 : f32 to vector<16x1xf32>
      %54 = arith.addf %52, %53 : vector<16x1xf32>
      %55 = math.rsqrt %54 : vector<16x1xf32>
      %56 = vector.broadcast %55 : vector<16x1xf32> to vector<16x32xf32>
      %57 = arith.mulf %47, %56 : vector<16x32xf32>
      %58 = vector.broadcast %40 : vector<1x32xf32> to vector<16x32xf32>
      %59 = arith.mulf %57, %58 : vector<16x32xf32>
      %60 = vector.broadcast %41 : vector<1x32xf32> to vector<16x32xf32>
      %61 = arith.addf %59, %60 : vector<16x32xf32>
      %62 = vector.extract_strided_slice %61 {offsets = [0, 0], sizes = [8, 32], strides = [1, 1]} : vector<16x32xf32> to vector<8x32xf32>
      %c0_21 = arith.constant 0 : index
      %c0_22 = arith.constant 0 : index
      %63 = vector.load %arg4[%c0_21, %c0_22] : memref<960x16xf32, #tpu.memory_space<vmem>>, vector<32x16xf32>
      %cst_23 = arith.constant dense<0.000000e+00> : vector<8x16xf32>
      %64 = tpu.matmul %62, %63, %cst_23 {dimension_numbers = #tpu.dot_dimension_numbers<[1], [0], [0], [1], [0, 0, 1, 1], [], []>} : vector<8x32xf32>, vector<32x16xf32>, vector<8x16xf32> -> vector<8x16xf32>
      %c96 = arith.constant 96 : index
      %c0_24 = arith.constant 0 : index
      %65 = vector.load %arg4[%c96, %c0_24] : memref<960x16xf32, #tpu.memory_space<vmem>>, vector<1x16xf32>
      %66 = vector.broadcast %65 : vector<1x16xf32> to vector<8x16xf32>
      %67 = arith.addf %64, %66 : vector<8x16xf32>
      %c32 = arith.constant 32 : index
      %c0_25 = arith.constant 0 : index
      %68 = vector.load %arg4[%c32, %c0_25] : memref<960x16xf32, #tpu.memory_space<vmem>>, vector<32x16xf32>
      %cst_26 = arith.constant dense<0.000000e+00> : vector<8x16xf32>
      %69 = tpu.matmul %62, %68, %cst_26 {dimension_numbers = #tpu.dot_dimension_numbers<[1], [0], [0], [1], [0, 0, 1, 1], [], []>} : vector<8x32xf32>, vector<32x16xf32>, vector<8x16xf32> -> vector<8x16xf32>
      %c104 = arith.constant 104 : index
      %c0_27 = arith.constant 0 : index
      %70 = vector.load %arg4[%c104, %c0_27] : memref<960x16xf32, #tpu.memory_space<vmem>>, vector<1x16xf32>
      %71 = vector.broadcast %70 : vector<1x16xf32> to vector<8x16xf32>
      %72 = arith.addf %69, %71 : vector<8x16xf32>
      %c64 = arith.constant 64 : index
      %c0_28 = arith.constant 0 : index
      %73 = vector.load %arg4[%c64, %c0_28] : memref<960x16xf32, #tpu.memory_space<vmem>>, vector<32x16xf32>
      %cst_29 = arith.constant dense<0.000000e+00> : vector<8x16xf32>
      %74 = tpu.matmul %62, %73, %cst_29 {dimension_numbers = #tpu.dot_dimension_numbers<[1], [0], [0], [1], [0, 0, 1, 1], [], []>} : vector<8x32xf32>, vector<32x16xf32>, vector<8x16xf32> -> vector<8x16xf32>
      %c112 = arith.constant 112 : index
      %c0_30 = arith.constant 0 : index
      %75 = vector.load %arg4[%c112, %c0_30] : memref<960x16xf32, #tpu.memory_space<vmem>>, vector<1x16xf32>
      %76 = vector.broadcast %75 : vector<1x16xf32> to vector<8x16xf32>
      %77 = arith.addf %74, %76 : vector<8x16xf32>
      %cst_31 = arith.constant dense<0.000000e+00> : vector<8x8xf32>
      %78 = tpu.matmul %67, %72, %cst_31 {dimension_numbers = #tpu.dot_dimension_numbers<[1], [1], [0], [0], [0, 0, 1, 0], [], []>} : vector<8x16xf32>, vector<8x16xf32>, vector<8x8xf32> -> vector<8x8xf32>
      %cst_32 = arith.constant 2.500000e-01 : f32
      %79 = vector.broadcast %cst_32 : f32 to vector<8x8xf32>
      %80 = arith.mulf %78, %79 : vector<8x8xf32>
      %81 = arith.addf %80, %39 : vector<8x8xf32>
      %cst_33 = arith.constant dense<0xFF800000> : vector<8xf32>
      %82 = vector.multi_reduction <maximumf>, %81, %cst_33 [1] : vector<8x8xf32> to vector<8xf32>
      %83 = vector.shape_cast %82 : vector<8xf32> to vector<8x1xf32>
      %84 = vector.broadcast %83 : vector<8x1xf32> to vector<8x8xf32>
      %85 = arith.subf %81, %84 : vector<8x8xf32>
      %86 = math.exp %85 : vector<8x8xf32>
      %cst_34 = arith.constant dense<0.000000e+00> : vector<8xf32>
      %87 = vector.multi_reduction <add>, %86, %cst_34 [1] : vector<8x8xf32> to vector<8xf32>
      %88 = vector.shape_cast %87 : vector<8xf32> to vector<8x1xf32>
      %89 = vector.broadcast %88 : vector<8x1xf32> to vector<8x8xf32>
      %90 = arith.divf %86, %89 : vector<8x8xf32>
      %cst_35 = arith.constant dense<0.000000e+00> : vector<8x16xf32>
      %91 = tpu.matmul %90, %77, %cst_35 {dimension_numbers = #tpu.dot_dimension_numbers<[1], [0], [0], [1], [0, 0, 1, 1], [], []>} : vector<8x8xf32>, vector<8x16xf32>, vector<8x16xf32> -> vector<8x16xf32>
      %c0_36 = arith.constant 0 : index
      %c0_37 = arith.constant 0 : index
      %92 = vector.load %arg5[%c0_36, %c0_37] : memref<1144x32xf32, #tpu.memory_space<vmem>>, vector<16x32xf32>
      %cst_38 = arith.constant dense<0.000000e+00> : vector<8x32xf32>
      %93 = tpu.matmul %91, %92, %cst_38 {dimension_numbers = #tpu.dot_dimension_numbers<[1], [0], [0], [1], [0, 0, 1, 1], [], []>} : vector<8x16xf32>, vector<16x32xf32>, vector<8x32xf32> -> vector<8x32xf32>
      %c120 = arith.constant 120 : index
      %c0_39 = arith.constant 0 : index
      %94 = vector.load %arg4[%c120, %c0_39] : memref<960x16xf32, #tpu.memory_space<vmem>>, vector<32x16xf32>
      %cst_40 = arith.constant dense<0.000000e+00> : vector<8x16xf32>
      %95 = tpu.matmul %62, %94, %cst_40 {dimension_numbers = #tpu.dot_dimension_numbers<[1], [0], [0], [1], [0, 0, 1, 1], [], []>} : vector<8x32xf32>, vector<32x16xf32>, vector<8x16xf32> -> vector<8x16xf32>
      %c216 = arith.constant 216 : index
      %c0_41 = arith.constant 0 : index
      %96 = vector.load %arg4[%c216, %c0_41] : memref<960x16xf32, #tpu.memory_space<vmem>>, vector<1x16xf32>
      %97 = vector.broadcast %96 : vector<1x16xf32> to vector<8x16xf32>
      %98 = arith.addf %95, %97 : vector<8x16xf32>
      %c152 = arith.constant 152 : index
      %c0_42 = arith.constant 0 : index
      %99 = vector.load %arg4[%c152, %c0_42] : memref<960x16xf32, #tpu.memory_space<vmem>>, vector<32x16xf32>
      %cst_43 = arith.constant dense<0.000000e+00> : vector<8x16xf32>
      %100 = tpu.matmul %62, %99, %cst_43 {dimension_numbers = #tpu.dot_dimension_numbers<[1], [0], [0], [1], [0, 0, 1, 1], [], []>} : vector<8x32xf32>, vector<32x16xf32>, vector<8x16xf32> -> vector<8x16xf32>
      %c224 = arith.constant 224 : index
      %c0_44 = arith.constant 0 : index
      %101 = vector.load %arg4[%c224, %c0_44] : memref<960x16xf32, #tpu.memory_space<vmem>>, vector<1x16xf32>
      %102 = vector.broadcast %101 : vector<1x16xf32> to vector<8x16xf32>
      %103 = arith.addf %100, %102 : vector<8x16xf32>
      %c184 = arith.constant 184 : index
      %c0_45 = arith.constant 0 : index
      %104 = vector.load %arg4[%c184, %c0_45] : memref<960x16xf32, #tpu.memory_space<vmem>>, vector<32x16xf32>
      %cst_46 = arith.constant dense<0.000000e+00> : vector<8x16xf32>
      %105 = tpu.matmul %62, %104, %cst_46 {dimension_numbers = #tpu.dot_dimension_numbers<[1], [0], [0], [1], [0, 0, 1, 1], [], []>} : vector<8x32xf32>, vector<32x16xf32>, vector<8x16xf32> -> vector<8x16xf32>
      %c232 = arith.constant 232 : index
      %c0_47 = arith.constant 0 : index
      %106 = vector.load %arg4[%c232, %c0_47] : memref<960x16xf32, #tpu.memory_space<vmem>>, vector<1x16xf32>
      %107 = vector.broadcast %106 : vector<1x16xf32> to vector<8x16xf32>
      %108 = arith.addf %105, %107 : vector<8x16xf32>
      %cst_48 = arith.constant dense<0.000000e+00> : vector<8x8xf32>
      %109 = tpu.matmul %98, %103, %cst_48 {dimension_numbers = #tpu.dot_dimension_numbers<[1], [1], [0], [0], [0, 0, 1, 0], [], []>} : vector<8x16xf32>, vector<8x16xf32>, vector<8x8xf32> -> vector<8x8xf32>
      %cst_49 = arith.constant 2.500000e-01 : f32
      %110 = vector.broadcast %cst_49 : f32 to vector<8x8xf32>
      %111 = arith.mulf %109, %110 : vector<8x8xf32>
      %112 = arith.addf %111, %39 : vector<8x8xf32>
      %cst_50 = arith.constant dense<0xFF800000> : vector<8xf32>
      %113 = vector.multi_reduction <maximumf>, %112, %cst_50 [1] : vector<8x8xf32> to vector<8xf32>
      %114 = vector.shape_cast %113 : vector<8xf32> to vector<8x1xf32>
      %115 = vector.broadcast %114 : vector<8x1xf32> to vector<8x8xf32>
      %116 = arith.subf %112, %115 : vector<8x8xf32>
      %117 = math.exp %116 : vector<8x8xf32>
      %cst_51 = arith.constant dense<0.000000e+00> : vector<8xf32>
      %118 = vector.multi_reduction <add>, %117, %cst_51 [1] : vector<8x8xf32> to vector<8xf32>
      %119 = vector.shape_cast %118 : vector<8xf32> to vector<8x1xf32>
      %120 = vector.broadcast %119 : vector<8x1xf32> to vector<8x8xf32>
      %121 = arith.divf %117, %120 : vector<8x8xf32>
      %cst_52 = arith.constant dense<0.000000e+00> : vector<8x16xf32>
      %122 = tpu.matmul %121, %108, %cst_52 {dimension_numbers = #tpu.dot_dimension_numbers<[1], [0], [0], [1], [0, 0, 1, 1], [], []>} : vector<8x8xf32>, vector<8x16xf32>, vector<8x16xf32> -> vector<8x16xf32>
      %c16 = arith.constant 16 : index
      %c0_53 = arith.constant 0 : index
      %123 = vector.load %arg5[%c16, %c0_53] : memref<1144x32xf32, #tpu.memory_space<vmem>>, vector<16x32xf32>
      %cst_54 = arith.constant dense<0.000000e+00> : vector<8x32xf32>
      %124 = tpu.matmul %122, %123, %cst_54 {dimension_numbers = #tpu.dot_dimension_numbers<[1], [0], [0], [1], [0, 0, 1, 1], [], []>} : vector<8x16xf32>, vector<16x32xf32>, vector<8x32xf32> -> vector<8x32xf32>
      %125 = arith.addf %93, %124 : vector<8x32xf32>
      %126 = vector.extract_strided_slice %61 {offsets = [8, 0], sizes = [8, 32], strides = [1, 1]} : vector<16x32xf32> to vector<8x32xf32>
      %c0_55 = arith.constant 0 : index
      %c0_56 = arith.constant 0 : index
      %127 = vector.load %arg4[%c0_55, %c0_56] : memref<960x16xf32, #tpu.memory_space<vmem>>, vector<32x16xf32>
      %cst_57 = arith.constant dense<0.000000e+00> : vector<8x16xf32>
      %128 = tpu.matmul %126, %127, %cst_57 {dimension_numbers = #tpu.dot_dimension_numbers<[1], [0], [0], [1], [0, 0, 1, 1], [], []>} : vector<8x32xf32>, vector<32x16xf32>, vector<8x16xf32> -> vector<8x16xf32>
      %c96_58 = arith.constant 96 : index
      %c0_59 = arith.constant 0 : index
      %129 = vector.load %arg4[%c96_58, %c0_59] : memref<960x16xf32, #tpu.memory_space<vmem>>, vector<1x16xf32>
      %130 = vector.broadcast %129 : vector<1x16xf32> to vector<8x16xf32>
      %131 = arith.addf %128, %130 : vector<8x16xf32>
      %c32_60 = arith.constant 32 : index
      %c0_61 = arith.constant 0 : index
      %132 = vector.load %arg4[%c32_60, %c0_61] : memref<960x16xf32, #tpu.memory_space<vmem>>, vector<32x16xf32>
      %cst_62 = arith.constant dense<0.000000e+00> : vector<8x16xf32>
      %133 = tpu.matmul %126, %132, %cst_62 {dimension_numbers = #tpu.dot_dimension_numbers<[1], [0], [0], [1], [0, 0, 1, 1], [], []>} : vector<8x32xf32>, vector<32x16xf32>, vector<8x16xf32> -> vector<8x16xf32>
      %c104_63 = arith.constant 104 : index
      %c0_64 = arith.constant 0 : index
      %134 = vector.load %arg4[%c104_63, %c0_64] : memref<960x16xf32, #tpu.memory_space<vmem>>, vector<1x16xf32>
      %135 = vector.broadcast %134 : vector<1x16xf32> to vector<8x16xf32>
      %136 = arith.addf %133, %135 : vector<8x16xf32>
      %c64_65 = arith.constant 64 : index
      %c0_66 = arith.constant 0 : index
      %137 = vector.load %arg4[%c64_65, %c0_66] : memref<960x16xf32, #tpu.memory_space<vmem>>, vector<32x16xf32>
      %cst_67 = arith.constant dense<0.000000e+00> : vector<8x16xf32>
      %138 = tpu.matmul %126, %137, %cst_67 {dimension_numbers = #tpu.dot_dimension_numbers<[1], [0], [0], [1], [0, 0, 1, 1], [], []>} : vector<8x32xf32>, vector<32x16xf32>, vector<8x16xf32> -> vector<8x16xf32>
      %c112_68 = arith.constant 112 : index
      %c0_69 = arith.constant 0 : index
      %139 = vector.load %arg4[%c112_68, %c0_69] : memref<960x16xf32, #tpu.memory_space<vmem>>, vector<1x16xf32>
      %140 = vector.broadcast %139 : vector<1x16xf32> to vector<8x16xf32>
      %141 = arith.addf %138, %140 : vector<8x16xf32>
      %cst_70 = arith.constant dense<0.000000e+00> : vector<8x8xf32>
      %142 = tpu.matmul %131, %136, %cst_70 {dimension_numbers = #tpu.dot_dimension_numbers<[1], [1], [0], [0], [0, 0, 1, 0], [], []>} : vector<8x16xf32>, vector<8x16xf32>, vector<8x8xf32> -> vector<8x8xf32>
      %cst_71 = arith.constant 2.500000e-01 : f32
      %143 = vector.broadcast %cst_71 : f32 to vector<8x8xf32>
      %144 = arith.mulf %142, %143 : vector<8x8xf32>
      %145 = arith.addf %144, %39 : vector<8x8xf32>
      %cst_72 = arith.constant dense<0xFF800000> : vector<8xf32>
      %146 = vector.multi_reduction <maximumf>, %145, %cst_72 [1] : vector<8x8xf32> to vector<8xf32>
      %147 = vector.shape_cast %146 : vector<8xf32> to vector<8x1xf32>
      %148 = vector.broadcast %147 : vector<8x1xf32> to vector<8x8xf32>
      %149 = arith.subf %145, %148 : vector<8x8xf32>
      %150 = math.exp %149 : vector<8x8xf32>
      %cst_73 = arith.constant dense<0.000000e+00> : vector<8xf32>
      %151 = vector.multi_reduction <add>, %150, %cst_73 [1] : vector<8x8xf32> to vector<8xf32>
      %152 = vector.shape_cast %151 : vector<8xf32> to vector<8x1xf32>
      %153 = vector.broadcast %152 : vector<8x1xf32> to vector<8x8xf32>
      %154 = arith.divf %150, %153 : vector<8x8xf32>
      %cst_74 = arith.constant dense<0.000000e+00> : vector<8x16xf32>
      %155 = tpu.matmul %154, %141, %cst_74 {dimension_numbers = #tpu.dot_dimension_numbers<[1], [0], [0], [1], [0, 0, 1, 1], [], []>} : vector<8x8xf32>, vector<8x16xf32>, vector<8x16xf32> -> vector<8x16xf32>
      %c0_75 = arith.constant 0 : index
      %c0_76 = arith.constant 0 : index
      %156 = vector.load %arg5[%c0_75, %c0_76] : memref<1144x32xf32, #tpu.memory_space<vmem>>, vector<16x32xf32>
      %cst_77 = arith.constant dense<0.000000e+00> : vector<8x32xf32>
      %157 = tpu.matmul %155, %156, %cst_77 {dimension_numbers = #tpu.dot_dimension_numbers<[1], [0], [0], [1], [0, 0, 1, 1], [], []>} : vector<8x16xf32>, vector<16x32xf32>, vector<8x32xf32> -> vector<8x32xf32>
      %c120_78 = arith.constant 120 : index
      %c0_79 = arith.constant 0 : index
      %158 = vector.load %arg4[%c120_78, %c0_79] : memref<960x16xf32, #tpu.memory_space<vmem>>, vector<32x16xf32>
      %cst_80 = arith.constant dense<0.000000e+00> : vector<8x16xf32>
      %159 = tpu.matmul %126, %158, %cst_80 {dimension_numbers = #tpu.dot_dimension_numbers<[1], [0], [0], [1], [0, 0, 1, 1], [], []>} : vector<8x32xf32>, vector<32x16xf32>, vector<8x16xf32> -> vector<8x16xf32>
      %c216_81 = arith.constant 216 : index
      %c0_82 = arith.constant 0 : index
      %160 = vector.load %arg4[%c216_81, %c0_82] : memref<960x16xf32, #tpu.memory_space<vmem>>, vector<1x16xf32>
      %161 = vector.broadcast %160 : vector<1x16xf32> to vector<8x16xf32>
      %162 = arith.addf %159, %161 : vector<8x16xf32>
      %c152_83 = arith.constant 152 : index
      %c0_84 = arith.constant 0 : index
      %163 = vector.load %arg4[%c152_83, %c0_84] : memref<960x16xf32, #tpu.memory_space<vmem>>, vector<32x16xf32>
      %cst_85 = arith.constant dense<0.000000e+00> : vector<8x16xf32>
      %164 = tpu.matmul %126, %163, %cst_85 {dimension_numbers = #tpu.dot_dimension_numbers<[1], [0], [0], [1], [0, 0, 1, 1], [], []>} : vector<8x32xf32>, vector<32x16xf32>, vector<8x16xf32> -> vector<8x16xf32>
      %c224_86 = arith.constant 224 : index
      %c0_87 = arith.constant 0 : index
      %165 = vector.load %arg4[%c224_86, %c0_87] : memref<960x16xf32, #tpu.memory_space<vmem>>, vector<1x16xf32>
      %166 = vector.broadcast %165 : vector<1x16xf32> to vector<8x16xf32>
      %167 = arith.addf %164, %166 : vector<8x16xf32>
      %c184_88 = arith.constant 184 : index
      %c0_89 = arith.constant 0 : index
      %168 = vector.load %arg4[%c184_88, %c0_89] : memref<960x16xf32, #tpu.memory_space<vmem>>, vector<32x16xf32>
      %cst_90 = arith.constant dense<0.000000e+00> : vector<8x16xf32>
      %169 = tpu.matmul %126, %168, %cst_90 {dimension_numbers = #tpu.dot_dimension_numbers<[1], [0], [0], [1], [0, 0, 1, 1], [], []>} : vector<8x32xf32>, vector<32x16xf32>, vector<8x16xf32> -> vector<8x16xf32>
      %c232_91 = arith.constant 232 : index
      %c0_92 = arith.constant 0 : index
      %170 = vector.load %arg4[%c232_91, %c0_92] : memref<960x16xf32, #tpu.memory_space<vmem>>, vector<1x16xf32>
      %171 = vector.broadcast %170 : vector<1x16xf32> to vector<8x16xf32>
      %172 = arith.addf %169, %171 : vector<8x16xf32>
      %cst_93 = arith.constant dense<0.000000e+00> : vector<8x8xf32>
      %173 = tpu.matmul %162, %167, %cst_93 {dimension_numbers = #tpu.dot_dimension_numbers<[1], [1], [0], [0], [0, 0, 1, 0], [], []>} : vector<8x16xf32>, vector<8x16xf32>, vector<8x8xf32> -> vector<8x8xf32>
      %cst_94 = arith.constant 2.500000e-01 : f32
      %174 = vector.broadcast %cst_94 : f32 to vector<8x8xf32>
      %175 = arith.mulf %173, %174 : vector<8x8xf32>
      %176 = arith.addf %175, %39 : vector<8x8xf32>
      %cst_95 = arith.constant dense<0xFF800000> : vector<8xf32>
      %177 = vector.multi_reduction <maximumf>, %176, %cst_95 [1] : vector<8x8xf32> to vector<8xf32>
      %178 = vector.shape_cast %177 : vector<8xf32> to vector<8x1xf32>
      %179 = vector.broadcast %178 : vector<8x1xf32> to vector<8x8xf32>
      %180 = arith.subf %176, %179 : vector<8x8xf32>
      %181 = math.exp %180 : vector<8x8xf32>
      %cst_96 = arith.constant dense<0.000000e+00> : vector<8xf32>
      %182 = vector.multi_reduction <add>, %181, %cst_96 [1] : vector<8x8xf32> to vector<8xf32>
      %183 = vector.shape_cast %182 : vector<8xf32> to vector<8x1xf32>
      %184 = vector.broadcast %183 : vector<8x1xf32> to vector<8x8xf32>
      %185 = arith.divf %181, %184 : vector<8x8xf32>
      %cst_97 = arith.constant dense<0.000000e+00> : vector<8x16xf32>
      %186 = tpu.matmul %185, %172, %cst_97 {dimension_numbers = #tpu.dot_dimension_numbers<[1], [0], [0], [1], [0, 0, 1, 1], [], []>} : vector<8x8xf32>, vector<8x16xf32>, vector<8x16xf32> -> vector<8x16xf32>
      %c16_98 = arith.constant 16 : index
      %c0_99 = arith.constant 0 : index
      %187 = vector.load %arg5[%c16_98, %c0_99] : memref<1144x32xf32, #tpu.memory_space<vmem>>, vector<16x32xf32>
      %cst_100 = arith.constant dense<0.000000e+00> : vector<8x32xf32>
      %188 = tpu.matmul %186, %187, %cst_100 {dimension_numbers = #tpu.dot_dimension_numbers<[1], [0], [0], [1], [0, 0, 1, 1], [], []>} : vector<8x16xf32>, vector<16x32xf32>, vector<8x32xf32> -> vector<8x32xf32>
      %189 = arith.addf %157, %188 : vector<8x32xf32>
      %190 = tpu.concatenate %125, %189 in 0 : vector<8x32xf32>, vector<8x32xf32> -> vector<16x32xf32>
      %191 = arith.addf %33, %190 : vector<16x32xf32>
      %c32_101 = arith.constant 32 : index
      %c0_102 = arith.constant 0 : index
      %192 = vector.load %arg5[%c32_101, %c0_102] : memref<1144x32xf32, #tpu.memory_space<vmem>>, vector<1x32xf32>
      %193 = vector.broadcast %192 : vector<1x32xf32> to vector<16x32xf32>
      %194 = arith.addf %191, %193 : vector<16x32xf32>
      %c56 = arith.constant 56 : index
      %c0_103 = arith.constant 0 : index
      %195 = vector.load %arg5[%c56, %c0_103] : memref<1144x32xf32, #tpu.memory_space<vmem>>, vector<1x32xf32>
      %c64_104 = arith.constant 64 : index
      %c0_105 = arith.constant 0 : index
      %196 = vector.load %arg5[%c64_104, %c0_105] : memref<1144x32xf32, #tpu.memory_space<vmem>>, vector<1x32xf32>
      %cst_106 = arith.constant dense<0.000000e+00> : vector<16xf32>
      %197 = vector.multi_reduction <add>, %194, %cst_106 [1] : vector<16x32xf32> to vector<16xf32>
      %198 = vector.shape_cast %197 : vector<16xf32> to vector<16x1xf32>
      %cst_107 = arith.constant 3.200000e+01 : f32
      %199 = vector.broadcast %cst_107 : f32 to vector<16x1xf32>
      %200 = arith.divf %198, %199 : vector<16x1xf32>
      %201 = vector.broadcast %200 : vector<16x1xf32> to vector<16x32xf32>
      %202 = arith.subf %194, %201 : vector<16x32xf32>
      %203 = arith.mulf %202, %202 : vector<16x32xf32>
      %cst_108 = arith.constant dense<0.000000e+00> : vector<16xf32>
      %204 = vector.multi_reduction <add>, %203, %cst_108 [1] : vector<16x32xf32> to vector<16xf32>
      %205 = vector.shape_cast %204 : vector<16xf32> to vector<16x1xf32>
      %cst_109 = arith.constant 3.200000e+01 : f32
      %206 = vector.broadcast %cst_109 : f32 to vector<16x1xf32>
      %207 = arith.divf %205, %206 : vector<16x1xf32>
      %cst_110 = arith.constant 9.99999974E-6 : f32
      %208 = vector.broadcast %cst_110 : f32 to vector<16x1xf32>
      %209 = arith.addf %207, %208 : vector<16x1xf32>
      %210 = math.rsqrt %209 : vector<16x1xf32>
      %211 = vector.broadcast %210 : vector<16x1xf32> to vector<16x32xf32>
      %212 = arith.mulf %202, %211 : vector<16x32xf32>
      %213 = vector.broadcast %195 : vector<1x32xf32> to vector<16x32xf32>
      %214 = arith.mulf %212, %213 : vector<16x32xf32>
      %215 = vector.broadcast %196 : vector<1x32xf32> to vector<16x32xf32>
      %216 = arith.addf %214, %215 : vector<16x32xf32>
      %c0_111 = arith.constant 0 : index
      %c0_112 = arith.constant 0 : index
      %217 = vector.load %arg6[%c0_111, %c0_112] : memref<160x128xf32, #tpu.memory_space<vmem>>, vector<32x128xf32>
      %cst_113 = arith.constant dense<0.000000e+00> : vector<16x128xf32>
      %218 = tpu.matmul %216, %217, %cst_113 {dimension_numbers = #tpu.dot_dimension_numbers<[1], [0], [0], [1], [0, 0, 1, 1], [], []>} : vector<16x32xf32>, vector<32x128xf32>, vector<16x128xf32> -> vector<16x128xf32>
      %c32_114 = arith.constant 32 : index
      %c0_115 = arith.constant 0 : index
      %219 = vector.load %arg6[%c32_114, %c0_115] : memref<160x128xf32, #tpu.memory_space<vmem>>, vector<1x128xf32>
      %220 = vector.broadcast %219 : vector<1x128xf32> to vector<16x128xf32>
      %221 = arith.addf %218, %220 : vector<16x128xf32>
      %cst_116 = arith.constant 5.000000e-01 : f32
      %222 = vector.broadcast %cst_116 : f32 to vector<16x128xf32>
      %223 = arith.mulf %222, %221 : vector<16x128xf32>
      %cst_117 = arith.constant 0.707106769 : f32
      %224 = vector.broadcast %cst_117 : f32 to vector<16x128xf32>
      %225 = arith.mulf %221, %224 : vector<16x128xf32>
      %226 = math.absf %225 : vector<16x128xf32>
      %cst_118 = arith.constant 0.327591091 : f32
      %227 = vector.broadcast %cst_118 : f32 to vector<16x128xf32>
      %228 = arith.mulf %227, %226 : vector<16x128xf32>
      %cst_119 = arith.constant 1.000000e+00 : f32
      %229 = vector.broadcast %cst_119 : f32 to vector<16x128xf32>
      %230 = arith.addf %229, %228 : vector<16x128xf32>
      %cst_120 = arith.constant 1.000000e+00 : f32
      %231 = vector.broadcast %cst_120 : f32 to vector<16x128xf32>
      %232 = arith.divf %231, %230 : vector<16x128xf32>
      %cst_121 = arith.constant 1.06140542 : f32
      %233 = vector.broadcast %cst_121 : f32 to vector<16x128xf32>
      %234 = arith.mulf %233, %232 : vector<16x128xf32>
      %cst_122 = arith.constant -1.45315206 : f32
      %235 = vector.broadcast %cst_122 : f32 to vector<16x128xf32>
      %236 = arith.addf %234, %235 : vector<16x128xf32>
      %237 = arith.mulf %236, %232 : vector<16x128xf32>
      %cst_123 = arith.constant 1.42141378 : f32
      %238 = vector.broadcast %cst_123 : f32 to vector<16x128xf32>
      %239 = arith.addf %237, %238 : vector<16x128xf32>
      %240 = arith.mulf %239, %232 : vector<16x128xf32>
      %cst_124 = arith.constant -0.284496725 : f32
      %241 = vector.broadcast %cst_124 : f32 to vector<16x128xf32>
      %242 = arith.addf %240, %241 : vector<16x128xf32>
      %243 = arith.mulf %242, %232 : vector<16x128xf32>
      %cst_125 = arith.constant 0.254829586 : f32
      %244 = vector.broadcast %cst_125 : f32 to vector<16x128xf32>
      %245 = arith.addf %243, %244 : vector<16x128xf32>
      %246 = arith.mulf %245, %232 : vector<16x128xf32>
      %cst_126 = arith.constant 0.000000e+00 : f32
      %247 = vector.broadcast %cst_126 : f32 to vector<16x128xf32>
      %248 = arith.subf %247, %226 : vector<16x128xf32>
      %249 = arith.mulf %248, %226 : vector<16x128xf32>
      %250 = math.exp %249 : vector<16x128xf32>
      %251 = arith.mulf %246, %250 : vector<16x128xf32>
      %cst_127 = arith.constant 1.000000e+00 : f32
      %252 = vector.broadcast %cst_127 : f32 to vector<16x128xf32>
      %253 = arith.subf %252, %251 : vector<16x128xf32>
      %cst_128 = arith.constant 0.000000e+00 : f32
      %254 = vector.broadcast %cst_128 : f32 to vector<16x128xf32>
      %255 = arith.cmpf oge, %225, %254 : vector<16x128xf32>
      %cst_129 = arith.constant 0.000000e+00 : f32
      %256 = vector.broadcast %cst_129 : f32 to vector<16x128xf32>
      %257 = arith.subf %256, %253 : vector<16x128xf32>
      %258 = arith.select %255, %253, %257 : vector<16x128xi1>, vector<16x128xf32>
      %cst_130 = arith.constant 1.000000e+00 : f32
      %259 = vector.broadcast %cst_130 : f32 to vector<16x128xf32>
      %260 = arith.addf %259, %258 : vector<16x128xf32>
      %261 = arith.mulf %223, %260 : vector<16x128xf32>
      %c72 = arith.constant 72 : index
      %c0_131 = arith.constant 0 : index
      %262 = vector.load %arg5[%c72, %c0_131] : memref<1144x32xf32, #tpu.memory_space<vmem>>, vector<128x32xf32>
      %cst_132 = arith.constant dense<0.000000e+00> : vector<16x32xf32>
      %263 = tpu.matmul %261, %262, %cst_132 {dimension_numbers = #tpu.dot_dimension_numbers<[1], [0], [0], [1], [0, 0, 1, 1], [], []>} : vector<16x128xf32>, vector<128x32xf32>, vector<16x32xf32> -> vector<16x32xf32>
      %264 = arith.addf %194, %263 : vector<16x32xf32>
      %c200 = arith.constant 200 : index
      %c0_133 = arith.constant 0 : index
      %265 = vector.load %arg5[%c200, %c0_133] : memref<1144x32xf32, #tpu.memory_space<vmem>>, vector<1x32xf32>
      %266 = vector.broadcast %265 : vector<1x32xf32> to vector<16x32xf32>
      %267 = arith.addf %264, %266 : vector<16x32xf32>
      %c248 = arith.constant 248 : index
      %c0_134 = arith.constant 0 : index
      %268 = vector.load %arg5[%c248, %c0_134] : memref<1144x32xf32, #tpu.memory_space<vmem>>, vector<1x32xf32>
      %c256 = arith.constant 256 : index
      %c0_135 = arith.constant 0 : index
      %269 = vector.load %arg5[%c256, %c0_135] : memref<1144x32xf32, #tpu.memory_space<vmem>>, vector<1x32xf32>
      %cst_136 = arith.constant dense<0.000000e+00> : vector<16xf32>
      %270 = vector.multi_reduction <add>, %267, %cst_136 [1] : vector<16x32xf32> to vector<16xf32>
      %271 = vector.shape_cast %270 : vector<16xf32> to vector<16x1xf32>
      %cst_137 = arith.constant 3.200000e+01 : f32
      %272 = vector.broadcast %cst_137 : f32 to vector<16x1xf32>
      %273 = arith.divf %271, %272 : vector<16x1xf32>
      %274 = vector.broadcast %273 : vector<16x1xf32> to vector<16x32xf32>
      %275 = arith.subf %267, %274 : vector<16x32xf32>
      %276 = arith.mulf %275, %275 : vector<16x32xf32>
      %cst_138 = arith.constant dense<0.000000e+00> : vector<16xf32>
      %277 = vector.multi_reduction <add>, %276, %cst_138 [1] : vector<16x32xf32> to vector<16xf32>
      %278 = vector.shape_cast %277 : vector<16xf32> to vector<16x1xf32>
      %cst_139 = arith.constant 3.200000e+01 : f32
      %279 = vector.broadcast %cst_139 : f32 to vector<16x1xf32>
      %280 = arith.divf %278, %279 : vector<16x1xf32>
      %cst_140 = arith.constant 9.99999974E-6 : f32
      %281 = vector.broadcast %cst_140 : f32 to vector<16x1xf32>
      %282 = arith.addf %280, %281 : vector<16x1xf32>
      %283 = math.rsqrt %282 : vector<16x1xf32>
      %284 = vector.broadcast %283 : vector<16x1xf32> to vector<16x32xf32>
      %285 = arith.mulf %275, %284 : vector<16x32xf32>
      %286 = vector.broadcast %268 : vector<1x32xf32> to vector<16x32xf32>
      %287 = arith.mulf %285, %286 : vector<16x32xf32>
      %288 = vector.broadcast %269 : vector<1x32xf32> to vector<16x32xf32>
      %289 = arith.addf %287, %288 : vector<16x32xf32>
      %290 = vector.extract_strided_slice %289 {offsets = [0, 0], sizes = [8, 32], strides = [1, 1]} : vector<16x32xf32> to vector<8x32xf32>
      %c240 = arith.constant 240 : index
      %c0_141 = arith.constant 0 : index
      %291 = vector.load %arg4[%c240, %c0_141] : memref<960x16xf32, #tpu.memory_space<vmem>>, vector<32x16xf32>
      %cst_142 = arith.constant dense<0.000000e+00> : vector<8x16xf32>
      %292 = tpu.matmul %290, %291, %cst_142 {dimension_numbers = #tpu.dot_dimension_numbers<[1], [0], [0], [1], [0, 0, 1, 1], [], []>} : vector<8x32xf32>, vector<32x16xf32>, vector<8x16xf32> -> vector<8x16xf32>
      %c336 = arith.constant 336 : index
      %c0_143 = arith.constant 0 : index
      %293 = vector.load %arg4[%c336, %c0_143] : memref<960x16xf32, #tpu.memory_space<vmem>>, vector<1x16xf32>
      %294 = vector.broadcast %293 : vector<1x16xf32> to vector<8x16xf32>
      %295 = arith.addf %292, %294 : vector<8x16xf32>
      %c272 = arith.constant 272 : index
      %c0_144 = arith.constant 0 : index
      %296 = vector.load %arg4[%c272, %c0_144] : memref<960x16xf32, #tpu.memory_space<vmem>>, vector<32x16xf32>
      %cst_145 = arith.constant dense<0.000000e+00> : vector<8x16xf32>
      %297 = tpu.matmul %290, %296, %cst_145 {dimension_numbers = #tpu.dot_dimension_numbers<[1], [0], [0], [1], [0, 0, 1, 1], [], []>} : vector<8x32xf32>, vector<32x16xf32>, vector<8x16xf32> -> vector<8x16xf32>
      %c344 = arith.constant 344 : index
      %c0_146 = arith.constant 0 : index
      %298 = vector.load %arg4[%c344, %c0_146] : memref<960x16xf32, #tpu.memory_space<vmem>>, vector<1x16xf32>
      %299 = vector.broadcast %298 : vector<1x16xf32> to vector<8x16xf32>
      %300 = arith.addf %297, %299 : vector<8x16xf32>
      %c304 = arith.constant 304 : index
      %c0_147 = arith.constant 0 : index
      %301 = vector.load %arg4[%c304, %c0_147] : memref<960x16xf32, #tpu.memory_space<vmem>>, vector<32x16xf32>
      %cst_148 = arith.constant dense<0.000000e+00> : vector<8x16xf32>
      %302 = tpu.matmul %290, %301, %cst_148 {dimension_numbers = #tpu.dot_dimension_numbers<[1], [0], [0], [1], [0, 0, 1, 1], [], []>} : vector<8x32xf32>, vector<32x16xf32>, vector<8x16xf32> -> vector<8x16xf32>
      %c352 = arith.constant 352 : index
      %c0_149 = arith.constant 0 : index
      %303 = vector.load %arg4[%c352, %c0_149] : memref<960x16xf32, #tpu.memory_space<vmem>>, vector<1x16xf32>
      %304 = vector.broadcast %303 : vector<1x16xf32> to vector<8x16xf32>
      %305 = arith.addf %302, %304 : vector<8x16xf32>
      %cst_150 = arith.constant dense<0.000000e+00> : vector<8x8xf32>
      %306 = tpu.matmul %295, %300, %cst_150 {dimension_numbers = #tpu.dot_dimension_numbers<[1], [1], [0], [0], [0, 0, 1, 0], [], []>} : vector<8x16xf32>, vector<8x16xf32>, vector<8x8xf32> -> vector<8x8xf32>
      %cst_151 = arith.constant 2.500000e-01 : f32
      %307 = vector.broadcast %cst_151 : f32 to vector<8x8xf32>
      %308 = arith.mulf %306, %307 : vector<8x8xf32>
      %309 = arith.addf %308, %39 : vector<8x8xf32>
      %cst_152 = arith.constant dense<0xFF800000> : vector<8xf32>
      %310 = vector.multi_reduction <maximumf>, %309, %cst_152 [1] : vector<8x8xf32> to vector<8xf32>
      %311 = vector.shape_cast %310 : vector<8xf32> to vector<8x1xf32>
      %312 = vector.broadcast %311 : vector<8x1xf32> to vector<8x8xf32>
      %313 = arith.subf %309, %312 : vector<8x8xf32>
      %314 = math.exp %313 : vector<8x8xf32>
      %cst_153 = arith.constant dense<0.000000e+00> : vector<8xf32>
      %315 = vector.multi_reduction <add>, %314, %cst_153 [1] : vector<8x8xf32> to vector<8xf32>
      %316 = vector.shape_cast %315 : vector<8xf32> to vector<8x1xf32>
      %317 = vector.broadcast %316 : vector<8x1xf32> to vector<8x8xf32>
      %318 = arith.divf %314, %317 : vector<8x8xf32>
      %cst_154 = arith.constant dense<0.000000e+00> : vector<8x16xf32>
      %319 = tpu.matmul %318, %305, %cst_154 {dimension_numbers = #tpu.dot_dimension_numbers<[1], [0], [0], [1], [0, 0, 1, 1], [], []>} : vector<8x8xf32>, vector<8x16xf32>, vector<8x16xf32> -> vector<8x16xf32>
      %c208 = arith.constant 208 : index
      %c0_155 = arith.constant 0 : index
      %320 = vector.load %arg5[%c208, %c0_155] : memref<1144x32xf32, #tpu.memory_space<vmem>>, vector<16x32xf32>
      %cst_156 = arith.constant dense<0.000000e+00> : vector<8x32xf32>
      %321 = tpu.matmul %319, %320, %cst_156 {dimension_numbers = #tpu.dot_dimension_numbers<[1], [0], [0], [1], [0, 0, 1, 1], [], []>} : vector<8x16xf32>, vector<16x32xf32>, vector<8x32xf32> -> vector<8x32xf32>
      %c360 = arith.constant 360 : index
      %c0_157 = arith.constant 0 : index
      %322 = vector.load %arg4[%c360, %c0_157] : memref<960x16xf32, #tpu.memory_space<vmem>>, vector<32x16xf32>
      %cst_158 = arith.constant dense<0.000000e+00> : vector<8x16xf32>
      %323 = tpu.matmul %290, %322, %cst_158 {dimension_numbers = #tpu.dot_dimension_numbers<[1], [0], [0], [1], [0, 0, 1, 1], [], []>} : vector<8x32xf32>, vector<32x16xf32>, vector<8x16xf32> -> vector<8x16xf32>
      %c456 = arith.constant 456 : index
      %c0_159 = arith.constant 0 : index
      %324 = vector.load %arg4[%c456, %c0_159] : memref<960x16xf32, #tpu.memory_space<vmem>>, vector<1x16xf32>
      %325 = vector.broadcast %324 : vector<1x16xf32> to vector<8x16xf32>
      %326 = arith.addf %323, %325 : vector<8x16xf32>
      %c392 = arith.constant 392 : index
      %c0_160 = arith.constant 0 : index
      %327 = vector.load %arg4[%c392, %c0_160] : memref<960x16xf32, #tpu.memory_space<vmem>>, vector<32x16xf32>
      %cst_161 = arith.constant dense<0.000000e+00> : vector<8x16xf32>
      %328 = tpu.matmul %290, %327, %cst_161 {dimension_numbers = #tpu.dot_dimension_numbers<[1], [0], [0], [1], [0, 0, 1, 1], [], []>} : vector<8x32xf32>, vector<32x16xf32>, vector<8x16xf32> -> vector<8x16xf32>
      %c464 = arith.constant 464 : index
      %c0_162 = arith.constant 0 : index
      %329 = vector.load %arg4[%c464, %c0_162] : memref<960x16xf32, #tpu.memory_space<vmem>>, vector<1x16xf32>
      %330 = vector.broadcast %329 : vector<1x16xf32> to vector<8x16xf32>
      %331 = arith.addf %328, %330 : vector<8x16xf32>
      %c424 = arith.constant 424 : index
      %c0_163 = arith.constant 0 : index
      %332 = vector.load %arg4[%c424, %c0_163] : memref<960x16xf32, #tpu.memory_space<vmem>>, vector<32x16xf32>
      %cst_164 = arith.constant dense<0.000000e+00> : vector<8x16xf32>
      %333 = tpu.matmul %290, %332, %cst_164 {dimension_numbers = #tpu.dot_dimension_numbers<[1], [0], [0], [1], [0, 0, 1, 1], [], []>} : vector<8x32xf32>, vector<32x16xf32>, vector<8x16xf32> -> vector<8x16xf32>
      %c472 = arith.constant 472 : index
      %c0_165 = arith.constant 0 : index
      %334 = vector.load %arg4[%c472, %c0_165] : memref<960x16xf32, #tpu.memory_space<vmem>>, vector<1x16xf32>
      %335 = vector.broadcast %334 : vector<1x16xf32> to vector<8x16xf32>
      %336 = arith.addf %333, %335 : vector<8x16xf32>
      %cst_166 = arith.constant dense<0.000000e+00> : vector<8x8xf32>
      %337 = tpu.matmul %326, %331, %cst_166 {dimension_numbers = #tpu.dot_dimension_numbers<[1], [1], [0], [0], [0, 0, 1, 0], [], []>} : vector<8x16xf32>, vector<8x16xf32>, vector<8x8xf32> -> vector<8x8xf32>
      %cst_167 = arith.constant 2.500000e-01 : f32
      %338 = vector.broadcast %cst_167 : f32 to vector<8x8xf32>
      %339 = arith.mulf %337, %338 : vector<8x8xf32>
      %340 = arith.addf %339, %39 : vector<8x8xf32>
      %cst_168 = arith.constant dense<0xFF800000> : vector<8xf32>
      %341 = vector.multi_reduction <maximumf>, %340, %cst_168 [1] : vector<8x8xf32> to vector<8xf32>
      %342 = vector.shape_cast %341 : vector<8xf32> to vector<8x1xf32>
      %343 = vector.broadcast %342 : vector<8x1xf32> to vector<8x8xf32>
      %344 = arith.subf %340, %343 : vector<8x8xf32>
      %345 = math.exp %344 : vector<8x8xf32>
      %cst_169 = arith.constant dense<0.000000e+00> : vector<8xf32>
      %346 = vector.multi_reduction <add>, %345, %cst_169 [1] : vector<8x8xf32> to vector<8xf32>
      %347 = vector.shape_cast %346 : vector<8xf32> to vector<8x1xf32>
      %348 = vector.broadcast %347 : vector<8x1xf32> to vector<8x8xf32>
      %349 = arith.divf %345, %348 : vector<8x8xf32>
      %cst_170 = arith.constant dense<0.000000e+00> : vector<8x16xf32>
      %350 = tpu.matmul %349, %336, %cst_170 {dimension_numbers = #tpu.dot_dimension_numbers<[1], [0], [0], [1], [0, 0, 1, 1], [], []>} : vector<8x8xf32>, vector<8x16xf32>, vector<8x16xf32> -> vector<8x16xf32>
      %c224_171 = arith.constant 224 : index
      %c0_172 = arith.constant 0 : index
      %351 = vector.load %arg5[%c224_171, %c0_172] : memref<1144x32xf32, #tpu.memory_space<vmem>>, vector<16x32xf32>
      %cst_173 = arith.constant dense<0.000000e+00> : vector<8x32xf32>
      %352 = tpu.matmul %350, %351, %cst_173 {dimension_numbers = #tpu.dot_dimension_numbers<[1], [0], [0], [1], [0, 0, 1, 1], [], []>} : vector<8x16xf32>, vector<16x32xf32>, vector<8x32xf32> -> vector<8x32xf32>
      %353 = arith.addf %321, %352 : vector<8x32xf32>
      %354 = vector.extract_strided_slice %289 {offsets = [8, 0], sizes = [8, 32], strides = [1, 1]} : vector<16x32xf32> to vector<8x32xf32>
      %c240_174 = arith.constant 240 : index
      %c0_175 = arith.constant 0 : index
      %355 = vector.load %arg4[%c240_174, %c0_175] : memref<960x16xf32, #tpu.memory_space<vmem>>, vector<32x16xf32>
      %cst_176 = arith.constant dense<0.000000e+00> : vector<8x16xf32>
      %356 = tpu.matmul %354, %355, %cst_176 {dimension_numbers = #tpu.dot_dimension_numbers<[1], [0], [0], [1], [0, 0, 1, 1], [], []>} : vector<8x32xf32>, vector<32x16xf32>, vector<8x16xf32> -> vector<8x16xf32>
      %c336_177 = arith.constant 336 : index
      %c0_178 = arith.constant 0 : index
      %357 = vector.load %arg4[%c336_177, %c0_178] : memref<960x16xf32, #tpu.memory_space<vmem>>, vector<1x16xf32>
      %358 = vector.broadcast %357 : vector<1x16xf32> to vector<8x16xf32>
      %359 = arith.addf %356, %358 : vector<8x16xf32>
      %c272_179 = arith.constant 272 : index
      %c0_180 = arith.constant 0 : index
      %360 = vector.load %arg4[%c272_179, %c0_180] : memref<960x16xf32, #tpu.memory_space<vmem>>, vector<32x16xf32>
      %cst_181 = arith.constant dense<0.000000e+00> : vector<8x16xf32>
      %361 = tpu.matmul %354, %360, %cst_181 {dimension_numbers = #tpu.dot_dimension_numbers<[1], [0], [0], [1], [0, 0, 1, 1], [], []>} : vector<8x32xf32>, vector<32x16xf32>, vector<8x16xf32> -> vector<8x16xf32>
      %c344_182 = arith.constant 344 : index
      %c0_183 = arith.constant 0 : index
      %362 = vector.load %arg4[%c344_182, %c0_183] : memref<960x16xf32, #tpu.memory_space<vmem>>, vector<1x16xf32>
      %363 = vector.broadcast %362 : vector<1x16xf32> to vector<8x16xf32>
      %364 = arith.addf %361, %363 : vector<8x16xf32>
      %c304_184 = arith.constant 304 : index
      %c0_185 = arith.constant 0 : index
      %365 = vector.load %arg4[%c304_184, %c0_185] : memref<960x16xf32, #tpu.memory_space<vmem>>, vector<32x16xf32>
      %cst_186 = arith.constant dense<0.000000e+00> : vector<8x16xf32>
      %366 = tpu.matmul %354, %365, %cst_186 {dimension_numbers = #tpu.dot_dimension_numbers<[1], [0], [0], [1], [0, 0, 1, 1], [], []>} : vector<8x32xf32>, vector<32x16xf32>, vector<8x16xf32> -> vector<8x16xf32>
      %c352_187 = arith.constant 352 : index
      %c0_188 = arith.constant 0 : index
      %367 = vector.load %arg4[%c352_187, %c0_188] : memref<960x16xf32, #tpu.memory_space<vmem>>, vector<1x16xf32>
      %368 = vector.broadcast %367 : vector<1x16xf32> to vector<8x16xf32>
      %369 = arith.addf %366, %368 : vector<8x16xf32>
      %cst_189 = arith.constant dense<0.000000e+00> : vector<8x8xf32>
      %370 = tpu.matmul %359, %364, %cst_189 {dimension_numbers = #tpu.dot_dimension_numbers<[1], [1], [0], [0], [0, 0, 1, 0], [], []>} : vector<8x16xf32>, vector<8x16xf32>, vector<8x8xf32> -> vector<8x8xf32>
      %cst_190 = arith.constant 2.500000e-01 : f32
      %371 = vector.broadcast %cst_190 : f32 to vector<8x8xf32>
      %372 = arith.mulf %370, %371 : vector<8x8xf32>
      %373 = arith.addf %372, %39 : vector<8x8xf32>
      %cst_191 = arith.constant dense<0xFF800000> : vector<8xf32>
      %374 = vector.multi_reduction <maximumf>, %373, %cst_191 [1] : vector<8x8xf32> to vector<8xf32>
      %375 = vector.shape_cast %374 : vector<8xf32> to vector<8x1xf32>
      %376 = vector.broadcast %375 : vector<8x1xf32> to vector<8x8xf32>
      %377 = arith.subf %373, %376 : vector<8x8xf32>
      %378 = math.exp %377 : vector<8x8xf32>
      %cst_192 = arith.constant dense<0.000000e+00> : vector<8xf32>
      %379 = vector.multi_reduction <add>, %378, %cst_192 [1] : vector<8x8xf32> to vector<8xf32>
      %380 = vector.shape_cast %379 : vector<8xf32> to vector<8x1xf32>
      %381 = vector.broadcast %380 : vector<8x1xf32> to vector<8x8xf32>
      %382 = arith.divf %378, %381 : vector<8x8xf32>
      %cst_193 = arith.constant dense<0.000000e+00> : vector<8x16xf32>
      %383 = tpu.matmul %382, %369, %cst_193 {dimension_numbers = #tpu.dot_dimension_numbers<[1], [0], [0], [1], [0, 0, 1, 1], [], []>} : vector<8x8xf32>, vector<8x16xf32>, vector<8x16xf32> -> vector<8x16xf32>
      %c208_194 = arith.constant 208 : index
      %c0_195 = arith.constant 0 : index
      %384 = vector.load %arg5[%c208_194, %c0_195] : memref<1144x32xf32, #tpu.memory_space<vmem>>, vector<16x32xf32>
      %cst_196 = arith.constant dense<0.000000e+00> : vector<8x32xf32>
      %385 = tpu.matmul %383, %384, %cst_196 {dimension_numbers = #tpu.dot_dimension_numbers<[1], [0], [0], [1], [0, 0, 1, 1], [], []>} : vector<8x16xf32>, vector<16x32xf32>, vector<8x32xf32> -> vector<8x32xf32>
      %c360_197 = arith.constant 360 : index
      %c0_198 = arith.constant 0 : index
      %386 = vector.load %arg4[%c360_197, %c0_198] : memref<960x16xf32, #tpu.memory_space<vmem>>, vector<32x16xf32>
      %cst_199 = arith.constant dense<0.000000e+00> : vector<8x16xf32>
      %387 = tpu.matmul %354, %386, %cst_199 {dimension_numbers = #tpu.dot_dimension_numbers<[1], [0], [0], [1], [0, 0, 1, 1], [], []>} : vector<8x32xf32>, vector<32x16xf32>, vector<8x16xf32> -> vector<8x16xf32>
      %c456_200 = arith.constant 456 : index
      %c0_201 = arith.constant 0 : index
      %388 = vector.load %arg4[%c456_200, %c0_201] : memref<960x16xf32, #tpu.memory_space<vmem>>, vector<1x16xf32>
      %389 = vector.broadcast %388 : vector<1x16xf32> to vector<8x16xf32>
      %390 = arith.addf %387, %389 : vector<8x16xf32>
      %c392_202 = arith.constant 392 : index
      %c0_203 = arith.constant 0 : index
      %391 = vector.load %arg4[%c392_202, %c0_203] : memref<960x16xf32, #tpu.memory_space<vmem>>, vector<32x16xf32>
      %cst_204 = arith.constant dense<0.000000e+00> : vector<8x16xf32>
      %392 = tpu.matmul %354, %391, %cst_204 {dimension_numbers = #tpu.dot_dimension_numbers<[1], [0], [0], [1], [0, 0, 1, 1], [], []>} : vector<8x32xf32>, vector<32x16xf32>, vector<8x16xf32> -> vector<8x16xf32>
      %c464_205 = arith.constant 464 : index
      %c0_206 = arith.constant 0 : index
      %393 = vector.load %arg4[%c464_205, %c0_206] : memref<960x16xf32, #tpu.memory_space<vmem>>, vector<1x16xf32>
      %394 = vector.broadcast %393 : vector<1x16xf32> to vector<8x16xf32>
      %395 = arith.addf %392, %394 : vector<8x16xf32>
      %c424_207 = arith.constant 424 : index
      %c0_208 = arith.constant 0 : index
      %396 = vector.load %arg4[%c424_207, %c0_208] : memref<960x16xf32, #tpu.memory_space<vmem>>, vector<32x16xf32>
      %cst_209 = arith.constant dense<0.000000e+00> : vector<8x16xf32>
      %397 = tpu.matmul %354, %396, %cst_209 {dimension_numbers = #tpu.dot_dimension_numbers<[1], [0], [0], [1], [0, 0, 1, 1], [], []>} : vector<8x32xf32>, vector<32x16xf32>, vector<8x16xf32> -> vector<8x16xf32>
      %c472_210 = arith.constant 472 : index
      %c0_211 = arith.constant 0 : index
      %398 = vector.load %arg4[%c472_210, %c0_211] : memref<960x16xf32, #tpu.memory_space<vmem>>, vector<1x16xf32>
      %399 = vector.broadcast %398 : vector<1x16xf32> to vector<8x16xf32>
      %400 = arith.addf %397, %399 : vector<8x16xf32>
      %cst_212 = arith.constant dense<0.000000e+00> : vector<8x8xf32>
      %401 = tpu.matmul %390, %395, %cst_212 {dimension_numbers = #tpu.dot_dimension_numbers<[1], [1], [0], [0], [0, 0, 1, 0], [], []>} : vector<8x16xf32>, vector<8x16xf32>, vector<8x8xf32> -> vector<8x8xf32>
      %cst_213 = arith.constant 2.500000e-01 : f32
      %402 = vector.broadcast %cst_213 : f32 to vector<8x8xf32>
      %403 = arith.mulf %401, %402 : vector<8x8xf32>
      %404 = arith.addf %403, %39 : vector<8x8xf32>
      %cst_214 = arith.constant dense<0xFF800000> : vector<8xf32>
      %405 = vector.multi_reduction <maximumf>, %404, %cst_214 [1] : vector<8x8xf32> to vector<8xf32>
      %406 = vector.shape_cast %405 : vector<8xf32> to vector<8x1xf32>
      %407 = vector.broadcast %406 : vector<8x1xf32> to vector<8x8xf32>
      %408 = arith.subf %404, %407 : vector<8x8xf32>
      %409 = math.exp %408 : vector<8x8xf32>
      %cst_215 = arith.constant dense<0.000000e+00> : vector<8xf32>
      %410 = vector.multi_reduction <add>, %409, %cst_215 [1] : vector<8x8xf32> to vector<8xf32>
      %411 = vector.shape_cast %410 : vector<8xf32> to vector<8x1xf32>
      %412 = vector.broadcast %411 : vector<8x1xf32> to vector<8x8xf32>
      %413 = arith.divf %409, %412 : vector<8x8xf32>
      %cst_216 = arith.constant dense<0.000000e+00> : vector<8x16xf32>
      %414 = tpu.matmul %413, %400, %cst_216 {dimension_numbers = #tpu.dot_dimension_numbers<[1], [0], [0], [1], [0, 0, 1, 1], [], []>} : vector<8x8xf32>, vector<8x16xf32>, vector<8x16xf32> -> vector<8x16xf32>
      %c224_217 = arith.constant 224 : index
      %c0_218 = arith.constant 0 : index
      %415 = vector.load %arg5[%c224_217, %c0_218] : memref<1144x32xf32, #tpu.memory_space<vmem>>, vector<16x32xf32>
      %cst_219 = arith.constant dense<0.000000e+00> : vector<8x32xf32>
      %416 = tpu.matmul %414, %415, %cst_219 {dimension_numbers = #tpu.dot_dimension_numbers<[1], [0], [0], [1], [0, 0, 1, 1], [], []>} : vector<8x16xf32>, vector<16x32xf32>, vector<8x32xf32> -> vector<8x32xf32>
      %417 = arith.addf %385, %416 : vector<8x32xf32>
      %418 = tpu.concatenate %353, %417 in 0 : vector<8x32xf32>, vector<8x32xf32> -> vector<16x32xf32>
      %419 = arith.addf %267, %418 : vector<16x32xf32>
      %c240_220 = arith.constant 240 : index
      %c0_221 = arith.constant 0 : index
      %420 = vector.load %arg5[%c240_220, %c0_221] : memref<1144x32xf32, #tpu.memory_space<vmem>>, vector<1x32xf32>
      %421 = vector.broadcast %420 : vector<1x32xf32> to vector<16x32xf32>
      %422 = arith.addf %419, %421 : vector<16x32xf32>
      %c264 = arith.constant 264 : index
      %c0_222 = arith.constant 0 : index
      %423 = vector.load %arg5[%c264, %c0_222] : memref<1144x32xf32, #tpu.memory_space<vmem>>, vector<1x32xf32>
      %c272_223 = arith.constant 272 : index
      %c0_224 = arith.constant 0 : index
      %424 = vector.load %arg5[%c272_223, %c0_224] : memref<1144x32xf32, #tpu.memory_space<vmem>>, vector<1x32xf32>
      %cst_225 = arith.constant dense<0.000000e+00> : vector<16xf32>
      %425 = vector.multi_reduction <add>, %422, %cst_225 [1] : vector<16x32xf32> to vector<16xf32>
      %426 = vector.shape_cast %425 : vector<16xf32> to vector<16x1xf32>
      %cst_226 = arith.constant 3.200000e+01 : f32
      %427 = vector.broadcast %cst_226 : f32 to vector<16x1xf32>
      %428 = arith.divf %426, %427 : vector<16x1xf32>
      %429 = vector.broadcast %428 : vector<16x1xf32> to vector<16x32xf32>
      %430 = arith.subf %422, %429 : vector<16x32xf32>
      %431 = arith.mulf %430, %430 : vector<16x32xf32>
      %cst_227 = arith.constant dense<0.000000e+00> : vector<16xf32>
      %432 = vector.multi_reduction <add>, %431, %cst_227 [1] : vector<16x32xf32> to vector<16xf32>
      %433 = vector.shape_cast %432 : vector<16xf32> to vector<16x1xf32>
      %cst_228 = arith.constant 3.200000e+01 : f32
      %434 = vector.broadcast %cst_228 : f32 to vector<16x1xf32>
      %435 = arith.divf %433, %434 : vector<16x1xf32>
      %cst_229 = arith.constant 9.99999974E-6 : f32
      %436 = vector.broadcast %cst_229 : f32 to vector<16x1xf32>
      %437 = arith.addf %435, %436 : vector<16x1xf32>
      %438 = math.rsqrt %437 : vector<16x1xf32>
      %439 = vector.broadcast %438 : vector<16x1xf32> to vector<16x32xf32>
      %440 = arith.mulf %430, %439 : vector<16x32xf32>
      %441 = vector.broadcast %423 : vector<1x32xf32> to vector<16x32xf32>
      %442 = arith.mulf %440, %441 : vector<16x32xf32>
      %443 = vector.broadcast %424 : vector<1x32xf32> to vector<16x32xf32>
      %444 = arith.addf %442, %443 : vector<16x32xf32>
      %c40_230 = arith.constant 40 : index
      %c0_231 = arith.constant 0 : index
      %445 = vector.load %arg6[%c40_230, %c0_231] : memref<160x128xf32, #tpu.memory_space<vmem>>, vector<32x128xf32>
      %cst_232 = arith.constant dense<0.000000e+00> : vector<16x128xf32>
      %446 = tpu.matmul %444, %445, %cst_232 {dimension_numbers = #tpu.dot_dimension_numbers<[1], [0], [0], [1], [0, 0, 1, 1], [], []>} : vector<16x32xf32>, vector<32x128xf32>, vector<16x128xf32> -> vector<16x128xf32>
      %c72_233 = arith.constant 72 : index
      %c0_234 = arith.constant 0 : index
      %447 = vector.load %arg6[%c72_233, %c0_234] : memref<160x128xf32, #tpu.memory_space<vmem>>, vector<1x128xf32>
      %448 = vector.broadcast %447 : vector<1x128xf32> to vector<16x128xf32>
      %449 = arith.addf %446, %448 : vector<16x128xf32>
      %cst_235 = arith.constant 5.000000e-01 : f32
      %450 = vector.broadcast %cst_235 : f32 to vector<16x128xf32>
      %451 = arith.mulf %450, %449 : vector<16x128xf32>
      %cst_236 = arith.constant 0.707106769 : f32
      %452 = vector.broadcast %cst_236 : f32 to vector<16x128xf32>
      %453 = arith.mulf %449, %452 : vector<16x128xf32>
      %454 = math.absf %453 : vector<16x128xf32>
      %cst_237 = arith.constant 0.327591091 : f32
      %455 = vector.broadcast %cst_237 : f32 to vector<16x128xf32>
      %456 = arith.mulf %455, %454 : vector<16x128xf32>
      %cst_238 = arith.constant 1.000000e+00 : f32
      %457 = vector.broadcast %cst_238 : f32 to vector<16x128xf32>
      %458 = arith.addf %457, %456 : vector<16x128xf32>
      %cst_239 = arith.constant 1.000000e+00 : f32
      %459 = vector.broadcast %cst_239 : f32 to vector<16x128xf32>
      %460 = arith.divf %459, %458 : vector<16x128xf32>
      %cst_240 = arith.constant 1.06140542 : f32
      %461 = vector.broadcast %cst_240 : f32 to vector<16x128xf32>
      %462 = arith.mulf %461, %460 : vector<16x128xf32>
      %cst_241 = arith.constant -1.45315206 : f32
      %463 = vector.broadcast %cst_241 : f32 to vector<16x128xf32>
      %464 = arith.addf %462, %463 : vector<16x128xf32>
      %465 = arith.mulf %464, %460 : vector<16x128xf32>
      %cst_242 = arith.constant 1.42141378 : f32
      %466 = vector.broadcast %cst_242 : f32 to vector<16x128xf32>
      %467 = arith.addf %465, %466 : vector<16x128xf32>
      %468 = arith.mulf %467, %460 : vector<16x128xf32>
      %cst_243 = arith.constant -0.284496725 : f32
      %469 = vector.broadcast %cst_243 : f32 to vector<16x128xf32>
      %470 = arith.addf %468, %469 : vector<16x128xf32>
      %471 = arith.mulf %470, %460 : vector<16x128xf32>
      %cst_244 = arith.constant 0.254829586 : f32
      %472 = vector.broadcast %cst_244 : f32 to vector<16x128xf32>
      %473 = arith.addf %471, %472 : vector<16x128xf32>
      %474 = arith.mulf %473, %460 : vector<16x128xf32>
      %cst_245 = arith.constant 0.000000e+00 : f32
      %475 = vector.broadcast %cst_245 : f32 to vector<16x128xf32>
      %476 = arith.subf %475, %454 : vector<16x128xf32>
      %477 = arith.mulf %476, %454 : vector<16x128xf32>
      %478 = math.exp %477 : vector<16x128xf32>
      %479 = arith.mulf %474, %478 : vector<16x128xf32>
      %cst_246 = arith.constant 1.000000e+00 : f32
      %480 = vector.broadcast %cst_246 : f32 to vector<16x128xf32>
      %481 = arith.subf %480, %479 : vector<16x128xf32>
      %cst_247 = arith.constant 0.000000e+00 : f32
      %482 = vector.broadcast %cst_247 : f32 to vector<16x128xf32>
      %483 = arith.cmpf oge, %453, %482 : vector<16x128xf32>
      %cst_248 = arith.constant 0.000000e+00 : f32
      %484 = vector.broadcast %cst_248 : f32 to vector<16x128xf32>
      %485 = arith.subf %484, %481 : vector<16x128xf32>
      %486 = arith.select %483, %481, %485 : vector<16x128xi1>, vector<16x128xf32>
      %cst_249 = arith.constant 1.000000e+00 : f32
      %487 = vector.broadcast %cst_249 : f32 to vector<16x128xf32>
      %488 = arith.addf %487, %486 : vector<16x128xf32>
      %489 = arith.mulf %451, %488 : vector<16x128xf32>
      %c280 = arith.constant 280 : index
      %c0_250 = arith.constant 0 : index
      %490 = vector.load %arg5[%c280, %c0_250] : memref<1144x32xf32, #tpu.memory_space<vmem>>, vector<128x32xf32>
      %cst_251 = arith.constant dense<0.000000e+00> : vector<16x32xf32>
      %491 = tpu.matmul %489, %490, %cst_251 {dimension_numbers = #tpu.dot_dimension_numbers<[1], [0], [0], [1], [0, 0, 1, 1], [], []>} : vector<16x128xf32>, vector<128x32xf32>, vector<16x32xf32> -> vector<16x32xf32>
      %492 = arith.addf %422, %491 : vector<16x32xf32>
      %c408 = arith.constant 408 : index
      %c0_252 = arith.constant 0 : index
      %493 = vector.load %arg5[%c408, %c0_252] : memref<1144x32xf32, #tpu.memory_space<vmem>>, vector<1x32xf32>
      %494 = vector.broadcast %493 : vector<1x32xf32> to vector<16x32xf32>
      %495 = arith.addf %492, %494 : vector<16x32xf32>
      %496 = tpu.iota {dimensions = array<i32: 0>} : vector<2x16xi32>
      %497 = tpu.iota {dimensions = array<i32: 1>} : vector<2x16xi32>
      %c8_i32 = arith.constant 8 : i32
      %498 = vector.broadcast %c8_i32 : i32 to vector<2x16xi32>
      %499 = arith.muli %496, %498 : vector<2x16xi32>
      %500 = arith.cmpi eq, %497, %499 : vector<2x16xi32>
      %cst_253 = arith.constant 1.000000e+00 : f32
      %cst_254 = arith.constant 0.000000e+00 : f32
      %501 = vector.broadcast %cst_253 : f32 to vector<2x16xf32>
      %502 = vector.broadcast %cst_254 : f32 to vector<2x16xf32>
      %503 = arith.select %500, %501, %502 : vector<2x16xi1>, vector<2x16xf32>
      %cst_255 = arith.constant dense<0.000000e+00> : vector<2x32xf32>
      %504 = tpu.matmul %503, %495, %cst_255 {dimension_numbers = #tpu.dot_dimension_numbers<[1], [0], [0], [1], [0, 0, 1, 1], [], []>} : vector<2x16xf32>, vector<16x32xf32>, vector<2x32xf32> -> vector<2x32xf32>
      %c1048 = arith.constant 1048 : index
      %c0_256 = arith.constant 0 : index
      %505 = vector.load %arg5[%c1048, %c0_256] : memref<1144x32xf32, #tpu.memory_space<vmem>>, vector<1x32xf32>
      %c1056 = arith.constant 1056 : index
      %c0_257 = arith.constant 0 : index
      %506 = vector.load %arg5[%c1056, %c0_257] : memref<1144x32xf32, #tpu.memory_space<vmem>>, vector<1x32xf32>
      %cst_258 = arith.constant dense<0.000000e+00> : vector<2xf32>
      %507 = vector.multi_reduction <add>, %504, %cst_258 [1] : vector<2x32xf32> to vector<2xf32>
      %508 = vector.shape_cast %507 : vector<2xf32> to vector<2x1xf32>
      %cst_259 = arith.constant 3.200000e+01 : f32
      %509 = vector.broadcast %cst_259 : f32 to vector<2x1xf32>
      %510 = arith.divf %508, %509 : vector<2x1xf32>
      %511 = vector.broadcast %510 : vector<2x1xf32> to vector<2x32xf32>
      %512 = arith.subf %504, %511 : vector<2x32xf32>
      %513 = arith.mulf %512, %512 : vector<2x32xf32>
      %cst_260 = arith.constant dense<0.000000e+00> : vector<2xf32>
      %514 = vector.multi_reduction <add>, %513, %cst_260 [1] : vector<2x32xf32> to vector<2xf32>
      %515 = vector.shape_cast %514 : vector<2xf32> to vector<2x1xf32>
      %cst_261 = arith.constant 3.200000e+01 : f32
      %516 = vector.broadcast %cst_261 : f32 to vector<2x1xf32>
      %517 = arith.divf %515, %516 : vector<2x1xf32>
      %cst_262 = arith.constant 9.99999974E-6 : f32
      %518 = vector.broadcast %cst_262 : f32 to vector<2x1xf32>
      %519 = arith.addf %517, %518 : vector<2x1xf32>
      %520 = math.rsqrt %519 : vector<2x1xf32>
      %521 = vector.broadcast %520 : vector<2x1xf32> to vector<2x32xf32>
      %522 = arith.mulf %512, %521 : vector<2x32xf32>
      %523 = vector.broadcast %505 : vector<1x32xf32> to vector<2x32xf32>
      %524 = arith.mulf %522, %523 : vector<2x32xf32>
      %525 = vector.broadcast %506 : vector<1x32xf32> to vector<2x32xf32>
      %526 = arith.addf %524, %525 : vector<2x32xf32>
      %c1064 = arith.constant 1064 : index
      %c0_263 = arith.constant 0 : index
      %527 = vector.load %arg5[%c1064, %c0_263] : memref<1144x32xf32, #tpu.memory_space<vmem>>, vector<32x32xf32>
      %cst_264 = arith.constant dense<0.000000e+00> : vector<2x32xf32>
      %528 = tpu.matmul %526, %527, %cst_264 {dimension_numbers = #tpu.dot_dimension_numbers<[1], [0], [0], [1], [0, 0, 1, 1], [], []>} : vector<2x32xf32>, vector<32x32xf32>, vector<2x32xf32> -> vector<2x32xf32>
      %529 = arith.mulf %528, %528 : vector<2x32xf32>
      %cst_265 = arith.constant dense<0.000000e+00> : vector<2xf32>
      %530 = vector.multi_reduction <add>, %529, %cst_265 [1] : vector<2x32xf32> to vector<2xf32>
      %531 = vector.shape_cast %530 : vector<2xf32> to vector<2x1xf32>
      %532 = math.sqrt %531 : vector<2x1xf32>
      %cst_266 = arith.constant 9.99999996E-13 : f32
      %533 = vector.broadcast %cst_266 : f32 to vector<2x1xf32>
      %534 = arith.maximumf %532, %533 : vector<2x1xf32>
      %535 = vector.broadcast %534 : vector<2x1xf32> to vector<2x32xf32>
      %536 = arith.divf %528, %535 : vector<2x32xf32>
      %cst_267 = arith.constant 0.000000e+00 : f32
      %537 = vector.broadcast %cst_267 : f32 to vector<8x128xf32>
      %c0_268 = arith.constant 0 : index
      %c0_269 = arith.constant 0 : index
      %538 = vector.load %arg7[%c0_268, %c0_269] : memref<8x128xf32, #tpu.memory_space<vmem>>, vector<8x128xf32>
      tpu.vector_store %arg7[%c0_268, %c0_269], %537 {strides = array<i32>} : memref<8x128xf32, #tpu.memory_space<vmem>>, vector<8x128xf32>,
      %c0_270 = arith.constant 0 : index
      %c0_271 = arith.constant 0 : index
      %539 = vector.load %arg7[%c0_270, %c0_271] : memref<8x128xf32, #tpu.memory_space<vmem>>, vector<2x32xf32>
      tpu.vector_store %arg7[%c0_270, %c0_271], %536 {strides = array<i32>} : memref<8x128xf32, #tpu.memory_space<vmem>>, vector<2x32xf32>,
    } else {
    }
    %c1_i32 = arith.constant 1 : i32
    %3 = arith.cmpi eq, %arg0, %c1_i32 : i32
    %4 = arith.extui %3 : i1 to i32
    %c0_i32_1 = arith.constant 0 : i32
    %5 = arith.cmpi ne, %4, %c0_i32_1 : i32
    scf.if %5 {
      %6 = tpu.iota {dimensions = array<i32: 0>} : vector<8x8xi32>
      %7 = tpu.iota {dimensions = array<i32: 1>} : vector<8x8xi32>
      %8 = arith.cmpi sgt, %7, %6 : vector<8x8xi32>
      %cst = arith.constant -1.000000e+09 : f32
      %cst_2 = arith.constant 0.000000e+00 : f32
      %9 = vector.broadcast %cst : f32 to vector<8x8xf32>
      %10 = vector.broadcast %cst_2 : f32 to vector<8x8xf32>
      %11 = arith.select %8, %9, %10 : vector<8x8xi1>, vector<8x8xf32>
      %c0 = arith.constant 0 : index
      %c0_3 = arith.constant 0 : index
      %12 = vector.load %arg2[%c0, %c0_3] : memref<16x32xf32, #tpu.memory_space<vmem>>, vector<16x32xf32>
      %c456 = arith.constant 456 : index
      %c0_4 = arith.constant 0 : index
      %13 = vector.load %arg5[%c456, %c0_4] : memref<1144x32xf32, #tpu.memory_space<vmem>>, vector<1x32xf32>
      %c464 = arith.constant 464 : index
      %c0_5 = arith.constant 0 : index
      %14 = vector.load %arg5[%c464, %c0_5] : memref<1144x32xf32, #tpu.memory_space<vmem>>, vector<1x32xf32>
      %cst_6 = arith.constant dense<0.000000e+00> : vector<16xf32>
      %15 = vector.multi_reduction <add>, %12, %cst_6 [1] : vector<16x32xf32> to vector<16xf32>
      %16 = vector.shape_cast %15 : vector<16xf32> to vector<16x1xf32>
      %cst_7 = arith.constant 3.200000e+01 : f32
      %17 = vector.broadcast %cst_7 : f32 to vector<16x1xf32>
      %18 = arith.divf %16, %17 : vector<16x1xf32>
      %19 = vector.broadcast %18 : vector<16x1xf32> to vector<16x32xf32>
      %20 = arith.subf %12, %19 : vector<16x32xf32>
      %21 = arith.mulf %20, %20 : vector<16x32xf32>
      %cst_8 = arith.constant dense<0.000000e+00> : vector<16xf32>
      %22 = vector.multi_reduction <add>, %21, %cst_8 [1] : vector<16x32xf32> to vector<16xf32>
      %23 = vector.shape_cast %22 : vector<16xf32> to vector<16x1xf32>
      %cst_9 = arith.constant 3.200000e+01 : f32
      %24 = vector.broadcast %cst_9 : f32 to vector<16x1xf32>
      %25 = arith.divf %23, %24 : vector<16x1xf32>
      %cst_10 = arith.constant 9.99999974E-6 : f32
      %26 = vector.broadcast %cst_10 : f32 to vector<16x1xf32>
      %27 = arith.addf %25, %26 : vector<16x1xf32>
      %28 = math.rsqrt %27 : vector<16x1xf32>
      %29 = vector.broadcast %28 : vector<16x1xf32> to vector<16x32xf32>
      %30 = arith.mulf %20, %29 : vector<16x32xf32>
      %31 = vector.broadcast %13 : vector<1x32xf32> to vector<16x32xf32>
      %32 = arith.mulf %30, %31 : vector<16x32xf32>
      %33 = vector.broadcast %14 : vector<1x32xf32> to vector<16x32xf32>
      %34 = arith.addf %32, %33 : vector<16x32xf32>
      %35 = vector.extract_strided_slice %34 {offsets = [0, 0], sizes = [8, 32], strides = [1, 1]} : vector<16x32xf32> to vector<8x32xf32>
      %c480 = arith.constant 480 : index
      %c0_11 = arith.constant 0 : index
      %36 = vector.load %arg4[%c480, %c0_11] : memref<960x16xf32, #tpu.memory_space<vmem>>, vector<32x16xf32>
      %cst_12 = arith.constant dense<0.000000e+00> : vector<8x16xf32>
      %37 = tpu.matmul %35, %36, %cst_12 {dimension_numbers = #tpu.dot_dimension_numbers<[1], [0], [0], [1], [0, 0, 1, 1], [], []>} : vector<8x32xf32>, vector<32x16xf32>, vector<8x16xf32> -> vector<8x16xf32>
      %c576 = arith.constant 576 : index
      %c0_13 = arith.constant 0 : index
      %38 = vector.load %arg4[%c576, %c0_13] : memref<960x16xf32, #tpu.memory_space<vmem>>, vector<1x16xf32>
      %39 = vector.broadcast %38 : vector<1x16xf32> to vector<8x16xf32>
      %40 = arith.addf %37, %39 : vector<8x16xf32>
      %c512 = arith.constant 512 : index
      %c0_14 = arith.constant 0 : index
      %41 = vector.load %arg4[%c512, %c0_14] : memref<960x16xf32, #tpu.memory_space<vmem>>, vector<32x16xf32>
      %cst_15 = arith.constant dense<0.000000e+00> : vector<8x16xf32>
      %42 = tpu.matmul %35, %41, %cst_15 {dimension_numbers = #tpu.dot_dimension_numbers<[1], [0], [0], [1], [0, 0, 1, 1], [], []>} : vector<8x32xf32>, vector<32x16xf32>, vector<8x16xf32> -> vector<8x16xf32>
      %c584 = arith.constant 584 : index
      %c0_16 = arith.constant 0 : index
      %43 = vector.load %arg4[%c584, %c0_16] : memref<960x16xf32, #tpu.memory_space<vmem>>, vector<1x16xf32>
      %44 = vector.broadcast %43 : vector<1x16xf32> to vector<8x16xf32>
      %45 = arith.addf %42, %44 : vector<8x16xf32>
      %c544 = arith.constant 544 : index
      %c0_17 = arith.constant 0 : index
      %46 = vector.load %arg4[%c544, %c0_17] : memref<960x16xf32, #tpu.memory_space<vmem>>, vector<32x16xf32>
      %cst_18 = arith.constant dense<0.000000e+00> : vector<8x16xf32>
      %47 = tpu.matmul %35, %46, %cst_18 {dimension_numbers = #tpu.dot_dimension_numbers<[1], [0], [0], [1], [0, 0, 1, 1], [], []>} : vector<8x32xf32>, vector<32x16xf32>, vector<8x16xf32> -> vector<8x16xf32>
      %c592 = arith.constant 592 : index
      %c0_19 = arith.constant 0 : index
      %48 = vector.load %arg4[%c592, %c0_19] : memref<960x16xf32, #tpu.memory_space<vmem>>, vector<1x16xf32>
      %49 = vector.broadcast %48 : vector<1x16xf32> to vector<8x16xf32>
      %50 = arith.addf %47, %49 : vector<8x16xf32>
      %cst_20 = arith.constant dense<0.000000e+00> : vector<8x8xf32>
      %51 = tpu.matmul %40, %45, %cst_20 {dimension_numbers = #tpu.dot_dimension_numbers<[1], [1], [0], [0], [0, 0, 1, 0], [], []>} : vector<8x16xf32>, vector<8x16xf32>, vector<8x8xf32> -> vector<8x8xf32>
      %cst_21 = arith.constant 2.500000e-01 : f32
      %52 = vector.broadcast %cst_21 : f32 to vector<8x8xf32>
      %53 = arith.mulf %51, %52 : vector<8x8xf32>
      %54 = arith.addf %53, %11 : vector<8x8xf32>
      %cst_22 = arith.constant dense<0xFF800000> : vector<8xf32>
      %55 = vector.multi_reduction <maximumf>, %54, %cst_22 [1] : vector<8x8xf32> to vector<8xf32>
      %56 = vector.shape_cast %55 : vector<8xf32> to vector<8x1xf32>
      %57 = vector.broadcast %56 : vector<8x1xf32> to vector<8x8xf32>
      %58 = arith.subf %54, %57 : vector<8x8xf32>
      %59 = math.exp %58 : vector<8x8xf32>
      %cst_23 = arith.constant dense<0.000000e+00> : vector<8xf32>
      %60 = vector.multi_reduction <add>, %59, %cst_23 [1] : vector<8x8xf32> to vector<8xf32>
      %61 = vector.shape_cast %60 : vector<8xf32> to vector<8x1xf32>
      %62 = vector.broadcast %61 : vector<8x1xf32> to vector<8x8xf32>
      %63 = arith.divf %59, %62 : vector<8x8xf32>
      %cst_24 = arith.constant dense<0.000000e+00> : vector<8x16xf32>
      %64 = tpu.matmul %63, %50, %cst_24 {dimension_numbers = #tpu.dot_dimension_numbers<[1], [0], [0], [1], [0, 0, 1, 1], [], []>} : vector<8x8xf32>, vector<8x16xf32>, vector<8x16xf32> -> vector<8x16xf32>
      %c416 = arith.constant 416 : index
      %c0_25 = arith.constant 0 : index
      %65 = vector.load %arg5[%c416, %c0_25] : memref<1144x32xf32, #tpu.memory_space<vmem>>, vector<16x32xf32>
      %cst_26 = arith.constant dense<0.000000e+00> : vector<8x32xf32>
      %66 = tpu.matmul %64, %65, %cst_26 {dimension_numbers = #tpu.dot_dimension_numbers<[1], [0], [0], [1], [0, 0, 1, 1], [], []>} : vector<8x16xf32>, vector<16x32xf32>, vector<8x32xf32> -> vector<8x32xf32>
      %c600 = arith.constant 600 : index
      %c0_27 = arith.constant 0 : index
      %67 = vector.load %arg4[%c600, %c0_27] : memref<960x16xf32, #tpu.memory_space<vmem>>, vector<32x16xf32>
      %cst_28 = arith.constant dense<0.000000e+00> : vector<8x16xf32>
      %68 = tpu.matmul %35, %67, %cst_28 {dimension_numbers = #tpu.dot_dimension_numbers<[1], [0], [0], [1], [0, 0, 1, 1], [], []>} : vector<8x32xf32>, vector<32x16xf32>, vector<8x16xf32> -> vector<8x16xf32>
      %c696 = arith.constant 696 : index
      %c0_29 = arith.constant 0 : index
      %69 = vector.load %arg4[%c696, %c0_29] : memref<960x16xf32, #tpu.memory_space<vmem>>, vector<1x16xf32>
      %70 = vector.broadcast %69 : vector<1x16xf32> to vector<8x16xf32>
      %71 = arith.addf %68, %70 : vector<8x16xf32>
      %c632 = arith.constant 632 : index
      %c0_30 = arith.constant 0 : index
      %72 = vector.load %arg4[%c632, %c0_30] : memref<960x16xf32, #tpu.memory_space<vmem>>, vector<32x16xf32>
      %cst_31 = arith.constant dense<0.000000e+00> : vector<8x16xf32>
      %73 = tpu.matmul %35, %72, %cst_31 {dimension_numbers = #tpu.dot_dimension_numbers<[1], [0], [0], [1], [0, 0, 1, 1], [], []>} : vector<8x32xf32>, vector<32x16xf32>, vector<8x16xf32> -> vector<8x16xf32>
      %c704 = arith.constant 704 : index
      %c0_32 = arith.constant 0 : index
      %74 = vector.load %arg4[%c704, %c0_32] : memref<960x16xf32, #tpu.memory_space<vmem>>, vector<1x16xf32>
      %75 = vector.broadcast %74 : vector<1x16xf32> to vector<8x16xf32>
      %76 = arith.addf %73, %75 : vector<8x16xf32>
      %c664 = arith.constant 664 : index
      %c0_33 = arith.constant 0 : index
      %77 = vector.load %arg4[%c664, %c0_33] : memref<960x16xf32, #tpu.memory_space<vmem>>, vector<32x16xf32>
      %cst_34 = arith.constant dense<0.000000e+00> : vector<8x16xf32>
      %78 = tpu.matmul %35, %77, %cst_34 {dimension_numbers = #tpu.dot_dimension_numbers<[1], [0], [0], [1], [0, 0, 1, 1], [], []>} : vector<8x32xf32>, vector<32x16xf32>, vector<8x16xf32> -> vector<8x16xf32>
      %c712 = arith.constant 712 : index
      %c0_35 = arith.constant 0 : index
      %79 = vector.load %arg4[%c712, %c0_35] : memref<960x16xf32, #tpu.memory_space<vmem>>, vector<1x16xf32>
      %80 = vector.broadcast %79 : vector<1x16xf32> to vector<8x16xf32>
      %81 = arith.addf %78, %80 : vector<8x16xf32>
      %cst_36 = arith.constant dense<0.000000e+00> : vector<8x8xf32>
      %82 = tpu.matmul %71, %76, %cst_36 {dimension_numbers = #tpu.dot_dimension_numbers<[1], [1], [0], [0], [0, 0, 1, 0], [], []>} : vector<8x16xf32>, vector<8x16xf32>, vector<8x8xf32> -> vector<8x8xf32>
      %cst_37 = arith.constant 2.500000e-01 : f32
      %83 = vector.broadcast %cst_37 : f32 to vector<8x8xf32>
      %84 = arith.mulf %82, %83 : vector<8x8xf32>
      %85 = arith.addf %84, %11 : vector<8x8xf32>
      %cst_38 = arith.constant dense<0xFF800000> : vector<8xf32>
      %86 = vector.multi_reduction <maximumf>, %85, %cst_38 [1] : vector<8x8xf32> to vector<8xf32>
      %87 = vector.shape_cast %86 : vector<8xf32> to vector<8x1xf32>
      %88 = vector.broadcast %87 : vector<8x1xf32> to vector<8x8xf32>
      %89 = arith.subf %85, %88 : vector<8x8xf32>
      %90 = math.exp %89 : vector<8x8xf32>
      %cst_39 = arith.constant dense<0.000000e+00> : vector<8xf32>
      %91 = vector.multi_reduction <add>, %90, %cst_39 [1] : vector<8x8xf32> to vector<8xf32>
      %92 = vector.shape_cast %91 : vector<8xf32> to vector<8x1xf32>
      %93 = vector.broadcast %92 : vector<8x1xf32> to vector<8x8xf32>
      %94 = arith.divf %90, %93 : vector<8x8xf32>
      %cst_40 = arith.constant dense<0.000000e+00> : vector<8x16xf32>
      %95 = tpu.matmul %94, %81, %cst_40 {dimension_numbers = #tpu.dot_dimension_numbers<[1], [0], [0], [1], [0, 0, 1, 1], [], []>} : vector<8x8xf32>, vector<8x16xf32>, vector<8x16xf32> -> vector<8x16xf32>
      %c432 = arith.constant 432 : index
      %c0_41 = arith.constant 0 : index
      %96 = vector.load %arg5[%c432, %c0_41] : memref<1144x32xf32, #tpu.memory_space<vmem>>, vector<16x32xf32>
      %cst_42 = arith.constant dense<0.000000e+00> : vector<8x32xf32>
      %97 = tpu.matmul %95, %96, %cst_42 {dimension_numbers = #tpu.dot_dimension_numbers<[1], [0], [0], [1], [0, 0, 1, 1], [], []>} : vector<8x16xf32>, vector<16x32xf32>, vector<8x32xf32> -> vector<8x32xf32>
      %98 = arith.addf %66, %97 : vector<8x32xf32>
      %99 = vector.extract_strided_slice %34 {offsets = [8, 0], sizes = [8, 32], strides = [1, 1]} : vector<16x32xf32> to vector<8x32xf32>
      %c480_43 = arith.constant 480 : index
      %c0_44 = arith.constant 0 : index
      %100 = vector.load %arg4[%c480_43, %c0_44] : memref<960x16xf32, #tpu.memory_space<vmem>>, vector<32x16xf32>
      %cst_45 = arith.constant dense<0.000000e+00> : vector<8x16xf32>
      %101 = tpu.matmul %99, %100, %cst_45 {dimension_numbers = #tpu.dot_dimension_numbers<[1], [0], [0], [1], [0, 0, 1, 1], [], []>} : vector<8x32xf32>, vector<32x16xf32>, vector<8x16xf32> -> vector<8x16xf32>
      %c576_46 = arith.constant 576 : index
      %c0_47 = arith.constant 0 : index
      %102 = vector.load %arg4[%c576_46, %c0_47] : memref<960x16xf32, #tpu.memory_space<vmem>>, vector<1x16xf32>
      %103 = vector.broadcast %102 : vector<1x16xf32> to vector<8x16xf32>
      %104 = arith.addf %101, %103 : vector<8x16xf32>
      %c512_48 = arith.constant 512 : index
      %c0_49 = arith.constant 0 : index
      %105 = vector.load %arg4[%c512_48, %c0_49] : memref<960x16xf32, #tpu.memory_space<vmem>>, vector<32x16xf32>
      %cst_50 = arith.constant dense<0.000000e+00> : vector<8x16xf32>
      %106 = tpu.matmul %99, %105, %cst_50 {dimension_numbers = #tpu.dot_dimension_numbers<[1], [0], [0], [1], [0, 0, 1, 1], [], []>} : vector<8x32xf32>, vector<32x16xf32>, vector<8x16xf32> -> vector<8x16xf32>
      %c584_51 = arith.constant 584 : index
      %c0_52 = arith.constant 0 : index
      %107 = vector.load %arg4[%c584_51, %c0_52] : memref<960x16xf32, #tpu.memory_space<vmem>>, vector<1x16xf32>
      %108 = vector.broadcast %107 : vector<1x16xf32> to vector<8x16xf32>
      %109 = arith.addf %106, %108 : vector<8x16xf32>
      %c544_53 = arith.constant 544 : index
      %c0_54 = arith.constant 0 : index
      %110 = vector.load %arg4[%c544_53, %c0_54] : memref<960x16xf32, #tpu.memory_space<vmem>>, vector<32x16xf32>
      %cst_55 = arith.constant dense<0.000000e+00> : vector<8x16xf32>
      %111 = tpu.matmul %99, %110, %cst_55 {dimension_numbers = #tpu.dot_dimension_numbers<[1], [0], [0], [1], [0, 0, 1, 1], [], []>} : vector<8x32xf32>, vector<32x16xf32>, vector<8x16xf32> -> vector<8x16xf32>
      %c592_56 = arith.constant 592 : index
      %c0_57 = arith.constant 0 : index
      %112 = vector.load %arg4[%c592_56, %c0_57] : memref<960x16xf32, #tpu.memory_space<vmem>>, vector<1x16xf32>
      %113 = vector.broadcast %112 : vector<1x16xf32> to vector<8x16xf32>
      %114 = arith.addf %111, %113 : vector<8x16xf32>
      %cst_58 = arith.constant dense<0.000000e+00> : vector<8x8xf32>
      %115 = tpu.matmul %104, %109, %cst_58 {dimension_numbers = #tpu.dot_dimension_numbers<[1], [1], [0], [0], [0, 0, 1, 0], [], []>} : vector<8x16xf32>, vector<8x16xf32>, vector<8x8xf32> -> vector<8x8xf32>
      %cst_59 = arith.constant 2.500000e-01 : f32
      %116 = vector.broadcast %cst_59 : f32 to vector<8x8xf32>
      %117 = arith.mulf %115, %116 : vector<8x8xf32>
      %118 = arith.addf %117, %11 : vector<8x8xf32>
      %cst_60 = arith.constant dense<0xFF800000> : vector<8xf32>
      %119 = vector.multi_reduction <maximumf>, %118, %cst_60 [1] : vector<8x8xf32> to vector<8xf32>
      %120 = vector.shape_cast %119 : vector<8xf32> to vector<8x1xf32>
      %121 = vector.broadcast %120 : vector<8x1xf32> to vector<8x8xf32>
      %122 = arith.subf %118, %121 : vector<8x8xf32>
      %123 = math.exp %122 : vector<8x8xf32>
      %cst_61 = arith.constant dense<0.000000e+00> : vector<8xf32>
      %124 = vector.multi_reduction <add>, %123, %cst_61 [1] : vector<8x8xf32> to vector<8xf32>
      %125 = vector.shape_cast %124 : vector<8xf32> to vector<8x1xf32>
      %126 = vector.broadcast %125 : vector<8x1xf32> to vector<8x8xf32>
      %127 = arith.divf %123, %126 : vector<8x8xf32>
      %cst_62 = arith.constant dense<0.000000e+00> : vector<8x16xf32>
      %128 = tpu.matmul %127, %114, %cst_62 {dimension_numbers = #tpu.dot_dimension_numbers<[1], [0], [0], [1], [0, 0, 1, 1], [], []>} : vector<8x8xf32>, vector<8x16xf32>, vector<8x16xf32> -> vector<8x16xf32>
      %c416_63 = arith.constant 416 : index
      %c0_64 = arith.constant 0 : index
      %129 = vector.load %arg5[%c416_63, %c0_64] : memref<1144x32xf32, #tpu.memory_space<vmem>>, vector<16x32xf32>
      %cst_65 = arith.constant dense<0.000000e+00> : vector<8x32xf32>
      %130 = tpu.matmul %128, %129, %cst_65 {dimension_numbers = #tpu.dot_dimension_numbers<[1], [0], [0], [1], [0, 0, 1, 1], [], []>} : vector<8x16xf32>, vector<16x32xf32>, vector<8x32xf32> -> vector<8x32xf32>
      %c600_66 = arith.constant 600 : index
      %c0_67 = arith.constant 0 : index
      %131 = vector.load %arg4[%c600_66, %c0_67] : memref<960x16xf32, #tpu.memory_space<vmem>>, vector<32x16xf32>
      %cst_68 = arith.constant dense<0.000000e+00> : vector<8x16xf32>
      %132 = tpu.matmul %99, %131, %cst_68 {dimension_numbers = #tpu.dot_dimension_numbers<[1], [0], [0], [1], [0, 0, 1, 1], [], []>} : vector<8x32xf32>, vector<32x16xf32>, vector<8x16xf32> -> vector<8x16xf32>
      %c696_69 = arith.constant 696 : index
      %c0_70 = arith.constant 0 : index
      %133 = vector.load %arg4[%c696_69, %c0_70] : memref<960x16xf32, #tpu.memory_space<vmem>>, vector<1x16xf32>
      %134 = vector.broadcast %133 : vector<1x16xf32> to vector<8x16xf32>
      %135 = arith.addf %132, %134 : vector<8x16xf32>
      %c632_71 = arith.constant 632 : index
      %c0_72 = arith.constant 0 : index
      %136 = vector.load %arg4[%c632_71, %c0_72] : memref<960x16xf32, #tpu.memory_space<vmem>>, vector<32x16xf32>
      %cst_73 = arith.constant dense<0.000000e+00> : vector<8x16xf32>
      %137 = tpu.matmul %99, %136, %cst_73 {dimension_numbers = #tpu.dot_dimension_numbers<[1], [0], [0], [1], [0, 0, 1, 1], [], []>} : vector<8x32xf32>, vector<32x16xf32>, vector<8x16xf32> -> vector<8x16xf32>
      %c704_74 = arith.constant 704 : index
      %c0_75 = arith.constant 0 : index
      %138 = vector.load %arg4[%c704_74, %c0_75] : memref<960x16xf32, #tpu.memory_space<vmem>>, vector<1x16xf32>
      %139 = vector.broadcast %138 : vector<1x16xf32> to vector<8x16xf32>
      %140 = arith.addf %137, %139 : vector<8x16xf32>
      %c664_76 = arith.constant 664 : index
      %c0_77 = arith.constant 0 : index
      %141 = vector.load %arg4[%c664_76, %c0_77] : memref<960x16xf32, #tpu.memory_space<vmem>>, vector<32x16xf32>
      %cst_78 = arith.constant dense<0.000000e+00> : vector<8x16xf32>
      %142 = tpu.matmul %99, %141, %cst_78 {dimension_numbers = #tpu.dot_dimension_numbers<[1], [0], [0], [1], [0, 0, 1, 1], [], []>} : vector<8x32xf32>, vector<32x16xf32>, vector<8x16xf32> -> vector<8x16xf32>
      %c712_79 = arith.constant 712 : index
      %c0_80 = arith.constant 0 : index
      %143 = vector.load %arg4[%c712_79, %c0_80] : memref<960x16xf32, #tpu.memory_space<vmem>>, vector<1x16xf32>
      %144 = vector.broadcast %143 : vector<1x16xf32> to vector<8x16xf32>
      %145 = arith.addf %142, %144 : vector<8x16xf32>
      %cst_81 = arith.constant dense<0.000000e+00> : vector<8x8xf32>
      %146 = tpu.matmul %135, %140, %cst_81 {dimension_numbers = #tpu.dot_dimension_numbers<[1], [1], [0], [0], [0, 0, 1, 0], [], []>} : vector<8x16xf32>, vector<8x16xf32>, vector<8x8xf32> -> vector<8x8xf32>
      %cst_82 = arith.constant 2.500000e-01 : f32
      %147 = vector.broadcast %cst_82 : f32 to vector<8x8xf32>
      %148 = arith.mulf %146, %147 : vector<8x8xf32>
      %149 = arith.addf %148, %11 : vector<8x8xf32>
      %cst_83 = arith.constant dense<0xFF800000> : vector<8xf32>
      %150 = vector.multi_reduction <maximumf>, %149, %cst_83 [1] : vector<8x8xf32> to vector<8xf32>
      %151 = vector.shape_cast %150 : vector<8xf32> to vector<8x1xf32>
      %152 = vector.broadcast %151 : vector<8x1xf32> to vector<8x8xf32>
      %153 = arith.subf %149, %152 : vector<8x8xf32>
      %154 = math.exp %153 : vector<8x8xf32>
      %cst_84 = arith.constant dense<0.000000e+00> : vector<8xf32>
      %155 = vector.multi_reduction <add>, %154, %cst_84 [1] : vector<8x8xf32> to vector<8xf32>
      %156 = vector.shape_cast %155 : vector<8xf32> to vector<8x1xf32>
      %157 = vector.broadcast %156 : vector<8x1xf32> to vector<8x8xf32>
      %158 = arith.divf %154, %157 : vector<8x8xf32>
      %cst_85 = arith.constant dense<0.000000e+00> : vector<8x16xf32>
      %159 = tpu.matmul %158, %145, %cst_85 {dimension_numbers = #tpu.dot_dimension_numbers<[1], [0], [0], [1], [0, 0, 1, 1], [], []>} : vector<8x8xf32>, vector<8x16xf32>, vector<8x16xf32> -> vector<8x16xf32>
      %c432_86 = arith.constant 432 : index
      %c0_87 = arith.constant 0 : index
      %160 = vector.load %arg5[%c432_86, %c0_87] : memref<1144x32xf32, #tpu.memory_space<vmem>>, vector<16x32xf32>
      %cst_88 = arith.constant dense<0.000000e+00> : vector<8x32xf32>
      %161 = tpu.matmul %159, %160, %cst_88 {dimension_numbers = #tpu.dot_dimension_numbers<[1], [0], [0], [1], [0, 0, 1, 1], [], []>} : vector<8x16xf32>, vector<16x32xf32>, vector<8x32xf32> -> vector<8x32xf32>
      %162 = arith.addf %130, %161 : vector<8x32xf32>
      %163 = tpu.concatenate %98, %162 in 0 : vector<8x32xf32>, vector<8x32xf32> -> vector<16x32xf32>
      %164 = arith.addf %12, %163 : vector<16x32xf32>
      %c448 = arith.constant 448 : index
      %c0_89 = arith.constant 0 : index
      %165 = vector.load %arg5[%c448, %c0_89] : memref<1144x32xf32, #tpu.memory_space<vmem>>, vector<1x32xf32>
      %166 = vector.broadcast %165 : vector<1x32xf32> to vector<16x32xf32>
      %167 = arith.addf %164, %166 : vector<16x32xf32>
      %c472 = arith.constant 472 : index
      %c0_90 = arith.constant 0 : index
      %168 = vector.load %arg5[%c472, %c0_90] : memref<1144x32xf32, #tpu.memory_space<vmem>>, vector<1x32xf32>
      %c480_91 = arith.constant 480 : index
      %c0_92 = arith.constant 0 : index
      %169 = vector.load %arg5[%c480_91, %c0_92] : memref<1144x32xf32, #tpu.memory_space<vmem>>, vector<1x32xf32>
      %cst_93 = arith.constant dense<0.000000e+00> : vector<16xf32>
      %170 = vector.multi_reduction <add>, %167, %cst_93 [1] : vector<16x32xf32> to vector<16xf32>
      %171 = vector.shape_cast %170 : vector<16xf32> to vector<16x1xf32>
      %cst_94 = arith.constant 3.200000e+01 : f32
      %172 = vector.broadcast %cst_94 : f32 to vector<16x1xf32>
      %173 = arith.divf %171, %172 : vector<16x1xf32>
      %174 = vector.broadcast %173 : vector<16x1xf32> to vector<16x32xf32>
      %175 = arith.subf %167, %174 : vector<16x32xf32>
      %176 = arith.mulf %175, %175 : vector<16x32xf32>
      %cst_95 = arith.constant dense<0.000000e+00> : vector<16xf32>
      %177 = vector.multi_reduction <add>, %176, %cst_95 [1] : vector<16x32xf32> to vector<16xf32>
      %178 = vector.shape_cast %177 : vector<16xf32> to vector<16x1xf32>
      %cst_96 = arith.constant 3.200000e+01 : f32
      %179 = vector.broadcast %cst_96 : f32 to vector<16x1xf32>
      %180 = arith.divf %178, %179 : vector<16x1xf32>
      %cst_97 = arith.constant 9.99999974E-6 : f32
      %181 = vector.broadcast %cst_97 : f32 to vector<16x1xf32>
      %182 = arith.addf %180, %181 : vector<16x1xf32>
      %183 = math.rsqrt %182 : vector<16x1xf32>
      %184 = vector.broadcast %183 : vector<16x1xf32> to vector<16x32xf32>
      %185 = arith.mulf %175, %184 : vector<16x32xf32>
      %186 = vector.broadcast %168 : vector<1x32xf32> to vector<16x32xf32>
      %187 = arith.mulf %185, %186 : vector<16x32xf32>
      %188 = vector.broadcast %169 : vector<1x32xf32> to vector<16x32xf32>
      %189 = arith.addf %187, %188 : vector<16x32xf32>
      %c80 = arith.constant 80 : index
      %c0_98 = arith.constant 0 : index
      %190 = vector.load %arg6[%c80, %c0_98] : memref<160x128xf32, #tpu.memory_space<vmem>>, vector<32x128xf32>
      %cst_99 = arith.constant dense<0.000000e+00> : vector<16x128xf32>
      %191 = tpu.matmul %189, %190, %cst_99 {dimension_numbers = #tpu.dot_dimension_numbers<[1], [0], [0], [1], [0, 0, 1, 1], [], []>} : vector<16x32xf32>, vector<32x128xf32>, vector<16x128xf32> -> vector<16x128xf32>
      %c112 = arith.constant 112 : index
      %c0_100 = arith.constant 0 : index
      %192 = vector.load %arg6[%c112, %c0_100] : memref<160x128xf32, #tpu.memory_space<vmem>>, vector<1x128xf32>
      %193 = vector.broadcast %192 : vector<1x128xf32> to vector<16x128xf32>
      %194 = arith.addf %191, %193 : vector<16x128xf32>
      %cst_101 = arith.constant 5.000000e-01 : f32
      %195 = vector.broadcast %cst_101 : f32 to vector<16x128xf32>
      %196 = arith.mulf %195, %194 : vector<16x128xf32>
      %cst_102 = arith.constant 0.707106769 : f32
      %197 = vector.broadcast %cst_102 : f32 to vector<16x128xf32>
      %198 = arith.mulf %194, %197 : vector<16x128xf32>
      %199 = math.absf %198 : vector<16x128xf32>
      %cst_103 = arith.constant 0.327591091 : f32
      %200 = vector.broadcast %cst_103 : f32 to vector<16x128xf32>
      %201 = arith.mulf %200, %199 : vector<16x128xf32>
      %cst_104 = arith.constant 1.000000e+00 : f32
      %202 = vector.broadcast %cst_104 : f32 to vector<16x128xf32>
      %203 = arith.addf %202, %201 : vector<16x128xf32>
      %cst_105 = arith.constant 1.000000e+00 : f32
      %204 = vector.broadcast %cst_105 : f32 to vector<16x128xf32>
      %205 = arith.divf %204, %203 : vector<16x128xf32>
      %cst_106 = arith.constant 1.06140542 : f32
      %206 = vector.broadcast %cst_106 : f32 to vector<16x128xf32>
      %207 = arith.mulf %206, %205 : vector<16x128xf32>
      %cst_107 = arith.constant -1.45315206 : f32
      %208 = vector.broadcast %cst_107 : f32 to vector<16x128xf32>
      %209 = arith.addf %207, %208 : vector<16x128xf32>
      %210 = arith.mulf %209, %205 : vector<16x128xf32>
      %cst_108 = arith.constant 1.42141378 : f32
      %211 = vector.broadcast %cst_108 : f32 to vector<16x128xf32>
      %212 = arith.addf %210, %211 : vector<16x128xf32>
      %213 = arith.mulf %212, %205 : vector<16x128xf32>
      %cst_109 = arith.constant -0.284496725 : f32
      %214 = vector.broadcast %cst_109 : f32 to vector<16x128xf32>
      %215 = arith.addf %213, %214 : vector<16x128xf32>
      %216 = arith.mulf %215, %205 : vector<16x128xf32>
      %cst_110 = arith.constant 0.254829586 : f32
      %217 = vector.broadcast %cst_110 : f32 to vector<16x128xf32>
      %218 = arith.addf %216, %217 : vector<16x128xf32>
      %219 = arith.mulf %218, %205 : vector<16x128xf32>
      %cst_111 = arith.constant 0.000000e+00 : f32
      %220 = vector.broadcast %cst_111 : f32 to vector<16x128xf32>
      %221 = arith.subf %220, %199 : vector<16x128xf32>
      %222 = arith.mulf %221, %199 : vector<16x128xf32>
      %223 = math.exp %222 : vector<16x128xf32>
      %224 = arith.mulf %219, %223 : vector<16x128xf32>
      %cst_112 = arith.constant 1.000000e+00 : f32
      %225 = vector.broadcast %cst_112 : f32 to vector<16x128xf32>
      %226 = arith.subf %225, %224 : vector<16x128xf32>
      %cst_113 = arith.constant 0.000000e+00 : f32
      %227 = vector.broadcast %cst_113 : f32 to vector<16x128xf32>
      %228 = arith.cmpf oge, %198, %227 : vector<16x128xf32>
      %cst_114 = arith.constant 0.000000e+00 : f32
      %229 = vector.broadcast %cst_114 : f32 to vector<16x128xf32>
      %230 = arith.subf %229, %226 : vector<16x128xf32>
      %231 = arith.select %228, %226, %230 : vector<16x128xi1>, vector<16x128xf32>
      %cst_115 = arith.constant 1.000000e+00 : f32
      %232 = vector.broadcast %cst_115 : f32 to vector<16x128xf32>
      %233 = arith.addf %232, %231 : vector<16x128xf32>
      %234 = arith.mulf %196, %233 : vector<16x128xf32>
      %c488 = arith.constant 488 : index
      %c0_116 = arith.constant 0 : index
      %235 = vector.load %arg5[%c488, %c0_116] : memref<1144x32xf32, #tpu.memory_space<vmem>>, vector<128x32xf32>
      %cst_117 = arith.constant dense<0.000000e+00> : vector<16x32xf32>
      %236 = tpu.matmul %234, %235, %cst_117 {dimension_numbers = #tpu.dot_dimension_numbers<[1], [0], [0], [1], [0, 0, 1, 1], [], []>} : vector<16x128xf32>, vector<128x32xf32>, vector<16x32xf32> -> vector<16x32xf32>
      %237 = arith.addf %167, %236 : vector<16x32xf32>
      %c616 = arith.constant 616 : index
      %c0_118 = arith.constant 0 : index
      %238 = vector.load %arg5[%c616, %c0_118] : memref<1144x32xf32, #tpu.memory_space<vmem>>, vector<1x32xf32>
      %239 = vector.broadcast %238 : vector<1x32xf32> to vector<16x32xf32>
      %240 = arith.addf %237, %239 : vector<16x32xf32>
      %c664_119 = arith.constant 664 : index
      %c0_120 = arith.constant 0 : index
      %241 = vector.load %arg5[%c664_119, %c0_120] : memref<1144x32xf32, #tpu.memory_space<vmem>>, vector<1x32xf32>
      %c672 = arith.constant 672 : index
      %c0_121 = arith.constant 0 : index
      %242 = vector.load %arg5[%c672, %c0_121] : memref<1144x32xf32, #tpu.memory_space<vmem>>, vector<1x32xf32>
      %cst_122 = arith.constant dense<0.000000e+00> : vector<16xf32>
      %243 = vector.multi_reduction <add>, %240, %cst_122 [1] : vector<16x32xf32> to vector<16xf32>
      %244 = vector.shape_cast %243 : vector<16xf32> to vector<16x1xf32>
      %cst_123 = arith.constant 3.200000e+01 : f32
      %245 = vector.broadcast %cst_123 : f32 to vector<16x1xf32>
      %246 = arith.divf %244, %245 : vector<16x1xf32>
      %247 = vector.broadcast %246 : vector<16x1xf32> to vector<16x32xf32>
      %248 = arith.subf %240, %247 : vector<16x32xf32>
      %249 = arith.mulf %248, %248 : vector<16x32xf32>
      %cst_124 = arith.constant dense<0.000000e+00> : vector<16xf32>
      %250 = vector.multi_reduction <add>, %249, %cst_124 [1] : vector<16x32xf32> to vector<16xf32>
      %251 = vector.shape_cast %250 : vector<16xf32> to vector<16x1xf32>
      %cst_125 = arith.constant 3.200000e+01 : f32
      %252 = vector.broadcast %cst_125 : f32 to vector<16x1xf32>
      %253 = arith.divf %251, %252 : vector<16x1xf32>
      %cst_126 = arith.constant 9.99999974E-6 : f32
      %254 = vector.broadcast %cst_126 : f32 to vector<16x1xf32>
      %255 = arith.addf %253, %254 : vector<16x1xf32>
      %256 = math.rsqrt %255 : vector<16x1xf32>
      %257 = vector.broadcast %256 : vector<16x1xf32> to vector<16x32xf32>
      %258 = arith.mulf %248, %257 : vector<16x32xf32>
      %259 = vector.broadcast %241 : vector<1x32xf32> to vector<16x32xf32>
      %260 = arith.mulf %258, %259 : vector<16x32xf32>
      %261 = vector.broadcast %242 : vector<1x32xf32> to vector<16x32xf32>
      %262 = arith.addf %260, %261 : vector<16x32xf32>
      %263 = vector.extract_strided_slice %262 {offsets = [0, 0], sizes = [8, 32], strides = [1, 1]} : vector<16x32xf32> to vector<8x32xf32>
      %c720 = arith.constant 720 : index
      %c0_127 = arith.constant 0 : index
      %264 = vector.load %arg4[%c720, %c0_127] : memref<960x16xf32, #tpu.memory_space<vmem>>, vector<32x16xf32>
      %cst_128 = arith.constant dense<0.000000e+00> : vector<8x16xf32>
      %265 = tpu.matmul %263, %264, %cst_128 {dimension_numbers = #tpu.dot_dimension_numbers<[1], [0], [0], [1], [0, 0, 1, 1], [], []>} : vector<8x32xf32>, vector<32x16xf32>, vector<8x16xf32> -> vector<8x16xf32>
      %c816 = arith.constant 816 : index
      %c0_129 = arith.constant 0 : index
      %266 = vector.load %arg4[%c816, %c0_129] : memref<960x16xf32, #tpu.memory_space<vmem>>, vector<1x16xf32>
      %267 = vector.broadcast %266 : vector<1x16xf32> to vector<8x16xf32>
      %268 = arith.addf %265, %267 : vector<8x16xf32>
      %c752 = arith.constant 752 : index
      %c0_130 = arith.constant 0 : index
      %269 = vector.load %arg4[%c752, %c0_130] : memref<960x16xf32, #tpu.memory_space<vmem>>, vector<32x16xf32>
      %cst_131 = arith.constant dense<0.000000e+00> : vector<8x16xf32>
      %270 = tpu.matmul %263, %269, %cst_131 {dimension_numbers = #tpu.dot_dimension_numbers<[1], [0], [0], [1], [0, 0, 1, 1], [], []>} : vector<8x32xf32>, vector<32x16xf32>, vector<8x16xf32> -> vector<8x16xf32>
      %c824 = arith.constant 824 : index
      %c0_132 = arith.constant 0 : index
      %271 = vector.load %arg4[%c824, %c0_132] : memref<960x16xf32, #tpu.memory_space<vmem>>, vector<1x16xf32>
      %272 = vector.broadcast %271 : vector<1x16xf32> to vector<8x16xf32>
      %273 = arith.addf %270, %272 : vector<8x16xf32>
      %c784 = arith.constant 784 : index
      %c0_133 = arith.constant 0 : index
      %274 = vector.load %arg4[%c784, %c0_133] : memref<960x16xf32, #tpu.memory_space<vmem>>, vector<32x16xf32>
      %cst_134 = arith.constant dense<0.000000e+00> : vector<8x16xf32>
      %275 = tpu.matmul %263, %274, %cst_134 {dimension_numbers = #tpu.dot_dimension_numbers<[1], [0], [0], [1], [0, 0, 1, 1], [], []>} : vector<8x32xf32>, vector<32x16xf32>, vector<8x16xf32> -> vector<8x16xf32>
      %c832 = arith.constant 832 : index
      %c0_135 = arith.constant 0 : index
      %276 = vector.load %arg4[%c832, %c0_135] : memref<960x16xf32, #tpu.memory_space<vmem>>, vector<1x16xf32>
      %277 = vector.broadcast %276 : vector<1x16xf32> to vector<8x16xf32>
      %278 = arith.addf %275, %277 : vector<8x16xf32>
      %cst_136 = arith.constant dense<0.000000e+00> : vector<8x8xf32>
      %279 = tpu.matmul %268, %273, %cst_136 {dimension_numbers = #tpu.dot_dimension_numbers<[1], [1], [0], [0], [0, 0, 1, 0], [], []>} : vector<8x16xf32>, vector<8x16xf32>, vector<8x8xf32> -> vector<8x8xf32>
      %cst_137 = arith.constant 2.500000e-01 : f32
      %280 = vector.broadcast %cst_137 : f32 to vector<8x8xf32>
      %281 = arith.mulf %279, %280 : vector<8x8xf32>
      %282 = arith.addf %281, %11 : vector<8x8xf32>
      %cst_138 = arith.constant dense<0xFF800000> : vector<8xf32>
      %283 = vector.multi_reduction <maximumf>, %282, %cst_138 [1] : vector<8x8xf32> to vector<8xf32>
      %284 = vector.shape_cast %283 : vector<8xf32> to vector<8x1xf32>
      %285 = vector.broadcast %284 : vector<8x1xf32> to vector<8x8xf32>
      %286 = arith.subf %282, %285 : vector<8x8xf32>
      %287 = math.exp %286 : vector<8x8xf32>
      %cst_139 = arith.constant dense<0.000000e+00> : vector<8xf32>
      %288 = vector.multi_reduction <add>, %287, %cst_139 [1] : vector<8x8xf32> to vector<8xf32>
      %289 = vector.shape_cast %288 : vector<8xf32> to vector<8x1xf32>
      %290 = vector.broadcast %289 : vector<8x1xf32> to vector<8x8xf32>
      %291 = arith.divf %287, %290 : vector<8x8xf32>
      %cst_140 = arith.constant dense<0.000000e+00> : vector<8x16xf32>
      %292 = tpu.matmul %291, %278, %cst_140 {dimension_numbers = #tpu.dot_dimension_numbers<[1], [0], [0], [1], [0, 0, 1, 1], [], []>} : vector<8x8xf32>, vector<8x16xf32>, vector<8x16xf32> -> vector<8x16xf32>
      %c624 = arith.constant 624 : index
      %c0_141 = arith.constant 0 : index
      %293 = vector.load %arg5[%c624, %c0_141] : memref<1144x32xf32, #tpu.memory_space<vmem>>, vector<16x32xf32>
      %cst_142 = arith.constant dense<0.000000e+00> : vector<8x32xf32>
      %294 = tpu.matmul %292, %293, %cst_142 {dimension_numbers = #tpu.dot_dimension_numbers<[1], [0], [0], [1], [0, 0, 1, 1], [], []>} : vector<8x16xf32>, vector<16x32xf32>, vector<8x32xf32> -> vector<8x32xf32>
      %c840 = arith.constant 840 : index
      %c0_143 = arith.constant 0 : index
      %295 = vector.load %arg4[%c840, %c0_143] : memref<960x16xf32, #tpu.memory_space<vmem>>, vector<32x16xf32>
      %cst_144 = arith.constant dense<0.000000e+00> : vector<8x16xf32>
      %296 = tpu.matmul %263, %295, %cst_144 {dimension_numbers = #tpu.dot_dimension_numbers<[1], [0], [0], [1], [0, 0, 1, 1], [], []>} : vector<8x32xf32>, vector<32x16xf32>, vector<8x16xf32> -> vector<8x16xf32>
      %c936 = arith.constant 936 : index
      %c0_145 = arith.constant 0 : index
      %297 = vector.load %arg4[%c936, %c0_145] : memref<960x16xf32, #tpu.memory_space<vmem>>, vector<1x16xf32>
      %298 = vector.broadcast %297 : vector<1x16xf32> to vector<8x16xf32>
      %299 = arith.addf %296, %298 : vector<8x16xf32>
      %c872 = arith.constant 872 : index
      %c0_146 = arith.constant 0 : index
      %300 = vector.load %arg4[%c872, %c0_146] : memref<960x16xf32, #tpu.memory_space<vmem>>, vector<32x16xf32>
      %cst_147 = arith.constant dense<0.000000e+00> : vector<8x16xf32>
      %301 = tpu.matmul %263, %300, %cst_147 {dimension_numbers = #tpu.dot_dimension_numbers<[1], [0], [0], [1], [0, 0, 1, 1], [], []>} : vector<8x32xf32>, vector<32x16xf32>, vector<8x16xf32> -> vector<8x16xf32>
      %c944 = arith.constant 944 : index
      %c0_148 = arith.constant 0 : index
      %302 = vector.load %arg4[%c944, %c0_148] : memref<960x16xf32, #tpu.memory_space<vmem>>, vector<1x16xf32>
      %303 = vector.broadcast %302 : vector<1x16xf32> to vector<8x16xf32>
      %304 = arith.addf %301, %303 : vector<8x16xf32>
      %c904 = arith.constant 904 : index
      %c0_149 = arith.constant 0 : index
      %305 = vector.load %arg4[%c904, %c0_149] : memref<960x16xf32, #tpu.memory_space<vmem>>, vector<32x16xf32>
      %cst_150 = arith.constant dense<0.000000e+00> : vector<8x16xf32>
      %306 = tpu.matmul %263, %305, %cst_150 {dimension_numbers = #tpu.dot_dimension_numbers<[1], [0], [0], [1], [0, 0, 1, 1], [], []>} : vector<8x32xf32>, vector<32x16xf32>, vector<8x16xf32> -> vector<8x16xf32>
      %c952 = arith.constant 952 : index
      %c0_151 = arith.constant 0 : index
      %307 = vector.load %arg4[%c952, %c0_151] : memref<960x16xf32, #tpu.memory_space<vmem>>, vector<1x16xf32>
      %308 = vector.broadcast %307 : vector<1x16xf32> to vector<8x16xf32>
      %309 = arith.addf %306, %308 : vector<8x16xf32>
      %cst_152 = arith.constant dense<0.000000e+00> : vector<8x8xf32>
      %310 = tpu.matmul %299, %304, %cst_152 {dimension_numbers = #tpu.dot_dimension_numbers<[1], [1], [0], [0], [0, 0, 1, 0], [], []>} : vector<8x16xf32>, vector<8x16xf32>, vector<8x8xf32> -> vector<8x8xf32>
      %cst_153 = arith.constant 2.500000e-01 : f32
      %311 = vector.broadcast %cst_153 : f32 to vector<8x8xf32>
      %312 = arith.mulf %310, %311 : vector<8x8xf32>
      %313 = arith.addf %312, %11 : vector<8x8xf32>
      %cst_154 = arith.constant dense<0xFF800000> : vector<8xf32>
      %314 = vector.multi_reduction <maximumf>, %313, %cst_154 [1] : vector<8x8xf32> to vector<8xf32>
      %315 = vector.shape_cast %314 : vector<8xf32> to vector<8x1xf32>
      %316 = vector.broadcast %315 : vector<8x1xf32> to vector<8x8xf32>
      %317 = arith.subf %313, %316 : vector<8x8xf32>
      %318 = math.exp %317 : vector<8x8xf32>
      %cst_155 = arith.constant dense<0.000000e+00> : vector<8xf32>
      %319 = vector.multi_reduction <add>, %318, %cst_155 [1] : vector<8x8xf32> to vector<8xf32>
      %320 = vector.shape_cast %319 : vector<8xf32> to vector<8x1xf32>
      %321 = vector.broadcast %320 : vector<8x1xf32> to vector<8x8xf32>
      %322 = arith.divf %318, %321 : vector<8x8xf32>
      %cst_156 = arith.constant dense<0.000000e+00> : vector<8x16xf32>
      %323 = tpu.matmul %322, %309, %cst_156 {dimension_numbers = #tpu.dot_dimension_numbers<[1], [0], [0], [1], [0, 0, 1, 1], [], []>} : vector<8x8xf32>, vector<8x16xf32>, vector<8x16xf32> -> vector<8x16xf32>
      %c640 = arith.constant 640 : index
      %c0_157 = arith.constant 0 : index
      %324 = vector.load %arg5[%c640, %c0_157] : memref<1144x32xf32, #tpu.memory_space<vmem>>, vector<16x32xf32>
      %cst_158 = arith.constant dense<0.000000e+00> : vector<8x32xf32>
      %325 = tpu.matmul %323, %324, %cst_158 {dimension_numbers = #tpu.dot_dimension_numbers<[1], [0], [0], [1], [0, 0, 1, 1], [], []>} : vector<8x16xf32>, vector<16x32xf32>, vector<8x32xf32> -> vector<8x32xf32>
      %326 = arith.addf %294, %325 : vector<8x32xf32>
      %327 = vector.extract_strided_slice %262 {offsets = [8, 0], sizes = [8, 32], strides = [1, 1]} : vector<16x32xf32> to vector<8x32xf32>
      %c720_159 = arith.constant 720 : index
      %c0_160 = arith.constant 0 : index
      %328 = vector.load %arg4[%c720_159, %c0_160] : memref<960x16xf32, #tpu.memory_space<vmem>>, vector<32x16xf32>
      %cst_161 = arith.constant dense<0.000000e+00> : vector<8x16xf32>
      %329 = tpu.matmul %327, %328, %cst_161 {dimension_numbers = #tpu.dot_dimension_numbers<[1], [0], [0], [1], [0, 0, 1, 1], [], []>} : vector<8x32xf32>, vector<32x16xf32>, vector<8x16xf32> -> vector<8x16xf32>
      %c816_162 = arith.constant 816 : index
      %c0_163 = arith.constant 0 : index
      %330 = vector.load %arg4[%c816_162, %c0_163] : memref<960x16xf32, #tpu.memory_space<vmem>>, vector<1x16xf32>
      %331 = vector.broadcast %330 : vector<1x16xf32> to vector<8x16xf32>
      %332 = arith.addf %329, %331 : vector<8x16xf32>
      %c752_164 = arith.constant 752 : index
      %c0_165 = arith.constant 0 : index
      %333 = vector.load %arg4[%c752_164, %c0_165] : memref<960x16xf32, #tpu.memory_space<vmem>>, vector<32x16xf32>
      %cst_166 = arith.constant dense<0.000000e+00> : vector<8x16xf32>
      %334 = tpu.matmul %327, %333, %cst_166 {dimension_numbers = #tpu.dot_dimension_numbers<[1], [0], [0], [1], [0, 0, 1, 1], [], []>} : vector<8x32xf32>, vector<32x16xf32>, vector<8x16xf32> -> vector<8x16xf32>
      %c824_167 = arith.constant 824 : index
      %c0_168 = arith.constant 0 : index
      %335 = vector.load %arg4[%c824_167, %c0_168] : memref<960x16xf32, #tpu.memory_space<vmem>>, vector<1x16xf32>
      %336 = vector.broadcast %335 : vector<1x16xf32> to vector<8x16xf32>
      %337 = arith.addf %334, %336 : vector<8x16xf32>
      %c784_169 = arith.constant 784 : index
      %c0_170 = arith.constant 0 : index
      %338 = vector.load %arg4[%c784_169, %c0_170] : memref<960x16xf32, #tpu.memory_space<vmem>>, vector<32x16xf32>
      %cst_171 = arith.constant dense<0.000000e+00> : vector<8x16xf32>
      %339 = tpu.matmul %327, %338, %cst_171 {dimension_numbers = #tpu.dot_dimension_numbers<[1], [0], [0], [1], [0, 0, 1, 1], [], []>} : vector<8x32xf32>, vector<32x16xf32>, vector<8x16xf32> -> vector<8x16xf32>
      %c832_172 = arith.constant 832 : index
      %c0_173 = arith.constant 0 : index
      %340 = vector.load %arg4[%c832_172, %c0_173] : memref<960x16xf32, #tpu.memory_space<vmem>>, vector<1x16xf32>
      %341 = vector.broadcast %340 : vector<1x16xf32> to vector<8x16xf32>
      %342 = arith.addf %339, %341 : vector<8x16xf32>
      %cst_174 = arith.constant dense<0.000000e+00> : vector<8x8xf32>
      %343 = tpu.matmul %332, %337, %cst_174 {dimension_numbers = #tpu.dot_dimension_numbers<[1], [1], [0], [0], [0, 0, 1, 0], [], []>} : vector<8x16xf32>, vector<8x16xf32>, vector<8x8xf32> -> vector<8x8xf32>
      %cst_175 = arith.constant 2.500000e-01 : f32
      %344 = vector.broadcast %cst_175 : f32 to vector<8x8xf32>
      %345 = arith.mulf %343, %344 : vector<8x8xf32>
      %346 = arith.addf %345, %11 : vector<8x8xf32>
      %cst_176 = arith.constant dense<0xFF800000> : vector<8xf32>
      %347 = vector.multi_reduction <maximumf>, %346, %cst_176 [1] : vector<8x8xf32> to vector<8xf32>
      %348 = vector.shape_cast %347 : vector<8xf32> to vector<8x1xf32>
      %349 = vector.broadcast %348 : vector<8x1xf32> to vector<8x8xf32>
      %350 = arith.subf %346, %349 : vector<8x8xf32>
      %351 = math.exp %350 : vector<8x8xf32>
      %cst_177 = arith.constant dense<0.000000e+00> : vector<8xf32>
      %352 = vector.multi_reduction <add>, %351, %cst_177 [1] : vector<8x8xf32> to vector<8xf32>
      %353 = vector.shape_cast %352 : vector<8xf32> to vector<8x1xf32>
      %354 = vector.broadcast %353 : vector<8x1xf32> to vector<8x8xf32>
      %355 = arith.divf %351, %354 : vector<8x8xf32>
      %cst_178 = arith.constant dense<0.000000e+00> : vector<8x16xf32>
      %356 = tpu.matmul %355, %342, %cst_178 {dimension_numbers = #tpu.dot_dimension_numbers<[1], [0], [0], [1], [0, 0, 1, 1], [], []>} : vector<8x8xf32>, vector<8x16xf32>, vector<8x16xf32> -> vector<8x16xf32>
      %c624_179 = arith.constant 624 : index
      %c0_180 = arith.constant 0 : index
      %357 = vector.load %arg5[%c624_179, %c0_180] : memref<1144x32xf32, #tpu.memory_space<vmem>>, vector<16x32xf32>
      %cst_181 = arith.constant dense<0.000000e+00> : vector<8x32xf32>
      %358 = tpu.matmul %356, %357, %cst_181 {dimension_numbers = #tpu.dot_dimension_numbers<[1], [0], [0], [1], [0, 0, 1, 1], [], []>} : vector<8x16xf32>, vector<16x32xf32>, vector<8x32xf32> -> vector<8x32xf32>
      %c840_182 = arith.constant 840 : index
      %c0_183 = arith.constant 0 : index
      %359 = vector.load %arg4[%c840_182, %c0_183] : memref<960x16xf32, #tpu.memory_space<vmem>>, vector<32x16xf32>
      %cst_184 = arith.constant dense<0.000000e+00> : vector<8x16xf32>
      %360 = tpu.matmul %327, %359, %cst_184 {dimension_numbers = #tpu.dot_dimension_numbers<[1], [0], [0], [1], [0, 0, 1, 1], [], []>} : vector<8x32xf32>, vector<32x16xf32>, vector<8x16xf32> -> vector<8x16xf32>
      %c936_185 = arith.constant 936 : index
      %c0_186 = arith.constant 0 : index
      %361 = vector.load %arg4[%c936_185, %c0_186] : memref<960x16xf32, #tpu.memory_space<vmem>>, vector<1x16xf32>
      %362 = vector.broadcast %361 : vector<1x16xf32> to vector<8x16xf32>
      %363 = arith.addf %360, %362 : vector<8x16xf32>
      %c872_187 = arith.constant 872 : index
      %c0_188 = arith.constant 0 : index
      %364 = vector.load %arg4[%c872_187, %c0_188] : memref<960x16xf32, #tpu.memory_space<vmem>>, vector<32x16xf32>
      %cst_189 = arith.constant dense<0.000000e+00> : vector<8x16xf32>
      %365 = tpu.matmul %327, %364, %cst_189 {dimension_numbers = #tpu.dot_dimension_numbers<[1], [0], [0], [1], [0, 0, 1, 1], [], []>} : vector<8x32xf32>, vector<32x16xf32>, vector<8x16xf32> -> vector<8x16xf32>
      %c944_190 = arith.constant 944 : index
      %c0_191 = arith.constant 0 : index
      %366 = vector.load %arg4[%c944_190, %c0_191] : memref<960x16xf32, #tpu.memory_space<vmem>>, vector<1x16xf32>
      %367 = vector.broadcast %366 : vector<1x16xf32> to vector<8x16xf32>
      %368 = arith.addf %365, %367 : vector<8x16xf32>
      %c904_192 = arith.constant 904 : index
      %c0_193 = arith.constant 0 : index
      %369 = vector.load %arg4[%c904_192, %c0_193] : memref<960x16xf32, #tpu.memory_space<vmem>>, vector<32x16xf32>
      %cst_194 = arith.constant dense<0.000000e+00> : vector<8x16xf32>
      %370 = tpu.matmul %327, %369, %cst_194 {dimension_numbers = #tpu.dot_dimension_numbers<[1], [0], [0], [1], [0, 0, 1, 1], [], []>} : vector<8x32xf32>, vector<32x16xf32>, vector<8x16xf32> -> vector<8x16xf32>
      %c952_195 = arith.constant 952 : index
      %c0_196 = arith.constant 0 : index
      %371 = vector.load %arg4[%c952_195, %c0_196] : memref<960x16xf32, #tpu.memory_space<vmem>>, vector<1x16xf32>
      %372 = vector.broadcast %371 : vector<1x16xf32> to vector<8x16xf32>
      %373 = arith.addf %370, %372 : vector<8x16xf32>
      %cst_197 = arith.constant dense<0.000000e+00> : vector<8x8xf32>
      %374 = tpu.matmul %363, %368, %cst_197 {dimension_numbers = #tpu.dot_dimension_numbers<[1], [1], [0], [0], [0, 0, 1, 0], [], []>} : vector<8x16xf32>, vector<8x16xf32>, vector<8x8xf32> -> vector<8x8xf32>
      %cst_198 = arith.constant 2.500000e-01 : f32
      %375 = vector.broadcast %cst_198 : f32 to vector<8x8xf32>
      %376 = arith.mulf %374, %375 : vector<8x8xf32>
      %377 = arith.addf %376, %11 : vector<8x8xf32>
      %cst_199 = arith.constant dense<0xFF800000> : vector<8xf32>
      %378 = vector.multi_reduction <maximumf>, %377, %cst_199 [1] : vector<8x8xf32> to vector<8xf32>
      %379 = vector.shape_cast %378 : vector<8xf32> to vector<8x1xf32>
      %380 = vector.broadcast %379 : vector<8x1xf32> to vector<8x8xf32>
      %381 = arith.subf %377, %380 : vector<8x8xf32>
      %382 = math.exp %381 : vector<8x8xf32>
      %cst_200 = arith.constant dense<0.000000e+00> : vector<8xf32>
      %383 = vector.multi_reduction <add>, %382, %cst_200 [1] : vector<8x8xf32> to vector<8xf32>
      %384 = vector.shape_cast %383 : vector<8xf32> to vector<8x1xf32>
      %385 = vector.broadcast %384 : vector<8x1xf32> to vector<8x8xf32>
      %386 = arith.divf %382, %385 : vector<8x8xf32>
      %cst_201 = arith.constant dense<0.000000e+00> : vector<8x16xf32>
      %387 = tpu.matmul %386, %373, %cst_201 {dimension_numbers = #tpu.dot_dimension_numbers<[1], [0], [0], [1], [0, 0, 1, 1], [], []>} : vector<8x8xf32>, vector<8x16xf32>, vector<8x16xf32> -> vector<8x16xf32>
      %c640_202 = arith.constant 640 : index
      %c0_203 = arith.constant 0 : index
      %388 = vector.load %arg5[%c640_202, %c0_203] : memref<1144x32xf32, #tpu.memory_space<vmem>>, vector<16x32xf32>
      %cst_204 = arith.constant dense<0.000000e+00> : vector<8x32xf32>
      %389 = tpu.matmul %387, %388, %cst_204 {dimension_numbers = #tpu.dot_dimension_numbers<[1], [0], [0], [1], [0, 0, 1, 1], [], []>} : vector<8x16xf32>, vector<16x32xf32>, vector<8x32xf32> -> vector<8x32xf32>
      %390 = arith.addf %358, %389 : vector<8x32xf32>
      %391 = tpu.concatenate %326, %390 in 0 : vector<8x32xf32>, vector<8x32xf32> -> vector<16x32xf32>
      %392 = arith.addf %240, %391 : vector<16x32xf32>
      %c656 = arith.constant 656 : index
      %c0_205 = arith.constant 0 : index
      %393 = vector.load %arg5[%c656, %c0_205] : memref<1144x32xf32, #tpu.memory_space<vmem>>, vector<1x32xf32>
      %394 = vector.broadcast %393 : vector<1x32xf32> to vector<16x32xf32>
      %395 = arith.addf %392, %394 : vector<16x32xf32>
      %c680 = arith.constant 680 : index
      %c0_206 = arith.constant 0 : index
      %396 = vector.load %arg5[%c680, %c0_206] : memref<1144x32xf32, #tpu.memory_space<vmem>>, vector<1x32xf32>
      %c688 = arith.constant 688 : index
      %c0_207 = arith.constant 0 : index
      %397 = vector.load %arg5[%c688, %c0_207] : memref<1144x32xf32, #tpu.memory_space<vmem>>, vector<1x32xf32>
      %cst_208 = arith.constant dense<0.000000e+00> : vector<16xf32>
      %398 = vector.multi_reduction <add>, %395, %cst_208 [1] : vector<16x32xf32> to vector<16xf32>
      %399 = vector.shape_cast %398 : vector<16xf32> to vector<16x1xf32>
      %cst_209 = arith.constant 3.200000e+01 : f32
      %400 = vector.broadcast %cst_209 : f32 to vector<16x1xf32>
      %401 = arith.divf %399, %400 : vector<16x1xf32>
      %402 = vector.broadcast %401 : vector<16x1xf32> to vector<16x32xf32>
      %403 = arith.subf %395, %402 : vector<16x32xf32>
      %404 = arith.mulf %403, %403 : vector<16x32xf32>
      %cst_210 = arith.constant dense<0.000000e+00> : vector<16xf32>
      %405 = vector.multi_reduction <add>, %404, %cst_210 [1] : vector<16x32xf32> to vector<16xf32>
      %406 = vector.shape_cast %405 : vector<16xf32> to vector<16x1xf32>
      %cst_211 = arith.constant 3.200000e+01 : f32
      %407 = vector.broadcast %cst_211 : f32 to vector<16x1xf32>
      %408 = arith.divf %406, %407 : vector<16x1xf32>
      %cst_212 = arith.constant 9.99999974E-6 : f32
      %409 = vector.broadcast %cst_212 : f32 to vector<16x1xf32>
      %410 = arith.addf %408, %409 : vector<16x1xf32>
      %411 = math.rsqrt %410 : vector<16x1xf32>
      %412 = vector.broadcast %411 : vector<16x1xf32> to vector<16x32xf32>
      %413 = arith.mulf %403, %412 : vector<16x32xf32>
      %414 = vector.broadcast %396 : vector<1x32xf32> to vector<16x32xf32>
      %415 = arith.mulf %413, %414 : vector<16x32xf32>
      %416 = vector.broadcast %397 : vector<1x32xf32> to vector<16x32xf32>
      %417 = arith.addf %415, %416 : vector<16x32xf32>
      %c120 = arith.constant 120 : index
      %c0_213 = arith.constant 0 : index
      %418 = vector.load %arg6[%c120, %c0_213] : memref<160x128xf32, #tpu.memory_space<vmem>>, vector<32x128xf32>
      %cst_214 = arith.constant dense<0.000000e+00> : vector<16x128xf32>
      %419 = tpu.matmul %417, %418, %cst_214 {dimension_numbers = #tpu.dot_dimension_numbers<[1], [0], [0], [1], [0, 0, 1, 1], [], []>} : vector<16x32xf32>, vector<32x128xf32>, vector<16x128xf32> -> vector<16x128xf32>
      %c152 = arith.constant 152 : index
      %c0_215 = arith.constant 0 : index
      %420 = vector.load %arg6[%c152, %c0_215] : memref<160x128xf32, #tpu.memory_space<vmem>>, vector<1x128xf32>
      %421 = vector.broadcast %420 : vector<1x128xf32> to vector<16x128xf32>
      %422 = arith.addf %419, %421 : vector<16x128xf32>
      %cst_216 = arith.constant 5.000000e-01 : f32
      %423 = vector.broadcast %cst_216 : f32 to vector<16x128xf32>
      %424 = arith.mulf %423, %422 : vector<16x128xf32>
      %cst_217 = arith.constant 0.707106769 : f32
      %425 = vector.broadcast %cst_217 : f32 to vector<16x128xf32>
      %426 = arith.mulf %422, %425 : vector<16x128xf32>
      %427 = math.absf %426 : vector<16x128xf32>
      %cst_218 = arith.constant 0.327591091 : f32
      %428 = vector.broadcast %cst_218 : f32 to vector<16x128xf32>
      %429 = arith.mulf %428, %427 : vector<16x128xf32>
      %cst_219 = arith.constant 1.000000e+00 : f32
      %430 = vector.broadcast %cst_219 : f32 to vector<16x128xf32>
      %431 = arith.addf %430, %429 : vector<16x128xf32>
      %cst_220 = arith.constant 1.000000e+00 : f32
      %432 = vector.broadcast %cst_220 : f32 to vector<16x128xf32>
      %433 = arith.divf %432, %431 : vector<16x128xf32>
      %cst_221 = arith.constant 1.06140542 : f32
      %434 = vector.broadcast %cst_221 : f32 to vector<16x128xf32>
      %435 = arith.mulf %434, %433 : vector<16x128xf32>
      %cst_222 = arith.constant -1.45315206 : f32
      %436 = vector.broadcast %cst_222 : f32 to vector<16x128xf32>
      %437 = arith.addf %435, %436 : vector<16x128xf32>
      %438 = arith.mulf %437, %433 : vector<16x128xf32>
      %cst_223 = arith.constant 1.42141378 : f32
      %439 = vector.broadcast %cst_223 : f32 to vector<16x128xf32>
      %440 = arith.addf %438, %439 : vector<16x128xf32>
      %441 = arith.mulf %440, %433 : vector<16x128xf32>
      %cst_224 = arith.constant -0.284496725 : f32
      %442 = vector.broadcast %cst_224 : f32 to vector<16x128xf32>
      %443 = arith.addf %441, %442 : vector<16x128xf32>
      %444 = arith.mulf %443, %433 : vector<16x128xf32>
      %cst_225 = arith.constant 0.254829586 : f32
      %445 = vector.broadcast %cst_225 : f32 to vector<16x128xf32>
      %446 = arith.addf %444, %445 : vector<16x128xf32>
      %447 = arith.mulf %446, %433 : vector<16x128xf32>
      %cst_226 = arith.constant 0.000000e+00 : f32
      %448 = vector.broadcast %cst_226 : f32 to vector<16x128xf32>
      %449 = arith.subf %448, %427 : vector<16x128xf32>
      %450 = arith.mulf %449, %427 : vector<16x128xf32>
      %451 = math.exp %450 : vector<16x128xf32>
      %452 = arith.mulf %447, %451 : vector<16x128xf32>
      %cst_227 = arith.constant 1.000000e+00 : f32
      %453 = vector.broadcast %cst_227 : f32 to vector<16x128xf32>
      %454 = arith.subf %453, %452 : vector<16x128xf32>
      %cst_228 = arith.constant 0.000000e+00 : f32
      %455 = vector.broadcast %cst_228 : f32 to vector<16x128xf32>
      %456 = arith.cmpf oge, %426, %455 : vector<16x128xf32>
      %cst_229 = arith.constant 0.000000e+00 : f32
      %457 = vector.broadcast %cst_229 : f32 to vector<16x128xf32>
      %458 = arith.subf %457, %454 : vector<16x128xf32>
      %459 = arith.select %456, %454, %458 : vector<16x128xi1>, vector<16x128xf32>
      %cst_230 = arith.constant 1.000000e+00 : f32
      %460 = vector.broadcast %cst_230 : f32 to vector<16x128xf32>
      %461 = arith.addf %460, %459 : vector<16x128xf32>
      %462 = arith.mulf %424, %461 : vector<16x128xf32>
      %c696_231 = arith.constant 696 : index
      %c0_232 = arith.constant 0 : index
      %463 = vector.load %arg5[%c696_231, %c0_232] : memref<1144x32xf32, #tpu.memory_space<vmem>>, vector<128x32xf32>
      %cst_233 = arith.constant dense<0.000000e+00> : vector<16x32xf32>
      %464 = tpu.matmul %462, %463, %cst_233 {dimension_numbers = #tpu.dot_dimension_numbers<[1], [0], [0], [1], [0, 0, 1, 1], [], []>} : vector<16x128xf32>, vector<128x32xf32>, vector<16x32xf32> -> vector<16x32xf32>
      %465 = arith.addf %395, %464 : vector<16x32xf32>
      %c824_234 = arith.constant 824 : index
      %c0_235 = arith.constant 0 : index
      %466 = vector.load %arg5[%c824_234, %c0_235] : memref<1144x32xf32, #tpu.memory_space<vmem>>, vector<1x32xf32>
      %467 = vector.broadcast %466 : vector<1x32xf32> to vector<16x32xf32>
      %468 = arith.addf %465, %467 : vector<16x32xf32>
      %c1096 = arith.constant 1096 : index
      %c0_236 = arith.constant 0 : index
      %469 = vector.load %arg5[%c1096, %c0_236] : memref<1144x32xf32, #tpu.memory_space<vmem>>, vector<1x32xf32>
      %c1104 = arith.constant 1104 : index
      %c0_237 = arith.constant 0 : index
      %470 = vector.load %arg5[%c1104, %c0_237] : memref<1144x32xf32, #tpu.memory_space<vmem>>, vector<1x32xf32>
      %cst_238 = arith.constant dense<0.000000e+00> : vector<16xf32>
      %471 = vector.multi_reduction <add>, %468, %cst_238 [1] : vector<16x32xf32> to vector<16xf32>
      %472 = vector.shape_cast %471 : vector<16xf32> to vector<16x1xf32>
      %cst_239 = arith.constant 3.200000e+01 : f32
      %473 = vector.broadcast %cst_239 : f32 to vector<16x1xf32>
      %474 = arith.divf %472, %473 : vector<16x1xf32>
      %475 = vector.broadcast %474 : vector<16x1xf32> to vector<16x32xf32>
      %476 = arith.subf %468, %475 : vector<16x32xf32>
      %477 = arith.mulf %476, %476 : vector<16x32xf32>
      %cst_240 = arith.constant dense<0.000000e+00> : vector<16xf32>
      %478 = vector.multi_reduction <add>, %477, %cst_240 [1] : vector<16x32xf32> to vector<16xf32>
      %479 = vector.shape_cast %478 : vector<16xf32> to vector<16x1xf32>
      %cst_241 = arith.constant 3.200000e+01 : f32
      %480 = vector.broadcast %cst_241 : f32 to vector<16x1xf32>
      %481 = arith.divf %479, %480 : vector<16x1xf32>
      %cst_242 = arith.constant 9.99999974E-6 : f32
      %482 = vector.broadcast %cst_242 : f32 to vector<16x1xf32>
      %483 = arith.addf %481, %482 : vector<16x1xf32>
      %484 = math.rsqrt %483 : vector<16x1xf32>
      %485 = vector.broadcast %484 : vector<16x1xf32> to vector<16x32xf32>
      %486 = arith.mulf %476, %485 : vector<16x32xf32>
      %487 = vector.broadcast %469 : vector<1x32xf32> to vector<16x32xf32>
      %488 = arith.mulf %486, %487 : vector<16x32xf32>
      %489 = vector.broadcast %470 : vector<1x32xf32> to vector<16x32xf32>
      %490 = arith.addf %488, %489 : vector<16x32xf32>
      %c0_243 = arith.constant 0 : index
      %c0_244 = arith.constant 0 : index
      %491 = vector.load %arg3[%c0_243, %c0_244] : memref<2x16xf32, #tpu.memory_space<vmem>>, vector<2x16xf32>
      %cst_245 = arith.constant dense<0.000000e+00> : vector<2x32xf32>
      %492 = tpu.matmul %491, %490, %cst_245 {dimension_numbers = #tpu.dot_dimension_numbers<[1], [0], [0], [1], [0, 0, 1, 1], [], []>} : vector<2x16xf32>, vector<16x32xf32>, vector<2x32xf32> -> vector<2x32xf32>
      %c1112 = arith.constant 1112 : index
      %c0_246 = arith.constant 0 : index
      %493 = vector.load %arg5[%c1112, %c0_246] : memref<1144x32xf32, #tpu.memory_space<vmem>>, vector<32x32xf32>
      %cst_247 = arith.constant dense<0.000000e+00> : vector<2x32xf32>
      %494 = tpu.matmul %492, %493, %cst_247 {dimension_numbers = #tpu.dot_dimension_numbers<[1], [0], [0], [1], [0, 0, 1, 1], [], []>} : vector<2x32xf32>, vector<32x32xf32>, vector<2x32xf32> -> vector<2x32xf32>
      %495 = arith.mulf %494, %494 : vector<2x32xf32>
      %cst_248 = arith.constant dense<0.000000e+00> : vector<2xf32>
      %496 = vector.multi_reduction <add>, %495, %cst_248 [1] : vector<2x32xf32> to vector<2xf32>
      %497 = vector.shape_cast %496 : vector<2xf32> to vector<2x1xf32>
      %498 = math.sqrt %497 : vector<2x1xf32>
      %cst_249 = arith.constant 9.99999996E-13 : f32
      %499 = vector.broadcast %cst_249 : f32 to vector<2x1xf32>
      %500 = arith.maximumf %498, %499 : vector<2x1xf32>
      %501 = vector.broadcast %500 : vector<2x1xf32> to vector<2x32xf32>
      %502 = arith.divf %494, %501 : vector<2x32xf32>
      %cst_250 = arith.constant 0.000000e+00 : f32
      %503 = vector.broadcast %cst_250 : f32 to vector<8x128xf32>
      %c0_251 = arith.constant 0 : index
      %c0_252 = arith.constant 0 : index
      %504 = vector.load %arg7[%c0_251, %c0_252] : memref<8x128xf32, #tpu.memory_space<vmem>>, vector<8x128xf32>
      tpu.vector_store %arg7[%c0_251, %c0_252], %503 {strides = array<i32>} : memref<8x128xf32, #tpu.memory_space<vmem>>, vector<8x128xf32>,
      %c0_253 = arith.constant 0 : index
      %c0_254 = arith.constant 0 : index
      %505 = vector.load %arg7[%c0_253, %c0_254] : memref<8x128xf32, #tpu.memory_space<vmem>>, vector<2x32xf32>
      tpu.vector_store %arg7[%c0_253, %c0_254], %502 {strides = array<i32>} : memref<8x128xf32, #tpu.memory_space<vmem>>, vector<2x32xf32>,
    } else {
    }
    return
  }
  func.func @transform_0(%arg0: i32) -> (i32, i32) {
    %c0_i32 = arith.constant 0 : i32
    %c0_i32_0 = arith.constant 0 : i32
    %c0_i32_1 = arith.constant 0 : i32
    return %c0_i32, %c0_i32_0 : i32, i32
  }
  func.func @transform_1(%arg0: i32) -> (i32, i32) {
    %c0_i32 = arith.constant 0 : i32
    %c0_i32_0 = arith.constant 0 : i32
    %c0_i32_1 = arith.constant 0 : i32
    return %c0_i32, %c0_i32_0 : i32, i32
  }
  func.func @transform_2(%arg0: i32) -> (i32, i32) {
    %c0_i32 = arith.constant 0 : i32
    %c0_i32_0 = arith.constant 0 : i32
    %c0_i32_1 = arith.constant 0 : i32
    return %c0_i32, %c0_i32_0 : i32, i32
  }
  func.func @transform_3(%arg0: i32) -> (i32, i32) {
    %c0_i32 = arith.constant 0 : i32
    %c0_i32_0 = arith.constant 0 : i32
    %c0_i32_1 = arith.constant 0 : i32
    return %c0_i32, %c0_i32_0 : i32, i32
  }
  func.func @transform_4(%arg0: i32) -> (i32, i32) {
    %c0_i32 = arith.constant 0 : i32
    %c0_i32_0 = arith.constant 0 : i32
    %c0_i32_1 = arith.constant 0 : i32
    return %c0_i32, %c0_i32_0 : i32, i32
  }
  func.func @transform_5(%arg0: i32) -> (i32, i32) {
    %c0_i32 = arith.constant 0 : i32
    %c0_i32_0 = arith.constant 0 : i32
    %c0_i32_1 = arith.constant 0 : i32
    return %c0_i32, %c0_i32_0 : i32, i32
  }
  func.func @transform_6(%arg0: i32) -> (i32, i32) {
    %c0_i32 = arith.constant 0 : i32
    %c0_i32_0 = arith.constant 0 : i32
    return %arg0, %c0_i32 : i32, i32
  }
}

</mosaic_0001>

<bundles_post_ra>
// kernel: forward.1
= control target key start
LH: loop header
LB: loop body
LE: loop exit
PB: predicated region body
PF: predicated region fallthrough
CT: control target
= control target key end

     0   :  { %s11449_s21 = smov 0   ;;  %s13820_s0 = inlined_call_operand.vmem [shape: f32[16,192], index: 0, kind: input, shape index: {}]   ;;  %s13821_s1 = inlined_call_operand.vmem [shape: f32[16,32], index: 1, kind: input, shape index: {}]   ;;  %s13822_s2 = inlined_call_operand.vmem [shape: f32[2,16], index: 2, kind: input, shape index: {}]   ;;  %s13823_s3 = inlined_call_operand.vmem [shape: f32[960,16], index: 3, kind: input, shape index: {}]   ;;  %s13824_s4 = inlined_call_operand.vmem [shape: f32[1144,32], index: 4, kind: input, shape index: {}]   ;;  %s13825_s5 = inlined_call_operand.vmem [shape: f32[160,128], index: 5, kind: input, shape index: {}]   ;;  %s13826_s6 = inlined_call_operand.vmem [shape: f32[16,128], index: 6, kind: output, shape index: {}]  }
   0x1 LB: > { %s11455_s22 = sadd.s32 4294967295, %s11408_s21   ;;  %p9566_p0 = scmp.ge.s32.totalorder %s11408_s21, 1  ;;  %s11408_s21 = sphi %s11449_s21, %s16_s21  }
   0x2   : > { %p202_p1 = scmp.lt.s32.totalorder %s11408_s21, 3 }
   0x4   : > { %p203_p2 = pnand %p9566_p0, %p202_p1 }
   0x5   : > { %p226_p3 = scmp.lt.s32.totalorder (!%p203_p2), %s11455_s22, 1  ;;  %p9568_p4 = scmp.ne.s32.totalorder (!%p203_p2), %s11455_s22, 0 }
   0x6   : > { %206 = sbr.rel (%p203_p2) target bundleno = 20347 (0x4f7b), region = 44 }
   0xb   : > { %s227_s23 = scalar_select %p226_p3, %s11455_s22, 1 }
   0xc   : > { %233 = sbr.rel (%p9568_p4) target bundleno = 10454 (0x28d6), region = 48 }
   0xd   : > { %s9567_s24 = sshll.u32 %s227_s23, 3 }
   0xe   : > { %s11464_s27 = scalar_lea.vmem %s13826_s6, %s9567_s24 }
  0x11   : > { %v254_v0 = vld [vmem:[%s13824_s4 + $0x3b8] sm:$0xff]  ;;  %v11410_v1 = vmov 0.0   ;;  %v253_v2 = vld [vmem:[%s13824_s4 + $0x3b0] sm:$0xff]  ;;  %v252_v3 = vld [vmem:[%s13824_s4 + $0x3a8] sm:$0xff]  ;;  %vm263_vm0 = vcmask 523264   ;;  %vm347_vm1 = vcmask 261120  }
  0x12   : > { %270 = vmatprep.subr.mxu0 %v11410_v1  ;;  %4942 = vst [vmem:[%s11464_s27] sm:$0xff] %v11410_v1  ;;  %10231 = vmatprep.subr.mxu1 %v11410_v1  ;;  %v251_v4 = vld [vmem:[%s13824_s4 + $0x3a0] sm:$0xff]  ;;  %v250_v5 = vld [vmem:[%s13824_s4 + $0x398] sm:$0xff]  ;;  %v236_v6 = vld [vmem:[%s13820_s0 + $0x8] sm:$0xff]  ;;  %vm11411_vm2 = vmmov 0   ;;  %vm671_vm3 = vcmask 130048   ;;  %vm750_vm5 = vcmask 64512  }
  0x13   : > { %271 = vmatpush1.msra.mxu0 %v254_v0  ;;  %v249_v7 = vld [vmem:[%s13824_s4 + $0x390] sm:$0xff]  ;;  %9569 = vmatprep.mubr.msk.f32.mxu0 %vm263_vm0, %v236_v6  ;;  %v248_v8 = vld [vmem:[%s13824_s4 + $0x388] sm:$0xff]  ;;  %v247_v9 = vld [vmem:[%s13824_s4 + $0x380] sm:$0xff]  ;;  %vm4827_vm11 = vcmask 254976  }
  0x14   : > { %272 = vmatprep.subr.mxu0 %v11410_v1  ;;  %v246_v10 = vld [vmem:[%s13824_s4 + $0x378] sm:$0xff]  ;;  %v245_v11 = vld [vmem:[%s13824_s4 + $0x370] sm:$0xff]  ;;  %v244_v12 = vld [vmem:[%s13824_s4 + $0x368] sm:$0xff]  ;;  %10239 = vmatprep.mubr.msk.f32.mxu1 %vm11411_vm2, %v11410_v1 }
  0x15   : > { %273 = vmatpush1.msra.mxu0 %v253_v2  ;;  %v243_v13 = vld [vmem:[%s13824_s4 + $0x360] sm:$0xff]  ;;  %v242_v14 = vld [vmem:[%s13824_s4 + $0x358] sm:$0xff]  ;;  %v241_v15 = vld [vmem:[%s13824_s4 + $0x350] sm:$0xff] }
  0x16   : > { %274 = vmatprep.subr.mxu0 %v11410_v1  ;;  %v240_v16 = vld [vmem:[%s13824_s4 + $0x348] sm:$0xff]  ;;  %v239_v17 = vld [vmem:[%s13824_s4 + $0x340] sm:$0xff]  ;;  %v262_v18 = vld [vmem:[%s13824_s4 + $0x3f8] sm:$0xff] }
  0x17   : > { %275 = vmatpush1.msra.mxu0 %v252_v3  ;;  %v261_v19 = vld [vmem:[%s13824_s4 + $0x3f0] sm:$0xff]  ;;  %v260_v20 = vld [vmem:[%s13824_s4 + $0x3e8] sm:$0xff]  ;;  %v259_v21 = vld [vmem:[%s13824_s4 + $0x3e0] sm:$0xff] }
  0x18   : > { %276 = vmatprep.subr.mxu0 %v11410_v1  ;;  %v258_v22 = vld [vmem:[%s13824_s4 + $0x3d8] sm:$0xff]  ;;  %v257_v23 = vld [vmem:[%s13824_s4 + $0x3d0] sm:$0xff]  ;;  %v256_v24 = vld [vmem:[%s13824_s4 + $0x3c8] sm:$0xff] }
  0x19   : > { %277 = vmatpush1.msra.mxu0 %v251_v4  ;;  %v255_v25 = vld [vmem:[%s13824_s4 + $0x3c0] sm:$0xff]  ;;  %v11585_v41 = vld [vmem:[%s13824_s4 + $0x408] ss:$0 sm:$0xff]  ;;  %v11590_v43 = vld [vmem:[%s13824_s4 + $0x410] ss:$0 sm:$0xff] }
  0x1a   : > { %278 = vmatprep.subr.mxu0 %v11410_v1  ;;  %v235_v26 = vld [vmem:[%s13820_s0] sm:$0xff]  ;;  %v11603_v52 = vld [vmem:[%s13823_s3 + $0x18] sm:$0xff]  ;;  %v11617_v54 = vld [vmem:[%s13823_s3 + $0x10] sm:$0xff] }
  0x1b   : > { %279 = vmatpush1.msra.mxu0 %v250_v5  ;;  %v11577_v27 = vld [vmem:[%s13824_s4 + $0x400] sm:$0xff]  ;;  %v11608_v53 = vld [vmem:[%s13823_s3 + $0x38] sm:$0xff]  ;;  %v11622_v55 = vld [vmem:[%s13823_s3 + $0x30] sm:$0xff] }
  0x1c   : > { %280 = vmatprep.subr.mxu0 %v11410_v1  ;;  %10232 = vmatpush3.msra.mxu1 %v11608_v53  ;;  %v238_v56 = vld [vmem:[%s13820_s0 + $0x18] sm:$0xff]  ;;  %v237_v57 = vld [vmem:[%s13820_s0 + $0x10] sm:$0xff]  ;;  %v11637_v58 = vld [vmem:[%s13823_s3 + $0x8] sm:$0xff] }
  0x1d   : > { %281 = vmatpush1.msra.mxu0 %v249_v7  ;;  %10233 = vmatprep.subr.mxu1 %v11410_v1  ;;  %v11642_v59 = vld [vmem:[%s13823_s3 + $0x28] sm:$0xff]  ;;  %v11648_v60 = vld [vmem:[%s13823_s3] sm:$0xff]  ;;  %v11675_v5 = vld [vmem:[%s13824_s4 + $0x30] ss:$0 sm:$0xff] }
  0x1e   : > { %282 = vmatprep.subr.mxu0 %v11410_v1  ;;  %10234 = vmatpush3.msra.mxu1 %v11622_v55  ;;  %v11653_v61 = vld [vmem:[%s13823_s3 + $0x20] sm:$0xff]  ;;  %v11670_v3 = vld [vmem:[%s13824_s4 + $0x28] ss:$0 sm:$0xff] }
  0x1f   : > { %283 = vmatpush1.msra.mxu0 %v248_v8  ;;  %10235 = vmatprep.subr.mxu1 %v11410_v1  ;;  %v11684_v8 = vld [vmem:[%s13823_s3 + $0x58] sm:$0xff] }
  0x20   : > { %284 = vmatprep.subr.mxu0 %v11410_v1  ;;  %10236 = vmatpush3.msra.mxu1 %v11642_v59 }
  0x21   : > { %285 = vmatpush1.msra.mxu0 %v247_v9  ;;  %10237 = vmatprep.subr.mxu1 %v11410_v1  ;;  %v11689_v9 = vld [vmem:[%s13823_s3 + $0xd0] sm:$0xff] }
  0x22   : > { %286 = vmatprep.subr.mxu0 %v11410_v1  ;;  %10238 = vmatpush3.msra.mxu1 %v11653_v61 }
  0x23   : > { %287 = vmatpush1.msra.mxu0 %v246_v10  ;;  %10242 = vmatprep.subr.mxu1 %v11410_v1  ;;  %v11698_v10 = vld [vmem:[%s13823_s3 + $0x50] sm:$0xff] }
  0x24   : > { %288 = vmatprep.subr.mxu0 %v11410_v1 }
  0x25   : > { %289 = vmatpush1.msra.mxu0 %v245_v11  ;;  %v11703_v11 = vld [vmem:[%s13823_s3 + $0xc8] sm:$0xff] }
  0x26   : > { %290 = vmatprep.subr.mxu0 %v11410_v1 }
  0x27   : > { %291 = vmatpush1.msra.mxu0 %v244_v12  ;;  %v11712_v12 = vld [vmem:[%s13823_s3 + $0x48] sm:$0xff] }
  0x28   : > { %292 = vmatprep.subr.mxu0 %v11410_v1 }
  0x29   : > { %293 = vmatpush1.msra.mxu0 %v243_v13  ;;  %v11717_v13 = vld [vmem:[%s13823_s3 + $0xc0] sm:$0xff] }
  0x2a   : > { %294 = vmatprep.subr.mxu0 %v11410_v1 }
  0x2b   : > { %295 = vmatpush1.msra.mxu0 %v242_v14  ;;  %v11726_v14 = vld [vmem:[%s13823_s3 + $0x40] sm:$0xff] }
  0x2c   : > { %296 = vmatprep.subr.mxu0 %v11410_v1 }
  0x2d   : > { %297 = vmatpush1.msra.mxu0 %v241_v15  ;;  %v11733_v15 = vld [vmem:[%s13823_s3 + $0xb8] sm:$0xff] }
  0x2e   : > { %298 = vmatprep.subr.mxu0 %v11410_v1 }
  0x2f   : > { %299 = vmatpush1.msra.mxu0 %v240_v16 }
  0x30   : > { %300 = vmatprep.subr.mxu0 %v11410_v1 }
  0x31   : > { %301 = vmatpush1.msra.mxu0 %v239_v17 }
  0x32   : > { %318 = vmatprep.subr.mxu0 %v11410_v1 }
  0x33   : > { %319 = vmatpush2.msra.mxu0 %v262_v18  ;;  %v11756_v18 = vld [vmem:[%s13823_s3 + $0x68] ss:$0 sm:$0xff] }
  0x34   : > { %320 = vmatprep.subr.mxu0 %v11410_v1 }
  0x35   : > { %321 = vmatpush2.msra.mxu0 %v261_v19 }
  0x36   : > { %322 = vmatprep.subr.mxu0 %v11410_v1 }
  0x37   : > { %323 = vmatpush2.msra.mxu0 %v260_v20 }
  0x38   : > { %324 = vmatprep.subr.mxu0 %v11410_v1 }
  0x39   : > { %325 = vmatpush2.msra.mxu0 %v259_v21  ;;  %v11761_v21 = vld [vmem:[%s13823_s3 + $0x60] ss:$0 sm:$0xff] }
  0x3a   : > { %326 = vmatprep.subr.mxu0 %v11410_v1 }
  0x3b   : > { %327 = vmatpush2.msra.mxu0 %v258_v22 }
  0x3c   : > { %328 = vmatprep.subr.mxu0 %v11410_v1 }
  0x3d   : > { %329 = vmatpush2.msra.mxu0 %v257_v23 }
  0x3e   : > { %330 = vmatprep.subr.mxu0 %v11410_v1 }
  0x3f   : > { %331 = vmatpush2.msra.mxu0 %v256_v24 }
  0x40   : > { %332 = vmatprep.subr.mxu0 %v11410_v1 }
  0x41   : > { %333 = vmatpush2.msra.mxu0 %v255_v25 }
  0x42   : > { %335 = vmatmul.mubr.f32.vlgmr.msra.gmra.mxu0 %v235_v26  ;;  %10220 = vmatprep.subr.mxu0 %v11410_v1  ;;  %v11771_v26 = vld [vmem:[%s13823_s3 + $0x70] ss:$0 sm:$0xff] }
  0x43   : > { %10221 = vmatpush3.msra.mxu0 %v11603_v52  ;;  %9570 = vmatprep.mubr.msk.f32.mxu0 %vm263_vm0, %v238_v56 }
  0x44   : > { %10222 = vmatprep.subr.mxu0 %v11410_v1 }
  0x45   : > { %10223 = vmatpush3.msra.mxu0 %v11617_v54 }
  0x46   : > { %10224 = vmatprep.subr.mxu0 %v11410_v1  ;;  %340 = vmatmul.mubr.f32.gmra.mxu0 %v237_v57 }
  0x47   : > { %10225 = vmatpush3.msra.mxu0 %v11637_v58  ;;  %10228 = vmatprep.mubr.msk.f32.mxu0 %vm11411_vm2, %v11410_v1 }
  0x48   : > { %10226 = vmatprep.subr.mxu0 %v11410_v1 }
  0x49   : > { %10227 = vmatpush3.msra.mxu0 %v11648_v60 }
  0x4a   : > { %10285 = vmatprep.subr.mxu0 %v11410_v1 }
 0x102   : > { %v336_v28 = vpop.f32.mrf.mxu0 }
 0x103   : > { %v337_v29 = vadd.f32 %v336_v28, %v11577_v27 }
 0x104   : > { %v338_v30 = vpop.f32.mrf.mxu0 }
 0x105   : > { %v348_v31 = vsel %vm347_vm1, %v337_v29, 0.0 }
 0x106   : > { %349 = vadd.xlane.f32.xlu0 %v348_v31  ;;  %v341_v16 = vpop.f32.mrf.mxu0 }
 0x108   : > { %v343_v17 = vpop.f32.mrf.mxu0 }
 0x109   : > { %v11821_v17 = vld [vmem:[%s13823_s3 + $0x78] sm:$0xff] }
 0x18f   : > { %v350_v32 = vpop.xlane.xlu0 %349 }
 0x190   : > { %v355_v33 = vmul.f32 0.03125, %v350_v32 }
 0x192   : > { %v357_v34 = vsub.f32 %v337_v29, %v355_v33  ;;  %v387_v33 = vlaneseq }
 0x194   : > { %v359_v35 = vmul.f32 %v357_v34, %v357_v34 }
 0x196   : > { %v361_v36 = vsel %vm347_vm1, %v359_v35, 0.0 }
 0x197   : > { %362 = vadd.xlane.f32.xlu0 %v361_v36 }
 0x220   : > { %v363_v37 = vpop.xlane.xlu0 %362 }
 0x221   : > { %v367_v38 = vmul.f32 0.03125, %v363_v37 }
 0x223   : > { %v369_v39 = vadd.f32 1e-05, %v367_v38 }
 0x225   : > { %11252 = vrsqrt.f32 %v369_v39 }
 0x232   : > { %v11253_v40 = vpop.eup %11252 }
 0x233   : > { %v373_v42 = vmul.f32 %v11253_v40, %v357_v34  ;;  %v11780_v34 = vand.u32 127, %v387_v33 }
 0x235   : > { %v379_v44 = vmul.f32 %v11585_v41, %v373_v42  ;;  %vm389_vm4 = vcmp.ge.s32.totalorder %v11780_v34, 5 }
 0x236   : > { %v11784_v36 = vsel %vm389_vm4, -1e+09, %v11410_v1 }
 0x237   : > { %v11594_v45 = vadd.f32 %v11590_v43, %v379_v44 }
 0x239   : > { %v393_v46 = vsel %vm347_vm1, %v11594_v45, 0.0 }
 0x23a   : > { %394 = vadd.xlane.f32.xlu1 %v393_v46 }
 0x2c3   : > { %v395_v47 = vpop.xlane.xlu1 %394 }
 0x2c4   : > { %v399_v48 = vmul.f32 0.03125, %v395_v47 }
 0x2c6   : > { %v401_v49 = vsub.f32 %v11594_v45, %v399_v48  ;;  %v342_v48 = vadd.f32 %v341_v16, %v11577_v27  ;;  %v11814_v16 = vld [vmem:[%s13823_s3 + $0x80] sm:$0xff] }
 0x2c8   : > { %v403_v50 = vmul.f32 %v401_v49, %v401_v49 }
 0x2ca   : > { %v405_v51 = vsel %vm347_vm1, %v403_v50, 0.0  ;;  %v351_v50 = vsel %vm347_vm1, %v342_v48, 0.0 }
 0x2cb   : > { %406 = vadd.xlane.f32.xlu1 %v405_v51 }
 0x354   : > { %v407_v62 = vpop.xlane.xlu1 %406 }
 0x355   : > { %v411_v63 = vmul.f32 0.03125, %v407_v62 }
 0x357   : > { %v413_v0 = vadd.f32 1e-05, %v411_v63 }
 0x359   : > { %11254 = vrsqrt.f32 %v413_v0 }
 0x366   : > { %v11255_v2 = vpop.eup %11254 }
 0x367   : > { %v417_v4 = vmul.f32 %v11255_v2, %v401_v49 }
 0x369   : > { %v423_v6 = vmul.f32 %v11670_v3, %v417_v4  ;;  %v11799_v4 = vld [vmem:[%s13823_s3 + $0x90] sm:$0xff] }
 0x36b   : > { %v11679_v7 = vadd.f32 %v11675_v5, %v423_v6  ;;  %v11805_v6 = vld [vmem:[%s13823_s3 + $0x88] sm:$0xff] }
 0x36d   : > { %10229 = vmatmul.mubr.msk.f32.vlgmr.msra.gmra.mxu0 %vm347_vm1, %v11679_v7  ;;  %10240 = vmatmul.mubr.msk.f32.vlgmr.msra.gmra.mxu1 %vm347_vm1, %v11679_v7 }
 0x36e   : > { %10243 = vmatpush3.msra.mxu1 %v11684_v8  ;;  %10286 = vmatpush3.msra.mxu0 %v11689_v9 }
 0x36f   : > { %10244 = vmatprep.subr.mxu1 %v11410_v1  ;;  %10287 = vmatprep.subr.mxu0 %v11410_v1 }
 0x370   : > { %10245 = vmatpush3.msra.mxu1 %v11698_v10  ;;  %10288 = vmatpush3.msra.mxu0 %v11703_v11 }
 0x371   : > { %10246 = vmatprep.subr.mxu1 %v11410_v1  ;;  %10289 = vmatprep.subr.mxu0 %v11410_v1 }
 0x372   : > { %10247 = vmatpush3.msra.mxu1 %v11712_v12  ;;  %10290 = vmatpush3.msra.mxu0 %v11717_v13 }
 0x373   : > { %10248 = vmatprep.subr.mxu1 %v11410_v1  ;;  %10291 = vmatprep.subr.mxu0 %v11410_v1 }
 0x374   : > { %10249 = vmatpush3.msra.mxu1 %v11726_v14  ;;  %10250 = vmatprep.mubr.msk.f32.mxu1 %vm11411_vm2, %v11410_v1 }
 0x375   : > { %10292 = vmatpush3.msra.mxu0 %v11733_v15  ;;  %10293 = vmatprep.mubr.msk.f32.mxu0 %vm11411_vm2, %v11410_v1 }
 0x376   : > { %10251 = vmatmul.mubr.msk.f32.vlgmr.msra.gmra.mxu1 %vm347_vm1, %v11679_v7  ;;  %10294 = vmatmul.mubr.msk.f32.vlgmr.msra.gmra.mxu0 %vm347_vm1, %v11679_v7 }
 0x377   : > { %10253 = vmatprep.subr.mxu1 %v11410_v1  ;;  %10255 = vmatprep.mubr.msk.f32.mxu1 %vm11411_vm2, %v11410_v1 }
 0x378   : > { %10306 = vmatprep.subr.mxu0 %v11410_v1  ;;  %10310 = vmatprep.mubr.msk.f32.mxu0 %vm11411_vm2, %v11410_v1 }
 0x42d   : > { %v509_v19 = vpop.f32.mrf.mxu0  ;;  %v588_v20 = vpop.f32.mrf.mxu1 }
 0x42e   : > { %v589_v22 = vadd.f32 %v11756_v18, %v588_v20  ;;  %v510_v25 = vadd.f32 %v11761_v21, %v509_v19  ;;  %v11828_v19 = vld [vmem:[%s13823_s3 + $0xb0] sm:$0xff]  ;;  %v11837_v20 = vld [vmem:[%s13823_s3 + $0xa8] sm:$0xff] }
 0x42f   : > { %v10230_v23 = vpop.f32.mrf.mxu0  ;;  %v10241_v24 = vpop.f32.mrf.mxu1 }
 0x430   : > { %10254 = vmatpush3.xpose.msk.msra.mxu1 %vm671_vm3, %v589_v22  ;;  %v11846_v22 = vld [vmem:[%s13823_s3 + $0xa0] sm:$0xff]  ;;  %v11853_v23 = vld [vmem:[%s13823_s3 + $0x98] sm:$0xff] }
 0x431   : > { %10258 = vmatprep.subr.mxu1 %v11410_v1 }
 0x433   : > { %10256 = vmatmul.mubr.msk.f32.vlgmr.msra.gmra.mxu1 %vm671_vm3, %v510_v25 }
 0x434   : > { %10260 = vmatprep.mubr.msk.f32.mxu1 %vm11411_vm2, %v11410_v1 }
 0x436   : > { %v667_v28 = vpop.f32.mrf.mxu1  ;;  %v11775_v29 = vpop.f32.mrf.mxu0 }
 0x437   : > { %v668_v30 = vadd.f32 %v11771_v26, %v667_v28 }
 0x438   : > { %v10252_v31 = vpop.f32.mrf.mxu1  ;;  %v10295_v32 = vpop.f32.mrf.mxu0 }
 0x439   : > { %10259 = vmatpush3.msra.mxu1 %v668_v30  ;;  %v11866_v31 = vld [vmem:[%s13823_s3 + $0xe0] ss:$0 sm:$0xff] }
 0x43a   : > { %10263 = vmatprep.subr.mxu1 %v11410_v1 }
 0x4f3   : > { %v744_v35 = vpop.f32.mrf.mxu1 }
 0x4f4   : > { %v748_v37 = vmul.f32 0.25, %v744_v35  ;;  %v11871_v35 = vld [vmem:[%s13823_s3 + $0xd8] ss:$0 sm:$0xff] }
 0x4f5   : > { %v10257_v38 = vpop.f32.mrf.mxu1 }
 0x4f6   : > { %v749_v39 = vadd.f32 %v748_v37, %v11784_v36  ;;  %v11877_v37 = vld [vmem:[%s13823_s3 + $0xe8] ss:$0 sm:$0xff] }
 0x4f8   : > { %v751_v40 = vsel %vm750_vm5, %v749_v39, -inf }
 0x4f9   : > { %752 = vmax.xlane.f32.xlu0 %v751_v40  ;;  %v1071_v40 = vadd.f32 %v11877_v37, %v11775_v29 }
 0x582   : > { %v753_v42 = vpop.xlane.xlu0 %752 }
 0x583   : > { %v754_v44 = vsub.f32 %v749_v39, %v753_v42 }
 0x585   : > { %v755_v46 = vmul.f32 1.442695, %v754_v44 }
 0x587   : > { %11256 = vpow2.f32 %v755_v46 }
 0x594   : > { %v11257_v47 = vpop.eup %11256 }
 0x595   : > { %v757_v49 = vsel %vm750_vm5, %v11257_v47, 0.0 }
 0x596   : > { %758 = vadd.xlane.f32.xlu1 %v757_v49 }
 0x59a   : > { %352 = vadd.xlane.f32.xlu1 %v351_v50 }
 0x61f   : > { %v759_v51 = vpop.xlane.xlu1 %758 }
 0x620   : > { %11258 = vrcp.f32 %v759_v51 }
 0x623   : > { %v353_v56 = vpop.xlane.xlu1 %352 }
 0x624   : > { %v356_v57 = vmul.f32 0.03125, %v353_v56 }
 0x626   : > { %v11791_v62 = vsub.f32 %v342_v48, %v356_v57 }
 0x628   : > { %v360_v63 = vmul.f32 %v11791_v62, %v11791_v62 }
 0x62a   : > { %v364_v0 = vsel %vm347_vm1, %v360_v63, 0.0 }
 0x62b   : > { %365 = vadd.xlane.f32.xlu1 %v364_v0 }
 0x62d   : > { %v11259_v2 = vpop.eup %11258 }
 0x62e   : > { %v761_v27 = vmul.f32 %v11259_v2, %v11257_v47 }
 0x630   : > { %10261 = vmatmul.mubr.msk.f32.vlgmr.msra.gmra.mxu1 %vm750_vm5, %v761_v27 }
 0x631   : > { %10264 = vmatpush3.msra.mxu1 %v11799_v4  ;;  %10271 = vmatprep.mubr.msk.f32.mxu1 %vm11411_vm2, %v11410_v1 }
 0x632   : > { %10265 = vmatprep.subr.mxu1 %v11410_v1 }
 0x633   : > { %10266 = vmatpush3.msra.mxu1 %v11805_v6 }
 0x634   : > { %10267 = vmatprep.subr.mxu1 %v11410_v1 }
 0x635   : > { %10268 = vmatpush3.msra.mxu1 %v11814_v16 }
 0x636   : > { %10269 = vmatprep.subr.mxu1 %v11410_v1 }
 0x637   : > { %10270 = vmatpush3.msra.mxu1 %v11821_v17 }
 0x638   : > { %10272 = vmatmul.mubr.msk.f32.vlgmr.msra.gmra.mxu1 %vm347_vm1, %v11679_v7  ;;  %10274 = vmatprep.subr.mxu1 %v11410_v1 }
 0x639   : > { %10275 = vmatpush3.msra.mxu1 %v11828_v19  ;;  %10282 = vmatprep.mubr.msk.f32.mxu1 %vm11411_vm2, %v11410_v1 }
 0x63a   : > { %10276 = vmatprep.subr.mxu1 %v11410_v1 }
 0x63b   : > { %10277 = vmatpush3.msra.mxu1 %v11837_v20 }
 0x63c   : > { %10278 = vmatprep.subr.mxu1 %v11410_v1 }
 0x63d   : > { %10279 = vmatpush3.msra.mxu1 %v11846_v22 }
 0x63e   : > { %10280 = vmatprep.subr.mxu1 %v11410_v1 }
 0x63f   : > { %10281 = vmatpush3.msra.mxu1 %v11853_v23 }
 0x640   : > { %10283 = vmatmul.mubr.msk.f32.vlgmr.msra.gmra.mxu1 %vm347_vm1, %v11679_v7  ;;  %10296 = vmatprep.subr.mxu1 %v11410_v1 }
 0x641   : > { %10298 = vmatprep.mubr.msk.f32.mxu1 %vm11411_vm2, %v11410_v1 }
 0x6b4   : > { %v366_v49 = vpop.xlane.xlu1 %365 }
 0x6b5   : > { %v368_v50 = vmul.f32 0.03125, %v366_v49 }
 0x6b7   : > { %v370_v51 = vadd.f32 1e-05, %v368_v50 }
 0x6b9   : > { %11260 = vrsqrt.f32 %v370_v51 }
 0x6c6   : > { %v11261_v63 = vpop.eup %11260 }
 0x6c7   : > { %v374_v0 = vmul.f32 %v11261_v63, %v11791_v62 }
 0x6c9   : > { %v380_v2 = vmul.f32 %v11585_v41, %v374_v0 }
 0x6f0   : > { %v831_v24 = vpop.f32.mrf.mxu1 }
 0x6f2   : > { %v10262_v25 = vpop.f32.mrf.mxu1 }
 0x6f8   : > { %v912_v28 = vpop.f32.mrf.mxu1 }
 0x6f9   : > { %v913_v39 = vadd.f32 %v11871_v35, %v912_v28  ;;  %v11894_v28 = vadd.f32 %v11590_v43, %v380_v2  ;;  %v11903_v43 = vld [vmem:[%s13824_s4 + $0x8] sm:$0xff] }
 0x6fa   : > { %v10273_v30 = vpop.f32.mrf.mxu1 }
 0x6fb   : > { %v396_v30 = vsel %vm347_vm1, %v11894_v28, 0.0 }
 0x700   : > { %v991_v32 = vpop.f32.mrf.mxu1 }
 0x701   : > { %v992_v7 = vadd.f32 %v11866_v31, %v991_v32 }
 0x702   : > { %v10284_v38 = vpop.f32.mrf.mxu1 }
 0x703   : > { %10297 = vmatpush3.xpose.msk.msra.mxu1 %vm671_vm3, %v992_v7 }
 0x704   : > { %10301 = vmatprep.subr.mxu1 %v11410_v1 }
 0x706   : > { %10299 = vmatmul.mubr.msk.f32.vlgmr.msra.gmra.mxu1 %vm671_vm3, %v913_v39 }
 0x707   : > { %10302 = vmatpush3.msra.mxu1 %v1071_v40  ;;  %10303 = vmatprep.mubr.msk.f32.mxu1 %vm11411_vm2, %v11410_v1 }
 0x708   : > { %10313 = vmatprep.subr.mxu1 %v11410_v1 }
 0x7c6   : > { %v1146_v42 = vpop.f32.mrf.mxu1 }
 0x7c7   : > { %v1150_v44 = vmul.f32 0.25, %v1146_v42 }
 0x7c8   : > { %v10300_v46 = vpop.f32.mrf.mxu1 }
 0x7c9   : > { %v1151_v47 = vadd.f32 %v1150_v44, %v11784_v36  ;;  %v11909_v44 = vld [vmem:[%s13824_s4] sm:$0xff] }
 0x7cb   : > { %v1152_v48 = vsel %vm750_vm5, %v1151_v47, -inf }
 0x7cc   : > { %1153 = vmax.xlane.f32.xlu0 %v1152_v48 }
 0x855   : > { %v1154_v29 = vpop.xlane.xlu0 %1153 }
 0x856   : > { %v1155_v56 = vsub.f32 %v1151_v47, %v1154_v29 }
 0x858   : > { %v1156_v57 = vmul.f32 1.442695, %v1155_v56 }
 0x85a   : > { %11262 = vpow2.f32 %v1156_v57 }
 0x867   : > { %v11263_v27 = vpop.eup %11262 }
 0x868   : > { %v1158_v25 = vsel %vm750_vm5, %v11263_v27, 0.0 }
 0x869   : > { %1159 = vadd.xlane.f32.xlu0 %v1158_v25 }
 0x86d   : > { %397 = vadd.xlane.f32.xlu0 %v396_v30 }
 0x8f2   : > { %v1160_v32 = vpop.xlane.xlu0 %1159 }
 0x8f3   : > { %11264 = vrcp.f32 %v1160_v32 }
 0x8f6   : > { %v398_v7 = vpop.xlane.xlu0 %397 }
 0x8f7   : > { %v400_v38 = vmul.f32 0.03125, %v398_v7 }
 0x8f9   : > { %v402_v39 = vsub.f32 %v11894_v28, %v400_v38 }
 0x8fb   : > { %v404_v62 = vmul.f32 %v402_v39, %v402_v39 }
 0x8fd   : > { %v408_v41 = vsel %vm347_vm1, %v404_v62, 0.0 }
 0x8fe   : > { %409 = vadd.xlane.f32.xlu1 %v408_v41 }
 0x900   : > { %v11265_v40 = vpop.eup %11264 }
 0x901   : > { %v1162_v42 = vmul.f32 %v11265_v40, %v11263_v27 }
 0x903   : > { %10304 = vmatmul.mubr.msk.f32.vlgmr.msra.gmra.mxu1 %vm750_vm5, %v1162_v42 }
 0x904   : > { %10314 = vmatpush3.msra.mxu1 %v11903_v43  ;;  %10317 = vmatprep.mubr.msk.f32.mxu1 %vm11411_vm2, %v11410_v1 }
 0x905   : > { %10315 = vmatprep.subr.mxu1 %v11410_v1 }
 0x906   : > { %10316 = vmatpush3.msra.mxu1 %v11909_v44 }
 0x907   : > { %10318 = vmatmul.mubr.msk.f32.vlgmr.msra.gmra.mxu1 %vm671_vm3, %v831_v24  ;;  %10331 = vmatprep.subr.mxu1 %v11410_v1  ;;  %v1236_v24 = vld [vmem:[%s13824_s4 + $0x10] sm:$0xff] }
 0x908   : > { %10332 = vmatpush3.msra.mxu1 %v11608_v53  ;;  %10339 = vmatprep.mubr.msk.f32.mxu1 %vm11411_vm2, %v11410_v1  ;;  %v1237_v53 = vld [vmem:[%s13824_s4 + $0x18] sm:$0xff] }
 0x909   : > { %10333 = vmatprep.subr.mxu1 %v11410_v1  ;;  %10307 = vmatpush3.msra.mxu0 %v1237_v53 }
 0x90a   : > { %10334 = vmatpush3.msra.mxu1 %v11622_v55  ;;  %10308 = vmatprep.subr.mxu0 %v11410_v1 }
 0x90b   : > { %10335 = vmatprep.subr.mxu1 %v11410_v1  ;;  %10309 = vmatpush3.msra.mxu0 %v1236_v24 }
 0x90c   : > { %10336 = vmatpush3.msra.mxu1 %v11642_v59  ;;  %10320 = vmatprep.subr.mxu0 %v11410_v1 }
 0x90d   : > { %10337 = vmatprep.subr.mxu1 %v11410_v1 }
 0x90e   : > { %10338 = vmatpush3.msra.mxu1 %v11653_v61 }
 0x90f   : > { %10353 = vmatprep.subr.mxu1 %v11410_v1 }
 0x987   : > { %v410_v55 = vpop.xlane.xlu1 %409 }
 0x988   : > { %v412_v59 = vmul.f32 0.03125, %v410_v55 }
 0x98a   : > { %v414_v46 = vadd.f32 1e-05, %v412_v59 }
 0x98c   : > { %11266 = vrsqrt.f32 %v414_v46 }
 0x999   : > { %v11267_v61 = vpop.eup %11266 }
 0x99a   : > { %v418_v47 = vmul.f32 %v11267_v61, %v402_v39 }
 0x99c   : > { %v424_v48 = vmul.f32 %v11670_v3, %v418_v47 }
 0x99e   : > { %v11938_v49 = vadd.f32 %v11675_v5, %v424_v48 }
 0x9a0   : > { %10340 = vmatmul.mubr.msk.f32.vlgmr.msra.gmra.mxu1 %vm347_vm1, %v11938_v49 }
 0x9a1   : > { %10355 = vmatprep.mubr.msk.f32.mxu1 %vm11411_vm2, %v11410_v1 }
 0x9c3   : > { %v1232_v50 = vpop.f32.mrf.mxu1 }
 0x9c4   : > { %10311 = vmatmul.mubr.msk.f32.vlgmr.msra.gmra.mxu0 %vm671_vm3, %v1232_v50 }
 0x9c5   : > { %10321 = vmatpush3.msra.mxu0 %v11603_v52  ;;  %v10305_v51 = vpop.f32.mrf.mxu1  ;;  %10328 = vmatprep.mubr.msk.f32.mxu0 %vm11411_vm2, %v11410_v1 }
 0x9c6   : > { %10322 = vmatprep.subr.mxu0 %v11410_v1 }
 0x9c7   : > { %10323 = vmatpush3.msra.mxu0 %v11617_v54  ;;  %v11950_v3 = vpop.f32.mrf.mxu1 }
 0x9c8   : > { %10324 = vmatprep.subr.mxu0 %v11410_v1 }
 0x9c9   : > { %10325 = vmatpush3.msra.mxu0 %v11637_v58  ;;  %v10319_v5 = vpop.f32.mrf.mxu1 }
 0x9ca   : > { %10326 = vmatprep.subr.mxu0 %v11410_v1 }
 0x9cb   : > { %10327 = vmatpush3.msra.mxu0 %v11648_v60 }
 0x9cc   : > { %10329 = vmatmul.mubr.msk.f32.vlgmr.msra.gmra.mxu0 %vm347_vm1, %v11938_v49  ;;  %10342 = vmatprep.subr.mxu0 %v11410_v1 }
 0x9cd   : > { %10343 = vmatpush3.msra.mxu0 %v11684_v8  ;;  %10350 = vmatprep.mubr.msk.f32.mxu0 %vm11411_vm2, %v11410_v1 }
 0x9ce   : > { %10344 = vmatprep.subr.mxu0 %v11410_v1 }
 0x9cf   : > { %10345 = vmatpush3.msra.mxu0 %v11698_v10 }
 0x9d0   : > { %10346 = vmatprep.subr.mxu0 %v11410_v1 }
 0x9d1   : > { %10347 = vmatpush3.msra.mxu0 %v11712_v12 }
 0x9d2   : > { %10348 = vmatprep.subr.mxu0 %v11410_v1 }
 0x9d3   : > { %10349 = vmatpush3.msra.mxu0 %v11726_v14 }
 0x9d4   : > { %10351 = vmatmul.mubr.msk.f32.vlgmr.msra.gmra.mxu0 %vm347_vm1, %v11938_v49  ;;  %10363 = vmatprep.subr.mxu0 %v11410_v1 }
 0x9d5   : > { %10364 = vmatpush3.msra.mxu0 %v11799_v4  ;;  %10371 = vmatprep.mubr.msk.f32.mxu0 %vm11411_vm2, %v11410_v1 }
 0x9d6   : > { %10365 = vmatprep.subr.mxu0 %v11410_v1 }
 0x9d7   : > { %10366 = vmatpush3.msra.mxu0 %v11805_v6 }
 0x9d8   : > { %10367 = vmatprep.subr.mxu0 %v11410_v1 }
 0x9d9   : > { %10368 = vmatpush3.msra.mxu0 %v11814_v16 }
 0x9da   : > { %10369 = vmatprep.subr.mxu0 %v11410_v1 }
 0x9db   : > { %10370 = vmatpush3.msra.mxu0 %v11821_v17 }
 0x9dc   : > { %10372 = vmatmul.mubr.msk.f32.vlgmr.msra.gmra.mxu0 %vm347_vm1, %v11938_v49  ;;  %10385 = vmatprep.subr.mxu0 %v11410_v1 }
 0x9dd   : > { %10386 = vmatpush3.msra.mxu0 %v11689_v9  ;;  %10393 = vmatprep.mubr.msk.f32.mxu0 %vm11411_vm2, %v11410_v1 }
 0x9de   : > { %10387 = vmatprep.subr.mxu0 %v11410_v1 }
 0x9df   : > { %10388 = vmatpush3.msra.mxu0 %v11703_v11 }
 0x9e0   : > { %10389 = vmatprep.subr.mxu0 %v11410_v1 }
 0x9e1   : > { %10390 = vmatpush3.msra.mxu0 %v11717_v13 }
 0x9e2   : > { %10391 = vmatprep.subr.mxu0 %v11410_v1 }
 0x9e3   : > { %10392 = vmatpush3.msra.mxu0 %v11733_v15 }
 0x9e4   : > { %10394 = vmatmul.mubr.msk.f32.vlgmr.msra.gmra.mxu0 %vm347_vm1, %v11938_v49  ;;  %10406 = vmatprep.subr.mxu0 %v11410_v1 }
 0x9e5   : > { %10407 = vmatpush3.msra.mxu0 %v1237_v53  ;;  %10410 = vmatprep.mubr.msk.f32.mxu0 %vm11411_vm2, %v11410_v1 }
 0x9e6   : > { %10408 = vmatprep.subr.mxu0 %v11410_v1 }
 0x9e7   : > { %10409 = vmatpush3.msra.mxu0 %v1236_v24 }
 0xa60   : > { %v1523_v52 = vpop.f32.mrf.mxu1 }
 0xa61   : > { %v1524_v54 = vadd.f32 %v11756_v18, %v1523_v52 }
 0xa62   : > { %v10341_v58 = vpop.f32.mrf.mxu1 }
 0xa63   : > { %10354 = vmatpush3.xpose.msk.msra.mxu1 %vm671_vm3, %v1524_v54 }
 0xa64   : > { %10358 = vmatprep.subr.mxu1 %v11410_v1 }
 0xa84   : > { %v1307_v60 = vpop.f32.mrf.mxu0 }
 0xa85   : > { %v1381_v39 = vadd.f32 %v11950_v3, %v1307_v60 }
 0xa86   : > { %v10312_v8 = vpop.f32.mrf.mxu0 }
 0xa87   : > { %v2277_v62 = vadd.f32 %v1381_v39, %v11594_v45  ;;  %v2483_v39 = vld [vmem:[%s13824_s4 + $0xb0] sm:$0xff] }
 0xa8c   : > { %v1453_v9 = vpop.f32.mrf.mxu0 }
 0xa8d   : > { %v1454_v10 = vadd.f32 %v11761_v21, %v1453_v9 }
 0xa8e   : > { %v10330_v11 = vpop.f32.mrf.mxu0 }
 0xa8f   : > { %10356 = vmatmul.mubr.msk.f32.vlgmr.msra.gmra.mxu1 %vm671_vm3, %v1454_v10  ;;  %v9610_v10 = vld [vmem:[%s13824_s4 + $0x38] ss:$0 sm:$0xff]  ;;  %v9611_v11 = vld [vmem:[%s13824_s4 + $0x40] ss:$0 sm:$0xff] }
 0xa90   : > { %10360 = vmatprep.mubr.msk.f32.mxu1 %vm11411_vm2, %v11410_v1 }
 0xa94   : > { %v1593_v12 = vpop.f32.mrf.mxu0 }
 0xa95   : > { %v1594_v13 = vadd.f32 %v11771_v26, %v1593_v12 }
 0xa96   : > { %v10352_v14 = vpop.f32.mrf.mxu0 }
 0xa97   : > { %10359 = vmatpush3.msra.mxu1 %v1594_v13 }
 0xa98   : > { %10374 = vmatprep.subr.mxu1 %v11410_v1 }
 0xa9c   : > { %v1825_v15 = vpop.f32.mrf.mxu0 }
 0xa9e   : > { %v10373_v18 = vpop.f32.mrf.mxu0 }
 0xaa4   : > { %v1965_v4 = vpop.f32.mrf.mxu0 }
 0xaa6   : > { %v10395_v6 = vpop.f32.mrf.mxu0 }
 0xb4f   : > { %v1669_v16 = vpop.f32.mrf.mxu1 }
 0xb50   : > { %v1673_v17 = vmul.f32 0.25, %v1669_v16 }
 0xb51   : > { %v10357_v21 = vpop.f32.mrf.mxu1 }
 0xb52   : > { %v1674_v29 = vadd.f32 %v1673_v17, %v11784_v36 }
 0xb54   : > { %v1675_v56 = vsel %vm750_vm5, %v1674_v29, -inf }
 0xb55   : > { %1676 = vmax.xlane.f32.xlu0 %v1675_v56 }
 0xbde   : > { %v1677_v57 = vpop.xlane.xlu0 %1676 }
 0xbdf   : > { %v1678_v63 = vsub.f32 %v1674_v29, %v1677_v57 }
 0xbe1   : > { %v1679_v0 = vmul.f32 1.442695, %v1678_v63 }
 0xbe3   : > { %11268 = vpow2.f32 %v1679_v0  ;;  %v2329_v0 = vld [vmem:[%s13825_s5 + $0x18] sm:$0xff] }
 0xbe4   : > { %10420 = vmatprep.subr.mxu0 %v2329_v0 }
 0xbf0   : > { %v11269_v26 = vpop.eup %11268 }
 0xbf1   : > { %v1681_v2 = vsel %vm750_vm5, %v11269_v26, 0.0 }
 0xbf2   : > { %1682 = vadd.xlane.f32.xlu1 %v1681_v2  ;;  %v2326_v2 = vld [vmem:[%s13825_s5] sm:$0xff] }
 0xc7b   : > { %v1683_v27 = vpop.xlane.xlu1 %1682 }
 0xc7c   : > { %11270 = vrcp.f32 %v1683_v27  ;;  %v12083_v27 = vld [vmem:[%s11464_s27] sm:$0xff] }
 0xc89   : > { %v11271_v25 = vpop.eup %11270 }
 0xc8a   : > { %v1685_v30 = vmul.f32 %v11271_v25, %v11269_v26  ;;  %v2327_v26 = vld [vmem:[%s13825_s5 + $0x8] sm:$0xff] }
 0xc8c   : > { %10361 = vmatmul.mubr.msk.f32.vlgmr.msra.gmra.mxu1 %vm750_vm5, %v1685_v30 }
 0xc8d   : > { %10375 = vmatpush3.msra.mxu1 %v11828_v19  ;;  %10382 = vmatprep.mubr.msk.f32.mxu1 %vm11411_vm2, %v11410_v1 }
 0xc8e   : > { %10376 = vmatprep.subr.mxu1 %v11410_v1 }
 0xc8f   : > { %10377 = vmatpush3.msra.mxu1 %v11837_v20 }
 0xc90   : > { %10378 = vmatprep.subr.mxu1 %v11410_v1 }
 0xc91   : > { %10379 = vmatpush3.msra.mxu1 %v11846_v22  ;;  %v1826_v22 = vadd.f32 %v11871_v35, %v1825_v15  ;;  %v9609_v35 = vld [vmem:[%s13824_s4 + $0x20] ss:$0 sm:$0xff] }
 0xc92   : > { %10380 = vmatprep.subr.mxu1 %v11410_v1  ;;  %v12040_v42 = vadd.f32 %v9609_v35, %v2277_v62  ;;  %v2481_v62 = vld [vmem:[%s13824_s4 + $0xa0] sm:$0xff] }
 0xc93   : > { %10381 = vmatpush3.msra.mxu1 %v11853_v23  ;;  %v1966_v23 = vadd.f32 %v11877_v37, %v1965_v4 }
 0xc94   : > { %10383 = vmatmul.mubr.msk.f32.vlgmr.msra.gmra.mxu1 %vm347_vm1, %v11938_v49  ;;  %10396 = vmatprep.subr.mxu1 %v11410_v1  ;;  %v2288_v24 = vsel %vm347_vm1, %v12040_v42, 0.0 }
 0xc95   : > { %10398 = vmatprep.mubr.msk.f32.mxu1 %vm11411_vm2, %v11410_v1 }
 0xd4c   : > { %v1755_v19 = vpop.f32.mrf.mxu1 }
 0xd4e   : > { %v10362_v32 = vpop.f32.mrf.mxu1 }
 0xd54   : > { %v1895_v7 = vpop.f32.mrf.mxu1 }
 0xd55   : > { %v1896_v20 = vadd.f32 %v11866_v31, %v1895_v7 }
 0xd56   : > { %v10384_v38 = vpop.f32.mrf.mxu1 }
 0xd57   : > { %10397 = vmatpush3.xpose.msk.msra.mxu1 %vm671_vm3, %v1896_v20 }
 0xd58   : > { %10401 = vmatprep.subr.mxu1 %v11410_v1 }
 0xd5a   : > { %10399 = vmatmul.mubr.msk.f32.vlgmr.msra.gmra.mxu1 %vm671_vm3, %v1826_v22  ;;  %v2485_v22 = vld [vmem:[%s13824_s4 + $0xc0] sm:$0xff] }
 0xd5b   : > { %10402 = vmatpush3.msra.mxu1 %v1966_v23  ;;  %10403 = vmatprep.mubr.msk.f32.mxu1 %vm11411_vm2, %v11410_v1  ;;  %v2484_v23 = vld [vmem:[%s13824_s4 + $0xb8] sm:$0xff] }
 0xd5c   : > { %10413 = vmatprep.subr.mxu1 %v11410_v1 }
 0xe1a   : > { %v2041_v31 = vpop.f32.mrf.mxu1 }
 0xe1b   : > { %v2045_v41 = vmul.f32 0.25, %v2041_v31  ;;  %v2482_v31 = vld [vmem:[%s13824_s4 + $0xa8] sm:$0xff] }
 0xe1c   : > { %v10400_v40 = vpop.f32.mrf.mxu1 }
 0xe1d   : > { %v2046_v37 = vadd.f32 %v2045_v41, %v11784_v36  ;;  %v2480_v41 = vld [vmem:[%s13824_s4 + $0x98] sm:$0xff]  ;;  %v2478_v40 = vld [vmem:[%s13824_s4 + $0x88] sm:$0xff] }
 0xe1f   : > { %v2047_v53 = vsel %vm750_vm5, %v2046_v37, -inf }
 0xe20   : > { %2048 = vmax.xlane.f32.xlu0 %v2047_v53  ;;  %v2476_v53 = vld [vmem:[%s13824_s4 + $0x78] sm:$0xff] }
 0xe24   : > { %2289 = vadd.xlane.f32.xlu0 %v2288_v24  ;;  %v2475_v24 = vld [vmem:[%s13824_s4 + $0x70] sm:$0xff] }
 0xea9   : > { %v2049_v55 = vpop.xlane.xlu0 %2048 }
 0xeaa   : > { %v2050_v59 = vsub.f32 %v2046_v37, %v2049_v55  ;;  %v2477_v37 = vld [vmem:[%s13824_s4 + $0x80] sm:$0xff]  ;;  %v2474_v55 = vld [vmem:[%s13824_s4 + $0x68] sm:$0xff] }
 0xeac   : > { %v2051_v45 = vmul.f32 1.442695, %v2050_v59  ;;  %v2473_v59 = vld [vmem:[%s13824_s4 + $0x60] sm:$0xff] }
 0xead   : > { %v2290_v46 = vpop.xlane.xlu0 %2289 }
 0xeae   : > { %11272 = vpow2.f32 %v2051_v45  ;;  %v2294_v61 = vmul.f32 0.03125, %v2290_v46  ;;  %v2472_v45 = vld [vmem:[%s13824_s4 + $0x58] sm:$0xff]  ;;  %v2471_v46 = vld [vmem:[%s13824_s4 + $0x50] sm:$0xff] }
 0xeb0   : > { %v2296_v47 = vsub.f32 %v12040_v42, %v2294_v61  ;;  %v2470_v61 = vld [vmem:[%s13824_s4 + $0x48] sm:$0xff] }
 0xeb2   : > { %v2298_v48 = vmul.f32 %v2296_v47, %v2296_v47 }
 0xeb4   : > { %v2300_v49 = vsel %vm347_vm1, %v2298_v48, 0.0 }
 0xeb5   : > { %2301 = vadd.xlane.f32.xlu0 %v2300_v49 }
 0xebb   : > { %v11273_v50 = vpop.eup %11272 }
 0xebc   : > { %v2053_v51 = vsel %vm750_vm5, %v11273_v50, 0.0 }
 0xebd   : > { %2054 = vadd.xlane.f32.xlu1 %v2053_v51 }
 0xf3e   : > { %v2302_v54 = vpop.xlane.xlu0 %2301 }
 0xf3f   : > { %v2306_v58 = vmul.f32 0.03125, %v2302_v54 }
 0xf41   : > { %v2308_v60 = vadd.f32 1e-05, %v2306_v58 }
 0xf46   : > { %v2055_v3 = vpop.xlane.xlu1 %2054 }
 0xf47   : > { %11274 = vrcp.f32 %v2055_v3 }
 0xf48   : > { %11276 = vrsqrt.f32 %v2308_v60 }
 0xf54   : > { %v11275_v5 = vpop.eup %11274 }
 0xf55   : > { %v2057_v52 = vmul.f32 %v11275_v5, %v11273_v50  ;;  %v11277_v8 = vpop.eup %11276 }
 0xf56   : > { %v2312_v9 = vmul.f32 %v11277_v8, %v2296_v47  ;;  %v9612_v47 = vld [vmem:[%s13825_s5 + $0x20] ss:$0 sm:$0xff] }
 0xf57   : > { %10404 = vmatmul.mubr.msk.f32.vlgmr.msra.gmra.mxu1 %vm750_vm5, %v2057_v52 }
 0xf58   : > { %10414 = vmatpush3.msra.mxu1 %v11903_v43  ;;  %10417 = vmatprep.mubr.msk.f32.mxu1 %vm11411_vm2, %v11410_v1  ;;  %v2318_v43 = vmul.f32 %v9610_v10, %v2312_v9 }
 0xf59   : > { %10415 = vmatprep.subr.mxu1 %v11410_v1 }
 0xf5a   : > { %10416 = vmatpush3.msra.mxu1 %v11909_v44  ;;  %v2324_v12 = vadd.f32 %v9611_v11, %v2318_v43 }
 0xf5b   : > { %10418 = vmatmul.mubr.msk.f32.vlgmr.msra.gmra.mxu1 %vm671_vm3, %v1755_v19  ;;  %10431 = vmatprep.subr.mxu1 %v2485_v22 }
 0xf5c   : > { %10432 = vmatpush3.msra.mxu1 %v2485_v22 }
 0xf5d   : > { %10433 = vmatprep.subr.mxu1 %v2484_v23 }
 0xf5e   : > { %10434 = vmatpush3.msra.mxu1 %v2484_v23 }
 0xf5f   : > { %10435 = vmatprep.subr.mxu1 %v2483_v39 }
 0xf60   : > { %10436 = vmatpush3.msra.mxu1 %v2483_v39 }
 0xf61   : > { %10437 = vmatprep.subr.mxu1 %v2482_v31 }
 0xf62   : > { %10438 = vmatpush3.msra.mxu1 %v2482_v31 }
 0xf63   : > { %10439 = vmatprep.subr.mxu1 %v2481_v62 }
 0xf64   : > { %10440 = vmatpush3.msra.mxu1 %v2481_v62 }
 0xf65   : > { %10441 = vmatprep.subr.mxu1 %v2480_v41 }
 0xf66   : > { %10442 = vmatpush3.msra.mxu1 %v2480_v41 }
0x1017   : > { %v2127_v1 = vpop.f32.mrf.mxu1 }
0x1018   : > { %10411 = vmatmul.mubr.msk.f32.vlgmr.msra.gmra.mxu0 %vm671_vm3, %v2127_v1 }
0x1019   : > { %v10405_v44 = vpop.f32.mrf.mxu1  ;;  %10428 = vmatprep.mubr.msk.f32.mxu0 %vm347_vm1, %v2324_v12  ;;  %10421 = vmatpush3.msra.mxu0 %v2329_v0 }
0x101b   : > { %v2273_v13 = vpop.f32.mrf.mxu1 }
0x101d   : > { %v10419_v14 = vpop.f32.mrf.mxu1 }
0x10d8   : > { %v2200_v15 = vpop.f32.mrf.mxu0 }
0x10d9   : > { %v2274_v18 = vadd.f32 %v2273_v13, %v2200_v15 }
0x10da   : > { %v10412_v4 = vpop.f32.mrf.mxu0 }
0x10db   : > { %v2278_v6 = vadd.f32 %v2274_v18, %v11894_v28  ;;  %v2328_v28 = vld [vmem:[%s13825_s5 + $0x10] sm:$0xff] }
0x10dc   : > { %10422 = vmatprep.subr.mxu0 %v2328_v28 }
0x10dd   : > { %v12064_v16 = vadd.f32 %v9609_v35, %v2278_v6  ;;  %10423 = vmatpush3.msra.mxu0 %v2328_v28  ;;  %v2479_v35 = vld [vmem:[%s13824_s4 + $0x90] sm:$0xff] }
0x10de   : > { %10424 = vmatprep.subr.mxu0 %v2327_v26  ;;  %10443 = vmatprep.subr.mxu1 %v2479_v35 }
0x10df   : > { %v2291_v17 = vsel %vm347_vm1, %v12064_v16, 0.0  ;;  %10425 = vmatpush3.msra.mxu0 %v2327_v26  ;;  %10444 = vmatpush3.msra.mxu1 %v2479_v35 }
0x10e0   : > { %2292 = vadd.xlane.f32.xlu1 %v2291_v17  ;;  %10426 = vmatprep.subr.mxu0 %v2326_v2 }
0x10e1   : > { %10427 = vmatpush3.msra.mxu0 %v2326_v2  ;;  %10445 = vmatprep.subr.mxu1 %v2478_v40 }
0x10e2   : > { %10466 = vmatprep.subr.mxu0 %v12083_v27  ;;  %10446 = vmatpush3.msra.mxu1 %v2478_v40 }
0x10e3   : > { %10447 = vmatprep.subr.mxu1 %v2477_v37 }
0x10e4   : > { %10448 = vmatpush3.msra.mxu1 %v2477_v37 }
0x10e5   : > { %10449 = vmatprep.subr.mxu1 %v2476_v53 }
0x10e6   : > { %10450 = vmatpush3.msra.mxu1 %v2476_v53 }
0x10e7   : > { %10451 = vmatprep.subr.mxu1 %v2475_v24 }
0x10e8   : > { %10452 = vmatpush3.msra.mxu1 %v2475_v24 }
0x10e9   : > { %10453 = vmatprep.subr.mxu1 %v2474_v55 }
0x10ea   : > { %10454 = vmatpush3.msra.mxu1 %v2474_v55 }
0x10eb   : > { %10455 = vmatprep.subr.mxu1 %v2473_v59 }
0x10ec   : > { %10456 = vmatpush3.msra.mxu1 %v2473_v59 }
0x10ed   : > { %10457 = vmatprep.subr.mxu1 %v2472_v45 }
0x10ee   : > { %10458 = vmatpush3.msra.mxu1 %v2472_v45 }
0x10ef   : > { %10459 = vmatprep.subr.mxu1 %v2471_v46 }
0x10f0   : > { %10460 = vmatpush3.msra.mxu1 %v2471_v46  ;;  %v9615_v46 = vld [vmem:[%s13824_s4 + $0xc8] ss:$0 sm:$0xff] }
0x10f1   : > { %10461 = vmatprep.subr.mxu1 %v2470_v61 }
0x10f2   : > { %10462 = vmatpush3.msra.mxu1 %v2470_v61 }
0x10f3   : > { %10504 = vmatprep.subr.mxu1 %v12083_v27 }
0x1169   : > { %v2293_v21 = vpop.xlane.xlu1 %2292 }
0x116a   : > { %v2295_v29 = vmul.f32 0.03125, %v2293_v21 }
0x116c   : > { %v2297_v56 = vsub.f32 %v12064_v16, %v2295_v29 }
0x116e   : > { %v2299_v57 = vmul.f32 %v2297_v56, %v2297_v56 }
0x1170   : > { %v2303_v63 = vsel %vm347_vm1, %v2299_v57, 0.0 }
0x1171   : > { %2304 = vadd.xlane.f32.xlu1 %v2303_v63 }
0x11fa   : > { %v2305_v25 = vpop.xlane.xlu1 %2304 }
0x11fb   : > { %v2307_v30 = vmul.f32 0.03125, %v2305_v25 }
0x11fd   : > { %v2309_v19 = vadd.f32 1e-05, %v2307_v30 }
0x11ff   : > { %11278 = vrsqrt.f32 %v2309_v19 }
0x120c   : > { %v11279_v32 = vpop.eup %11278 }
0x120d   : > { %v2313_v7 = vmul.f32 %v11279_v32, %v2297_v56 }
0x120f   : > { %v2319_v20 = vmul.f32 %v9610_v10, %v2313_v7 }
0x1211   : > { %v2325_v38 = vadd.f32 %v9611_v11, %v2319_v20 }
0x1213   : > { %10429 = vmatmul.mubr.msk.f32.vlgmr.msra.gmra.mxu0 %vm347_vm1, %v2325_v38 }
0x1214   : > { %10474 = vmatprep.mubr.msk.f32.mxu0 %vm11411_vm2, %v12083_v27 }
0x12d3   : > { %v10430_v48 = vpop.f32.mrf.mxu0 }
0x12d4   : > { %v2413_v49 = vadd.f32 %v10430_v48, %v9612_v47 }
0x12d5   : > { %v2407_v50 = vpop.f32.mrf.mxu0 }
0x12d6   : > { %v2419_v51 = vmul.f32 0.70710677, %v2413_v49  ;;  %v2408_v3 = vadd.f32 %v9612_v47, %v2407_v50  ;;  %v2417_v24 = vmul.f32 0.5, %v2413_v49 }
0x12d8   : > { %v2421_v5 = vand.u32 2147483647, %v2419_v51  ;;  %v2418_v52 = vmul.f32 0.70710677, %v2408_v3  ;;  %vm2461_vm6 = vcmp.ge.f32.partialorder %v2419_v51, 0.0  ;;  %v2416_v37 = vmul.f32 0.5, %v2408_v3 }
0x12da   : > { %v2423_v54 = vmul.f32 0.3275911, %v2421_v5  ;;  %v2420_v58 = vand.u32 2147483647, %v2418_v52  ;;  %v2449_v10 = vsub.f32 0.0, %v2421_v5  ;;  %vm2460_vm7 = vcmp.ge.f32.partialorder %v2418_v52, 0.0 }
0x12dc   : > { %v2425_v60 = vadd.f32 1.0, %v2423_v54  ;;  %v2422_v8 = vmul.f32 0.3275911, %v2420_v58  ;;  %v2448_v43 = vsub.f32 0.0, %v2420_v58  ;;  %v2451_v11 = vmul.f32 %v2449_v10, %v2421_v5 }
0x12de   : > { %11280 = vrcp.f32 %v2425_v60  ;;  %v2424_v9 = vadd.f32 1.0, %v2422_v8  ;;  %v2450_v12 = vmul.f32 %v2448_v43, %v2420_v58  ;;  %v2454_v13 = vmul.f32 1.442695, %v2451_v11  ;;  %v12173_v60 = vld [vmem:[%s13823_s3 + $0xf8] sm:$0xff]  ;;  %v12179_v8 = vld [vmem:[%s13823_s3 + $0xf0] sm:$0xff] }
0x12e0   : > { %11282 = vrcp.f32 %v2424_v9  ;;  %v2452_v18 = vmul.f32 1.442695, %v2450_v12 }
0x12e1   : > { %11284 = vpow2.f32 %v2454_v13 }
0x12e2   : > { %11286 = vpow2.f32 %v2452_v18  ;;  %v12208_v18 = vld [vmem:[%s13823_s3 + $0x120] sm:$0xff] }
0x12eb   : > { %v11281_v1 = vpop.eup %11280 }
0x12ec   : > { %v2431_v44 = vmul.f32 1.0614054, %v11281_v1 }
0x12ed   : > { %v11283_v14 = vpop.eup %11282 }
0x12ee   : > { %v2433_v15 = vadd.f32 -1.4531521, %v2431_v44  ;;  %v2430_v4 = vmul.f32 1.0614054, %v11283_v14  ;;  %v11285_v19 = vpop.eup %11284  ;;  %v12192_v44 = vld [vmem:[%s13824_s4 + $0x100] ss:$0 sm:$0xff] }
0x12ef   : > { %v11287_v38 = vpop.eup %11286 }
0x12f0   : > { %v2435_v6 = vmul.f32 %v11281_v1, %v2433_v15  ;;  %v2432_v17 = vadd.f32 -1.4531521, %v2430_v4  ;;  %v12201_v15 = vld [vmem:[%s13823_s3 + $0x128] sm:$0xff]  ;;  %v12217_v4 = vld [vmem:[%s13823_s3 + $0x118] sm:$0xff] }
0x12f2   : > { %v2437_v21 = vadd.f32 1.4214138, %v2435_v6  ;;  %v2434_v29 = vmul.f32 %v11283_v14, %v2432_v17  ;;  %v12224_v6 = vld [vmem:[%s13823_s3 + $0x110] sm:$0xff]  ;;  %v12231_v17 = vld [vmem:[%s13823_s3 + $0x148] sm:$0xff] }
0x12f4   : > { %v2439_v56 = vmul.f32 %v11281_v1, %v2437_v21  ;;  %v2436_v57 = vadd.f32 1.4214138, %v2434_v29  ;;  %v12240_v21 = vld [vmem:[%s13823_s3 + $0x140] sm:$0xff]  ;;  %v12249_v29 = vld [vmem:[%s13823_s3 + $0x138] sm:$0xff] }
0x12f6   : > { %v2441_v63 = vadd.f32 -0.28449672, %v2439_v56  ;;  %v2438_v0 = vmul.f32 %v11283_v14, %v2436_v57  ;;  %v12256_v56 = vld [vmem:[%s13823_s3 + $0x130] sm:$0xff] }
0x12f8   : > { %v2443_v28 = vmul.f32 %v11281_v1, %v2441_v63  ;;  %v2440_v26 = vadd.f32 -0.28449672, %v2438_v0  ;;  %v12269_v0 = vld [vmem:[%s13823_s3 + $0x158] ss:$0 sm:$0xff] }
0x12fa   : > { %v2445_v2 = vadd.f32 0.2548296, %v2443_v28  ;;  %v2442_v25 = vmul.f32 %v11283_v14, %v2440_v26  ;;  %v12274_v26 = vld [vmem:[%s13823_s3 + $0x150] ss:$0 sm:$0xff] }
0x12fc   : > { %v2447_v30 = vmul.f32 %v11281_v1, %v2445_v2  ;;  %v2444_v32 = vadd.f32 0.2548296, %v2442_v25  ;;  %v12187_v1 = vld [vmem:[%s13824_s4 + $0xf8] ss:$0 sm:$0xff] }
0x12fe   : > { %v2457_v7 = vmul.f32 %v11285_v19, %v2447_v30  ;;  %v2446_v20 = vmul.f32 %v11283_v14, %v2444_v32  ;;  %v12283_v19 = vld [vmem:[%s13823_s3 + $0x180] sm:$0xff] }
0x12ff   : > { %v12289_v32 = vld [vmem:[%s13823_s3 + $0x160] ss:$0 sm:$0xff] }
0x1300   : > { %v2459_v22 = vsub.f32 1.0, %v2457_v7  ;;  %v2456_v23 = vmul.f32 %v11287_v38, %v2446_v20  ;;  %v12294_v7 = vld [vmem:[%s13823_s3 + $0x178] sm:$0xff]  ;;  %v12303_v38 = vld [vmem:[%s13823_s3 + $0x170] sm:$0xff] }
0x1302   : > { %v2463_v39 = vsub.f32 0.0, %v2459_v22  ;;  %v2458_v31 = vsub.f32 1.0, %v2456_v23 }
0x1304   : > { %v2465_v62 = vsel %vm2461_vm6, %v2459_v22, %v2463_v39  ;;  %v2462_v41 = vsub.f32 0.0, %v2458_v31  ;;  %v12311_v39 = vld [vmem:[%s13823_s3 + $0x168] sm:$0xff] }
0x1305   : > { %v2467_v35 = vadd.f32 1.0, %v2465_v62  ;;  %v12328_v62 = vld [vmem:[%s13823_s3 + $0x1b8] sm:$0xff] }
0x1306   : > { %v2464_v40 = vsel %vm2460_vm7, %v2458_v31, %v2462_v41  ;;  %v12318_v31 = vld [vmem:[%s13823_s3 + $0x1c0] sm:$0xff]  ;;  %v12337_v41 = vld [vmem:[%s13823_s3 + $0x1b0] sm:$0xff] }
0x1307   : > { %v2466_v53 = vadd.f32 1.0, %v2464_v40  ;;  %v2469_v59 = vmul.f32 %v2467_v35, %v2417_v24  ;;  %v12344_v35 = vld [vmem:[%s13823_s3 + $0x1a8] sm:$0xff] }
0x1309   : > { %v2468_v55 = vmul.f32 %v2466_v53, %v2416_v37 }
0x130b   : > { %10463 = vmatprep.mubr.f32.mxu1 %v2468_v55 }
0x130c   : > { %10464 = vmatmul.mubr.f32.vlgmr.msra.gmra.mxu1 %v2469_v59 }
0x130d   : > { %10506 = vmatprep.mubr.msk.f32.mxu1 %vm11411_vm2, %v12083_v27 }
0x13cc   : > { %v10465_v45 = vpop.f32.mrf.mxu1 }
0x13cd   : > { %v2562_v61 = vadd.f32 %v10465_v45, %v12064_v16  ;;  %v12159_v16 = vld [vmem:[%s13823_s3 + $0x108] sm:$0xff] }
0x13ce   : > { %v2552_v47 = vpop.f32.mrf.mxu1  ;;  %10467 = vmatpush3.msra.mxu0 %v12159_v16 }
0x13cf   : > { %v12147_v48 = vadd.f32 %v9615_v46, %v2562_v61  ;;  %v2561_v50 = vadd.f32 %v2552_v47, %v12040_v42  ;;  %10468 = vmatprep.subr.mxu0 %v12083_v27  ;;  %v12166_v42 = vld [vmem:[%s13823_s3 + $0x100] sm:$0xff] }
0x13d0   : > { %10469 = vmatpush3.msra.mxu0 %v12166_v42 }
0x13d1   : > { %v12150_v49 = vadd.f32 %v9615_v46, %v2561_v50  ;;  %10470 = vmatprep.subr.mxu0 %v12083_v27 }
0x13d2   : > { %10471 = vmatpush3.msra.mxu0 %v12173_v60 }
0x13d3   : > { %v2572_v51 = vsel %vm347_vm1, %v12150_v49, 0.0  ;;  %10472 = vmatprep.subr.mxu0 %v12083_v27 }
0x13d4   : > { %2573 = vadd.xlane.f32.xlu0 %v2572_v51  ;;  %10473 = vmatpush3.msra.mxu0 %v12179_v8 }
0x13d5   : > { %10477 = vmatprep.subr.mxu0 %v12083_v27 }
0x145d   : > { %v2574_v3 = vpop.xlane.xlu0 %2573 }
0x145e   : > { %v2578_v5 = vmul.f32 0.03125, %v2574_v3 }
0x1460   : > { %v2580_v52 = vsub.f32 %v12150_v49, %v2578_v5 }
0x1462   : > { %v2582_v54 = vmul.f32 %v2580_v52, %v2580_v52 }
0x1464   : > { %v2584_v58 = vsel %vm347_vm1, %v2582_v54, 0.0 }
0x1465   : > { %2585 = vadd.xlane.f32.xlu1 %v2584_v58 }
0x14ee   : > { %v2586_v9 = vpop.xlane.xlu1 %2585 }
0x14ef   : > { %v2590_v10 = vmul.f32 0.03125, %v2586_v9  ;;  %v12360_v9 = vld [vmem:[%s13823_s3 + $0x1a0] sm:$0xff] }
0x14f1   : > { %v2592_v43 = vadd.f32 1e-05, %v2590_v10  ;;  %v12366_v10 = vld [vmem:[%s13823_s3 + $0x198] sm:$0xff] }
0x14f3   : > { %11288 = vrsqrt.f32 %v2592_v43  ;;  %v12375_v43 = vld [vmem:[%s13823_s3 + $0x190] sm:$0xff] }
0x1500   : > { %v11289_v11 = vpop.eup %11288 }
0x1501   : > { %v2596_v12 = vmul.f32 %v11289_v11, %v2580_v52  ;;  %v12382_v11 = vld [vmem:[%s13823_s3 + $0x188] sm:$0xff] }
0x1503   : > { %v2602_v13 = vmul.f32 %v12187_v1, %v2596_v12 }
0x1505   : > { %v12196_v14 = vadd.f32 %v12192_v44, %v2602_v13 }
0x1507   : > { %10475 = vmatmul.mubr.msk.f32.vlgmr.msra.gmra.mxu0 %vm347_vm1, %v12196_v14 }
0x1508   : > { %10478 = vmatpush3.msra.mxu0 %v12201_v15  ;;  %10485 = vmatprep.mubr.msk.f32.mxu0 %vm11411_vm2, %v12083_v27 }
0x1509   : > { %10479 = vmatprep.subr.mxu0 %v12083_v27 }
0x150a   : > { %10480 = vmatpush3.msra.mxu0 %v12208_v18 }
0x150b   : > { %10481 = vmatprep.subr.mxu0 %v12083_v27 }
0x150c   : > { %10482 = vmatpush3.msra.mxu0 %v12217_v4 }
0x150d   : > { %10483 = vmatprep.subr.mxu0 %v12083_v27 }
0x150e   : > { %10484 = vmatpush3.msra.mxu0 %v12224_v6 }
0x150f   : > { %10486 = vmatmul.mubr.msk.f32.vlgmr.msra.gmra.mxu0 %vm347_vm1, %v12196_v14  ;;  %10488 = vmatprep.subr.mxu0 %v12083_v27 }
0x1510   : > { %10489 = vmatpush3.msra.mxu0 %v12231_v17  ;;  %10496 = vmatprep.mubr.msk.f32.mxu0 %vm11411_vm2, %v12083_v27 }
0x1511   : > { %10490 = vmatprep.subr.mxu0 %v12083_v27 }
0x1512   : > { %10491 = vmatpush3.msra.mxu0 %v12240_v21 }
0x1513   : > { %10492 = vmatprep.subr.mxu0 %v12083_v27 }
0x1514   : > { %10493 = vmatpush3.msra.mxu0 %v12249_v29 }
0x1515   : > { %10494 = vmatprep.subr.mxu0 %v12083_v27 }
0x1516   : > { %10495 = vmatpush3.msra.mxu0 %v12256_v56 }
0x1517   : > { %10497 = vmatmul.mubr.msk.f32.vlgmr.msra.gmra.mxu0 %vm347_vm1, %v12196_v14  ;;  %10499 = vmatprep.subr.mxu0 %v12083_v27 }
0x1518   : > { %10501 = vmatprep.mubr.msk.f32.mxu0 %vm11411_vm2, %v12083_v27 }
0x15c7   : > { %v2688_v57 = vpop.f32.mrf.mxu0 }
0x15c8   : > { %v2689_v30 = vadd.f32 %v12274_v26, %v2688_v57  ;;  %v12395_v57 = vld [vmem:[%s13823_s3 + $0x1d0] ss:$0 sm:$0xff] }
0x15c9   : > { %v10476_v63 = vpop.f32.mrf.mxu0 }
0x15cf   : > { %v2767_v28 = vpop.f32.mrf.mxu0 }
0x15d0   : > { %v2768_v2 = vadd.f32 %v12269_v0, %v2767_v28  ;;  %v12400_v28 = vld [vmem:[%s13823_s3 + $0x1c8] ss:$0 sm:$0xff] }
0x15d1   : > { %v10487_v25 = vpop.f32.mrf.mxu0 }
0x15d2   : > { %10500 = vmatpush3.xpose.msk.msra.mxu0 %vm671_vm3, %v2768_v2  ;;  %v12406_v2 = vld [vmem:[%s13823_s3 + $0x1d8] ss:$0 sm:$0xff] }
0x15d3   : > { %10509 = vmatprep.subr.mxu0 %v12083_v27 }
0x15d5   : > { %10502 = vmatmul.mubr.msk.f32.vlgmr.msra.gmra.mxu0 %vm671_vm3, %v2689_v30 }
0x15d6   : > { %10510 = vmatpush3.msra.mxu0 %v12283_v19  ;;  %10517 = vmatprep.mubr.msk.f32.mxu0 %vm11411_vm2, %v12083_v27 }
0x15d7   : > { %v2846_v20 = vpop.f32.mrf.mxu0  ;;  %10511 = vmatprep.subr.mxu0 %v12083_v27 }
0x15d8   : > { %v2847_v22 = vadd.f32 %v12289_v32, %v2846_v20  ;;  %10512 = vmatpush3.msra.mxu0 %v12294_v7 }
0x15d9   : > { %v10498_v23 = vpop.f32.mrf.mxu0  ;;  %10513 = vmatprep.subr.mxu0 %v12083_v27 }
0x15da   : > { %10505 = vmatpush3.msra.mxu1 %v2847_v22  ;;  %10514 = vmatpush3.msra.mxu0 %v12303_v38 }
0x15db   : > { %10515 = vmatprep.subr.mxu0 %v12083_v27  ;;  %10520 = vmatprep.subr.mxu1 %v12083_v27 }
0x15dc   : > { %10516 = vmatpush3.msra.mxu0 %v12311_v39 }
0x15dd   : > { %10518 = vmatmul.mubr.msk.f32.vlgmr.msra.gmra.mxu0 %vm347_vm1, %v12196_v14  ;;  %10531 = vmatprep.subr.mxu0 %v12083_v27 }
0x15de   : > { %10532 = vmatpush3.msra.mxu0 %v12318_v31  ;;  %10539 = vmatprep.mubr.msk.f32.mxu0 %vm11411_vm2, %v12083_v27 }
0x15df   : > { %10533 = vmatprep.subr.mxu0 %v12083_v27 }
0x15e0   : > { %10534 = vmatpush3.msra.mxu0 %v12328_v62 }
0x15e1   : > { %10535 = vmatprep.subr.mxu0 %v12083_v27 }
0x15e2   : > { %10536 = vmatpush3.msra.mxu0 %v12337_v41 }
0x15e3   : > { %10537 = vmatprep.subr.mxu0 %v12083_v27 }
0x15e4   : > { %10538 = vmatpush3.msra.mxu0 %v12344_v35 }
0x15e5   : > { %10540 = vmatmul.mubr.msk.f32.vlgmr.msra.gmra.mxu0 %vm347_vm1, %v12196_v14  ;;  %10552 = vmatprep.subr.mxu0 %v12083_v27 }
0x15e6   : > { %10556 = vmatprep.mubr.msk.f32.mxu0 %vm11411_vm2, %v12083_v27 }
0x1695   : > { %v2922_v40 = vpop.f32.mrf.mxu0 }
0x1696   : > { %v2926_v37 = vmul.f32 0.25, %v2922_v40 }
0x1697   : > { %v10503_v53 = vpop.f32.mrf.mxu0 }
0x1698   : > { %v2927_v24 = vadd.f32 %v2926_v37, %v11784_v36 }
0x169a   : > { %v2928_v55 = vsel %vm750_vm5, %v2927_v24, -inf }
0x169b   : > { %2929 = vmax.xlane.f32.xlu0 %v2928_v55 }
0x169d   : > { %v3089_v59 = vpop.f32.mrf.mxu0 }
0x169e   : > { %v3090_v30 = vadd.f32 %v12400_v28, %v3089_v59 }
0x169f   : > { %v10519_v45 = vpop.f32.mrf.mxu0 }
0x16a5   : > { %v3247_v46 = vpop.f32.mrf.mxu0 }
0x16a6   : > { %v3248_v20 = vadd.f32 %v12406_v2, %v3247_v46 }
0x16a7   : > { %v10541_v61 = vpop.f32.mrf.mxu0 }
0x1724   : > { %v2930_v47 = vpop.xlane.xlu0 %2929 }
0x1725   : > { %v2931_v50 = vsub.f32 %v2927_v24, %v2930_v47  ;;  %v2575_v24 = vsel %vm347_vm1, %v12147_v48, 0.0 }
0x1727   : > { %v2932_v51 = vmul.f32 1.442695, %v2931_v50 }
0x1729   : > { %11290 = vpow2.f32 %v2932_v51 }
0x1736   : > { %v11291_v3 = vpop.eup %11290 }
0x1737   : > { %v2934_v5 = vsel %vm750_vm5, %v11291_v3, 0.0 }
0x1738   : > { %2935 = vadd.xlane.f32.xlu1 %v2934_v5 }
0x17c1   : > { %v2936_v52 = vpop.xlane.xlu1 %2935 }
0x17c2   : > { %11292 = vrcp.f32 %v2936_v52  ;;  %v12426_v52 = vld [vmem:[%s13824_s4 + $0xe8] sm:$0xff] }
0x17c3   : > { %10553 = vmatpush3.msra.mxu0 %v12426_v52 }
0x17c4   : > { %10554 = vmatprep.subr.mxu0 %v12083_v27 }
0x17cf   : > { %v11293_v54 = vpop.eup %11292 }
0x17d0   : > { %v2938_v58 = vmul.f32 %v11293_v54, %v11291_v3  ;;  %v12431_v54 = vld [vmem:[%s13824_s4 + $0xe0] sm:$0xff] }
0x17d1   : > { %10555 = vmatpush3.msra.mxu0 %v12431_v54 }
0x17d2   : > { %10507 = vmatmul.mubr.msk.f32.vlgmr.msra.gmra.mxu1 %vm750_vm5, %v2938_v58  ;;  %10566 = vmatprep.subr.mxu0 %v12083_v27 }
0x17d3   : > { %10521 = vmatpush3.msra.mxu1 %v12360_v9  ;;  %10528 = vmatprep.mubr.msk.f32.mxu1 %vm11411_vm2, %v12083_v27 }
0x17d4   : > { %10522 = vmatprep.subr.mxu1 %v12083_v27 }
0x17d5   : > { %10523 = vmatpush3.msra.mxu1 %v12366_v10 }
0x17d6   : > { %10524 = vmatprep.subr.mxu1 %v12083_v27 }
0x17d7   : > { %10525 = vmatpush3.msra.mxu1 %v12375_v43 }
0x17d8   : > { %10526 = vmatprep.subr.mxu1 %v12083_v27 }
0x17d9   : > { %10527 = vmatpush3.msra.mxu1 %v12382_v11 }
0x17da   : > { %10529 = vmatmul.mubr.msk.f32.vlgmr.msra.gmra.mxu1 %vm347_vm1, %v12196_v14  ;;  %10542 = vmatprep.subr.mxu1 %v12083_v27 }
0x17db   : > { %10544 = vmatprep.mubr.msk.f32.mxu1 %vm11411_vm2, %v12083_v27 }
0x1892   : > { %v3008_v12 = vpop.f32.mrf.mxu1 }
0x1894   : > { %v10508_v13 = vpop.f32.mrf.mxu1 }
0x189a   : > { %v3168_v63 = vpop.f32.mrf.mxu1 }
0x189b   : > { %v3169_v14 = vadd.f32 %v12395_v57, %v3168_v63 }
0x189c   : > { %v10530_v25 = vpop.f32.mrf.mxu1 }
0x189d   : > { %10543 = vmatpush3.xpose.msk.msra.mxu1 %vm671_vm3, %v3169_v14 }
0x189e   : > { %10547 = vmatprep.subr.mxu1 %v12083_v27 }
0x18a0   : > { %10545 = vmatmul.mubr.msk.f32.vlgmr.msra.gmra.mxu1 %vm671_vm3, %v3090_v30 }
0x18a1   : > { %10548 = vmatpush3.msra.mxu1 %v3248_v20  ;;  %10549 = vmatprep.mubr.msk.f32.mxu1 %vm11411_vm2, %v12083_v27  ;;  %v12440_v20 = vld [vmem:[%s13824_s4 + $0xd8] sm:$0xff] }
0x18a2   : > { %10559 = vmatprep.subr.mxu1 %v12083_v27 }
0x1960   : > { %v3323_v22 = vpop.f32.mrf.mxu1 }
0x1961   : > { %v3327_v23 = vmul.f32 0.25, %v3323_v22  ;;  %v12446_v22 = vld [vmem:[%s13824_s4 + $0xd0] sm:$0xff] }
0x1962   : > { %v10546_v40 = vpop.f32.mrf.mxu1 }
0x1963   : > { %v3328_v37 = vadd.f32 %v3327_v23, %v11784_v36 }
0x1965   : > { %v3329_v53 = vsel %vm750_vm5, %v3328_v37, -inf }
0x1966   : > { %3330 = vmax.xlane.f32.xlu0 %v3329_v53 }
0x196a   : > { %2576 = vadd.xlane.f32.xlu0 %v2575_v24 }
0x19ef   : > { %v3331_v55 = vpop.xlane.xlu0 %3330 }
0x19f0   : > { %v3332_v59 = vsub.f32 %v3328_v37, %v3331_v55 }
0x19f2   : > { %v3333_v45 = vmul.f32 1.442695, %v3332_v59 }
0x19f3   : > { %v2577_v46 = vpop.xlane.xlu0 %2576 }
0x19f4   : > { %11294 = vpow2.f32 %v3333_v45  ;;  %v2579_v61 = vmul.f32 0.03125, %v2577_v46 }
0x19f6   : > { %v2581_v47 = vsub.f32 %v12147_v48, %v2579_v61 }
0x19f8   : > { %v2583_v3 = vmul.f32 %v2581_v47, %v2581_v47 }
0x19fa   : > { %v2587_v5 = vsel %vm347_vm1, %v2583_v3, 0.0 }
0x1a01   : > { %v11295_v50 = vpop.eup %11294 }
0x1a02   : > { %v3335_v51 = vsel %vm750_vm5, %v11295_v50, 0.0 }
0x1a03   : > { %3336 = vadd.xlane.f32.xlu1 %v3335_v51 }
0x1a07   : > { %2588 = vadd.xlane.f32.xlu1 %v2587_v5 }
0x1a8c   : > { %v3337_v58 = vpop.xlane.xlu1 %3336 }
0x1a8d   : > { %11296 = vrcp.f32 %v3337_v58 }
0x1a90   : > { %v2589_v13 = vpop.xlane.xlu1 %2588 }
0x1a91   : > { %v2591_v63 = vmul.f32 0.03125, %v2589_v13 }
0x1a93   : > { %v2593_v14 = vadd.f32 1e-05, %v2591_v63 }
0x1a95   : > { %11298 = vrsqrt.f32 %v2593_v14 }
0x1a9a   : > { %v11297_v25 = vpop.eup %11296 }
0x1a9b   : > { %v3339_v30 = vmul.f32 %v11297_v25, %v11295_v50 }
0x1a9d   : > { %10550 = vmatmul.mubr.msk.f32.vlgmr.msra.gmra.mxu1 %vm750_vm5, %v3339_v30 }
0x1a9e   : > { %10560 = vmatpush3.msra.mxu1 %v12440_v20  ;;  %10563 = vmatprep.mubr.msk.f32.mxu1 %vm11411_vm2, %v12083_v27 }
0x1a9f   : > { %10561 = vmatprep.subr.mxu1 %v12083_v27 }
0x1aa0   : > { %10562 = vmatpush3.msra.mxu1 %v12446_v22 }
0x1aa1   : > { %10564 = vmatmul.mubr.msk.f32.vlgmr.msra.gmra.mxu1 %vm671_vm3, %v3008_v12  ;;  %10577 = vmatprep.subr.mxu1 %v12083_v27 }
0x1aa2   : > { %v11299_v23 = vpop.eup %11298  ;;  %10578 = vmatpush3.msra.mxu1 %v12201_v15  ;;  %10585 = vmatprep.mubr.msk.f32.mxu1 %vm11411_vm2, %v12083_v27 }
0x1aa3   : > { %v2597_v40 = vmul.f32 %v11299_v23, %v2581_v47  ;;  %10579 = vmatprep.subr.mxu1 %v12083_v27 }
0x1aa4   : > { %10580 = vmatpush3.msra.mxu1 %v12208_v18 }
0x1aa5   : > { %v2603_v37 = vmul.f32 %v12187_v1, %v2597_v40  ;;  %10581 = vmatprep.subr.mxu1 %v12083_v27 }
0x1aa6   : > { %10582 = vmatpush3.msra.mxu1 %v12217_v4 }
0x1aa7   : > { %10583 = vmatprep.subr.mxu1 %v12083_v27  ;;  %v12465_v12 = vadd.f32 %v12192_v44, %v2603_v37 }
0x1aa8   : > { %10584 = vmatpush3.msra.mxu1 %v12224_v6 }
0x1aa9   : > { %10586 = vmatmul.mubr.msk.f32.vlgmr.msra.gmra.mxu1 %vm347_vm1, %v12465_v12  ;;  %10599 = vmatprep.subr.mxu1 %v12083_v27 }
0x1aaa   : > { %10601 = vmatprep.mubr.msk.f32.mxu1 %vm11411_vm2, %v12083_v27 }
0x1b5d   : > { %v3409_v1 = vpop.f32.mrf.mxu1 }
0x1b5e   : > { %10557 = vmatmul.mubr.msk.f32.vlgmr.msra.gmra.mxu0 %vm671_vm3, %v3409_v1 }
0x1b5f   : > { %10567 = vmatpush3.msra.mxu0 %v12159_v16  ;;  %v10551_v15 = vpop.f32.mrf.mxu1  ;;  %10574 = vmatprep.mubr.msk.f32.mxu0 %vm11411_vm2, %v12083_v27 }
0x1b60   : > { %10568 = vmatprep.subr.mxu0 %v12083_v27 }
0x1b61   : > { %10569 = vmatpush3.msra.mxu0 %v12166_v42  ;;  %v12479_v44 = vpop.f32.mrf.mxu1 }
0x1b62   : > { %10570 = vmatprep.subr.mxu0 %v12083_v27 }
0x1b63   : > { %10571 = vmatpush3.msra.mxu0 %v12173_v60  ;;  %v10565_v18 = vpop.f32.mrf.mxu1 }
0x1b64   : > { %10572 = vmatprep.subr.mxu0 %v12083_v27 }
0x1b65   : > { %10573 = vmatpush3.msra.mxu0 %v12179_v8 }
0x1b66   : > { %10575 = vmatmul.mubr.msk.f32.vlgmr.msra.gmra.mxu0 %vm347_vm1, %v12465_v12  ;;  %10588 = vmatprep.subr.mxu0 %v12083_v27 }
0x1b67   : > { %10589 = vmatpush3.msra.mxu0 %v12231_v17  ;;  %10596 = vmatprep.mubr.msk.f32.mxu0 %vm11411_vm2, %v12083_v27 }
0x1b68   : > { %10590 = vmatprep.subr.mxu0 %v12083_v27 }
0x1b69   : > { %10591 = vmatpush3.msra.mxu0 %v12240_v21  ;;  %v3700_v16 = vpop.f32.mrf.mxu1 }
0x1b6a   : > { %v3701_v42 = vadd.f32 %v12269_v0, %v3700_v16  ;;  %10592 = vmatprep.subr.mxu0 %v12083_v27 }
0x1b6b   : > { %10593 = vmatpush3.msra.mxu0 %v12249_v29  ;;  %v10587_v60 = vpop.f32.mrf.mxu1 }
0x1b6c   : > { %10594 = vmatprep.subr.mxu0 %v12083_v27  ;;  %10600 = vmatpush3.xpose.msk.msra.mxu1 %vm671_vm3, %v3701_v42 }
0x1b6d   : > { %10595 = vmatpush3.msra.mxu0 %v12256_v56  ;;  %10604 = vmatprep.subr.mxu1 %v12083_v27 }
0x1b6e   : > { %10597 = vmatmul.mubr.msk.f32.vlgmr.msra.gmra.mxu0 %vm347_vm1, %v12465_v12  ;;  %10609 = vmatprep.subr.mxu0 %v12083_v27 }
0x1b6f   : > { %10610 = vmatpush3.msra.mxu0 %v12283_v19  ;;  %10617 = vmatprep.mubr.msk.f32.mxu0 %vm11411_vm2, %v12083_v27 }
0x1b70   : > { %10611 = vmatprep.subr.mxu0 %v12083_v27 }
0x1b71   : > { %10612 = vmatpush3.msra.mxu0 %v12294_v7 }
0x1b72   : > { %10613 = vmatprep.subr.mxu0 %v12083_v27 }
0x1b73   : > { %10614 = vmatpush3.msra.mxu0 %v12303_v38 }
0x1b74   : > { %10615 = vmatprep.subr.mxu0 %v12083_v27 }
0x1b75   : > { %10616 = vmatpush3.msra.mxu0 %v12311_v39 }
0x1b76   : > { %10618 = vmatmul.mubr.msk.f32.vlgmr.msra.gmra.mxu0 %vm347_vm1, %v12465_v12  ;;  %10631 = vmatprep.subr.mxu0 %v12083_v27 }
0x1b77   : > { %10632 = vmatpush3.msra.mxu0 %v12318_v31  ;;  %10639 = vmatprep.mubr.msk.f32.mxu0 %vm11411_vm2, %v12083_v27 }
0x1b78   : > { %10633 = vmatprep.subr.mxu0 %v12083_v27 }
0x1b79   : > { %10634 = vmatpush3.msra.mxu0 %v12328_v62 }
0x1b7a   : > { %10635 = vmatprep.subr.mxu0 %v12083_v27 }
0x1b7b   : > { %10636 = vmatpush3.msra.mxu0 %v12337_v41 }
0x1b7c   : > { %10637 = vmatprep.subr.mxu0 %v12083_v27 }
0x1b7d   : > { %10638 = vmatpush3.msra.mxu0 %v12344_v35 }
0x1b7e   : > { %10640 = vmatmul.mubr.msk.f32.vlgmr.msra.gmra.mxu0 %vm347_vm1, %v12465_v12  ;;  %10652 = vmatprep.subr.mxu0 %v12083_v27 }
0x1b7f   : > { %10653 = vmatpush3.msra.mxu0 %v12426_v52  ;;  %10656 = vmatprep.mubr.msk.f32.mxu0 %vm11411_vm2, %v12083_v27 }
0x1b80   : > { %10654 = vmatprep.subr.mxu0 %v12083_v27 }
0x1b81   : > { %10655 = vmatpush3.msra.mxu0 %v12431_v54 }
0x1c1e   : > { %v3484_v8 = vpop.f32.mrf.mxu0 }
0x1c1f   : > { %v3558_v3 = vadd.f32 %v12479_v44, %v3484_v8 }
0x1c20   : > { %v10558_v4 = vpop.f32.mrf.mxu0 }
0x1c21   : > { %v4454_v5 = vadd.f32 %v3558_v3, %v12150_v49  ;;  %v4659_v3 = vld [vmem:[%s13824_s4 + $0x178] sm:$0xff] }
0x1c26   : > { %v3630_v6 = vpop.f32.mrf.mxu0 }
0x1c27   : > { %v3631_v17 = vadd.f32 %v12274_v26, %v3630_v6  ;;  %v9653_v6 = vld [vmem:[%s13824_s4 + $0x108] ss:$0 sm:$0xff] }
0x1c28   : > { %v10576_v21 = vpop.f32.mrf.mxu0 }
0x1c29   : > { %10602 = vmatmul.mubr.msk.f32.vlgmr.msra.gmra.mxu1 %vm671_vm3, %v3631_v17  ;;  %v9654_v17 = vld [vmem:[%s13824_s4 + $0x110] ss:$0 sm:$0xff] }
0x1c2a   : > { %10606 = vmatprep.mubr.msk.f32.mxu1 %vm11411_vm2, %v12083_v27 }
0x1c2e   : > { %v3770_v29 = vpop.f32.mrf.mxu0 }
0x1c2f   : > { %v3771_v56 = vadd.f32 %v12289_v32, %v3770_v29 }
0x1c30   : > { %v10598_v0 = vpop.f32.mrf.mxu0 }
0x1c31   : > { %10605 = vmatpush3.msra.mxu1 %v3771_v56 }
0x1c32   : > { %10620 = vmatprep.subr.mxu1 %v12083_v27 }
0x1c36   : > { %v4002_v19 = vpop.f32.mrf.mxu0 }
0x1c38   : > { %v10619_v7 = vpop.f32.mrf.mxu0 }
0x1c3e   : > { %v4142_v38 = vpop.f32.mrf.mxu0 }
0x1c40   : > { %v10641_v39 = vpop.f32.mrf.mxu0 }
0x1ce9   : > { %v3846_v31 = vpop.f32.mrf.mxu1 }
0x1cea   : > { %v3850_v62 = vmul.f32 0.25, %v3846_v31 }
0x1ceb   : > { %v10603_v26 = vpop.f32.mrf.mxu1 }
0x1cec   : > { %v3851_v41 = vadd.f32 %v3850_v62, %v11784_v36 }
0x1cee   : > { %v3852_v35 = vsel %vm750_vm5, %v3851_v41, -inf }
0x1cef   : > { %3853 = vmax.xlane.f32.xlu0 %v3852_v35 }
0x1d78   : > { %v3854_v53 = vpop.xlane.xlu0 %3853 }
0x1d79   : > { %v3855_v24 = vsub.f32 %v3851_v41, %v3854_v53 }
0x1d7b   : > { %v3856_v55 = vmul.f32 1.442695, %v3855_v24  ;;  %v4506_v24 = vld [vmem:[%s13825_s5 + $0x40] sm:$0xff] }
0x1d7c   : > { %10666 = vmatprep.subr.mxu0 %v4506_v24 }
0x1d7d   : > { %11300 = vpow2.f32 %v3856_v55  ;;  %v4504_v55 = vld [vmem:[%s13825_s5 + $0x30] sm:$0xff] }
0x1d8a   : > { %v11301_v32 = vpop.eup %11300 }
0x1d8b   : > { %v3858_v59 = vsel %vm750_vm5, %v11301_v32, 0.0 }
0x1d8c   : > { %3859 = vadd.xlane.f32.xlu1 %v3858_v59  ;;  %v12614_v59 = vld [vmem:[%s11464_s27] sm:$0xff] }
0x1e15   : > { %v3860_v45 = vpop.xlane.xlu1 %3859 }
0x1e16   : > { %11302 = vrcp.f32 %v3860_v45 }
0x1e23   : > { %v11303_v46 = vpop.eup %11302 }
0x1e24   : > { %v3862_v61 = vmul.f32 %v11303_v46, %v11301_v32  ;;  %v4503_v32 = vld [vmem:[%s13825_s5 + $0x28] sm:$0xff] }
0x1e26   : > { %10607 = vmatmul.mubr.msk.f32.vlgmr.msra.gmra.mxu1 %vm750_vm5, %v3862_v61 }
0x1e27   : > { %10621 = vmatpush3.msra.mxu1 %v12360_v9  ;;  %10628 = vmatprep.mubr.msk.f32.mxu1 %vm11411_vm2, %v12083_v27 }
0x1e28   : > { %10622 = vmatprep.subr.mxu1 %v12083_v27 }
0x1e29   : > { %10623 = vmatpush3.msra.mxu1 %v12366_v10 }
0x1e2a   : > { %10624 = vmatprep.subr.mxu1 %v12083_v27 }
0x1e2b   : > { %10625 = vmatpush3.msra.mxu1 %v12375_v43  ;;  %v4003_v43 = vadd.f32 %v12400_v28, %v4002_v19  ;;  %v9652_v28 = vld [vmem:[%s13824_s4 + $0xf0] ss:$0 sm:$0xff] }
0x1e2c   : > { %10626 = vmatprep.subr.mxu1 %v12083_v27  ;;  %v12571_v58 = vadd.f32 %v9652_v28, %v4454_v5  ;;  %v4657_v5 = vld [vmem:[%s13824_s4 + $0x168] sm:$0xff] }
0x1e2d   : > { %10627 = vmatpush3.msra.mxu1 %v12382_v11  ;;  %v4143_v11 = vadd.f32 %v12406_v2, %v4142_v38 }
0x1e2e   : > { %10629 = vmatmul.mubr.msk.f32.vlgmr.msra.gmra.mxu1 %vm347_vm1, %v12465_v12  ;;  %10642 = vmatprep.subr.mxu1 %v12083_v27  ;;  %v4465_v63 = vsel %vm347_vm1, %v12571_v58, 0.0 }
0x1e2f   : > { %10644 = vmatprep.mubr.msk.f32.mxu1 %vm11411_vm2, %v12083_v27 }
0x1ee6   : > { %v3932_v9 = vpop.f32.mrf.mxu1 }
0x1ee8   : > { %v10608_v47 = vpop.f32.mrf.mxu1 }
0x1eee   : > { %v4072_v50 = vpop.f32.mrf.mxu1 }
0x1eef   : > { %v4073_v10 = vadd.f32 %v12395_v57, %v4072_v50 }
0x1ef0   : > { %v10630_v51 = vpop.f32.mrf.mxu1 }
0x1ef1   : > { %10643 = vmatpush3.xpose.msk.msra.mxu1 %vm671_vm3, %v4073_v10  ;;  %v4662_v51 = vld [vmem:[%s13824_s4 + $0x190] sm:$0xff] }
0x1ef2   : > { %10647 = vmatprep.subr.mxu1 %v12083_v27 }
0x1ef4   : > { %10645 = vmatmul.mubr.msk.f32.vlgmr.msra.gmra.mxu1 %vm671_vm3, %v4003_v43  ;;  %v4661_v43 = vld [vmem:[%s13824_s4 + $0x188] sm:$0xff] }
0x1ef5   : > { %10648 = vmatpush3.msra.mxu1 %v4143_v11  ;;  %10649 = vmatprep.mubr.msk.f32.mxu1 %vm11411_vm2, %v12083_v27  ;;  %v4660_v11 = vld [vmem:[%s13824_s4 + $0x180] sm:$0xff] }
0x1ef6   : > { %10659 = vmatprep.subr.mxu1 %v12083_v27 }
0x1fb4   : > { %v4218_v57 = vpop.f32.mrf.mxu1 }
0x1fb5   : > { %v4222_v52 = vmul.f32 0.25, %v4218_v57  ;;  %v4658_v57 = vld [vmem:[%s13824_s4 + $0x170] sm:$0xff] }
0x1fb6   : > { %v10646_v54 = vpop.f32.mrf.mxu1 }
0x1fb7   : > { %v4223_v2 = vadd.f32 %v4222_v52, %v11784_v36  ;;  %v4656_v52 = vld [vmem:[%s13824_s4 + $0x160] sm:$0xff]  ;;  %v4654_v54 = vld [vmem:[%s13824_s4 + $0x150] sm:$0xff] }
0x1fb9   : > { %v4224_v13 = vsel %vm750_vm5, %v4223_v2, -inf }
0x1fba   : > { %4225 = vmax.xlane.f32.xlu0 %v4224_v13  ;;  %v4652_v13 = vld [vmem:[%s13824_s4 + $0x140] sm:$0xff] }
0x1fbe   : > { %4466 = vadd.xlane.f32.xlu0 %v4465_v63  ;;  %v4651_v63 = vld [vmem:[%s13824_s4 + $0x138] sm:$0xff] }
0x2043   : > { %v4226_v14 = vpop.xlane.xlu0 %4225 }
0x2044   : > { %v4227_v25 = vsub.f32 %v4223_v2, %v4226_v14  ;;  %v4653_v2 = vld [vmem:[%s13824_s4 + $0x148] sm:$0xff]  ;;  %v4650_v14 = vld [vmem:[%s13824_s4 + $0x130] sm:$0xff] }
0x2046   : > { %v4228_v49 = vmul.f32 1.442695, %v4227_v25  ;;  %v4649_v25 = vld [vmem:[%s13824_s4 + $0x128] sm:$0xff] }
0x2047   : > { %v4467_v30 = vpop.xlane.xlu0 %4466 }
0x2048   : > { %11304 = vpow2.f32 %v4228_v49  ;;  %v4471_v23 = vmul.f32 0.03125, %v4467_v30  ;;  %v4648_v49 = vld [vmem:[%s13824_s4 + $0x120] sm:$0xff]  ;;  %v4647_v30 = vld [vmem:[%s13824_s4 + $0x118] sm:$0xff] }
0x204a   : > { %v4473_v40 = vsub.f32 %v12571_v58, %v4471_v23  ;;  %v9655_v23 = vld [vmem:[%s13825_s5 + $0x48] ss:$0 sm:$0xff] }
0x204c   : > { %v4475_v37 = vmul.f32 %v4473_v40, %v4473_v40 }
0x204e   : > { %v4477_v36 = vsel %vm347_vm1, %v4475_v37, 0.0 }
0x204f   : > { %4478 = vadd.xlane.f32.xlu0 %v4477_v36 }
0x2055   : > { %v11305_v12 = vpop.eup %11304 }
0x2056   : > { %v4230_v1 = vsel %vm750_vm5, %v11305_v12, 0.0 }
0x2057   : > { %4231 = vadd.xlane.f32.xlu1 %v4230_v1 }
0x20d8   : > { %v4479_v16 = vpop.xlane.xlu0 %4478 }
0x20d9   : > { %v4483_v42 = vmul.f32 0.03125, %v4479_v16 }
0x20db   : > { %v4485_v60 = vadd.f32 1e-05, %v4483_v42 }
0x20e0   : > { %v4232_v15 = vpop.xlane.xlu1 %4231 }
0x20e1   : > { %11306 = vrcp.f32 %v4232_v15 }
0x20e2   : > { %11308 = vrsqrt.f32 %v4485_v60 }
0x20ee   : > { %v11307_v44 = vpop.eup %11306 }
0x20ef   : > { %v4234_v18 = vmul.f32 %v11307_v44, %v11305_v12  ;;  %v11309_v8 = vpop.eup %11308 }
0x20f0   : > { %v4489_v4 = vmul.f32 %v11309_v8, %v4473_v40 }
0x20f1   : > { %10650 = vmatmul.mubr.msk.f32.vlgmr.msra.gmra.mxu1 %vm750_vm5, %v4234_v18 }
0x20f2   : > { %10660 = vmatpush3.msra.mxu1 %v12440_v20  ;;  %10663 = vmatprep.mubr.msk.f32.mxu1 %vm11411_vm2, %v12083_v27  ;;  %v4495_v20 = vmul.f32 %v9653_v6, %v4489_v4 }
0x20f3   : > { %10661 = vmatprep.subr.mxu1 %v12083_v27 }
0x20f4   : > { %10662 = vmatpush3.msra.mxu1 %v12446_v22  ;;  %v4501_v21 = vadd.f32 %v9654_v17, %v4495_v20 }
0x20f5   : > { %10664 = vmatmul.mubr.msk.f32.vlgmr.msra.gmra.mxu1 %vm671_vm3, %v3932_v9  ;;  %10677 = vmatprep.subr.mxu1 %v4662_v51 }
0x20f6   : > { %10678 = vmatpush3.msra.mxu1 %v4662_v51 }
0x20f7   : > { %10679 = vmatprep.subr.mxu1 %v4661_v43 }
0x20f8   : > { %10680 = vmatpush3.msra.mxu1 %v4661_v43 }
0x20f9   : > { %10681 = vmatprep.subr.mxu1 %v4660_v11 }
0x20fa   : > { %10682 = vmatpush3.msra.mxu1 %v4660_v11 }
0x20fb   : > { %10683 = vmatprep.subr.mxu1 %v4659_v3 }
0x20fc   : > { %10684 = vmatpush3.msra.mxu1 %v4659_v3 }
0x20fd   : > { %10685 = vmatprep.subr.mxu1 %v4658_v57 }
0x20fe   : > { %10686 = vmatpush3.msra.mxu1 %v4658_v57 }
0x20ff   : > { %10687 = vmatprep.subr.mxu1 %v4657_v5 }
0x2100   : > { %10688 = vmatpush3.msra.mxu1 %v4657_v5 }
0x2101   : > { %10689 = vmatprep.subr.mxu1 %v4656_v52 }
0x2102   : > { %10690 = vmatpush3.msra.mxu1 %v4656_v52 }
0x21b1   : > { %v4304_v27 = vpop.f32.mrf.mxu1 }
0x21b2   : > { %10657 = vmatmul.mubr.msk.f32.vlgmr.msra.gmra.mxu0 %vm671_vm3, %v4304_v27 }
0x21b3   : > { %v10651_v22 = vpop.f32.mrf.mxu1  ;;  %10674 = vmatprep.mubr.msk.f32.mxu0 %vm347_vm1, %v4501_v21  ;;  %10667 = vmatpush3.msra.mxu0 %v4506_v24 }
0x21b5   : > { %v4450_v29 = vpop.f32.mrf.mxu1 }
0x21b7   : > { %v10665_v56 = vpop.f32.mrf.mxu1 }
0x2272   : > { %v4377_v0 = vpop.f32.mrf.mxu0 }
0x2273   : > { %v4451_v19 = vadd.f32 %v4450_v29, %v4377_v0 }
0x2274   : > { %v10658_v7 = vpop.f32.mrf.mxu0 }
0x2275   : > { %v4455_v38 = vadd.f32 %v4451_v19, %v12147_v48  ;;  %v4505_v48 = vld [vmem:[%s13825_s5 + $0x38] sm:$0xff] }
0x2276   : > { %10668 = vmatprep.subr.mxu0 %v4505_v48 }
0x2277   : > { %v12595_v39 = vadd.f32 %v9652_v28, %v4455_v38  ;;  %10669 = vmatpush3.msra.mxu0 %v4505_v48  ;;  %v4655_v28 = vld [vmem:[%s13824_s4 + $0x158] sm:$0xff] }
0x2278   : > { %10670 = vmatprep.subr.mxu0 %v4504_v55  ;;  %10691 = vmatprep.subr.mxu1 %v4655_v28 }
0x2279   : > { %v4468_v31 = vsel %vm347_vm1, %v12595_v39, 0.0  ;;  %10671 = vmatpush3.msra.mxu0 %v4504_v55  ;;  %10692 = vmatpush3.msra.mxu1 %v4655_v28 }
0x227a   : > { %4469 = vadd.xlane.f32.xlu1 %v4468_v31  ;;  %10672 = vmatprep.subr.mxu0 %v4503_v32 }
0x227b   : > { %10673 = vmatpush3.msra.mxu0 %v4503_v32  ;;  %10693 = vmatprep.subr.mxu1 %v4654_v54 }
0x227c   : > { %10712 = vmatprep.subr.mxu0 %v12614_v59  ;;  %10694 = vmatpush3.msra.mxu1 %v4654_v54 }
0x227d   : > { %10695 = vmatprep.subr.mxu1 %v4653_v2 }
0x227e   : > { %10696 = vmatpush3.msra.mxu1 %v4653_v2 }
0x227f   : > { %10697 = vmatprep.subr.mxu1 %v4652_v13 }
0x2280   : > { %10698 = vmatpush3.msra.mxu1 %v4652_v13 }
0x2281   : > { %10699 = vmatprep.subr.mxu1 %v4651_v63 }
0x2282   : > { %10700 = vmatpush3.msra.mxu1 %v4651_v63 }
0x2283   : > { %10701 = vmatprep.subr.mxu1 %v4650_v14 }
0x2284   : > { %10702 = vmatpush3.msra.mxu1 %v4650_v14  ;;  %v4748_v14 = vshrl.u32 %v387_v33, 7 }
0x2285   : > { %10703 = vmatprep.subr.mxu1 %v4649_v25 }
0x2286   : > { %10704 = vmatpush3.msra.mxu1 %v4649_v25  ;;  %v4749_v25 = vmul.u32 8, %v4748_v14 }
0x2287   : > { %10705 = vmatprep.subr.mxu1 %v4648_v49 }
0x2288   : > { %10706 = vmatpush3.msra.mxu1 %v4648_v49  ;;  %vm4750_vm10 = vcmp.eq.s32.totalorder %v11780_v34, %v4749_v25 }
0x2289   : > { %10707 = vmatprep.subr.mxu1 %v4647_v30 }
0x228a   : > { %10708 = vmatpush3.msra.mxu1 %v4647_v30  ;;  %v9658_v30 = vld [vmem:[%s13824_s4 + $0x198] ss:$0 sm:$0xff] }
0x2303   : > { %v4470_v62 = vpop.xlane.xlu1 %4469 }
0x2304   : > { %v4472_v26 = vmul.f32 0.03125, %v4470_v62 }
0x2306   : > { %v4474_v41 = vsub.f32 %v12595_v39, %v4472_v26 }
0x2308   : > { %v4476_v35 = vmul.f32 %v4474_v41, %v4474_v41 }
0x230a   : > { %v4480_v53 = vsel %vm347_vm1, %v4476_v35, 0.0 }
0x230b   : > { %4481 = vadd.xlane.f32.xlu1 %v4480_v53 }
0x2394   : > { %v4482_v45 = vpop.xlane.xlu1 %4481 }
0x2395   : > { %v4484_v46 = vmul.f32 0.03125, %v4482_v45 }
0x2397   : > { %v4486_v61 = vadd.f32 1e-05, %v4484_v46 }
0x2399   : > { %11310 = vrsqrt.f32 %v4486_v61 }
0x23a6   : > { %v11311_v9 = vpop.eup %11310 }
0x23a7   : > { %v4490_v47 = vmul.f32 %v11311_v9, %v4474_v41 }
0x23a9   : > { %v4496_v50 = vmul.f32 %v9653_v6, %v4490_v47 }
0x23ab   : > { %v4502_v10 = vadd.f32 %v9654_v17, %v4496_v50 }
0x23ad   : > { %10675 = vmatmul.mubr.msk.f32.vlgmr.msra.gmra.mxu0 %vm347_vm1, %v4502_v10 }
0x23ae   : > { %10716 = vmatprep.mubr.msk.f32.mxu0 %vm11411_vm2, %v12614_v59 }
0x246d   : > { %v10676_v40 = vpop.f32.mrf.mxu0 }
0x246e   : > { %v4590_v37 = vadd.f32 %v10676_v40, %v9655_v23 }
0x246f   : > { %v4584_v36 = vpop.f32.mrf.mxu0 }
0x2470   : > { %v4596_v12 = vmul.f32 0.70710677, %v4590_v37  ;;  %v4585_v1 = vadd.f32 %v9655_v23, %v4584_v36  ;;  %v4594_v2 = vmul.f32 0.5, %v4590_v37 }
0x2472   : > { %v4598_v15 = vand.u32 2147483647, %v4596_v12  ;;  %v4595_v44 = vmul.f32 0.70710677, %v4585_v1  ;;  %vm4638_vm8 = vcmp.ge.f32.partialorder %v4596_v12, 0.0  ;;  %v4593_v28 = vmul.f32 0.5, %v4585_v1 }
0x2473   : > { %v4751_v1 = vsel %vm4750_vm10, 1.0, %v12614_v59 }
0x2474   : > { %v4600_v18 = vmul.f32 0.3275911, %v4598_v15  ;;  %v4597_v16 = vand.u32 2147483647, %v4595_v44  ;;  %v4626_v4 = vsub.f32 0.0, %v4598_v15  ;;  %vm4637_vm9 = vcmp.ge.f32.partialorder %v4595_v44, 0.0 }
0x2476   : > { %v4602_v42 = vadd.f32 1.0, %v4600_v18  ;;  %v4599_v60 = vmul.f32 0.3275911, %v4597_v16  ;;  %v4625_v6 = vsub.f32 0.0, %v4597_v16  ;;  %v4628_v20 = vmul.f32 %v4626_v4, %v4598_v15  ;;  %v4851_v4 = vld [vmem:[%s13824_s4 + $0x428] sm:$0xff] }
0x2478   : > { %11312 = vrcp.f32 %v4602_v42  ;;  %v4601_v8 = vadd.f32 1.0, %v4599_v60  ;;  %v4627_v27 = vmul.f32 %v4625_v6, %v4597_v16  ;;  %v4631_v22 = vmul.f32 1.442695, %v4628_v20  ;;  %v4854_v42 = vld [vmem:[%s13824_s4 + $0x440] sm:$0xff]  ;;  %v4853_v60 = vld [vmem:[%s13824_s4 + $0x438] sm:$0xff] }
0x247a   : > { %11314 = vrcp.f32 %v4601_v8  ;;  %v4629_v0 = vmul.f32 1.442695, %v4627_v27  ;;  %v4852_v8 = vld [vmem:[%s13824_s4 + $0x430] sm:$0xff] }
0x247b   : > { %11316 = vpow2.f32 %v4631_v22 }
0x247c   : > { %11318 = vpow2.f32 %v4629_v0 }
0x2485   : > { %v11313_v17 = vpop.eup %11312 }
0x2486   : > { %v4608_v21 = vmul.f32 1.0614054, %v11313_v17 }
0x2487   : > { %v11315_v29 = vpop.eup %11314 }
0x2488   : > { %v4610_v56 = vadd.f32 -1.4531521, %v4608_v21  ;;  %v4607_v19 = vmul.f32 1.0614054, %v11315_v29  ;;  %v11317_v46 = vpop.eup %11316  ;;  %v9660_v21 = vld [vmem:[%s13824_s4 + $0x418] ss:$0 sm:$0xff] }
0x2489   : > { %v11319_v50 = vpop.eup %11318 }
0x248a   : > { %v4612_v7 = vmul.f32 %v11313_v17, %v4610_v56  ;;  %v4609_v38 = vadd.f32 -1.4531521, %v4607_v19 }
0x248c   : > { %v4614_v31 = vadd.f32 1.4214138, %v4612_v7  ;;  %v4611_v62 = vmul.f32 %v11315_v29, %v4609_v38 }
0x248e   : > { %v4616_v26 = vmul.f32 %v11313_v17, %v4614_v31  ;;  %v4613_v41 = vadd.f32 1.4214138, %v4611_v62 }
0x2490   : > { %v4618_v35 = vadd.f32 -0.28449672, %v4616_v26  ;;  %v4615_v53 = vmul.f32 %v11315_v29, %v4613_v41 }
0x2492   : > { %v4620_v24 = vmul.f32 %v11313_v17, %v4618_v35  ;;  %v4617_v48 = vadd.f32 -0.28449672, %v4615_v53 }
0x2494   : > { %v4622_v55 = vadd.f32 0.2548296, %v4620_v24  ;;  %v4619_v32 = vmul.f32 %v11315_v29, %v4617_v48 }
0x2496   : > { %v4624_v45 = vmul.f32 %v11313_v17, %v4622_v55  ;;  %v4621_v61 = vadd.f32 0.2548296, %v4619_v32 }
0x2498   : > { %v4634_v9 = vmul.f32 %v11317_v46, %v4624_v45  ;;  %v4623_v47 = vmul.f32 %v11315_v29, %v4621_v61  ;;  %v9661_v29 = vld [vmem:[%s13824_s4 + $0x420] ss:$0 sm:$0xff] }
0x249a   : > { %v4636_v10 = vsub.f32 1.0, %v4634_v9  ;;  %v4633_v51 = vmul.f32 %v11319_v50, %v4623_v47 }
0x249c   : > { %v4640_v43 = vsub.f32 0.0, %v4636_v10  ;;  %v4635_v11 = vsub.f32 1.0, %v4633_v51 }
0x249e   : > { %v4642_v3 = vsel %vm4638_vm8, %v4636_v10, %v4640_v43  ;;  %v4639_v57 = vsub.f32 0.0, %v4635_v11 }
0x249f   : > { %v4644_v5 = vadd.f32 1.0, %v4642_v3 }
0x24a0   : > { %v4641_v52 = vsel %vm4637_vm9, %v4635_v11, %v4639_v57 }
0x24a1   : > { %v4643_v54 = vadd.f32 1.0, %v4641_v52  ;;  %v4646_v63 = vmul.f32 %v4644_v5, %v4594_v2 }
0x24a3   : > { %v4645_v13 = vmul.f32 %v4643_v54, %v4593_v28 }
0x24a5   : > { %10709 = vmatprep.mubr.f32.mxu1 %v4645_v13 }
0x24a6   : > { %10710 = vmatmul.mubr.f32.vlgmr.msra.gmra.mxu1 %v4646_v63 }
0x2566   : > { %v10711_v49 = vpop.f32.mrf.mxu1 }
0x2567   : > { %v4739_v23 = vadd.f32 %v10711_v49, %v12595_v39 }
0x2568   : > { %v4729_v40 = vpop.f32.mrf.mxu1 }
0x2569   : > { %v4746_v36 = vadd.f32 %v9658_v30, %v4739_v23  ;;  %v4738_v37 = vadd.f32 %v4729_v40, %v12571_v58 }
0x256b   : > { %v4745_v12 = vadd.f32 %v9658_v30, %v4738_v37  ;;  %10713 = vmatpush3.msra.mxu0 %v4746_v36 }
0x256c   : > { %10714 = vmatprep.subr.mxu0 %v12614_v59 }
0x256d   : > { %10715 = vmatpush3.msra.mxu0 %v4745_v12 }
0x256e   : > { %10717 = vmatmul.mubr.msk.f32.vlgmr.msra.gmra.mxu0 %vm671_vm3, %v4751_v1  ;;  %10719 = vmatprep.subr.mxu0 %v12614_v59 }
0x256f   : > { %10727 = vmatprep.mubr.msk.f32.mxu0 %vm11411_vm2, %v12614_v59  ;;  %10720 = vmatpush3.msra.mxu0 %v4854_v42 }
0x2570   : > { %10721 = vmatprep.subr.mxu0 %v12614_v59 }
0x2571   : > { %10722 = vmatpush3.msra.mxu0 %v4853_v60 }
0x2572   : > { %10723 = vmatprep.subr.mxu0 %v12614_v59 }
0x2573   : > { %10724 = vmatpush3.msra.mxu0 %v4852_v8 }
0x2574   : > { %10725 = vmatprep.subr.mxu0 %v12614_v59 }
0x2575   : > { %10726 = vmatpush3.msra.mxu0 %v4851_v4 }
0x262e   : > { %v4821_v33 = vpop.f32.mrf.mxu0 }
0x262f   : > { %v4828_v34 = vsel %vm4827_vm11, %v4821_v33, 0.0 }
0x2630   : > { %4829 = vadd.xlane.f32.xlu0 %v4828_v34  ;;  %v10718_v58 = vpop.f32.mrf.mxu0 }
0x26b9   : > { %v4830_v39 = vpop.xlane.xlu0 %4829 }
0x26ba   : > { %v4831_v15 = vmul.f32 0.03125, %v4830_v39 }
0x26bc   : > { %v4832_v44 = vsub.f32 %v4821_v33, %v4831_v15 }
0x26be   : > { %v4833_v18 = vmul.f32 %v4832_v44, %v4832_v44 }
0x26c0   : > { %v4834_v16 = vsel %vm4827_vm11, %v4833_v18, 0.0 }
0x26c1   : > { %4835 = vadd.xlane.f32.xlu1 %v4834_v16 }
0x274a   : > { %v4836_v6 = vpop.xlane.xlu1 %4835 }
0x274b   : > { %v4837_v20 = vmul.f32 0.03125, %v4836_v6 }
0x274d   : > { %v4838_v17 = vadd.f32 1e-05, %v4837_v20 }
0x274f   : > { %11320 = vrsqrt.f32 %v4838_v17 }
0x275c   : > { %v11321_v27 = vpop.eup %11320 }
0x275d   : > { %v4840_v22 = vmul.f32 %v11321_v27, %v4832_v44 }
0x275f   : > { %v4845_v56 = vmul.f32 %v9660_v21, %v4840_v22 }
0x2761   : > { %v4850_v0 = vadd.f32 %v9661_v29, %v4845_v56 }
0x2763   : > { %10728 = vmatmul.mubr.msk.f32.vlgmr.msra.gmra.mxu0 %vm347_vm1, %v4850_v0 }
0x2823   : > { %v4924_v59 = vpop.f32.mrf.mxu0 }
0x2824   : > { %v4928_v19 = vmul.f32 %v4924_v59, %v4924_v59 }
0x2825   : > { %v10729_v7 = vpop.f32.mrf.mxu0 }
0x2826   : > { %v4929_v38 = vsel %vm4827_vm11, %v4928_v19, 0.0 }
0x2827   : > { %4930 = vadd.xlane.f32.xlu0 %v4929_v38 }
0x28b0   : > { %v4931_v31 = vpop.xlane.xlu0 %4930 }
0x28b1   : > { %11322 = vrsqrt.f32 %v4931_v31  ;;  %vm4934_vm12 = vcmp.eq.f32.partialorder %v4931_v31, inf  ;;  %v4937_v41 = vand.u32 2147483648, %v4931_v31  ;;  %vm4936_vm13 = vcmp.eq.f32.partialorder %v4931_v31, 0.0 }
0x28be   : > { %v11323_v62 = vpop.eup %11322 }
0x28bf   : > { %v4933_v26 = vmul.f32 %v11323_v62, %v4931_v31 }
0x28c1   : > { %v4935_v35 = vsel %vm4934_vm12, %v4931_v31, %v4933_v26 }
0x28c2   : > { %v4938_v53 = vsel %vm4936_vm13, %v4937_v41, %v4935_v35 }
0x28c3   : > { %v4939_v24 = vmax.f32 %v4938_v53, 1e-12 }
0x28c5   : > { %11324 = vrcp.f32 %v4939_v24 }
0x28d2   : > { %v11325_v48 = vpop.eup %11324 }
0x28d3   : > { %v4941_v55 = vmul.f32 %v11325_v48, %v4924_v59 }
0x28d5   : > { %4943 = vst.msk [vmem:[%s11464_s27] sm:$0x3] %vm4827_vm11, %v4941_v55 }
0x28d6 PF: > { %p9663_p5 = scmp.ne.s32.totalorder %s11455_s22, 1 }
0x28d8   : > { %4947 = sbr.rel (%p9663_p5) target bundleno = 20347 (0x4f7b), region = 52 }
0x28dd   : > { %v12715_v32 = vld [vmem:[%s13821_s1] sm:$0xff]  ;;  %vm4958_vm14 = vcmask 261120   ;;  %v11412_v10 = vmov 0.0   ;;  %v12727_v51 = vld [vmem:[%s13823_s3 + $0x1f8] sm:$0xff]  ;;  %v12735_v43 = vld [vmem:[%s13823_s3 + $0x1f0] sm:$0xff]  ;;  %vm11413_vm15 = vmmov 0   ;;  %v4948_v7 = vlaneseq }
0x28de   : > { %v4959_v45 = vsel %vm4958_vm14, %v12715_v32, 0.0  ;;  %10730 = vmatprep.subr.mxu0 %v11412_v10  ;;  %9520 = vst [vmem:[%s11464_s27] sm:$0xff] %v11412_v10  ;;  %10763 = vmatprep.subr.mxu1 %v11412_v10  ;;  %v12742_v11 = vld [vmem:[%s13823_s3 + $0x1e8] sm:$0xff]  ;;  %v12748_v3 = vld [vmem:[%s13823_s3 + $0x1e0] sm:$0xff]  ;;  %v12765_v13 = vld [vmem:[%s13824_s4 + $0x1d0] ss:$0 sm:$0xff]  ;;  %vm5238_vm0 = vcmask 130048  }
0x28df   : > { %4960 = vadd.xlane.f32.xlu0 %v4959_v45  ;;  %10731 = vmatpush3.msra.mxu0 %v12727_v51  ;;  %v12760_v54 = vld [vmem:[%s13824_s4 + $0x1c8] ss:$0 sm:$0xff]  ;;  %v12774_v25 = vld [vmem:[%s13823_s3 + $0x218] sm:$0xff]  ;;  %v12781_v49 = vld [vmem:[%s13823_s3 + $0x210] sm:$0xff]  ;;  %v4949_v38 = vshrl.u32 %v4948_v7, 7  ;;  %v4951_v31 = vand.u32 127, %v4948_v7 }
0x28e0   : > { %10732 = vmatprep.subr.mxu0 %v11412_v10  ;;  %10738 = vmatprep.mubr.msk.f32.mxu0 %vm11413_vm15, %v11412_v10  ;;  %v12790_v30 = vld [vmem:[%s13823_s3 + $0x208] sm:$0xff]  ;;  %v12797_v23 = vld [vmem:[%s13823_s3 + $0x200] sm:$0xff]  ;;  %v12804_v40 = vld [vmem:[%s13823_s3 + $0x238] sm:$0xff]  ;;  %vm5317_vm2 = vcmask 64512   ;;  %vm9506_vm7 = vcmask 254976  }
0x28e1   : > { %10733 = vmatpush3.msra.mxu0 %v12735_v43  ;;  %10765 = vmatprep.mubr.msk.f32.mxu1 %vm11413_vm15, %v11412_v10  ;;  %v12813_v36 = vld [vmem:[%s13823_s3 + $0x230] sm:$0xff]  ;;  %v12822_v37 = vld [vmem:[%s13823_s3 + $0x228] sm:$0xff]  ;;  %v12829_v12 = vld [vmem:[%s13823_s3 + $0x220] sm:$0xff]  ;;  %vm4952_vm1 = vcmp.gt.s32.totalorder %v4951_v31, %v4949_v38 }
0x28e2   : > { %10734 = vmatprep.subr.mxu0 %v11412_v10  ;;  %v12836_v1 = vld [vmem:[%s13823_s3 + $0x270] sm:$0xff]  ;;  %v12845_v33 = vld [vmem:[%s13823_s3 + $0x268] sm:$0xff]  ;;  %v12854_v34 = vld [vmem:[%s13823_s3 + $0x260] sm:$0xff]  ;;  %v12928_v26 = vsel %vm4952_vm1, -1e+09, %v11412_v10 }
0x28e3   : > { %10735 = vmatpush3.msra.mxu0 %v12742_v11  ;;  %v12861_v58 = vld [vmem:[%s13823_s3 + $0x258] sm:$0xff]  ;;  %v12868_v39 = vld [vmem:[%s13823_s3 + $0x2b0] sm:$0xff]  ;;  %v12877_v15 = vld [vmem:[%s13823_s3 + $0x2a8] sm:$0xff] }
0x28e4   : > { %10736 = vmatprep.subr.mxu0 %v11412_v10  ;;  %v12886_v44 = vld [vmem:[%s13823_s3 + $0x2a0] sm:$0xff]  ;;  %v12893_v18 = vld [vmem:[%s13823_s3 + $0x298] sm:$0xff]  ;;  %v12906_v60 = vld [vmem:[%s13823_s3 + $0x248] ss:$0 sm:$0xff] }
0x28e5   : > { %10737 = vmatpush3.msra.mxu0 %v12748_v3  ;;  %v12911_v4 = vld [vmem:[%s13823_s3 + $0x240] ss:$0 sm:$0xff]  ;;  %v12921_v27 = vld [vmem:[%s13823_s3 + $0x250] ss:$0 sm:$0xff] }
0x28e6   : > { %10741 = vmatprep.subr.mxu0 %v11412_v10 }
0x2968   : > { %v4961_v46 = vpop.xlane.xlu0 %4960 }
0x2969   : > { %v4966_v61 = vmul.f32 0.03125, %v4961_v46 }
0x296b   : > { %v4968_v9 = vsub.f32 %v12715_v32, %v4966_v61 }
0x296d   : > { %v4970_v47 = vmul.f32 %v4968_v9, %v4968_v9 }
0x296f   : > { %v4972_v50 = vsel %vm4958_vm14, %v4970_v47, 0.0 }
0x2970   : > { %4973 = vadd.xlane.f32.xlu0 %v4972_v50 }
0x29f9   : > { %v4974_v57 = vpop.xlane.xlu0 %4973 }
0x29fa   : > { %v4978_v5 = vmul.f32 0.03125, %v4974_v57  ;;  %v12936_v57 = vld [vmem:[%s13823_s3 + $0x290] sm:$0xff] }
0x29fc   : > { %v4980_v52 = vadd.f32 1e-05, %v4978_v5  ;;  %v12942_v5 = vld [vmem:[%s13823_s3 + $0x288] sm:$0xff] }
0x29fe   : > { %11328 = vrsqrt.f32 %v4980_v52  ;;  %v12951_v52 = vld [vmem:[%s13823_s3 + $0x280] sm:$0xff] }
0x2a0b   : > { %v11329_v28 = vpop.eup %11328 }
0x2a0c   : > { %v4984_v2 = vmul.f32 %v11329_v28, %v4968_v9  ;;  %v12958_v28 = vld [vmem:[%s13823_s3 + $0x278] sm:$0xff] }
0x2a0e   : > { %v4990_v63 = vmul.f32 %v12760_v54, %v4984_v2 }
0x2a10   : > { %v12769_v14 = vadd.f32 %v12765_v13, %v4990_v63 }
0x2a12   : > { %10739 = vmatmul.mubr.msk.f32.vlgmr.msra.gmra.mxu0 %vm4958_vm14, %v12769_v14 }
0x2a13   : > { %10742 = vmatpush3.msra.mxu0 %v12774_v25  ;;  %10749 = vmatprep.mubr.msk.f32.mxu0 %vm11413_vm15, %v11412_v10 }
0x2a14   : > { %10743 = vmatprep.subr.mxu0 %v11412_v10 }
0x2a15   : > { %10744 = vmatpush3.msra.mxu0 %v12781_v49 }
0x2a16   : > { %10745 = vmatprep.subr.mxu0 %v11412_v10 }
0x2a17   : > { %10746 = vmatpush3.msra.mxu0 %v12790_v30 }
0x2a18   : > { %10747 = vmatprep.subr.mxu0 %v11412_v10 }
0x2a19   : > { %10748 = vmatpush3.msra.mxu0 %v12797_v23 }
0x2a1a   : > { %10750 = vmatmul.mubr.msk.f32.vlgmr.msra.gmra.mxu0 %vm4958_vm14, %v12769_v14  ;;  %10752 = vmatprep.subr.mxu0 %v11412_v10 }
0x2a1b   : > { %10753 = vmatpush3.msra.mxu0 %v12804_v40  ;;  %10760 = vmatprep.mubr.msk.f32.mxu0 %vm11413_vm15, %v11412_v10 }
0x2a1c   : > { %10754 = vmatprep.subr.mxu0 %v11412_v10 }
0x2a1d   : > { %10755 = vmatpush3.msra.mxu0 %v12813_v36 }
0x2a1e   : > { %10756 = vmatprep.subr.mxu0 %v11412_v10 }
0x2a1f   : > { %10757 = vmatpush3.msra.mxu0 %v12822_v37 }
0x2a20   : > { %10758 = vmatprep.subr.mxu0 %v11412_v10 }
0x2a21   : > { %10759 = vmatpush3.msra.mxu0 %v12829_v12 }
0x2a22   : > { %10761 = vmatmul.mubr.msk.f32.vlgmr.msra.gmra.mxu0 %vm4958_vm14, %v12769_v14  ;;  %10773 = vmatprep.subr.mxu0 %v11412_v10 }
0x2a23   : > { %10774 = vmatpush3.msra.mxu0 %v12836_v1  ;;  %10781 = vmatprep.mubr.msk.f32.mxu0 %vm11413_vm15, %v11412_v10 }
0x2a24   : > { %10775 = vmatprep.subr.mxu0 %v11412_v10 }
0x2a25   : > { %10776 = vmatpush3.msra.mxu0 %v12845_v33 }
0x2a26   : > { %10777 = vmatprep.subr.mxu0 %v11412_v10 }
0x2a27   : > { %10778 = vmatpush3.msra.mxu0 %v12854_v34 }
0x2a28   : > { %10779 = vmatprep.subr.mxu0 %v11412_v10 }
0x2a29   : > { %10780 = vmatpush3.msra.mxu0 %v12861_v58 }
0x2a2a   : > { %10782 = vmatmul.mubr.msk.f32.vlgmr.msra.gmra.mxu0 %vm4958_vm14, %v12769_v14  ;;  %10795 = vmatprep.subr.mxu0 %v11412_v10 }
0x2a2b   : > { %10796 = vmatpush3.msra.mxu0 %v12868_v39  ;;  %10803 = vmatprep.mubr.msk.f32.mxu0 %vm11413_vm15, %v11412_v10 }
0x2a2c   : > { %10797 = vmatprep.subr.mxu0 %v11412_v10 }
0x2a2d   : > { %10798 = vmatpush3.msra.mxu0 %v12877_v15 }
0x2a2e   : > { %10799 = vmatprep.subr.mxu0 %v11412_v10 }
0x2a2f   : > { %10800 = vmatpush3.msra.mxu0 %v12886_v44 }
0x2a30   : > { %10801 = vmatprep.subr.mxu0 %v11412_v10 }
0x2a31   : > { %10802 = vmatpush3.msra.mxu0 %v12893_v18 }
0x2a32   : > { %10804 = vmatmul.mubr.msk.f32.vlgmr.msra.gmra.mxu0 %vm4958_vm14, %v12769_v14  ;;  %10816 = vmatprep.subr.mxu0 %v11412_v10 }
0x2a33   : > { %10820 = vmatprep.mubr.msk.f32.mxu0 %vm11413_vm15, %v11412_v10 }
0x2ad2   : > { %v5076_v16 = vpop.f32.mrf.mxu0 }
0x2ad3   : > { %v5077_v17 = vadd.f32 %v12911_v4, %v5076_v16  ;;  %v12971_v16 = vld [vmem:[%s13823_s3 + $0x2c0] ss:$0 sm:$0xff] }
0x2ad4   : > { %v10740_v42 = vpop.f32.mrf.mxu0 }
0x2ada   : > { %v5155_v8 = vpop.f32.mrf.mxu0 }
0x2adb   : > { %v5156_v6 = vadd.f32 %v12906_v60, %v5155_v8  ;;  %v12976_v8 = vld [vmem:[%s13823_s3 + $0x2b8] ss:$0 sm:$0xff] }
0x2adc   : > { %v10751_v20 = vpop.f32.mrf.mxu0 }
0x2add   : > { %10764 = vmatpush3.xpose.msk.msra.mxu1 %vm5238_vm0, %v5156_v6  ;;  %v12982_v6 = vld [vmem:[%s13823_s3 + $0x2c8] ss:$0 sm:$0xff] }
0x2ade   : > { %10768 = vmatprep.subr.mxu1 %v11412_v10 }
0x2ae0   : > { %10766 = vmatmul.mubr.msk.f32.vlgmr.msra.gmra.mxu1 %vm5238_vm0, %v5077_v17 }
0x2ae1   : > { %10770 = vmatprep.mubr.msk.f32.mxu1 %vm11413_vm15, %v11412_v10 }
0x2ae2   : > { %v5234_v21 = vpop.f32.mrf.mxu0 }
0x2ae3   : > { %v5235_v22 = vadd.f32 %v12921_v27, %v5234_v21 }
0x2ae4   : > { %v10762_v29 = vpop.f32.mrf.mxu0 }
0x2ae5   : > { %10769 = vmatpush3.msra.mxu1 %v5235_v22 }
0x2ae6   : > { %10784 = vmatprep.subr.mxu1 %v11412_v10 }
0x2aea   : > { %v5479_v56 = vpop.f32.mrf.mxu0 }
0x2aeb   : > { %v5480_v17 = vadd.f32 %v12976_v8, %v5479_v56  ;;  %v12996_v56 = vld [vmem:[%s13821_s1 + $0x8] sm:$0xff] }
0x2aec   : > { %v10783_v0 = vpop.f32.mrf.mxu0  ;;  %v4962_v7 = vsel %vm4958_vm14, %v12996_v56, 0.0 }
0x2af2   : > { %v5637_v59 = vpop.f32.mrf.mxu0 }
0x2af3   : > { %v5638_v21 = vadd.f32 %v12982_v6, %v5637_v59 }
0x2af4   : > { %v10805_v19 = vpop.f32.mrf.mxu0 }
0x2ba0   : > { %v5311_v62 = vpop.f32.mrf.mxu1 }
0x2ba1   : > { %v5315_v41 = vmul.f32 0.25, %v5311_v62 }
0x2ba2   : > { %v10767_v35 = vpop.f32.mrf.mxu1 }
0x2ba3   : > { %v5316_v53 = vadd.f32 %v5315_v41, %v12928_v26 }
0x2ba5   : > { %v5318_v24 = vsel %vm5317_vm2, %v5316_v53, -inf }
0x2ba6   : > { %5319 = vmax.xlane.f32.xlu1 %v5318_v24 }
0x2c2f   : > { %v5320_v48 = vpop.xlane.xlu1 %5319 }
0x2c30   : > { %v5321_v55 = vsub.f32 %v5316_v53, %v5320_v48 }
0x2c32   : > { %v5322_v45 = vmul.f32 1.442695, %v5321_v55 }
0x2c34   : > { %11330 = vpow2.f32 %v5322_v45 }
0x2c41   : > { %v11331_v46 = vpop.eup %11330 }
0x2c42   : > { %v5324_v61 = vsel %vm5317_vm2, %v11331_v46, 0.0 }
0x2c43   : > { %5325 = vadd.xlane.f32.xlu1 %v5324_v61  ;;  %v13012_v61 = vld [vmem:[%s13824_s4 + $0x1b0] sm:$0xff] }
0x2ccc   : > { %v5326_v9 = vpop.xlane.xlu1 %5325 }
0x2ccd   : > { %11332 = vrcp.f32 %v5326_v9 }
0x2cda   : > { %v11333_v47 = vpop.eup %11332 }
0x2cdb   : > { %v5328_v50 = vmul.f32 %v11333_v47, %v11331_v46  ;;  %v13007_v46 = vld [vmem:[%s13824_s4 + $0x1b8] sm:$0xff] }
0x2cdc   : > { %10817 = vmatpush3.msra.mxu0 %v13007_v46 }
0x2cdd   : > { %10771 = vmatmul.mubr.msk.f32.vlgmr.msra.gmra.mxu1 %vm5317_vm2, %v5328_v50  ;;  %10818 = vmatprep.subr.mxu0 %v11412_v10 }
0x2cde   : > { %10785 = vmatpush3.msra.mxu1 %v12936_v57  ;;  %10792 = vmatprep.mubr.msk.f32.mxu1 %vm11413_vm15, %v11412_v10 }
0x2cdf   : > { %10786 = vmatprep.subr.mxu1 %v11412_v10  ;;  %10819 = vmatpush3.msra.mxu0 %v13012_v61 }
0x2ce0   : > { %10787 = vmatpush3.msra.mxu1 %v12942_v5  ;;  %10830 = vmatprep.subr.mxu0 %v11412_v10 }
0x2ce1   : > { %10788 = vmatprep.subr.mxu1 %v11412_v10 }
0x2ce2   : > { %10789 = vmatpush3.msra.mxu1 %v12951_v52 }
0x2ce3   : > { %10790 = vmatprep.subr.mxu1 %v11412_v10 }
0x2ce4   : > { %10791 = vmatpush3.msra.mxu1 %v12958_v28 }
0x2ce5   : > { %10793 = vmatmul.mubr.msk.f32.vlgmr.msra.gmra.mxu1 %vm4958_vm14, %v12769_v14  ;;  %10806 = vmatprep.subr.mxu1 %v11412_v10 }
0x2ce6   : > { %10808 = vmatprep.mubr.msk.f32.mxu1 %vm11413_vm15, %v11412_v10 }
0x2d9d   : > { %v5398_v2 = vpop.f32.mrf.mxu1 }
0x2d9f   : > { %v10772_v63 = vpop.f32.mrf.mxu1 }
0x2da5   : > { %v5558_v42 = vpop.f32.mrf.mxu1 }
0x2da6   : > { %v5559_v14 = vadd.f32 %v12971_v16, %v5558_v42 }
0x2da7   : > { %v10794_v20 = vpop.f32.mrf.mxu1 }
0x2da8   : > { %10807 = vmatpush3.xpose.msk.msra.mxu1 %vm5238_vm0, %v5559_v14  ;;  %v13021_v20 = vld [vmem:[%s13824_s4 + $0x1a8] sm:$0xff] }
0x2da9   : > { %10811 = vmatprep.subr.mxu1 %v11412_v10 }
0x2dab   : > { %10809 = vmatmul.mubr.msk.f32.vlgmr.msra.gmra.mxu1 %vm5238_vm0, %v5480_v17  ;;  %v13027_v17 = vld [vmem:[%s13824_s4 + $0x1a0] sm:$0xff] }
0x2dac   : > { %10812 = vmatpush3.msra.mxu1 %v5638_v21  ;;  %10813 = vmatprep.mubr.msk.f32.mxu1 %vm11413_vm15, %v11412_v10 }
0x2dad   : > { %10823 = vmatprep.subr.mxu1 %v11412_v10 }
0x2e6b   : > { %v5713_v22 = vpop.f32.mrf.mxu1 }
0x2e6c   : > { %v5717_v29 = vmul.f32 0.25, %v5713_v22 }
0x2e6d   : > { %v10810_v0 = vpop.f32.mrf.mxu1 }
0x2e6e   : > { %v5718_v19 = vadd.f32 %v5717_v29, %v12928_v26 }
0x2e70   : > { %v5719_v59 = vsel %vm5317_vm2, %v5718_v19, -inf }
0x2e71   : > { %5720 = vmax.xlane.f32.xlu0 %v5719_v59 }
0x2e75   : > { %4963 = vadd.xlane.f32.xlu0 %v4962_v7 }
0x2efa   : > { %v5721_v38 = vpop.xlane.xlu0 %5720 }
0x2efb   : > { %v5722_v31 = vsub.f32 %v5718_v19, %v5721_v38 }
0x2efd   : > { %v5723_v62 = vmul.f32 1.442695, %v5722_v31 }
0x2efe   : > { %v4964_v41 = vpop.xlane.xlu0 %4963 }
0x2eff   : > { %11334 = vpow2.f32 %v5723_v62  ;;  %v4967_v35 = vmul.f32 0.03125, %v4964_v41 }
0x2f01   : > { %v4969_v53 = vsub.f32 %v12996_v56, %v4967_v35 }
0x2f03   : > { %v4971_v24 = vmul.f32 %v4969_v53, %v4969_v53 }
0x2f05   : > { %v4975_v45 = vsel %vm4958_vm14, %v4971_v24, 0.0 }
0x2f0c   : > { %v11335_v48 = vpop.eup %11334 }
0x2f0d   : > { %v5725_v55 = vsel %vm5317_vm2, %v11335_v48, 0.0 }
0x2f0e   : > { %5726 = vadd.xlane.f32.xlu1 %v5725_v55 }
0x2f12   : > { %4976 = vadd.xlane.f32.xlu1 %v4975_v45 }
0x2f97   : > { %v5727_v9 = vpop.xlane.xlu1 %5726 }
0x2f98   : > { %11336 = vrcp.f32 %v5727_v9 }
0x2f9b   : > { %v4977_v47 = vpop.xlane.xlu1 %4976 }
0x2f9c   : > { %v4979_v50 = vmul.f32 0.03125, %v4977_v47 }
0x2f9e   : > { %v4981_v63 = vadd.f32 1e-05, %v4979_v50 }
0x2fa0   : > { %11338 = vrsqrt.f32 %v4981_v63 }
0x2fa5   : > { %v11337_v42 = vpop.eup %11336 }
0x2fa6   : > { %v5729_v14 = vmul.f32 %v11337_v42, %v11335_v48 }
0x2fa8   : > { %10814 = vmatmul.mubr.msk.f32.vlgmr.msra.gmra.mxu1 %vm5317_vm2, %v5729_v14 }
0x2fa9   : > { %10824 = vmatpush3.msra.mxu1 %v13021_v20  ;;  %10827 = vmatprep.mubr.msk.f32.mxu1 %vm11413_vm15, %v11412_v10 }
0x2faa   : > { %10825 = vmatprep.subr.mxu1 %v11412_v10 }
0x2fab   : > { %10826 = vmatpush3.msra.mxu1 %v13027_v17 }
0x2fac   : > { %10828 = vmatmul.mubr.msk.f32.vlgmr.msra.gmra.mxu1 %vm5238_vm0, %v5398_v2  ;;  %10841 = vmatprep.subr.mxu1 %v11412_v10 }
0x2fad   : > { %v11339_v21 = vpop.eup %11338  ;;  %10842 = vmatpush3.msra.mxu1 %v12774_v25  ;;  %10849 = vmatprep.mubr.msk.f32.mxu1 %vm11413_vm15, %v11412_v10 }
0x2fae   : > { %v4985_v22 = vmul.f32 %v11339_v21, %v4969_v53  ;;  %10843 = vmatprep.subr.mxu1 %v11412_v10 }
0x2faf   : > { %10844 = vmatpush3.msra.mxu1 %v12781_v49 }
0x2fb0   : > { %v4991_v29 = vmul.f32 %v12760_v54, %v4985_v22  ;;  %10845 = vmatprep.subr.mxu1 %v11412_v10 }
0x2fb1   : > { %10846 = vmatpush3.msra.mxu1 %v12790_v30 }
0x2fb2   : > { %10847 = vmatprep.subr.mxu1 %v11412_v10  ;;  %v13046_v2 = vadd.f32 %v12765_v13, %v4991_v29 }
0x2fb3   : > { %10848 = vmatpush3.msra.mxu1 %v12797_v23 }
0x2fb4   : > { %10850 = vmatmul.mubr.msk.f32.vlgmr.msra.gmra.mxu1 %vm4958_vm14, %v13046_v2  ;;  %10863 = vmatprep.subr.mxu1 %v11412_v10 }
0x2fb5   : > { %10865 = vmatprep.mubr.msk.f32.mxu1 %vm11413_vm15, %v11412_v10 }
0x3068   : > { %v5799_v54 = vpop.f32.mrf.mxu1 }
0x3069   : > { %10821 = vmatmul.mubr.msk.f32.vlgmr.msra.gmra.mxu0 %vm5238_vm0, %v5799_v54 }
0x306a   : > { %10831 = vmatpush3.msra.mxu0 %v12727_v51  ;;  %v10815_v25 = vpop.f32.mrf.mxu1  ;;  %10838 = vmatprep.mubr.msk.f32.mxu0 %vm11413_vm15, %v11412_v10 }
0x306b   : > { %10832 = vmatprep.subr.mxu0 %v11412_v10 }
0x306c   : > { %10833 = vmatpush3.msra.mxu0 %v12735_v43  ;;  %v13060_v13 = vpop.f32.mrf.mxu1 }
0x306d   : > { %10834 = vmatprep.subr.mxu0 %v11412_v10 }
0x306e   : > { %10835 = vmatpush3.msra.mxu0 %v12742_v11  ;;  %v10829_v49 = vpop.f32.mrf.mxu1 }
0x306f   : > { %10836 = vmatprep.subr.mxu0 %v11412_v10 }
0x3070   : > { %10837 = vmatpush3.msra.mxu0 %v12748_v3 }
0x3071   : > { %10839 = vmatmul.mubr.msk.f32.vlgmr.msra.gmra.mxu0 %vm4958_vm14, %v13046_v2  ;;  %10852 = vmatprep.subr.mxu0 %v11412_v10 }
0x3072   : > { %10853 = vmatpush3.msra.mxu0 %v12804_v40  ;;  %10860 = vmatprep.mubr.msk.f32.mxu0 %vm11413_vm15, %v11412_v10 }
0x3073   : > { %10854 = vmatprep.subr.mxu0 %v11412_v10 }
0x3074   : > { %10855 = vmatpush3.msra.mxu0 %v12813_v36  ;;  %v6090_v51 = vpop.f32.mrf.mxu1 }
0x3075   : > { %10856 = vmatprep.subr.mxu0 %v11412_v10  ;;  %v6091_v43 = vadd.f32 %v12906_v60, %v6090_v51 }
0x3076   : > { %10857 = vmatpush3.msra.mxu0 %v12822_v37  ;;  %v10851_v11 = vpop.f32.mrf.mxu1 }
0x3077   : > { %10858 = vmatprep.subr.mxu0 %v11412_v10  ;;  %10864 = vmatpush3.xpose.msk.msra.mxu1 %vm5238_vm0, %v6091_v43 }
0x3078   : > { %10859 = vmatpush3.msra.mxu0 %v12829_v12  ;;  %10868 = vmatprep.subr.mxu1 %v11412_v10 }
0x3079   : > { %10861 = vmatmul.mubr.msk.f32.vlgmr.msra.gmra.mxu0 %vm4958_vm14, %v13046_v2  ;;  %10873 = vmatprep.subr.mxu0 %v11412_v10 }
0x307a   : > { %10874 = vmatpush3.msra.mxu0 %v12836_v1  ;;  %10881 = vmatprep.mubr.msk.f32.mxu0 %vm11413_vm15, %v11412_v10 }
0x307b   : > { %10875 = vmatprep.subr.mxu0 %v11412_v10 }
0x307c   : > { %10876 = vmatpush3.msra.mxu0 %v12845_v33 }
0x307d   : > { %10877 = vmatprep.subr.mxu0 %v11412_v10 }
0x307e   : > { %10878 = vmatpush3.msra.mxu0 %v12854_v34 }
0x307f   : > { %10879 = vmatprep.subr.mxu0 %v11412_v10 }
0x3080   : > { %10880 = vmatpush3.msra.mxu0 %v12861_v58 }
0x3081   : > { %10882 = vmatmul.mubr.msk.f32.vlgmr.msra.gmra.mxu0 %vm4958_vm14, %v13046_v2  ;;  %10895 = vmatprep.subr.mxu0 %v11412_v10 }
0x3082   : > { %10896 = vmatpush3.msra.mxu0 %v12868_v39  ;;  %10903 = vmatprep.mubr.msk.f32.mxu0 %vm11413_vm15, %v11412_v10 }
0x3083   : > { %10897 = vmatprep.subr.mxu0 %v11412_v10 }
0x3084   : > { %10898 = vmatpush3.msra.mxu0 %v12877_v15 }
0x3085   : > { %10899 = vmatprep.subr.mxu0 %v11412_v10 }
0x3086   : > { %10900 = vmatpush3.msra.mxu0 %v12886_v44 }
0x3087   : > { %10901 = vmatprep.subr.mxu0 %v11412_v10 }
0x3088   : > { %10902 = vmatpush3.msra.mxu0 %v12893_v18 }
0x3089   : > { %10904 = vmatmul.mubr.msk.f32.vlgmr.msra.gmra.mxu0 %vm4958_vm14, %v13046_v2  ;;  %10916 = vmatprep.subr.mxu0 %v11412_v10 }
0x308a   : > { %10917 = vmatpush3.msra.mxu0 %v13007_v46  ;;  %10920 = vmatprep.mubr.msk.f32.mxu0 %vm11413_vm15, %v11412_v10 }
0x308b   : > { %10918 = vmatprep.subr.mxu0 %v11412_v10 }
0x308c   : > { %10919 = vmatpush3.msra.mxu0 %v13012_v61 }
0x3129   : > { %v5874_v3 = vpop.f32.mrf.mxu0 }
0x312a   : > { %v5948_v24 = vadd.f32 %v13060_v13, %v5874_v3 }
0x312b   : > { %v10822_v30 = vpop.f32.mrf.mxu0 }
0x312c   : > { %v6844_v48 = vadd.f32 %v5948_v24, %v12715_v32  ;;  %v9701_v30 = vld [vmem:[%s13824_s4 + $0x1d8] ss:$0 sm:$0xff]  ;;  %v7048_v24 = vld [vmem:[%s13824_s4 + $0x240] sm:$0xff] }
0x3131   : > { %v6020_v23 = vpop.f32.mrf.mxu0 }
0x3132   : > { %v6021_v40 = vadd.f32 %v12911_v4, %v6020_v23  ;;  %v9702_v23 = vld [vmem:[%s13824_s4 + $0x1e0] ss:$0 sm:$0xff] }
0x3133   : > { %v10840_v36 = vpop.f32.mrf.mxu0 }
0x3134   : > { %10866 = vmatmul.mubr.msk.f32.vlgmr.msra.gmra.mxu1 %vm5238_vm0, %v6021_v40 }
0x3135   : > { %10870 = vmatprep.mubr.msk.f32.mxu1 %vm11413_vm15, %v11412_v10 }
0x3139   : > { %v6160_v37 = vpop.f32.mrf.mxu0 }
0x313a   : > { %v6161_v12 = vadd.f32 %v12921_v27, %v6160_v37 }
0x313b   : > { %v10862_v1 = vpop.f32.mrf.mxu0 }
0x313c   : > { %10869 = vmatpush3.msra.mxu1 %v6161_v12 }
0x313d   : > { %10884 = vmatprep.subr.mxu1 %v11412_v10 }
0x3141   : > { %v6392_v33 = vpop.f32.mrf.mxu0 }
0x3143   : > { %v10883_v34 = vpop.f32.mrf.mxu0 }
0x3149   : > { %v6532_v58 = vpop.f32.mrf.mxu0 }
0x314b   : > { %v10905_v39 = vpop.f32.mrf.mxu0 }
0x31f4   : > { %v6236_v15 = vpop.f32.mrf.mxu1 }
0x31f5   : > { %v6240_v44 = vmul.f32 0.25, %v6236_v15 }
0x31f6   : > { %v10867_v18 = vpop.f32.mrf.mxu1 }
0x31f7   : > { %v6241_v60 = vadd.f32 %v6240_v44, %v12928_v26 }
0x31f9   : > { %v6242_v4 = vsel %vm5317_vm2, %v6241_v60, -inf }
0x31fa   : > { %6243 = vmax.xlane.f32.xlu0 %v6242_v4 }
0x3283   : > { %v6244_v0 = vpop.xlane.xlu0 %6243 }
0x3284   : > { %v6245_v19 = vsub.f32 %v6241_v60, %v6244_v0 }
0x3286   : > { %v6246_v59 = vmul.f32 1.442695, %v6245_v19  ;;  %v6896_v19 = vld [vmem:[%s13825_s5 + $0x68] sm:$0xff] }
0x3287   : > { %10930 = vmatprep.subr.mxu0 %v6896_v19 }
0x3288   : > { %11340 = vpow2.f32 %v6246_v59  ;;  %v6894_v59 = vld [vmem:[%s13825_s5 + $0x58] sm:$0xff] }
0x3295   : > { %v11341_v27 = vpop.eup %11340 }
0x3296   : > { %v6248_v7 = vsel %vm5317_vm2, %v11341_v27, 0.0 }
0x3297   : > { %6249 = vadd.xlane.f32.xlu1 %v6248_v7 }
0x3320   : > { %v6250_v38 = vpop.xlane.xlu1 %6249 }
0x3321   : > { %11342 = vrcp.f32 %v6250_v38 }
0x332e   : > { %v11343_v31 = vpop.eup %11342 }
0x332f   : > { %v6252_v62 = vmul.f32 %v11343_v31, %v11341_v27  ;;  %v6893_v27 = vld [vmem:[%s13825_s5 + $0x50] sm:$0xff] }
0x3331   : > { %10871 = vmatmul.mubr.msk.f32.vlgmr.msra.gmra.mxu1 %vm5317_vm2, %v6252_v62 }
0x3332   : > { %10885 = vmatpush3.msra.mxu1 %v12936_v57  ;;  %10892 = vmatprep.mubr.msk.f32.mxu1 %vm11413_vm15, %v11412_v10 }
0x3333   : > { %10886 = vmatprep.subr.mxu1 %v11412_v10 }
0x3334   : > { %10887 = vmatpush3.msra.mxu1 %v12942_v5 }
0x3335   : > { %10888 = vmatprep.subr.mxu1 %v11412_v10 }
0x3336   : > { %10889 = vmatpush3.msra.mxu1 %v12951_v52  ;;  %v6393_v52 = vadd.f32 %v12976_v8, %v6392_v33  ;;  %v9700_v8 = vld [vmem:[%s13824_s4 + $0x1c0] ss:$0 sm:$0xff] }
0x3337   : > { %10890 = vmatprep.subr.mxu1 %v11412_v10  ;;  %v13152_v46 = vadd.f32 %v9700_v8, %v6844_v48  ;;  %v7046_v48 = vld [vmem:[%s13824_s4 + $0x230] sm:$0xff] }
0x3338   : > { %10891 = vmatpush3.msra.mxu1 %v12958_v28  ;;  %v6533_v28 = vadd.f32 %v12982_v6, %v6532_v58 }
0x3339   : > { %10893 = vmatmul.mubr.msk.f32.vlgmr.msra.gmra.mxu1 %vm4958_vm14, %v13046_v2  ;;  %10906 = vmatprep.subr.mxu1 %v11412_v10  ;;  %v6855_v9 = vsel %vm4958_vm14, %v13152_v46, 0.0 }
0x333a   : > { %10908 = vmatprep.mubr.msk.f32.mxu1 %vm11413_vm15, %v11412_v10 }
0x33f1   : > { %v6322_v57 = vpop.f32.mrf.mxu1 }
0x33f3   : > { %v10872_v41 = vpop.f32.mrf.mxu1 }
0x33f9   : > { %v6462_v35 = vpop.f32.mrf.mxu1 }
0x33fa   : > { %v6463_v5 = vadd.f32 %v12971_v16, %v6462_v35 }
0x33fb   : > { %v10894_v53 = vpop.f32.mrf.mxu1 }
0x33fc   : > { %10907 = vmatpush3.xpose.msk.msra.mxu1 %vm5238_vm0, %v6463_v5  ;;  %v7052_v5 = vld [vmem:[%s13824_s4 + $0x260] sm:$0xff]  ;;  %v7051_v53 = vld [vmem:[%s13824_s4 + $0x258] sm:$0xff] }
0x33fd   : > { %10911 = vmatprep.subr.mxu1 %v11412_v10 }
0x33ff   : > { %10909 = vmatmul.mubr.msk.f32.vlgmr.msra.gmra.mxu1 %vm5238_vm0, %v6393_v52  ;;  %v7050_v52 = vld [vmem:[%s13824_s4 + $0x250] sm:$0xff] }
0x3400   : > { %10912 = vmatpush3.msra.mxu1 %v6533_v28  ;;  %10913 = vmatprep.mubr.msk.f32.mxu1 %vm11413_vm15, %v11412_v10  ;;  %v7049_v28 = vld [vmem:[%s13824_s4 + $0x248] sm:$0xff] }
0x3401   : > { %10923 = vmatprep.subr.mxu1 %v11412_v10 }
0x34bf   : > { %v6608_v16 = vpop.f32.mrf.mxu1 }
0x34c0   : > { %v6612_v55 = vmul.f32 0.25, %v6608_v16  ;;  %v7047_v16 = vld [vmem:[%s13824_s4 + $0x238] sm:$0xff] }
0x34c1   : > { %v10910_v45 = vpop.f32.mrf.mxu1 }
0x34c2   : > { %v6613_v6 = vadd.f32 %v6612_v55, %v12928_v26  ;;  %v7045_v55 = vld [vmem:[%s13824_s4 + $0x228] sm:$0xff]  ;;  %v7043_v45 = vld [vmem:[%s13824_s4 + $0x218] sm:$0xff] }
0x34c4   : > { %v6614_v61 = vsel %vm5317_vm2, %v6613_v6, -inf }
0x34c5   : > { %6615 = vmax.xlane.f32.xlu0 %v6614_v61  ;;  %v7041_v61 = vld [vmem:[%s13824_s4 + $0x208] sm:$0xff] }
0x34c9   : > { %6856 = vadd.xlane.f32.xlu0 %v6855_v9  ;;  %v7040_v9 = vld [vmem:[%s13824_s4 + $0x200] sm:$0xff] }
0x354e   : > { %v6616_v47 = vpop.xlane.xlu0 %6615 }
0x354f   : > { %v6617_v50 = vsub.f32 %v6613_v6, %v6616_v47  ;;  %v7042_v6 = vld [vmem:[%s13824_s4 + $0x210] sm:$0xff]  ;;  %v7039_v47 = vld [vmem:[%s13824_s4 + $0x1f8] sm:$0xff] }
0x3551   : > { %v6618_v32 = vmul.f32 1.442695, %v6617_v50  ;;  %v7038_v50 = vld [vmem:[%s13824_s4 + $0x1f0] sm:$0xff] }
0x3552   : > { %v6857_v63 = vpop.xlane.xlu0 %6856 }
0x3553   : > { %11344 = vpow2.f32 %v6618_v32  ;;  %v6861_v42 = vmul.f32 0.03125, %v6857_v63  ;;  %v7037_v32 = vld [vmem:[%s13824_s4 + $0x1e8] sm:$0xff]  ;;  %v9703_v63 = vld [vmem:[%s13825_s5 + $0x70] ss:$0 sm:$0xff] }
0x3555   : > { %v6863_v14 = vsub.f32 %v13152_v46, %v6861_v42 }
0x3557   : > { %v6865_v21 = vmul.f32 %v6863_v14, %v6863_v14 }
0x3559   : > { %v6867_v22 = vsel %vm4958_vm14, %v6865_v21, 0.0 }
0x355a   : > { %6868 = vadd.xlane.f32.xlu0 %v6867_v22 }
0x3560   : > { %v11345_v29 = vpop.eup %11344 }
0x3561   : > { %v6620_v2 = vsel %vm5317_vm2, %v11345_v29, 0.0 }
0x3562   : > { %6621 = vadd.xlane.f32.xlu1 %v6620_v2 }
0x35e3   : > { %v6869_v49 = vpop.xlane.xlu0 %6868 }
0x35e4   : > { %v6873_v51 = vmul.f32 0.03125, %v6869_v49 }
0x35e6   : > { %v6875_v43 = vadd.f32 1e-05, %v6873_v51 }
0x35eb   : > { %v6622_v54 = vpop.xlane.xlu1 %6621 }
0x35ec   : > { %11346 = vrcp.f32 %v6622_v54 }
0x35ed   : > { %11348 = vrsqrt.f32 %v6875_v43 }
0x35f9   : > { %v11347_v25 = vpop.eup %11346 }
0x35fa   : > { %v6624_v13 = vmul.f32 %v11347_v25, %v11345_v29  ;;  %v11349_v11 = vpop.eup %11348 }
0x35fb   : > { %v6879_v3 = vmul.f32 %v11349_v11, %v6863_v14 }
0x35fc   : > { %10914 = vmatmul.mubr.msk.f32.vlgmr.msra.gmra.mxu1 %vm5317_vm2, %v6624_v13 }
0x35fd   : > { %10924 = vmatpush3.msra.mxu1 %v13021_v20  ;;  %10927 = vmatprep.mubr.msk.f32.mxu1 %vm11413_vm15, %v11412_v10  ;;  %v6885_v20 = vmul.f32 %v9701_v30, %v6879_v3 }
0x35fe   : > { %10925 = vmatprep.subr.mxu1 %v11412_v10 }
0x35ff   : > { %10926 = vmatpush3.msra.mxu1 %v13027_v17  ;;  %v6891_v36 = vadd.f32 %v9702_v23, %v6885_v20 }
0x3600   : > { %10928 = vmatmul.mubr.msk.f32.vlgmr.msra.gmra.mxu1 %vm5238_vm0, %v6322_v57  ;;  %10941 = vmatprep.subr.mxu1 %v7052_v5 }
0x3601   : > { %10942 = vmatpush3.msra.mxu1 %v7052_v5 }
0x3602   : > { %10943 = vmatprep.subr.mxu1 %v7051_v53 }
0x3603   : > { %10944 = vmatpush3.msra.mxu1 %v7051_v53 }
0x3604   : > { %10945 = vmatprep.subr.mxu1 %v7050_v52 }
0x3605   : > { %10946 = vmatpush3.msra.mxu1 %v7050_v52 }
0x3606   : > { %10947 = vmatprep.subr.mxu1 %v7049_v28 }
0x3607   : > { %10948 = vmatpush3.msra.mxu1 %v7049_v28 }
0x3608   : > { %10949 = vmatprep.subr.mxu1 %v7048_v24 }
0x3609   : > { %10950 = vmatpush3.msra.mxu1 %v7048_v24 }
0x360a   : > { %10951 = vmatprep.subr.mxu1 %v7047_v16 }
0x360b   : > { %10952 = vmatpush3.msra.mxu1 %v7047_v16 }
0x360c   : > { %10953 = vmatprep.subr.mxu1 %v7046_v48 }
0x360d   : > { %10954 = vmatpush3.msra.mxu1 %v7046_v48 }
0x360e   : > { %10955 = vmatprep.subr.mxu1 %v7045_v55 }
0x360f   : > { %10956 = vmatpush3.msra.mxu1 %v7045_v55 }
0x36bc   : > { %v6694_v40 = vpop.f32.mrf.mxu1 }
0x36bd   : > { %10921 = vmatmul.mubr.msk.f32.vlgmr.msra.gmra.mxu0 %vm5238_vm0, %v6694_v40 }
0x36be   : > { %v10915_v17 = vpop.f32.mrf.mxu1  ;;  %10938 = vmatprep.mubr.msk.f32.mxu0 %vm4958_vm14, %v6891_v36  ;;  %10931 = vmatpush3.msra.mxu0 %v6896_v19 }
0x36c0   : > { %v6840_v37 = vpop.f32.mrf.mxu1 }
0x36c2   : > { %v10929_v12 = vpop.f32.mrf.mxu1 }
0x377d   : > { %v6767_v1 = vpop.f32.mrf.mxu0 }
0x377e   : > { %v6841_v33 = vadd.f32 %v6840_v37, %v6767_v1 }
0x377f   : > { %v10922_v34 = vpop.f32.mrf.mxu0 }
0x3780   : > { %v6845_v58 = vadd.f32 %v6841_v33, %v12996_v56  ;;  %v6895_v56 = vld [vmem:[%s13825_s5 + $0x60] sm:$0xff] }
0x3781   : > { %10932 = vmatprep.subr.mxu0 %v6895_v56 }
0x3782   : > { %v13176_v39 = vadd.f32 %v9700_v8, %v6845_v58  ;;  %10933 = vmatpush3.msra.mxu0 %v6895_v56  ;;  %v7044_v8 = vld [vmem:[%s13824_s4 + $0x220] sm:$0xff] }
0x3783   : > { %10934 = vmatprep.subr.mxu0 %v6894_v59  ;;  %10957 = vmatprep.subr.mxu1 %v7044_v8 }
0x3784   : > { %v6858_v15 = vsel %vm4958_vm14, %v13176_v39, 0.0  ;;  %10935 = vmatpush3.msra.mxu0 %v6894_v59  ;;  %10958 = vmatpush3.msra.mxu1 %v7044_v8 }
0x3785   : > { %6859 = vadd.xlane.f32.xlu1 %v6858_v15  ;;  %10936 = vmatprep.subr.mxu0 %v6893_v27 }
0x3786   : > { %10937 = vmatpush3.msra.mxu0 %v6893_v27  ;;  %10959 = vmatprep.subr.mxu1 %v7043_v45 }
0x3787   : > { %10976 = vmatprep.subr.mxu0 %v11412_v10  ;;  %10960 = vmatpush3.msra.mxu1 %v7043_v45 }
0x3788   : > { %10961 = vmatprep.subr.mxu1 %v7042_v6 }
0x3789   : > { %10962 = vmatpush3.msra.mxu1 %v7042_v6  ;;  %v13251_v6 = vld [vmem:[%s11464_s27] sm:$0xff] }
0x378a   : > { %10963 = vmatprep.subr.mxu1 %v7041_v61 }
0x378b   : > { %10964 = vmatpush3.msra.mxu1 %v7041_v61 }
0x378c   : > { %10965 = vmatprep.subr.mxu1 %v7040_v9 }
0x378d   : > { %10966 = vmatpush3.msra.mxu1 %v7040_v9  ;;  %v9706_v9 = vld [vmem:[%s13824_s4 + $0x268] ss:$0 sm:$0xff] }
0x378e   : > { %10967 = vmatprep.subr.mxu1 %v7039_v47 }
0x378f   : > { %10968 = vmatpush3.msra.mxu1 %v7039_v47 }
0x3790   : > { %10969 = vmatprep.subr.mxu1 %v7038_v50 }
0x3791   : > { %10970 = vmatpush3.msra.mxu1 %v7038_v50 }
0x3792   : > { %10971 = vmatprep.subr.mxu1 %v7037_v32 }
0x3793   : > { %10972 = vmatpush3.msra.mxu1 %v7037_v32 }
0x3794   : > { %11014 = vmatprep.subr.mxu1 %v11412_v10 }
0x380e   : > { %v6860_v44 = vpop.xlane.xlu1 %6859 }
0x380f   : > { %v6862_v18 = vmul.f32 0.03125, %v6860_v44 }
0x3811   : > { %v6864_v60 = vsub.f32 %v13176_v39, %v6862_v18 }
0x3813   : > { %v6866_v4 = vmul.f32 %v6864_v60, %v6864_v60 }
0x3815   : > { %v6870_v0 = vsel %vm4958_vm14, %v6866_v4, 0.0 }
0x3816   : > { %6871 = vadd.xlane.f32.xlu1 %v6870_v0 }
0x389f   : > { %v6872_v7 = vpop.xlane.xlu1 %6871 }
0x38a0   : > { %v6874_v38 = vmul.f32 0.03125, %v6872_v7 }
0x38a2   : > { %v6876_v31 = vadd.f32 1e-05, %v6874_v38 }
0x38a4   : > { %11350 = vrsqrt.f32 %v6876_v31 }
0x38b1   : > { %v11351_v62 = vpop.eup %11350 }
0x38b2   : > { %v6880_v57 = vmul.f32 %v11351_v62, %v6864_v60 }
0x38b4   : > { %v6886_v41 = vmul.f32 %v9701_v30, %v6880_v57 }
0x38b6   : > { %v6892_v35 = vadd.f32 %v9702_v23, %v6886_v41 }
0x38b8   : > { %10939 = vmatmul.mubr.msk.f32.vlgmr.msra.gmra.mxu0 %vm4958_vm14, %v6892_v35 }
0x38b9   : > { %10984 = vmatprep.mubr.msk.f32.mxu0 %vm11413_vm15, %v11412_v10 }
0x3978   : > { %v10940_v42 = vpop.f32.mrf.mxu0 }
0x3979   : > { %v6980_v14 = vadd.f32 %v10940_v42, %v9703_v63 }
0x397a   : > { %v6974_v21 = vpop.f32.mrf.mxu0 }
0x397b   : > { %v6986_v22 = vmul.f32 0.70710677, %v6980_v14  ;;  %v6975_v29 = vadd.f32 %v9703_v63, %v6974_v21  ;;  %v6984_v55 = vmul.f32 0.5, %v6980_v14 }
0x397d   : > { %v6988_v2 = vand.u32 2147483647, %v6986_v22  ;;  %v6985_v54 = vmul.f32 0.70710677, %v6975_v29  ;;  %vm7028_vm3 = vcmp.ge.f32.partialorder %v6986_v22, 0.0  ;;  %v6983_v16 = vmul.f32 0.5, %v6975_v29 }
0x397f   : > { %v6990_v25 = vmul.f32 0.3275911, %v6988_v2  ;;  %v6987_v13 = vand.u32 2147483647, %v6985_v54  ;;  %v7016_v11 = vsub.f32 0.0, %v6988_v2  ;;  %vm7027_vm4 = vcmp.ge.f32.partialorder %v6985_v54, 0.0 }
0x3981   : > { %v6992_v49 = vadd.f32 1.0, %v6990_v25  ;;  %v6989_v51 = vmul.f32 0.3275911, %v6987_v13  ;;  %v7015_v10 = vsub.f32 0.0, %v6987_v13  ;;  %v7018_v3 = vmul.f32 %v7016_v11, %v6988_v2  ;;  %v13285_v25 = vld [vmem:[%s13823_s3 + $0x2d8] sm:$0xff] }
0x3983   : > { %11352 = vrcp.f32 %v6992_v49  ;;  %v6991_v43 = vadd.f32 1.0, %v6989_v51  ;;  %v7017_v20 = vmul.f32 %v7015_v10, %v6987_v13  ;;  %v7021_v40 = vmul.f32 1.442695, %v7018_v3  ;;  %v13291_v13 = vld [vmem:[%s13823_s3 + $0x2d0] sm:$0xff]  ;;  %v13299_v10 = vld [vmem:[%s13824_s4 + $0x298] ss:$0 sm:$0xff] }
0x3985   : > { %11354 = vrcp.f32 %v6991_v43  ;;  %v7019_v37 = vmul.f32 1.442695, %v7017_v20 }
0x3986   : > { %11356 = vpow2.f32 %v7021_v40  ;;  %v13313_v40 = vld [vmem:[%s13823_s3 + $0x308] sm:$0xff] }
0x3987   : > { %11358 = vpow2.f32 %v7019_v37  ;;  %v13336_v37 = vld [vmem:[%s13823_s3 + $0x2f0] sm:$0xff] }
0x3990   : > { %v11353_v30 = vpop.eup %11352 }
0x3991   : > { %v6998_v23 = vmul.f32 1.0614054, %v11353_v30 }
0x3992   : > { %v11355_v36 = vpop.eup %11354 }
0x3993   : > { %v7000_v17 = vadd.f32 -1.4531521, %v6998_v23  ;;  %v6997_v12 = vmul.f32 1.0614054, %v11355_v36  ;;  %v11357_v27 = vpop.eup %11356 }
0x3994   : > { %v11359_v62 = vpop.eup %11358 }
0x3995   : > { %v7002_v1 = vmul.f32 %v11353_v30, %v7000_v17  ;;  %v6999_v33 = vadd.f32 -1.4531521, %v6997_v12  ;;  %v13329_v17 = vld [vmem:[%s13823_s3 + $0x2f8] sm:$0xff]  ;;  %v13343_v12 = vld [vmem:[%s13823_s3 + $0x328] sm:$0xff] }
0x3997   : > { %v7004_v34 = vadd.f32 1.4214138, %v7002_v1  ;;  %v7001_v58 = vmul.f32 %v11355_v36, %v6999_v33  ;;  %v13352_v1 = vld [vmem:[%s13823_s3 + $0x320] sm:$0xff]  ;;  %v13361_v33 = vld [vmem:[%s13823_s3 + $0x318] sm:$0xff] }
0x3999   : > { %v7006_v15 = vmul.f32 %v11353_v30, %v7004_v34  ;;  %v7003_v44 = vadd.f32 1.4214138, %v7001_v58  ;;  %v13368_v34 = vld [vmem:[%s13823_s3 + $0x310] sm:$0xff] }
0x399b   : > { %v7008_v18 = vadd.f32 -0.28449672, %v7006_v15  ;;  %v7005_v60 = vmul.f32 %v11355_v36, %v7003_v44  ;;  %v13381_v44 = vld [vmem:[%s13823_s3 + $0x338] ss:$0 sm:$0xff] }
0x399d   : > { %v7010_v4 = vmul.f32 %v11353_v30, %v7008_v18  ;;  %v7007_v0 = vadd.f32 -0.28449672, %v7005_v60  ;;  %v13386_v60 = vld [vmem:[%s13823_s3 + $0x330] ss:$0 sm:$0xff] }
0x399f   : > { %v7012_v19 = vadd.f32 0.2548296, %v7010_v4  ;;  %v7009_v56 = vmul.f32 %v11355_v36, %v7007_v0 }
0x39a1   : > { %v7014_v59 = vmul.f32 %v11353_v30, %v7012_v19  ;;  %v7011_v7 = vadd.f32 0.2548296, %v7009_v56  ;;  %v13304_v30 = vld [vmem:[%s13824_s4 + $0x2a0] ss:$0 sm:$0xff] }
0x39a2   : > { %v13395_v56 = vld [vmem:[%s13823_s3 + $0x360] sm:$0xff] }
0x39a3   : > { %v7024_v38 = vmul.f32 %v11357_v27, %v7014_v59  ;;  %v7013_v31 = vmul.f32 %v11355_v36, %v7011_v7  ;;  %v13320_v36 = vld [vmem:[%s13823_s3 + $0x300] sm:$0xff]  ;;  %v13406_v27 = vld [vmem:[%s13823_s3 + $0x358] sm:$0xff] }
0x39a4   : > { %v13401_v59 = vld [vmem:[%s13823_s3 + $0x340] ss:$0 sm:$0xff] }
0x39a5   : > { %v7026_v57 = vsub.f32 1.0, %v7024_v38  ;;  %v7023_v41 = vmul.f32 %v11359_v62, %v7013_v31  ;;  %v13415_v38 = vld [vmem:[%s13823_s3 + $0x350] sm:$0xff] }
0x39a7   : > { %v7030_v35 = vsub.f32 0.0, %v7026_v57  ;;  %v7025_v5 = vsub.f32 1.0, %v7023_v41  ;;  %v13430_v41 = vld [vmem:[%s13823_s3 + $0x3a0] sm:$0xff] }
0x39a9   : > { %v7032_v53 = vsel %vm7028_vm3, %v7026_v57, %v7030_v35  ;;  %v7029_v52 = vsub.f32 0.0, %v7025_v5  ;;  %v13423_v57 = vld [vmem:[%s13823_s3 + $0x348] sm:$0xff]  ;;  %v13440_v35 = vld [vmem:[%s13823_s3 + $0x398] sm:$0xff] }
0x39aa   : > { %v7034_v28 = vadd.f32 1.0, %v7032_v53  ;;  %v13456_v53 = vld [vmem:[%s13823_s3 + $0x388] sm:$0xff] }
0x39ab   : > { %v7031_v24 = vsel %vm7027_vm4, %v7025_v5, %v7029_v52  ;;  %v13449_v5 = vld [vmem:[%s13823_s3 + $0x390] sm:$0xff] }
0x39ac   : > { %v7033_v48 = vadd.f32 1.0, %v7031_v24  ;;  %v7036_v45 = vmul.f32 %v7034_v28, %v6984_v55 }
0x39ae   : > { %v7035_v8 = vmul.f32 %v7033_v48, %v6983_v16 }
0x39b0   : > { %10973 = vmatprep.mubr.f32.mxu1 %v7035_v8 }
0x39b1   : > { %10974 = vmatmul.mubr.f32.vlgmr.msra.gmra.mxu1 %v7036_v45 }
0x39b2   : > { %11016 = vmatprep.mubr.msk.f32.mxu1 %vm11413_vm15, %v13251_v6 }
0x3a71   : > { %v10975_v61 = vpop.f32.mrf.mxu1 }
0x3a72   : > { %v7129_v47 = vadd.f32 %v10975_v61, %v13176_v39  ;;  %v13271_v39 = vld [vmem:[%s13823_s3 + $0x2e8] sm:$0xff] }
0x3a73   : > { %v7119_v50 = vpop.f32.mrf.mxu1  ;;  %10977 = vmatpush3.msra.mxu0 %v13271_v39 }
0x3a74   : > { %v13259_v32 = vadd.f32 %v9706_v9, %v7129_v47  ;;  %v7128_v63 = vadd.f32 %v7119_v50, %v13152_v46  ;;  %10978 = vmatprep.subr.mxu0 %v13251_v6  ;;  %v13278_v46 = vld [vmem:[%s13823_s3 + $0x2e0] sm:$0xff] }
0x3a75   : > { %10979 = vmatpush3.msra.mxu0 %v13278_v46 }
0x3a76   : > { %v13262_v42 = vadd.f32 %v9706_v9, %v7128_v63  ;;  %10980 = vmatprep.subr.mxu0 %v13251_v6 }
0x3a77   : > { %10981 = vmatpush3.msra.mxu0 %v13285_v25 }
0x3a78   : > { %v7139_v14 = vsel %vm4958_vm14, %v13262_v42, 0.0  ;;  %10982 = vmatprep.subr.mxu0 %v13251_v6 }
0x3a79   : > { %7140 = vadd.xlane.f32.xlu0 %v7139_v14  ;;  %10983 = vmatpush3.msra.mxu0 %v13291_v13 }
0x3a7a   : > { %10987 = vmatprep.subr.mxu0 %v13251_v6 }
0x3b02   : > { %v7141_v21 = vpop.xlane.xlu0 %7140 }
0x3b03   : > { %v7145_v22 = vmul.f32 0.03125, %v7141_v21 }
0x3b05   : > { %v7147_v29 = vsub.f32 %v13262_v42, %v7145_v22 }
0x3b07   : > { %v7149_v2 = vmul.f32 %v7147_v29, %v7147_v29 }
0x3b09   : > { %v7151_v54 = vsel %vm4958_vm14, %v7149_v2, 0.0  ;;  %v13472_v2 = vld [vmem:[%s13823_s3 + $0x380] sm:$0xff] }
0x3b0a   : > { %7152 = vadd.xlane.f32.xlu1 %v7151_v54  ;;  %v13478_v54 = vld [vmem:[%s13823_s3 + $0x378] sm:$0xff] }
0x3b93   : > { %v7153_v49 = vpop.xlane.xlu1 %7152 }
0x3b94   : > { %v7157_v51 = vmul.f32 0.03125, %v7153_v49  ;;  %v13487_v49 = vld [vmem:[%s13823_s3 + $0x370] sm:$0xff] }
0x3b96   : > { %v7159_v43 = vadd.f32 1e-05, %v7157_v51  ;;  %v13494_v51 = vld [vmem:[%s13823_s3 + $0x368] sm:$0xff] }
0x3b98   : > { %11360 = vrsqrt.f32 %v7159_v43 }
0x3ba5   : > { %v11361_v11 = vpop.eup %11360 }
0x3ba6   : > { %v7163_v3 = vmul.f32 %v11361_v11, %v7147_v29 }
0x3ba8   : > { %v7169_v20 = vmul.f32 %v13299_v10, %v7163_v3  ;;  %v13507_v3 = vld [vmem:[%s13823_s3 + $0x3b0] ss:$0 sm:$0xff] }
0x3baa   : > { %v13308_v23 = vadd.f32 %v13304_v30, %v7169_v20 }
0x3bac   : > { %10985 = vmatmul.mubr.msk.f32.vlgmr.msra.gmra.mxu0 %vm4958_vm14, %v13308_v23 }
0x3bad   : > { %10988 = vmatpush3.msra.mxu0 %v13313_v40  ;;  %10995 = vmatprep.mubr.msk.f32.mxu0 %vm11413_vm15, %v13251_v6 }
0x3bae   : > { %10989 = vmatprep.subr.mxu0 %v13251_v6 }
0x3baf   : > { %10990 = vmatpush3.msra.mxu0 %v13320_v36 }
0x3bb0   : > { %10991 = vmatprep.subr.mxu0 %v13251_v6 }
0x3bb1   : > { %10992 = vmatpush3.msra.mxu0 %v13329_v17 }
0x3bb2   : > { %10993 = vmatprep.subr.mxu0 %v13251_v6 }
0x3bb3   : > { %10994 = vmatpush3.msra.mxu0 %v13336_v37 }
0x3bb4   : > { %10996 = vmatmul.mubr.msk.f32.vlgmr.msra.gmra.mxu0 %vm4958_vm14, %v13308_v23  ;;  %10998 = vmatprep.subr.mxu0 %v13251_v6 }
0x3bb5   : > { %10999 = vmatpush3.msra.mxu0 %v13343_v12  ;;  %11006 = vmatprep.mubr.msk.f32.mxu0 %vm11413_vm15, %v13251_v6 }
0x3bb6   : > { %11000 = vmatprep.subr.mxu0 %v13251_v6 }
0x3bb7   : > { %11001 = vmatpush3.msra.mxu0 %v13352_v1 }
0x3bb8   : > { %11002 = vmatprep.subr.mxu0 %v13251_v6 }
0x3bb9   : > { %11003 = vmatpush3.msra.mxu0 %v13361_v33 }
0x3bba   : > { %11004 = vmatprep.subr.mxu0 %v13251_v6 }
0x3bbb   : > { %11005 = vmatpush3.msra.mxu0 %v13368_v34 }
0x3bbc   : > { %11007 = vmatmul.mubr.msk.f32.vlgmr.msra.gmra.mxu0 %vm4958_vm14, %v13308_v23  ;;  %11009 = vmatprep.subr.mxu0 %v13251_v6 }
0x3bbd   : > { %11011 = vmatprep.mubr.msk.f32.mxu0 %vm11413_vm15, %v13251_v6 }
0x3c6c   : > { %v7255_v58 = vpop.f32.mrf.mxu0 }
0x3c6d   : > { %v7256_v19 = vadd.f32 %v13386_v60, %v7255_v58  ;;  %v13512_v58 = vld [vmem:[%s13823_s3 + $0x3a8] ss:$0 sm:$0xff] }
0x3c6e   : > { %v10986_v15 = vpop.f32.mrf.mxu0 }
0x3c6f   : > { %v13518_v15 = vld [vmem:[%s13823_s3 + $0x3b8] ss:$0 sm:$0xff] }
0x3c74   : > { %v7334_v18 = vpop.f32.mrf.mxu0 }
0x3c75   : > { %v7335_v4 = vadd.f32 %v13381_v44, %v7334_v18 }
0x3c76   : > { %v10997_v0 = vpop.f32.mrf.mxu0 }
0x3c77   : > { %11010 = vmatpush3.xpose.msk.msra.mxu0 %vm5238_vm0, %v7335_v4 }
0x3c78   : > { %11019 = vmatprep.subr.mxu0 %v13251_v6 }
0x3c7a   : > { %11012 = vmatmul.mubr.msk.f32.vlgmr.msra.gmra.mxu0 %vm5238_vm0, %v7256_v19 }
0x3c7b   : > { %11020 = vmatpush3.msra.mxu0 %v13395_v56  ;;  %11027 = vmatprep.mubr.msk.f32.mxu0 %vm11413_vm15, %v13251_v6 }
0x3c7c   : > { %v7413_v7 = vpop.f32.mrf.mxu0  ;;  %11021 = vmatprep.subr.mxu0 %v13251_v6 }
0x3c7d   : > { %v7414_v31 = vadd.f32 %v13401_v59, %v7413_v7  ;;  %11022 = vmatpush3.msra.mxu0 %v13406_v27 }
0x3c7e   : > { %v11008_v62 = vpop.f32.mrf.mxu0  ;;  %11023 = vmatprep.subr.mxu0 %v13251_v6 }
0x3c7f   : > { %11015 = vmatpush3.msra.mxu1 %v7414_v31  ;;  %11024 = vmatpush3.msra.mxu0 %v13415_v38 }
0x3c80   : > { %11025 = vmatprep.subr.mxu0 %v13251_v6  ;;  %11030 = vmatprep.subr.mxu1 %v13251_v6 }
0x3c81   : > { %11026 = vmatpush3.msra.mxu0 %v13423_v57 }
0x3c82   : > { %11028 = vmatmul.mubr.msk.f32.vlgmr.msra.gmra.mxu0 %vm4958_vm14, %v13308_v23  ;;  %11041 = vmatprep.subr.mxu0 %v13251_v6 }
0x3c83   : > { %11042 = vmatpush3.msra.mxu0 %v13430_v41  ;;  %11049 = vmatprep.mubr.msk.f32.mxu0 %vm11413_vm15, %v13251_v6 }
0x3c84   : > { %11043 = vmatprep.subr.mxu0 %v13251_v6 }
0x3c85   : > { %11044 = vmatpush3.msra.mxu0 %v13440_v35 }
0x3c86   : > { %11045 = vmatprep.subr.mxu0 %v13251_v6 }
0x3c87   : > { %11046 = vmatpush3.msra.mxu0 %v13449_v5 }
0x3c88   : > { %11047 = vmatprep.subr.mxu0 %v13251_v6 }
0x3c89   : > { %11048 = vmatpush3.msra.mxu0 %v13456_v53 }
0x3c8a   : > { %11050 = vmatmul.mubr.msk.f32.vlgmr.msra.gmra.mxu0 %vm4958_vm14, %v13308_v23  ;;  %11062 = vmatprep.subr.mxu0 %v13251_v6 }
0x3c8b   : > { %11066 = vmatprep.mubr.msk.f32.mxu0 %vm11413_vm15, %v13251_v6 }
0x3d3a   : > { %v7489_v52 = vpop.f32.mrf.mxu0 }
0x3d3b   : > { %v7493_v28 = vmul.f32 0.25, %v7489_v52 }
0x3d3c   : > { %v11013_v24 = vpop.f32.mrf.mxu0 }
0x3d3d   : > { %v7494_v16 = vadd.f32 %v7493_v28, %v12928_v26  ;;  %v7142_v28 = vsel %vm4958_vm14, %v13259_v32, 0.0 }
0x3d3f   : > { %v7495_v48 = vsel %vm5317_vm2, %v7494_v16, -inf }
0x3d40   : > { %7496 = vmax.xlane.f32.xlu0 %v7495_v48 }
0x3d42   : > { %v7656_v55 = vpop.f32.mrf.mxu0 }
0x3d43   : > { %v7657_v4 = vadd.f32 %v13512_v58, %v7656_v55 }
0x3d44   : > { %v11029_v8 = vpop.f32.mrf.mxu0 }
0x3d4a   : > { %v7814_v45 = vpop.f32.mrf.mxu0 }
0x3d4b   : > { %v7815_v0 = vadd.f32 %v13518_v15, %v7814_v45 }
0x3d4c   : > { %v11051_v61 = vpop.f32.mrf.mxu0 }
0x3dc9   : > { %v7497_v9 = vpop.xlane.xlu0 %7496 }
0x3dca   : > { %v7498_v47 = vsub.f32 %v7494_v16, %v7497_v9 }
0x3dcc   : > { %v7499_v50 = vmul.f32 1.442695, %v7498_v47 }
0x3dce   : > { %11362 = vpow2.f32 %v7499_v50 }
0x3ddb   : > { %v11363_v63 = vpop.eup %11362 }
0x3ddc   : > { %v7501_v14 = vsel %vm5317_vm2, %v11363_v63, 0.0 }
0x3ddd   : > { %7502 = vadd.xlane.f32.xlu1 %v7501_v14  ;;  %v13543_v14 = vld [vmem:[%s13824_s4 + $0x280] sm:$0xff] }
0x3e66   : > { %v7503_v21 = vpop.xlane.xlu1 %7502 }
0x3e67   : > { %11364 = vrcp.f32 %v7503_v21 }
0x3e74   : > { %v11365_v22 = vpop.eup %11364 }
0x3e75   : > { %v7505_v29 = vmul.f32 %v11365_v22, %v11363_v63  ;;  %v13538_v63 = vld [vmem:[%s13824_s4 + $0x288] sm:$0xff] }
0x3e76   : > { %11063 = vmatpush3.msra.mxu0 %v13538_v63 }
0x3e77   : > { %11017 = vmatmul.mubr.msk.f32.vlgmr.msra.gmra.mxu1 %vm5317_vm2, %v7505_v29  ;;  %11064 = vmatprep.subr.mxu0 %v13251_v6 }
0x3e78   : > { %11031 = vmatpush3.msra.mxu1 %v13472_v2  ;;  %11038 = vmatprep.mubr.msk.f32.mxu1 %vm11413_vm15, %v13251_v6 }
0x3e79   : > { %11032 = vmatprep.subr.mxu1 %v13251_v6  ;;  %11065 = vmatpush3.msra.mxu0 %v13543_v14 }
0x3e7a   : > { %11033 = vmatpush3.msra.mxu1 %v13478_v54  ;;  %11076 = vmatprep.subr.mxu0 %v13251_v6 }
0x3e7b   : > { %11034 = vmatprep.subr.mxu1 %v13251_v6 }
0x3e7c   : > { %11035 = vmatpush3.msra.mxu1 %v13487_v49 }
0x3e7d   : > { %11036 = vmatprep.subr.mxu1 %v13251_v6 }
0x3e7e   : > { %11037 = vmatpush3.msra.mxu1 %v13494_v51 }
0x3e7f   : > { %11039 = vmatmul.mubr.msk.f32.vlgmr.msra.gmra.mxu1 %vm4958_vm14, %v13308_v23  ;;  %11052 = vmatprep.subr.mxu1 %v13251_v6 }
0x3e80   : > { %11054 = vmatprep.mubr.msk.f32.mxu1 %vm11413_vm15, %v13251_v6 }
0x3f37   : > { %v7575_v43 = vpop.f32.mrf.mxu1 }
0x3f39   : > { %v11018_v11 = vpop.f32.mrf.mxu1 }
0x3f3f   : > { %v7735_v20 = vpop.f32.mrf.mxu1 }
0x3f40   : > { %v7736_v23 = vadd.f32 %v13507_v3, %v7735_v20 }
0x3f41   : > { %v11040_v18 = vpop.f32.mrf.mxu1 }
0x3f42   : > { %11053 = vmatpush3.xpose.msk.msra.mxu1 %vm5238_vm0, %v7736_v23  ;;  %v13552_v18 = vld [vmem:[%s13824_s4 + $0x278] sm:$0xff] }
0x3f43   : > { %11057 = vmatprep.subr.mxu1 %v13251_v6 }
0x3f45   : > { %11055 = vmatmul.mubr.msk.f32.vlgmr.msra.gmra.mxu1 %vm5238_vm0, %v7657_v4  ;;  %v13558_v4 = vld [vmem:[%s13824_s4 + $0x270] sm:$0xff] }
0x3f46   : > { %11058 = vmatpush3.msra.mxu1 %v7815_v0  ;;  %11059 = vmatprep.mubr.msk.f32.mxu1 %vm11413_vm15, %v13251_v6 }
0x3f47   : > { %11069 = vmatprep.subr.mxu1 %v13251_v6 }
0x4005   : > { %v7890_v19 = vpop.f32.mrf.mxu1 }
0x4006   : > { %v7894_v7 = vmul.f32 0.25, %v7890_v19 }
0x4007   : > { %v11056_v31 = vpop.f32.mrf.mxu1 }
0x4008   : > { %v7895_v62 = vadd.f32 %v7894_v7, %v12928_v26 }
0x400a   : > { %v7896_v52 = vsel %vm5317_vm2, %v7895_v62, -inf }
0x400b   : > { %7897 = vmax.xlane.f32.xlu0 %v7896_v52 }
0x400f   : > { %7143 = vadd.xlane.f32.xlu0 %v7142_v28 }
0x4094   : > { %v7898_v24 = vpop.xlane.xlu0 %7897 }
0x4095   : > { %v7899_v16 = vsub.f32 %v7895_v62, %v7898_v24 }
0x4097   : > { %v7900_v48 = vmul.f32 1.442695, %v7899_v16 }
0x4098   : > { %v7144_v55 = vpop.xlane.xlu0 %7143 }
0x4099   : > { %11366 = vpow2.f32 %v7900_v48  ;;  %v7146_v8 = vmul.f32 0.03125, %v7144_v55 }
0x409b   : > { %v7148_v45 = vsub.f32 %v13259_v32, %v7146_v8 }
0x409d   : > { %v7150_v47 = vmul.f32 %v7148_v45, %v7148_v45 }
0x409f   : > { %v7154_v50 = vsel %vm4958_vm14, %v7150_v47, 0.0 }
0x40a6   : > { %v11367_v61 = vpop.eup %11366 }
0x40a7   : > { %v7902_v9 = vsel %vm5317_vm2, %v11367_v61, 0.0 }
0x40a8   : > { %7903 = vadd.xlane.f32.xlu1 %v7902_v9 }
0x40ac   : > { %7155 = vadd.xlane.f32.xlu1 %v7154_v50 }
0x4131   : > { %v7904_v21 = vpop.xlane.xlu1 %7903 }
0x4132   : > { %11368 = vrcp.f32 %v7904_v21 }
0x4135   : > { %v7156_v22 = vpop.xlane.xlu1 %7155 }
0x4136   : > { %v7158_v29 = vmul.f32 0.03125, %v7156_v22 }
0x4138   : > { %v7160_v11 = vadd.f32 1e-05, %v7158_v29 }
0x413a   : > { %11370 = vrsqrt.f32 %v7160_v11 }
0x413f   : > { %v11369_v20 = vpop.eup %11368 }
0x4140   : > { %v7906_v23 = vmul.f32 %v11369_v20, %v11367_v61 }
0x4142   : > { %11060 = vmatmul.mubr.msk.f32.vlgmr.msra.gmra.mxu1 %vm5317_vm2, %v7906_v23 }
0x4143   : > { %11070 = vmatpush3.msra.mxu1 %v13552_v18  ;;  %11073 = vmatprep.mubr.msk.f32.mxu1 %vm11413_vm15, %v13251_v6 }
0x4144   : > { %11071 = vmatprep.subr.mxu1 %v13251_v6 }
0x4145   : > { %11072 = vmatpush3.msra.mxu1 %v13558_v4 }
0x4146   : > { %11074 = vmatmul.mubr.msk.f32.vlgmr.msra.gmra.mxu1 %vm5238_vm0, %v7575_v43  ;;  %11087 = vmatprep.subr.mxu1 %v13251_v6 }
0x4147   : > { %v11371_v0 = vpop.eup %11370  ;;  %11088 = vmatpush3.msra.mxu1 %v13313_v40  ;;  %11095 = vmatprep.mubr.msk.f32.mxu1 %vm11413_vm15, %v13251_v6 }
0x4148   : > { %v7164_v19 = vmul.f32 %v11371_v0, %v7148_v45  ;;  %11089 = vmatprep.subr.mxu1 %v13251_v6 }
0x4149   : > { %11090 = vmatpush3.msra.mxu1 %v13320_v36 }
0x414a   : > { %v7170_v7 = vmul.f32 %v13299_v10, %v7164_v19  ;;  %11091 = vmatprep.subr.mxu1 %v13251_v6 }
0x414b   : > { %11092 = vmatpush3.msra.mxu1 %v13329_v17 }
0x414c   : > { %11093 = vmatprep.subr.mxu1 %v13251_v6  ;;  %v13577_v43 = vadd.f32 %v13304_v30, %v7170_v7 }
0x414d   : > { %11094 = vmatpush3.msra.mxu1 %v13336_v37 }
0x414e   : > { %11096 = vmatmul.mubr.msk.f32.vlgmr.msra.gmra.mxu1 %vm4958_vm14, %v13577_v43  ;;  %11109 = vmatprep.subr.mxu1 %v13251_v6 }
0x414f   : > { %11111 = vmatprep.mubr.msk.f32.mxu1 %vm11413_vm15, %v13251_v6 }
0x4202   : > { %v7976_v10 = vpop.f32.mrf.mxu1 }
0x4203   : > { %11067 = vmatmul.mubr.msk.f32.vlgmr.msra.gmra.mxu0 %vm5238_vm0, %v7976_v10 }
0x4204   : > { %11077 = vmatpush3.msra.mxu0 %v13271_v39  ;;  %v11061_v40 = vpop.f32.mrf.mxu1  ;;  %11084 = vmatprep.mubr.msk.f32.mxu0 %vm11413_vm15, %v13251_v6 }
0x4205   : > { %11078 = vmatprep.subr.mxu0 %v13251_v6 }
0x4206   : > { %11079 = vmatpush3.msra.mxu0 %v13278_v46  ;;  %v13591_v30 = vpop.f32.mrf.mxu1 }
0x4207   : > { %11080 = vmatprep.subr.mxu0 %v13251_v6 }
0x4208   : > { %11081 = vmatpush3.msra.mxu0 %v13285_v25  ;;  %v11075_v36 = vpop.f32.mrf.mxu1 }
0x4209   : > { %11082 = vmatprep.subr.mxu0 %v13251_v6 }
0x420a   : > { %11083 = vmatpush3.msra.mxu0 %v13291_v13 }
0x420b   : > { %11085 = vmatmul.mubr.msk.f32.vlgmr.msra.gmra.mxu0 %vm4958_vm14, %v13577_v43  ;;  %11098 = vmatprep.subr.mxu0 %v13251_v6 }
0x420c   : > { %11099 = vmatpush3.msra.mxu0 %v13343_v12  ;;  %11106 = vmatprep.mubr.msk.f32.mxu0 %vm11413_vm15, %v13251_v6 }
0x420d   : > { %11100 = vmatprep.subr.mxu0 %v13251_v6 }
0x420e   : > { %11101 = vmatpush3.msra.mxu0 %v13352_v1  ;;  %v8267_v39 = vpop.f32.mrf.mxu1 }
0x420f   : > { %v8268_v46 = vadd.f32 %v13381_v44, %v8267_v39  ;;  %11102 = vmatprep.subr.mxu0 %v13251_v6 }
0x4210   : > { %11103 = vmatpush3.msra.mxu0 %v13361_v33  ;;  %v11097_v25 = vpop.f32.mrf.mxu1 }
0x4211   : > { %11104 = vmatprep.subr.mxu0 %v13251_v6  ;;  %11110 = vmatpush3.xpose.msk.msra.mxu1 %vm5238_vm0, %v8268_v46 }
0x4212   : > { %11105 = vmatpush3.msra.mxu0 %v13368_v34  ;;  %11114 = vmatprep.subr.mxu1 %v13251_v6 }
0x4213   : > { %11107 = vmatmul.mubr.msk.f32.vlgmr.msra.gmra.mxu0 %vm4958_vm14, %v13577_v43  ;;  %11119 = vmatprep.subr.mxu0 %v13251_v6 }
0x4214   : > { %11120 = vmatpush3.msra.mxu0 %v13395_v56  ;;  %11127 = vmatprep.mubr.msk.f32.mxu0 %vm11413_vm15, %v13251_v6 }
0x4215   : > { %11121 = vmatprep.subr.mxu0 %v13251_v6 }
0x4216   : > { %11122 = vmatpush3.msra.mxu0 %v13406_v27 }
0x4217   : > { %11123 = vmatprep.subr.mxu0 %v13251_v6 }
0x4218   : > { %11124 = vmatpush3.msra.mxu0 %v13415_v38 }
0x4219   : > { %11125 = vmatprep.subr.mxu0 %v13251_v6 }
0x421a   : > { %11126 = vmatpush3.msra.mxu0 %v13423_v57 }
0x421b   : > { %11128 = vmatmul.mubr.msk.f32.vlgmr.msra.gmra.mxu0 %vm4958_vm14, %v13577_v43  ;;  %11141 = vmatprep.subr.mxu0 %v13251_v6 }
0x421c   : > { %11142 = vmatpush3.msra.mxu0 %v13430_v41  ;;  %11149 = vmatprep.mubr.msk.f32.mxu0 %vm11413_vm15, %v13251_v6 }
0x421d   : > { %11143 = vmatprep.subr.mxu0 %v13251_v6 }
0x421e   : > { %11144 = vmatpush3.msra.mxu0 %v13440_v35 }
0x421f   : > { %11145 = vmatprep.subr.mxu0 %v13251_v6 }
0x4220   : > { %11146 = vmatpush3.msra.mxu0 %v13449_v5 }
0x4221   : > { %11147 = vmatprep.subr.mxu0 %v13251_v6 }
0x4222   : > { %11148 = vmatpush3.msra.mxu0 %v13456_v53 }
0x4223   : > { %11150 = vmatmul.mubr.msk.f32.vlgmr.msra.gmra.mxu0 %vm4958_vm14, %v13577_v43  ;;  %11162 = vmatprep.subr.mxu0 %v13251_v6 }
0x4224   : > { %11163 = vmatpush3.msra.mxu0 %v13538_v63  ;;  %11166 = vmatprep.mubr.msk.f32.mxu0 %vm11413_vm15, %v13251_v6 }
0x4225   : > { %11164 = vmatprep.subr.mxu0 %v13251_v6 }
0x4226   : > { %11165 = vmatpush3.msra.mxu0 %v13543_v14 }
0x42c3   : > { %v8051_v13 = vpop.f32.mrf.mxu0 }
0x42c4   : > { %v8125_v61 = vadd.f32 %v13591_v30, %v8051_v13  ;;  %v9744_v13 = vld [vmem:[%s13824_s4 + $0x2a8] ss:$0 sm:$0xff] }
0x42c5   : > { %v11068_v17 = vpop.f32.mrf.mxu0 }
0x42c6   : > { %v9021_v9 = vadd.f32 %v8125_v61, %v13262_v42  ;;  %v9745_v17 = vld [vmem:[%s13824_s4 + $0x2b0] ss:$0 sm:$0xff]  ;;  %v9223_v61 = vld [vmem:[%s13824_s4 + $0x300] sm:$0xff] }
0x42cb   : > { %v8197_v37 = vpop.f32.mrf.mxu0 }
0x42cc   : > { %v8198_v12 = vadd.f32 %v13386_v60, %v8197_v37 }
0x42cd   : > { %v11086_v1 = vpop.f32.mrf.mxu0 }
0x42ce   : > { %11112 = vmatmul.mubr.msk.f32.vlgmr.msra.gmra.mxu1 %vm5238_vm0, %v8198_v12 }
0x42cf   : > { %11116 = vmatprep.mubr.msk.f32.mxu1 %vm11413_vm15, %v13251_v6 }
0x42d3   : > { %v8337_v33 = vpop.f32.mrf.mxu0 }
0x42d4   : > { %v8338_v34 = vadd.f32 %v13401_v59, %v8337_v33 }
0x42d5   : > { %v11108_v44 = vpop.f32.mrf.mxu0 }
0x42d6   : > { %11115 = vmatpush3.msra.mxu1 %v8338_v34 }
0x42d7   : > { %11130 = vmatprep.subr.mxu1 %v13251_v6 }
0x42db   : > { %v8569_v56 = vpop.f32.mrf.mxu0 }
0x42dd   : > { %v11129_v27 = vpop.f32.mrf.mxu0 }
0x42e3   : > { %v8709_v38 = vpop.f32.mrf.mxu0 }
0x42e5   : > { %v11151_v57 = vpop.f32.mrf.mxu0 }
0x438e   : > { %v8413_v41 = vpop.f32.mrf.mxu1 }
0x438f   : > { %v8417_v35 = vmul.f32 0.25, %v8413_v41 }
0x4390   : > { %v11113_v60 = vpop.f32.mrf.mxu1 }
0x4391   : > { %v8418_v5 = vadd.f32 %v8417_v35, %v12928_v26 }
0x4393   : > { %v8419_v53 = vsel %vm5317_vm2, %v8418_v5, -inf }
0x4394   : > { %8420 = vmax.xlane.f32.xlu0 %v8419_v53 }
0x441d   : > { %v8421_v31 = vpop.xlane.xlu0 %8420 }
0x441e   : > { %v8422_v62 = vsub.f32 %v8418_v5, %v8421_v31  ;;  %v9073_v31 = vld [vmem:[%s13825_s5 + $0x90] sm:$0xff] }
0x441f   : > { %11176 = vmatprep.subr.mxu0 %v9073_v31 }
0x4420   : > { %v8423_v52 = vmul.f32 1.442695, %v8422_v62  ;;  %v9071_v62 = vld [vmem:[%s13825_s5 + $0x80] sm:$0xff] }
0x4422   : > { %11372 = vpow2.f32 %v8423_v52  ;;  %v9070_v52 = vld [vmem:[%s13825_s5 + $0x78] sm:$0xff] }
0x442f   : > { %v11373_v59 = vpop.eup %11372 }
0x4430   : > { %v8425_v28 = vsel %vm5317_vm2, %v11373_v59, 0.0 }
0x4431   : > { %8426 = vadd.xlane.f32.xlu1 %v8425_v28 }
0x44ba   : > { %v8427_v24 = vpop.xlane.xlu1 %8426 }
0x44bb   : > { %11374 = vrcp.f32 %v8427_v24 }
0x44c8   : > { %v11375_v16 = vpop.eup %11374 }
0x44c9   : > { %v8429_v48 = vmul.f32 %v11375_v16, %v11373_v59 }
0x44cb   : > { %11117 = vmatmul.mubr.msk.f32.vlgmr.msra.gmra.mxu1 %vm5317_vm2, %v8429_v48 }
0x44cc   : > { %11131 = vmatpush3.msra.mxu1 %v13472_v2  ;;  %11138 = vmatprep.mubr.msk.f32.mxu1 %vm11413_vm15, %v13251_v6 }
0x44cd   : > { %11132 = vmatprep.subr.mxu1 %v13251_v6 }
0x44ce   : > { %11133 = vmatpush3.msra.mxu1 %v13478_v54 }
0x44cf   : > { %11134 = vmatprep.subr.mxu1 %v13251_v6 }
0x44d0   : > { %11135 = vmatpush3.msra.mxu1 %v13487_v49  ;;  %v8570_v49 = vadd.f32 %v13512_v58, %v8569_v56  ;;  %v9743_v58 = vld [vmem:[%s13824_s4 + $0x290] ss:$0 sm:$0xff] }
0x44d1   : > { %11136 = vmatprep.subr.mxu1 %v13251_v6  ;;  %v13683_v63 = vadd.f32 %v9743_v58, %v9021_v9  ;;  %v9221_v9 = vld [vmem:[%s13824_s4 + $0x2f0] sm:$0xff] }
0x44d2   : > { %11137 = vmatpush3.msra.mxu1 %v13494_v51  ;;  %v8710_v51 = vadd.f32 %v13518_v15, %v8709_v38 }
0x44d3   : > { %11139 = vmatmul.mubr.msk.f32.vlgmr.msra.gmra.mxu1 %vm4958_vm14, %v13577_v43  ;;  %11152 = vmatprep.subr.mxu1 %v13251_v6  ;;  %v9032_v21 = vsel %vm4958_vm14, %v13683_v63, 0.0 }
0x44d4   : > { %11154 = vmatprep.mubr.msk.f32.mxu1 %vm11413_vm15, %v13251_v6 }
0x458b   : > { %v8499_v2 = vpop.f32.mrf.mxu1 }
0x458d   : > { %v11118_v55 = vpop.f32.mrf.mxu1 }
0x4593   : > { %v8639_v8 = vpop.f32.mrf.mxu1 }
0x4594   : > { %v8640_v54 = vadd.f32 %v13507_v3, %v8639_v8  ;;  %v9229_v8 = vld [vmem:[%s13824_s4 + $0x330] sm:$0xff] }
0x4595   : > { %v11140_v45 = vpop.f32.mrf.mxu1 }
0x4596   : > { %11153 = vmatpush3.xpose.msk.msra.mxu1 %vm5238_vm0, %v8640_v54  ;;  %v9228_v54 = vld [vmem:[%s13824_s4 + $0x328] sm:$0xff]  ;;  %v9227_v45 = vld [vmem:[%s13824_s4 + $0x320] sm:$0xff] }
0x4597   : > { %11157 = vmatprep.subr.mxu1 %v13251_v6 }
0x4599   : > { %11155 = vmatmul.mubr.msk.f32.vlgmr.msra.gmra.mxu1 %vm5238_vm0, %v8570_v49  ;;  %v9225_v49 = vld [vmem:[%s13824_s4 + $0x310] sm:$0xff] }
0x459a   : > { %11158 = vmatpush3.msra.mxu1 %v8710_v51  ;;  %11159 = vmatprep.mubr.msk.f32.mxu1 %vm11413_vm15, %v13251_v6  ;;  %v9224_v51 = vld [vmem:[%s13824_s4 + $0x308] sm:$0xff] }
0x459b   : > { %11169 = vmatprep.subr.mxu1 %v13251_v6 }
0x4659   : > { %v8785_v3 = vpop.f32.mrf.mxu1 }
0x465a   : > { %v8789_v47 = vmul.f32 0.25, %v8785_v3  ;;  %v9222_v3 = vld [vmem:[%s13824_s4 + $0x2f8] sm:$0xff] }
0x465b   : > { %v11156_v50 = vpop.f32.mrf.mxu1 }
0x465c   : > { %v8790_v15 = vadd.f32 %v8789_v47, %v12928_v26  ;;  %v9220_v47 = vld [vmem:[%s13824_s4 + $0x2e8] sm:$0xff]  ;;  %v9218_v50 = vld [vmem:[%s13824_s4 + $0x2d8] sm:$0xff] }
0x465e   : > { %v8791_v14 = vsel %vm5317_vm2, %v8790_v15, -inf }
0x465f   : > { %8792 = vmax.xlane.f32.xlu0 %v8791_v14  ;;  %v9216_v14 = vld [vmem:[%s13824_s4 + $0x2c8] sm:$0xff] }
0x4663   : > { %9033 = vadd.xlane.f32.xlu0 %v9032_v21  ;;  %v9215_v21 = vld [vmem:[%s13824_s4 + $0x2c0] sm:$0xff] }
0x46e8   : > { %v8793_v22 = vpop.xlane.xlu0 %8792 }
0x46e9   : > { %v8794_v29 = vsub.f32 %v8790_v15, %v8793_v22  ;;  %v9217_v15 = vld [vmem:[%s13824_s4 + $0x2d0] sm:$0xff]  ;;  %v9214_v22 = vld [vmem:[%s13824_s4 + $0x2b8] sm:$0xff] }
0x46eb   : > { %v8795_v42 = vmul.f32 1.442695, %v8794_v29  ;;  %v9746_v29 = vld [vmem:[%s13825_s5 + $0x98] ss:$0 sm:$0xff] }
0x46ec   : > { %v9034_v11 = vpop.xlane.xlu0 %9033 }
0x46ed   : > { %11376 = vpow2.f32 %v8795_v42  ;;  %v9038_v20 = vmul.f32 0.03125, %v9034_v11 }
0x46ef   : > { %v9040_v23 = vsub.f32 %v13683_v63, %v9038_v20 }
0x46f1   : > { %v9042_v0 = vmul.f32 %v9040_v23, %v9040_v23 }
0x46f3   : > { %v9044_v26 = vsel %vm4958_vm14, %v9042_v0, 0.0 }
0x46f4   : > { %9045 = vadd.xlane.f32.xlu0 %v9044_v26 }
0x46fa   : > { %v11377_v19 = vpop.eup %11376 }
0x46fb   : > { %v8797_v7 = vsel %vm5317_vm2, %v11377_v19, 0.0 }
0x46fc   : > { %8798 = vadd.xlane.f32.xlu1 %v8797_v7 }
0x477d   : > { %v9046_v30 = vpop.xlane.xlu0 %9045 }
0x477e   : > { %v9050_v36 = vmul.f32 0.03125, %v9046_v30 }
0x4780   : > { %v9052_v39 = vadd.f32 1e-05, %v9050_v36 }
0x4785   : > { %v8799_v43 = vpop.xlane.xlu1 %8798 }
0x4786   : > { %11378 = vrcp.f32 %v8799_v43 }
0x4787   : > { %11380 = vrsqrt.f32 %v9052_v39 }
0x4793   : > { %v11379_v10 = vpop.eup %11378 }
0x4794   : > { %v8801_v40 = vmul.f32 %v11379_v10, %v11377_v19  ;;  %v11381_v46 = vpop.eup %11380 }
0x4795   : > { %v9056_v25 = vmul.f32 %v11381_v46, %v9040_v23 }
0x4796   : > { %11160 = vmatmul.mubr.msk.f32.vlgmr.msra.gmra.mxu1 %vm5317_vm2, %v8801_v40 }
0x4797   : > { %11170 = vmatpush3.msra.mxu1 %v13552_v18  ;;  %11173 = vmatprep.mubr.msk.f32.mxu1 %vm11413_vm15, %v13251_v6  ;;  %v9062_v18 = vmul.f32 %v9744_v13, %v9056_v25 }
0x4798   : > { %11171 = vmatprep.subr.mxu1 %v13251_v6 }
0x4799   : > { %11172 = vmatpush3.msra.mxu1 %v13558_v4  ;;  %v9068_v12 = vadd.f32 %v9745_v17, %v9062_v18 }
0x479a   : > { %11174 = vmatmul.mubr.msk.f32.vlgmr.msra.gmra.mxu1 %vm5238_vm0, %v8499_v2  ;;  %11187 = vmatprep.subr.mxu1 %v9229_v8 }
0x479b   : > { %11188 = vmatpush3.msra.mxu1 %v9229_v8 }
0x479c   : > { %11189 = vmatprep.subr.mxu1 %v9228_v54 }
0x479d   : > { %11190 = vmatpush3.msra.mxu1 %v9228_v54 }
0x479e   : > { %11191 = vmatprep.subr.mxu1 %v9227_v45 }
0x479f   : > { %11192 = vmatpush3.msra.mxu1 %v9227_v45 }
0x4856   : > { %v8871_v37 = vpop.f32.mrf.mxu1 }
0x4857   : > { %11167 = vmatmul.mubr.msk.f32.vlgmr.msra.gmra.mxu0 %vm5238_vm0, %v8871_v37 }
0x4858   : > { %v11161_v4 = vpop.f32.mrf.mxu1  ;;  %11184 = vmatprep.mubr.msk.f32.mxu0 %vm4958_vm14, %v9068_v12  ;;  %11177 = vmatpush3.msra.mxu0 %v9073_v31 }
0x485a   : > { %v9017_v1 = vpop.f32.mrf.mxu1 }
0x485c   : > { %v11175_v33 = vpop.f32.mrf.mxu1 }
0x4917   : > { %v8944_v34 = vpop.f32.mrf.mxu0 }
0x4918   : > { %v9018_v44 = vadd.f32 %v9017_v1, %v8944_v34 }
0x4919   : > { %v11168_v56 = vpop.f32.mrf.mxu0 }
0x491a   : > { %v9022_v27 = vadd.f32 %v9018_v44, %v13259_v32  ;;  %v9072_v32 = vld [vmem:[%s13825_s5 + $0x88] sm:$0xff] }
0x491b   : > { %11178 = vmatprep.subr.mxu0 %v9072_v32 }
0x491c   : > { %v13707_v38 = vadd.f32 %v9743_v58, %v9022_v27  ;;  %11179 = vmatpush3.msra.mxu0 %v9072_v32  ;;  %v9219_v58 = vld [vmem:[%s13824_s4 + $0x2e0] sm:$0xff] }
0x491d   : > { %11180 = vmatprep.subr.mxu0 %v9071_v62 }
0x491e   : > { %v9035_v57 = vsel %vm4958_vm14, %v13707_v38, 0.0  ;;  %11181 = vmatpush3.msra.mxu0 %v9071_v62 }
0x491f   : > { %9036 = vadd.xlane.f32.xlu1 %v9035_v57  ;;  %11182 = vmatprep.subr.mxu0 %v9070_v52 }
0x4920   : > { %11183 = vmatpush3.msra.mxu0 %v9070_v52 }
0x4921   : > { %11222 = vmatprep.subr.mxu0 %v13251_v6 }
0x49a8   : > { %v9037_v41 = vpop.xlane.xlu1 %9036 }
0x49a9   : > { %v9039_v35 = vmul.f32 0.03125, %v9037_v41 }
0x49ab   : > { %v9041_v60 = vsub.f32 %v13707_v38, %v9039_v35 }
0x49ad   : > { %v9043_v5 = vmul.f32 %v9041_v60, %v9041_v60 }
0x49af   : > { %v9047_v53 = vsel %vm4958_vm14, %v9043_v5, 0.0 }
0x49b0   : > { %9048 = vadd.xlane.f32.xlu1 %v9047_v53 }
0x4a39   : > { %v9049_v59 = vpop.xlane.xlu1 %9048 }
0x4a3a   : > { %v9051_v28 = vmul.f32 0.03125, %v9049_v59 }
0x4a3c   : > { %v9053_v24 = vadd.f32 1e-05, %v9051_v28 }
0x4a3e   : > { %11382 = vrsqrt.f32 %v9053_v24 }
0x4a4b   : > { %v11383_v16 = vpop.eup %11382 }
0x4a4c   : > { %v9057_v48 = vmul.f32 %v11383_v16, %v9041_v60 }
0x4a4e   : > { %v9063_v2 = vmul.f32 %v9744_v13, %v9057_v48 }
0x4a50   : > { %v9069_v55 = vadd.f32 %v9745_v17, %v9063_v2 }
0x4a52   : > { %11185 = vmatmul.mubr.msk.f32.vlgmr.msra.gmra.mxu0 %vm4958_vm14, %v9069_v55 }
0x4a53   : > { %11226 = vmatprep.mubr.msk.f32.mxu0 %vm11413_vm15, %v13251_v6  ;;  %v9226_v6 = vld [vmem:[%s13824_s4 + $0x318] sm:$0xff] }
0x4a54   : > { %11193 = vmatprep.subr.mxu1 %v9226_v6 }
0x4a55   : > { %11194 = vmatpush3.msra.mxu1 %v9226_v6 }
0x4a56   : > { %11195 = vmatprep.subr.mxu1 %v9225_v49 }
0x4a57   : > { %11196 = vmatpush3.msra.mxu1 %v9225_v49 }
0x4a58   : > { %11197 = vmatprep.subr.mxu1 %v9224_v51 }
0x4a59   : > { %11198 = vmatpush3.msra.mxu1 %v9224_v51 }
0x4a5a   : > { %11199 = vmatprep.subr.mxu1 %v9223_v61 }
0x4a5b   : > { %11200 = vmatpush3.msra.mxu1 %v9223_v61 }
0x4a5c   : > { %11201 = vmatprep.subr.mxu1 %v9222_v3 }
0x4a5d   : > { %11202 = vmatpush3.msra.mxu1 %v9222_v3 }
0x4a5e   : > { %11203 = vmatprep.subr.mxu1 %v9221_v9 }
0x4a5f   : > { %11204 = vmatpush3.msra.mxu1 %v9221_v9 }
0x4a60   : > { %11205 = vmatprep.subr.mxu1 %v9220_v47 }
0x4a61   : > { %11206 = vmatpush3.msra.mxu1 %v9220_v47 }
0x4a62   : > { %11207 = vmatprep.subr.mxu1 %v9219_v58 }
0x4a63   : > { %11208 = vmatpush3.msra.mxu1 %v9219_v58  ;;  %v9749_v58 = vld [vmem:[%s13824_s4 + $0x338] ss:$0 sm:$0xff] }
0x4a64   : > { %11209 = vmatprep.subr.mxu1 %v9218_v50 }
0x4a65   : > { %11210 = vmatpush3.msra.mxu1 %v9218_v50 }
0x4a66   : > { %11211 = vmatprep.subr.mxu1 %v9217_v15 }
0x4a67   : > { %11212 = vmatpush3.msra.mxu1 %v9217_v15 }
0x4a68   : > { %11213 = vmatprep.subr.mxu1 %v9216_v14 }
0x4a69   : > { %11214 = vmatpush3.msra.mxu1 %v9216_v14 }
0x4a6a   : > { %11215 = vmatprep.subr.mxu1 %v9215_v21 }
0x4a6b   : > { %11216 = vmatpush3.msra.mxu1 %v9215_v21 }
0x4a6c   : > { %11217 = vmatprep.subr.mxu1 %v9214_v22 }
0x4a6d   : > { %11218 = vmatpush3.msra.mxu1 %v9214_v22 }
0x4b12   : > { %v11186_v42 = vpop.f32.mrf.mxu0 }
0x4b13   : > { %v9157_v11 = vadd.f32 %v11186_v42, %v9746_v29 }
0x4b14   : > { %v9151_v20 = vpop.f32.mrf.mxu0 }
0x4b15   : > { %v9163_v23 = vmul.f32 0.70710677, %v9157_v11  ;;  %v9152_v0 = vadd.f32 %v9746_v29, %v9151_v20  ;;  %v9161_v61 = vmul.f32 0.5, %v9157_v11 }
0x4b17   : > { %v9165_v26 = vand.u32 2147483647, %v9163_v23  ;;  %v9162_v19 = vmul.f32 0.70710677, %v9152_v0  ;;  %vm9205_vm5 = vcmp.ge.f32.partialorder %v9163_v23, 0.0  ;;  %v9160_v49 = vmul.f32 0.5, %v9152_v0 }
0x4b19   : > { %v9167_v7 = vmul.f32 0.3275911, %v9165_v26  ;;  %v9164_v43 = vand.u32 2147483647, %v9162_v19  ;;  %v9193_v36 = vsub.f32 0.0, %v9165_v26  ;;  %vm9204_vm6 = vcmp.ge.f32.partialorder %v9162_v19, 0.0 }
0x4b1b   : > { %v9169_v10 = vadd.f32 1.0, %v9167_v7  ;;  %v9166_v40 = vmul.f32 0.3275911, %v9164_v43  ;;  %v9192_v39 = vsub.f32 0.0, %v9164_v43  ;;  %v9195_v46 = vmul.f32 %v9193_v36, %v9165_v26 }
0x4b1d   : > { %11384 = vrcp.f32 %v9169_v10  ;;  %v9168_v30 = vadd.f32 1.0, %v9166_v40  ;;  %v9194_v13 = vmul.f32 %v9192_v39, %v9164_v43  ;;  %v9198_v17 = vmul.f32 1.442695, %v9195_v46 }
0x4b1f   : > { %11386 = vrcp.f32 %v9168_v30  ;;  %v9196_v4 = vmul.f32 1.442695, %v9194_v13  ;;  %v9750_v13 = vld [vmem:[%s13824_s4 + $0x448] ss:$0 sm:$0xff] }
0x4b20   : > { %11388 = vpow2.f32 %v9198_v17 }
0x4b21   : > { %11390 = vpow2.f32 %v9196_v4 }
0x4b2a   : > { %v11385_v25 = vpop.eup %11384 }
0x4b2b   : > { %v9175_v18 = vmul.f32 1.0614054, %v11385_v25 }
0x4b2c   : > { %v11387_v37 = vpop.eup %11386 }
0x4b2d   : > { %v9177_v12 = vadd.f32 -1.4531521, %v9175_v18  ;;  %v9174_v1 = vmul.f32 1.0614054, %v11387_v37  ;;  %v11389_v62 = vpop.eup %11388 }
0x4b2e   : > { %v11391_v24 = vpop.eup %11390 }
0x4b2f   : > { %v9179_v33 = vmul.f32 %v11385_v25, %v9177_v12  ;;  %v9176_v34 = vadd.f32 -1.4531521, %v9174_v1 }
0x4b31   : > { %v9181_v44 = vadd.f32 1.4214138, %v9179_v33  ;;  %v9178_v56 = vmul.f32 %v11387_v37, %v9176_v34 }
0x4b33   : > { %v9183_v27 = vmul.f32 %v11385_v25, %v9181_v44  ;;  %v9180_v57 = vadd.f32 1.4214138, %v9178_v56  ;;  %v9354_v44 = vld [vmem:[%s13822_s2] sm:$0x3] }
0x4b34   : > { %v11401_v56 = vld [vmem:[%s11464_s27] sm:$0xff] }
0x4b35   : > { %v9185_v41 = vadd.f32 -0.28449672, %v9183_v27  ;;  %v9182_v35 = vmul.f32 %v11387_v37, %v9180_v57  ;;  %v9431_v27 = vld [vmem:[%s13824_s4 + $0x470] sm:$0xff]  ;;  %v9430_v57 = vld [vmem:[%s13824_s4 + $0x468] sm:$0xff] }
0x4b37   : > { %v9187_v60 = vmul.f32 %v11385_v25, %v9185_v41  ;;  %v9184_v5 = vadd.f32 -0.28449672, %v9182_v35  ;;  %v9429_v41 = vld [vmem:[%s13824_s4 + $0x460] sm:$0xff]  ;;  %v9428_v35 = vld [vmem:[%s13824_s4 + $0x458] sm:$0xff] }
0x4b39   : > { %v9189_v53 = vadd.f32 0.2548296, %v9187_v60  ;;  %v9186_v31 = vmul.f32 %v11387_v37, %v9184_v5 }
0x4b3b   : > { %v9191_v32 = vmul.f32 %v11385_v25, %v9189_v53  ;;  %v9188_v52 = vadd.f32 0.2548296, %v9186_v31 }
0x4b3d   : > { %v9201_v59 = vmul.f32 %v11389_v62, %v9191_v32  ;;  %v9190_v28 = vmul.f32 %v11387_v37, %v9188_v52  ;;  %v9751_v37 = vld [vmem:[%s13824_s4 + $0x450] ss:$0 sm:$0xff] }
0x4b3f   : > { %v9203_v16 = vsub.f32 1.0, %v9201_v59  ;;  %v9200_v48 = vmul.f32 %v11391_v24, %v9190_v28 }
0x4b41   : > { %v9207_v2 = vsub.f32 0.0, %v9203_v16  ;;  %v9202_v55 = vsub.f32 1.0, %v9200_v48 }
0x4b43   : > { %v9209_v8 = vsel %vm9205_vm5, %v9203_v16, %v9207_v2  ;;  %v9206_v54 = vsub.f32 0.0, %v9202_v55 }
0x4b44   : > { %v9211_v45 = vadd.f32 1.0, %v9209_v8 }
0x4b45   : > { %v9208_v6 = vsel %vm9204_vm6, %v9202_v55, %v9206_v54 }
0x4b46   : > { %v9210_v51 = vadd.f32 1.0, %v9208_v6  ;;  %v9213_v9 = vmul.f32 %v9211_v45, %v9161_v61 }
0x4b48   : > { %v9212_v3 = vmul.f32 %v9210_v51, %v9160_v49 }
0x4b4a   : > { %11219 = vmatprep.mubr.f32.mxu1 %v9212_v3 }
0x4b4b   : > { %11220 = vmatmul.mubr.f32.vlgmr.msra.gmra.mxu1 %v9213_v9 }
0x4c0b   : > { %v11221_v47 = vpop.f32.mrf.mxu1 }
0x4c0c   : > { %v9306_v50 = vadd.f32 %v11221_v47, %v13707_v38 }
0x4c0d   : > { %v9296_v15 = vpop.f32.mrf.mxu1 }
0x4c0e   : > { %v9305_v14 = vadd.f32 %v9296_v15, %v13683_v63  ;;  %v9313_v21 = vadd.f32 %v9749_v58, %v9306_v50 }
0x4c10   : > { %v9319_v22 = vsel %vm4958_vm14, %v9313_v21, 0.0  ;;  %v9312_v29 = vadd.f32 %v9749_v58, %v9305_v14 }
0x4c11   : > { %9320 = vadd.xlane.f32.xlu0 %v9319_v22 }
0x4c12   : > { %v9316_v42 = vsel %vm4958_vm14, %v9312_v29, 0.0 }
0x4c13   : > { %9317 = vadd.xlane.f32.xlu1 %v9316_v42 }
0x4c9a   : > { %v9321_v11 = vpop.xlane.xlu0 %9320 }
0x4c9b   : > { %v9323_v20 = vmul.f32 0.03125, %v9321_v11 }
0x4c9c   : > { %v9318_v23 = vpop.xlane.xlu1 %9317 }
0x4c9d   : > { %v9325_v0 = vsub.f32 %v9313_v21, %v9323_v20  ;;  %v9322_v26 = vmul.f32 0.03125, %v9318_v23 }
0x4c9f   : > { %v9324_v19 = vsub.f32 %v9312_v29, %v9322_v26  ;;  %v9327_v7 = vmul.f32 %v9325_v0, %v9325_v0 }
0x4ca1   : > { %v9331_v38 = vsel %vm4958_vm14, %v9327_v7, 0.0  ;;  %v9326_v43 = vmul.f32 %v9324_v19, %v9324_v19 }
0x4ca2   : > { %9332 = vadd.xlane.f32.xlu0 %v9331_v38 }
0x4ca3   : > { %v9328_v63 = vsel %vm4958_vm14, %v9326_v43, 0.0 }
0x4ca4   : > { %9329 = vadd.xlane.f32.xlu1 %v9328_v63 }
0x4d2b   : > { %v9333_v10 = vpop.xlane.xlu0 %9332 }
0x4d2c   : > { %v9335_v40 = vmul.f32 0.03125, %v9333_v10 }
0x4d2d   : > { %v9330_v30 = vpop.xlane.xlu1 %9329 }
0x4d2e   : > { %v9337_v36 = vadd.f32 1e-05, %v9335_v40  ;;  %v9334_v39 = vmul.f32 0.03125, %v9330_v30 }
0x4d30   : > { %11392 = vrsqrt.f32 %v9337_v36  ;;  %v9336_v46 = vadd.f32 1e-05, %v9334_v39 }
0x4d32   : > { %11394 = vrsqrt.f32 %v9336_v46 }
0x4d3d   : > { %v11393_v25 = vpop.eup %11392 }
0x4d3e   : > { %v9341_v18 = vmul.f32 %v11393_v25, %v9325_v0 }
0x4d3f   : > { %v11395_v17 = vpop.eup %11394 }
0x4d40   : > { %v9347_v12 = vmul.f32 %v9750_v13, %v9341_v18  ;;  %v9340_v4 = vmul.f32 %v11395_v17, %v9324_v19 }
0x4d42   : > { %v9353_v1 = vadd.f32 %v9751_v37, %v9347_v12  ;;  %v9346_v33 = vmul.f32 %v9750_v13, %v9340_v4 }
0x4d44   : > { %11223 = vmatpush3.msra.mxu0 %v9353_v1  ;;  %v9352_v34 = vadd.f32 %v9751_v37, %v9346_v33 }
0x4d45   : > { %11224 = vmatprep.subr.mxu0 %v11401_v56 }
0x4d46   : > { %11225 = vmatpush3.msra.mxu0 %v9352_v34 }
0x4d47   : > { %11227 = vmatmul.mubr.msk.f32.vlgmr.msra.gmra.mxu0 %vm5238_vm0, %v9354_v44  ;;  %11229 = vmatprep.subr.mxu0 %v11401_v56 }
0x4d48   : > { %11230 = vmatpush3.msra.mxu0 %v9431_v27  ;;  %11237 = vmatprep.mubr.msk.f32.mxu0 %vm11413_vm15, %v11401_v56 }
0x4d49   : > { %11231 = vmatprep.subr.mxu0 %v11401_v56 }
0x4d4a   : > { %11232 = vmatpush3.msra.mxu0 %v9430_v57 }
0x4d4b   : > { %11233 = vmatprep.subr.mxu0 %v11401_v56 }
0x4d4c   : > { %11234 = vmatpush3.msra.mxu0 %v9429_v41 }
0x4d4d   : > { %11235 = vmatprep.subr.mxu0 %v11401_v56 }
0x4d4e   : > { %11236 = vmatpush3.msra.mxu0 %v9428_v35 }
0x4e07   : > { %v9424_v60 = vpop.f32.mrf.mxu0 }
0x4e08   : > { %11238 = vmatmul.mubr.msk.f32.vlgmr.msra.gmra.mxu0 %vm4958_vm14, %v9424_v60 }
0x4e09   : > { %v11228_v5 = vpop.f32.mrf.mxu0 }
0x4ec8   : > { %v9501_v53 = vpop.f32.mrf.mxu0 }
0x4ec9   : > { %v9505_v31 = vmul.f32 %v9501_v53, %v9501_v53 }
0x4eca   : > { %v11239_v32 = vpop.f32.mrf.mxu0 }
0x4ecb   : > { %v9507_v62 = vsel %vm9506_vm7, %v9505_v31, 0.0 }
0x4ecc   : > { %9508 = vadd.xlane.f32.xlu0 %v9507_v62 }
0x4f55   : > { %v9509_v52 = vpop.xlane.xlu0 %9508 }
0x4f56   : > { %11396 = vrsqrt.f32 %v9509_v52  ;;  %vm9512_vm8 = vcmp.eq.f32.partialorder %v9509_v52, inf  ;;  %v9515_v24 = vand.u32 2147483648, %v9509_v52  ;;  %vm9514_vm9 = vcmp.eq.f32.partialorder %v9509_v52, 0.0 }
0x4f63   : > { %v11397_v59 = vpop.eup %11396 }
0x4f64   : > { %v9511_v28 = vmul.f32 %v11397_v59, %v9509_v52 }
0x4f66   : > { %v9513_v16 = vsel %vm9512_vm8, %v9509_v52, %v9511_v28 }
0x4f67   : > { %v9516_v48 = vsel %vm9514_vm9, %v9515_v24, %v9513_v16 }
0x4f68   : > { %v9517_v2 = vmax.f32 %v9516_v48, 1e-12 }
0x4f6a   : > { %11398 = vrcp.f32 %v9517_v2 }
0x4f77   : > { %v11399_v55 = vpop.eup %11398 }
0x4f78   : > { %v9519_v8 = vmul.f32 %v11399_v55, %v9501_v53 }
0x4f7a   : > { %9521 = vst.msk [vmem:[%s11464_s27] sm:$0x3] %vm9506_vm7, %v9519_v8 }
0x4f7b PF: > { %s16_s21 = sadd.s32 1, %s11408_s21  }
0x4f7c   : > { %p13_p6 = scmp.ge.s32.totalorder %s16_s21, 4  }
0x4f7e   :  { %15 = sbr.rel (!%p13_p6) target bundleno = 1 (0x1), region = 79 }

</bundles_post_ra>
